<compile_context>
chip_gen: v5e
topology: v5e:2x2
jax: 0.10.0
libtpu: 0.0.40
codegen_flags: <defaults>
</compile_context>

<pallas_src>
import math
import functools

import jax
import jax.numpy as jnp
from jax import lax
from jax.experimental import pallas as pl
from jax.experimental.pallas import tpu as pltpu


# ----------------------------------------------------------------------------- kernel
def _ffn_kernel(x_ref, wa1_ref, wg1_ref, wa2_ref, wg2_ref, wo1_ref, wo2_ref,
                o_ref, *, eps, enable_time, compute_dtype):
    # x block: (1, T, TILE_S, C)
    _, T, TS, C = x_ref.shape
    n1 = wa1_ref.shape[1]
    n2 = wa2_ref.shape[1]
    inner = n1 + n2
    M = T * TS

    # MXU operands in compute_dtype (bf16 by default); accumulate in f32.
    x = x_ref[0].reshape(M, C).astype(compute_dtype)

    inv_sqrt2 = 1.0 / math.sqrt(2.0)

    def geglu_half(wa_ref, wg_ref):
        # proj_in (1x1x1 conv == channel matmul) for one token-shift channel half,
        # followed by GEGLU (exact erf GELU, matching torch.F.gelu default) in f32.
        a = jnp.dot(x, wa_ref[...], preferred_element_type=jnp.float32)
        gt = jnp.dot(x, wg_ref[...], preferred_element_type=jnp.float32)
        return a * (0.5 * gt * (1.0 + lax.erf(gt * inv_sqrt2)))

    z1 = geglu_half(wa1_ref, wg1_ref)          # (M, n1) f32 — un-shifted half
    z2 = geglu_half(wa2_ref, wg2_ref)          # (M, n2) f32 — half to be time-shifted

    # shift_token: second channel half shifted forward by one frame along T
    # (first frame zero).  Done along the leading (non-lane) axis; the two channel
    # halves are never re-concatenated.
    if enable_time:
        z2 = z2.reshape(T, TS, n2)
        z2 = jnp.concatenate(
            [jnp.zeros((1, TS, n2), jnp.float32), z2[:T - 1]], axis=0)
        z2 = z2.reshape(M, n2)

    # ChanLayerNorm over all `inner` channels: single fused-stat pass over both halves,
    # var = E[x^2] - E[x]^2, clamped at eps (== torch var.clamp(min=eps).rsqrt()).
    inv_inner = 1.0 / inner
    mean = (jnp.sum(z1, axis=-1, keepdims=True)
            + jnp.sum(z2, axis=-1, keepdims=True)) * inv_inner
    msq = (jnp.sum(z1 * z1, axis=-1, keepdims=True)
           + jnp.sum(z2 * z2, axis=-1, keepdims=True)) * inv_inner
    var = msq - mean * mean
    rstd = lax.rsqrt(jnp.maximum(var, eps))

    y1 = ((z1 - mean) * rstd).astype(compute_dtype)
    y2 = ((z2 - mean) * rstd).astype(compute_dtype)

    # proj_out (1x1x1 conv) with the ChanLayerNorm gain already folded into the weights.
    out = (jnp.dot(y1, wo1_ref[...], preferred_element_type=jnp.float32)
           + jnp.dot(y2, wo2_ref[...], preferred_element_type=jnp.float32))
    o_ref[...] = out.reshape(1, T, TS, C).astype(o_ref.dtype)


# --------------------------------------------------------------------------- wrappers
def _prepare_weights(w_in, g, w_out, compute_dtype):
    """Split / transpose the 1x1x1-conv weights and fold the ChanLayerNorm gain.

    w_in : (2*inner, C)  proj_in Conv3d weight, squeezed. rows [0:inner]=value, [inner:]=gate
    g    : (inner,)      ChanLayerNorm gain
    w_out: (C, inner)    proj_out Conv3d weight, squeezed
    """
    two_inner, _C = w_in.shape
    inner = two_inner // 2
    n1 = -(-inner // 2)                       # torch.chunk(2): first chunk gets ceil(inner/2)

    w_in_t = jnp.transpose(w_in).astype(jnp.float32)          # (C, 2*inner)
    wa, wg = w_in_t[:, :inner], w_in_t[:, inner:]
    wa1, wa2 = wa[:, :n1], wa[:, n1:]
    wg1, wg2 = wg[:, :n1], wg[:, n1:]

    # (zn * g) @ w_out.T == zn @ (g[:, None] * w_out.T)  — fold LN gain into proj_out.
    w_out_t = jnp.transpose(w_out).astype(jnp.float32) * g.astype(jnp.float32)[:, None]
    wo1, wo2 = w_out_t[:n1], w_out_t[n1:]

    return tuple(w.astype(compute_dtype) for w in (wa1, wg1, wa2, wg2, wo1, wo2))


def _pick_tile_s(S, T, C, inner, budget_bytes=16 * 1024 * 1024):
    """Largest S-tile (a multiple of 8 dividing S, or S itself) whose rough per-step
    VMEM working set fits `budget_bytes` (conservative so it also holds on v7x)."""
    def footprint(ts):
        m = T * ts
        io = 4 * m * C * 4                    # double-buffered x block + out block (f32)
        inter = 3 * m * inner * 4             # z1/z2 (+ shifted copy) + normalized halves
        return io + inter

    candidates = sorted({d for d in range(8, S + 1, 8) if S % d == 0} | {S})
    fitting = [d for d in candidates if footprint(d) <= budget_bytes]
    if not fitting:
        return candidates[0]                  # smallest legal tile
    return max(fitting)


def feedforward_pallas_channels_last(x, w_in, g, w_out, *, enable_time=True,
                                     compute_dtype=jnp.bfloat16, tile_s=None,
                                     vmem_limit_bytes=48 * 1024 * 1024):
    """Channels-last entry point (preferred: no HBM layout transposes).

    x: (B, T, S, C) f32.  Returns (B, T, S, C) f32.
    """
    B, T, S, C = x.shape
    inner = w_in.shape[0] // 2
    n1 = -(-inner // 2)
    n2 = inner - n1

    wa1, wg1, wa2, wg2, wo1, wo2 = _prepare_weights(w_in, g, w_out, compute_dtype)

    if tile_s is None:
        tile_s = _pick_tile_s(S, T, C, inner)
    assert S % tile_s == 0 and (tile_s % 8 == 0 or tile_s == S), (
        f"tile_s={tile_s} must divide S={S} and be a multiple of 8 (or equal S)")

    # ChanLayerNorm always sees f32 input (GEGLU casts to float) -> torch picks eps=1e-5.
    eps = 1e-5

    kernel = functools.partial(_ffn_kernel, eps=eps, enable_time=enable_time,
                               compute_dtype=compute_dtype)

    out = pl.pallas_call(
        kernel,
        out_shape=jax.ShapeDtypeStruct((B, T, S, C), x.dtype),
        grid=(B, S // tile_s),
        in_specs=[
            pl.BlockSpec((1, T, tile_s, C), lambda b, s: (b, 0, s, 0)),
            pl.BlockSpec((C, n1), lambda b, s: (0, 0)),
            pl.BlockSpec((C, n1), lambda b, s: (0, 0)),
            pl.BlockSpec((C, n2), lambda b, s: (0, 0)),
            pl.BlockSpec((C, n2), lambda b, s: (0, 0)),
            pl.BlockSpec((n1, C), lambda b, s: (0, 0)),
            pl.BlockSpec((n2, C), lambda b, s: (0, 0)),
        ],
        out_specs=pl.BlockSpec((1, T, tile_s, C), lambda b, s: (b, 0, s, 0)),
        compiler_params=pltpu.CompilerParams(
            dimension_semantics=("parallel", "parallel"),
            vmem_limit_bytes=vmem_limit_bytes,
        ),
    )(x, wa1, wg1, wa2, wg2, wo1, wo2)
    return out


def feedforward_pallas(x_ncdhw, w_in, g, w_out, *, enable_time=True,
                       compute_dtype=jnp.bfloat16, tile_s=None):
    """Drop-in NCDHW wrapper matching the torch module's layout.

    x_ncdhw: (B, C, T, H, W) f32
    w_in   : (2*inner, C)   -- torch Conv3d weight squeezed
    g      : (inner,)       -- ChanLayerNorm gain
    w_out  : (C, inner)     -- torch Conv3d weight squeezed

    Note: the NCDHW<->channels-last transposes below are full-tensor HBM transposes done
    by XLA; keep the surrounding model channels-last and call
    `feedforward_pallas_channels_last` directly to avoid them.
    """
    B, C, T, H, W = x_ncdhw.shape
    x = jnp.transpose(x_ncdhw, (0, 2, 3, 4, 1)).reshape(B, T, H * W, C)
    out = feedforward_pallas_channels_last(
        x, w_in, g, w_out, enable_time=enable_time,
        compute_dtype=compute_dtype, tile_s=tile_s)
    return jnp.transpose(out.reshape(B, T, H, W, C), (0, 4, 1, 2, 3))


# -------------------------------------------------------------------------- reference
def feedforward_reference(x, w_in, g, w_out, enable_time=True):
    """Pure-JAX f32 reference mirroring the PyTorch module (NCDHW)."""
    inner = w_in.shape[0] // 2
    h = jnp.einsum('bcthw,oc->bothw', x, w_in)
    a, gate = h[:, :inner], h[:, inner:]
    z = a * (0.5 * gate * (1.0 + lax.erf(gate / jnp.sqrt(2.0))))
    if enable_time:
        n1 = -(-inner // 2)
        zk, zs = z[:, :n1], z[:, n1:]
        zs = jnp.pad(zs, ((0, 0), (0, 0), (1, 0), (0, 0), (0, 0)))[:, :, :-1]
        z = jnp.concatenate([zk, zs], axis=1)
    mean = jnp.mean(z, axis=1, keepdims=True)
    var = jnp.mean((z - mean) ** 2, axis=1, keepdims=True)   # unbiased=False
    zn = (z - mean) * lax.rsqrt(jnp.maximum(var, 1e-5))
    zn = zn * g.reshape(1, inner, 1, 1, 1)
    return jnp.einsum('bothw,do->bdthw', zn, w_out)


# ------------------------------------------------------------------------------- test
if __name__ == "__main__":
    # Module config: dim=48, mult=4 -> inner_dim = int(48*4*2/3) = 128
    dim, mult = 48, 4
    inner_dim = int(dim * mult * 2 / 3)
    B, T, H, W = 2, 4, 16, 16        # S = 256

    key = jax.random.PRNGKey(0)
    k_x, k_win, k_wout, k_g = jax.random.split(key, 4)

    x = jax.random.normal(k_x, (B, dim, T, H, W), dtype=jnp.float32)
    # Conv3d(dim, 2*inner, 1, bias=False).weight squeezed -> (2*inner, dim)
    w_in = 0.2 * jax.random.normal(k_win, (2 * inner_dim, dim), dtype=jnp.float32)
    # Conv3d(inner, dim, 1, bias=False).weight squeezed -> (dim, inner)
    w_out = 0.2 * jax.random.normal(k_wout, (dim, inner_dim), dtype=jnp.float32)
    # ChanLayerNorm.g (init is ones; perturb deterministically to exercise it)
    g = 1.0 + 0.1 * jax.random.normal(k_g, (inner_dim,), dtype=jnp.float32)

    ref = feedforward_reference(x, w_in, g, w_out, enable_time=True)

    # 1) Exact-precision path (f32 MXU operands), forced multi-tile grid (2, 4):
    #    tight semantic check against the torch-faithful reference.
    out_f32 = feedforward_pallas(x, w_in, g, w_out, enable_time=True,
                                 compute_dtype=jnp.float32, tile_s=64)
    out_f32 = jax.block_until_ready(out_f32)
    assert out_f32.shape == (B, dim, T, H, W)
    assert jnp.allclose(out_f32, ref, atol=1e-4, rtol=1e-4), "f32 path mismatch vs reference"

    # 2) Performance configuration (bf16 MXU operands, f32 elementwise/LN math,
    #    auto-picked S tile): looser sanity check (bf16 operand rounding).
    out_bf16 = feedforward_pallas(x, w_in, g, w_out, enable_time=True,
                                  compute_dtype=jnp.bfloat16)
    out_bf16 = jax.block_until_ready(out_bf16)
    assert out_bf16.shape == (B, dim, T, H, W)
    assert jnp.allclose(out_bf16, ref, atol=1e-1, rtol=1e-1), "bf16 path mismatch vs reference"

    print("KERNEL_OK")
</pallas_src>

<mosaic_0001>
module attributes {stable_mosaic.version = 11 : i64} {
  func.func @_ffn_kernel(%arg0: i32, %arg1: i32, %arg2: memref<1x4x64x48xf32, #tpu.memory_space<vmem>>, %arg3: memref<48x64xf32, #tpu.memory_space<vmem>>, %arg4: memref<48x64xf32, #tpu.memory_space<vmem>>, %arg5: memref<48x64xf32, #tpu.memory_space<vmem>>, %arg6: memref<48x64xf32, #tpu.memory_space<vmem>>, %arg7: memref<64x48xf32, #tpu.memory_space<vmem>>, %arg8: memref<64x48xf32, #tpu.memory_space<vmem>>, %arg9: memref<1x4x64x48xf32, #tpu.memory_space<vmem>>) attributes {dimension_semantics = [#tpu.dimension_semantics<parallel>, #tpu.dimension_semantics<parallel>], iteration_bounds = array<i64: 2, 4>, scalar_prefetch = 0 : i64, scratch_operands = 0 : i64, tpu.core_type = #tpu.core_type<tc>, window_params = [{transform_indices = @transform_0, window_bounds = array<i64: 1, 4, 64, 48>}, {pipeline_mode = #tpu.pipeline_mode<synchronous>, transform_indices = @transform_1, window_bounds = array<i64: 48, 64>}, {pipeline_mode = #tpu.pipeline_mode<synchronous>, transform_indices = @transform_2, window_bounds = array<i64: 48, 64>}, {pipeline_mode = #tpu.pipeline_mode<synchronous>, transform_indices = @transform_3, window_bounds = array<i64: 48, 64>}, {pipeline_mode = #tpu.pipeline_mode<synchronous>, transform_indices = @transform_4, window_bounds = array<i64: 48, 64>}, {pipeline_mode = #tpu.pipeline_mode<synchronous>, transform_indices = @transform_5, window_bounds = array<i64: 64, 48>}, {pipeline_mode = #tpu.pipeline_mode<synchronous>, transform_indices = @transform_6, window_bounds = array<i64: 64, 48>}, {transform_indices = @transform_7, window_bounds = array<i64: 1, 4, 64, 48>}]} {
    %c0 = arith.constant 0 : index
    %c0_0 = arith.constant 0 : index
    %c0_1 = arith.constant 0 : index
    %c0_2 = arith.constant 0 : index
    %0 = vector.load %arg2[%c0, %c0_0, %c0_1, %c0_2] : memref<1x4x64x48xf32, #tpu.memory_space<vmem>>, vector<1x4x64x48xf32>
    %1 = vector.shape_cast %0 : vector<1x4x64x48xf32> to vector<4x64x48xf32>
    %2 = vector.shape_cast %1 : vector<4x64x48xf32> to vector<256x48xf32>
    %c0_3 = arith.constant 0 : index
    %c0_4 = arith.constant 0 : index
    %3 = vector.load %arg3[%c0_3, %c0_4] : memref<48x64xf32, #tpu.memory_space<vmem>>, vector<48x64xf32>
    %cst = arith.constant dense<0.000000e+00> : vector<256x64xf32>
    %4 = tpu.matmul %2, %3, %cst {dimension_numbers = #tpu.dot_dimension_numbers<[1], [0], [0], [1], [0, 0, 1, 1], [], []>} : vector<256x48xf32>, vector<48x64xf32>, vector<256x64xf32> -> vector<256x64xf32>
    %c0_5 = arith.constant 0 : index
    %c0_6 = arith.constant 0 : index
    %5 = vector.load %arg4[%c0_5, %c0_6] : memref<48x64xf32, #tpu.memory_space<vmem>>, vector<48x64xf32>
    %cst_7 = arith.constant dense<0.000000e+00> : vector<256x64xf32>
    %6 = tpu.matmul %2, %5, %cst_7 {dimension_numbers = #tpu.dot_dimension_numbers<[1], [0], [0], [1], [0, 0, 1, 1], [], []>} : vector<256x48xf32>, vector<48x64xf32>, vector<256x64xf32> -> vector<256x64xf32>
    %cst_8 = arith.constant 5.000000e-01 : f32
    %7 = vector.broadcast %cst_8 : f32 to vector<256x64xf32>
    %8 = arith.mulf %7, %6 : vector<256x64xf32>
    %cst_9 = arith.constant 0.707106769 : f32
    %9 = vector.broadcast %cst_9 : f32 to vector<256x64xf32>
    %10 = arith.mulf %6, %9 : vector<256x64xf32>
    %11 = math.erf %10 : vector<256x64xf32>
    %cst_10 = arith.constant 1.000000e+00 : f32
    %12 = vector.broadcast %cst_10 : f32 to vector<256x64xf32>
    %13 = arith.addf %12, %11 : vector<256x64xf32>
    %14 = arith.mulf %8, %13 : vector<256x64xf32>
    %15 = arith.mulf %4, %14 : vector<256x64xf32>
    %c0_11 = arith.constant 0 : index
    %c0_12 = arith.constant 0 : index
    %16 = vector.load %arg5[%c0_11, %c0_12] : memref<48x64xf32, #tpu.memory_space<vmem>>, vector<48x64xf32>
    %cst_13 = arith.constant dense<0.000000e+00> : vector<256x64xf32>
    %17 = tpu.matmul %2, %16, %cst_13 {dimension_numbers = #tpu.dot_dimension_numbers<[1], [0], [0], [1], [0, 0, 1, 1], [], []>} : vector<256x48xf32>, vector<48x64xf32>, vector<256x64xf32> -> vector<256x64xf32>
    %c0_14 = arith.constant 0 : index
    %c0_15 = arith.constant 0 : index
    %18 = vector.load %arg6[%c0_14, %c0_15] : memref<48x64xf32, #tpu.memory_space<vmem>>, vector<48x64xf32>
    %cst_16 = arith.constant dense<0.000000e+00> : vector<256x64xf32>
    %19 = tpu.matmul %2, %18, %cst_16 {dimension_numbers = #tpu.dot_dimension_numbers<[1], [0], [0], [1], [0, 0, 1, 1], [], []>} : vector<256x48xf32>, vector<48x64xf32>, vector<256x64xf32> -> vector<256x64xf32>
    %cst_17 = arith.constant 5.000000e-01 : f32
    %20 = vector.broadcast %cst_17 : f32 to vector<256x64xf32>
    %21 = arith.mulf %20, %19 : vector<256x64xf32>
    %cst_18 = arith.constant 0.707106769 : f32
    %22 = vector.broadcast %cst_18 : f32 to vector<256x64xf32>
    %23 = arith.mulf %19, %22 : vector<256x64xf32>
    %24 = math.erf %23 : vector<256x64xf32>
    %cst_19 = arith.constant 1.000000e+00 : f32
    %25 = vector.broadcast %cst_19 : f32 to vector<256x64xf32>
    %26 = arith.addf %25, %24 : vector<256x64xf32>
    %27 = arith.mulf %21, %26 : vector<256x64xf32>
    %28 = arith.mulf %17, %27 : vector<256x64xf32>
    %29 = vector.shape_cast %28 : vector<256x64xf32> to vector<4x64x64xf32>
    %cst_20 = arith.constant 0.000000e+00 : f32
    %30 = vector.broadcast %cst_20 : f32 to vector<1x64x64xf32>
    %31 = vector.extract_strided_slice %29 {offsets = [0, 0, 0], sizes = [3, 64, 64], strides = [1, 1, 1]} : vector<4x64x64xf32> to vector<3x64x64xf32>
    %32 = tpu.concatenate %30, %31 in 0 : vector<1x64x64xf32>, vector<3x64x64xf32> -> vector<4x64x64xf32>
    %33 = vector.shape_cast %32 : vector<4x64x64xf32> to vector<256x64xf32>
    %cst_21 = arith.constant dense<0.000000e+00> : vector<256xf32>
    %34 = vector.multi_reduction <add>, %15, %cst_21 [1] : vector<256x64xf32> to vector<256xf32>
    %35 = vector.shape_cast %34 : vector<256xf32> to vector<256x1xf32>
    %cst_22 = arith.constant dense<0.000000e+00> : vector<256xf32>
    %36 = vector.multi_reduction <add>, %33, %cst_22 [1] : vector<256x64xf32> to vector<256xf32>
    %37 = vector.shape_cast %36 : vector<256xf32> to vector<256x1xf32>
    %38 = arith.addf %35, %37 : vector<256x1xf32>
    %cst_23 = arith.constant 7.812500e-03 : f32
    %39 = vector.broadcast %cst_23 : f32 to vector<256x1xf32>
    %40 = arith.mulf %38, %39 : vector<256x1xf32>
    %41 = arith.mulf %15, %15 : vector<256x64xf32>
    %cst_24 = arith.constant dense<0.000000e+00> : vector<256xf32>
    %42 = vector.multi_reduction <add>, %41, %cst_24 [1] : vector<256x64xf32> to vector<256xf32>
    %43 = vector.shape_cast %42 : vector<256xf32> to vector<256x1xf32>
    %44 = arith.mulf %33, %33 : vector<256x64xf32>
    %cst_25 = arith.constant dense<0.000000e+00> : vector<256xf32>
    %45 = vector.multi_reduction <add>, %44, %cst_25 [1] : vector<256x64xf32> to vector<256xf32>
    %46 = vector.shape_cast %45 : vector<256xf32> to vector<256x1xf32>
    %47 = arith.addf %43, %46 : vector<256x1xf32>
    %cst_26 = arith.constant 7.812500e-03 : f32
    %48 = vector.broadcast %cst_26 : f32 to vector<256x1xf32>
    %49 = arith.mulf %47, %48 : vector<256x1xf32>
    %50 = arith.mulf %40, %40 : vector<256x1xf32>
    %51 = arith.subf %49, %50 : vector<256x1xf32>
    %cst_27 = arith.constant 9.99999974E-6 : f32
    %52 = vector.broadcast %cst_27 : f32 to vector<256x1xf32>
    %53 = arith.maximumf %51, %52 : vector<256x1xf32>
    %54 = math.rsqrt %53 : vector<256x1xf32>
    %55 = vector.broadcast %40 : vector<256x1xf32> to vector<256x64xf32>
    %56 = arith.subf %15, %55 : vector<256x64xf32>
    %57 = vector.broadcast %54 : vector<256x1xf32> to vector<256x64xf32>
    %58 = arith.mulf %56, %57 : vector<256x64xf32>
    %59 = vector.broadcast %40 : vector<256x1xf32> to vector<256x64xf32>
    %60 = arith.subf %33, %59 : vector<256x64xf32>
    %61 = vector.broadcast %54 : vector<256x1xf32> to vector<256x64xf32>
    %62 = arith.mulf %60, %61 : vector<256x64xf32>
    %c0_28 = arith.constant 0 : index
    %c0_29 = arith.constant 0 : index
    %63 = vector.load %arg7[%c0_28, %c0_29] : memref<64x48xf32, #tpu.memory_space<vmem>>, vector<64x48xf32>
    %cst_30 = arith.constant dense<0.000000e+00> : vector<256x48xf32>
    %64 = tpu.matmul %58, %63, %cst_30 {dimension_numbers = #tpu.dot_dimension_numbers<[1], [0], [0], [1], [0, 0, 1, 1], [], []>} : vector<256x64xf32>, vector<64x48xf32>, vector<256x48xf32> -> vector<256x48xf32>
    %c0_31 = arith.constant 0 : index
    %c0_32 = arith.constant 0 : index
    %65 = vector.load %arg8[%c0_31, %c0_32] : memref<64x48xf32, #tpu.memory_space<vmem>>, vector<64x48xf32>
    %cst_33 = arith.constant dense<0.000000e+00> : vector<256x48xf32>
    %66 = tpu.matmul %62, %65, %cst_33 {dimension_numbers = #tpu.dot_dimension_numbers<[1], [0], [0], [1], [0, 0, 1, 1], [], []>} : vector<256x64xf32>, vector<64x48xf32>, vector<256x48xf32> -> vector<256x48xf32>
    %67 = arith.addf %64, %66 : vector<256x48xf32>
    %68 = vector.shape_cast %67 : vector<256x48xf32> to vector<1x4x64x48xf32>
    %c0_34 = arith.constant 0 : index
    %c0_35 = arith.constant 0 : index
    %c0_36 = arith.constant 0 : index
    %c0_37 = arith.constant 0 : index
    %69 = vector.load %arg9[%c0_34, %c0_35, %c0_36, %c0_37] : memref<1x4x64x48xf32, #tpu.memory_space<vmem>>, vector<1x4x64x48xf32>
    tpu.vector_store %arg9[%c0_34, %c0_35, %c0_36, %c0_37], %68 {strides = array<i32>} : memref<1x4x64x48xf32, #tpu.memory_space<vmem>>, vector<1x4x64x48xf32>,
    return
  }
  func.func @transform_0(%arg0: i32, %arg1: i32) -> (i32, i32, i32, i32) {
    %c0_i32 = arith.constant 0 : i32
    %c0_i32_0 = arith.constant 0 : i32
    %c0_i32_1 = arith.constant 0 : i32
    return %arg0, %c0_i32, %arg1, %c0_i32_0 : i32, i32, i32, i32
  }
  func.func @transform_1(%arg0: i32, %arg1: i32) -> (i32, i32) {
    %c0_i32 = arith.constant 0 : i32
    %c0_i32_0 = arith.constant 0 : i32
    %c0_i32_1 = arith.constant 0 : i32
    return %c0_i32, %c0_i32_0 : i32, i32
  }
  func.func @transform_2(%arg0: i32, %arg1: i32) -> (i32, i32) {
    %c0_i32 = arith.constant 0 : i32
    %c0_i32_0 = arith.constant 0 : i32
    %c0_i32_1 = arith.constant 0 : i32
    return %c0_i32, %c0_i32_0 : i32, i32
  }
  func.func @transform_3(%arg0: i32, %arg1: i32) -> (i32, i32) {
    %c0_i32 = arith.constant 0 : i32
    %c0_i32_0 = arith.constant 0 : i32
    %c0_i32_1 = arith.constant 0 : i32
    return %c0_i32, %c0_i32_0 : i32, i32
  }
  func.func @transform_4(%arg0: i32, %arg1: i32) -> (i32, i32) {
    %c0_i32 = arith.constant 0 : i32
    %c0_i32_0 = arith.constant 0 : i32
    %c0_i32_1 = arith.constant 0 : i32
    return %c0_i32, %c0_i32_0 : i32, i32
  }
  func.func @transform_5(%arg0: i32, %arg1: i32) -> (i32, i32) {
    %c0_i32 = arith.constant 0 : i32
    %c0_i32_0 = arith.constant 0 : i32
    %c0_i32_1 = arith.constant 0 : i32
    return %c0_i32, %c0_i32_0 : i32, i32
  }
  func.func @transform_6(%arg0: i32, %arg1: i32) -> (i32, i32) {
    %c0_i32 = arith.constant 0 : i32
    %c0_i32_0 = arith.constant 0 : i32
    %c0_i32_1 = arith.constant 0 : i32
    return %c0_i32, %c0_i32_0 : i32, i32
  }
  func.func @transform_7(%arg0: i32, %arg1: i32) -> (i32, i32, i32, i32) {
    %c0_i32 = arith.constant 0 : i32
    %c0_i32_0 = arith.constant 0 : i32
    %c0_i32_1 = arith.constant 0 : i32
    return %arg0, %c0_i32, %arg1, %c0_i32_0 : i32, i32, i32, i32
  }
}

</mosaic_0001>

<bundles_post_ra>
// kernel: tpu_custom_call.1
= control target key start
LH: loop header
LB: loop body
LE: loop exit
PB: predicated region body
PF: predicated region fallthrough
CT: control target
= control target key end

     0   :  { %s5974_s24 = smov 0   ;;  %s5976_s25 = smov 0   ;;  %s9914_s0 = inlined_call_operand.vmem [shape: f32[2,4,256,48], index: 0, kind: input, shape index: {}]   ;;  %s9915_s1 = inlined_call_operand.vmem [shape: f32[48,64], index: 1, kind: input, shape index: {}]   ;;  %s9916_s2 = inlined_call_operand.vmem [shape: f32[48,64], index: 2, kind: input, shape index: {}]   ;;  %s9917_s3 = inlined_call_operand.vmem [shape: f32[48,64], index: 3, kind: input, shape index: {}]   ;;  %s9918_s4 = inlined_call_operand.vmem [shape: f32[48,64], index: 4, kind: input, shape index: {}]   ;;  %s9919_s5 = inlined_call_operand.vmem [shape: f32[64,48], index: 5, kind: input, shape index: {}]   ;;  %s9920_s6 = inlined_call_operand.vmem [shape: f32[64,48], index: 6, kind: input, shape index: {}]   ;;  %s9921_s7 = inlined_call_operand.vmem [shape: f32[2,4,256,48], index: 7, kind: output, shape index: {}]  }
   0x1   :  { %s5978_s26 = smov 0   ;;  %s5980_s27 = smov 0  }
   0x2   :  { %s5982_s28 = smov 0   ;;  %s5984_s29 = smov 0  }
   0x3   :  { %s5986_s30 = smov 0  }
   0x4 LB: > { %s26_s8 = sadd.s32 1, %s5923_s28  ;;  %s29_s9 = sadd.s32 1, %s5927_s29  ;;  %s5931_s30 = sphi %s5986_s30, %s17_s30   ;;  %s5927_s29 = sphi %s5984_s29, %s10146_s29   ;;  %s5923_s28 = sphi %s5982_s28, %s10145_s28   ;;  %s5919_s27 = sphi %s5980_s27, %s10144_s27   ;;  %s5915_s26 = sphi %s5978_s26, %s10143_s26   ;;  %s5911_s25 = sphi %s5976_s25, %s10142_s25   ;;  %s5907_s24 = sphi %s5974_s24, %s10141_s24  }
   0x5   : > { %p27_p0 = scmp.ge.s32.totalorder %s26_s8, 4  ;;  %s5338_s10 = sadd.s32 4294967295, %s5931_s30  }
   0x6   : > { %p45_p1 = scmp.ne.s32.totalorder %s5911_s25, %s5907_s24  ;;  %p46_p2 = scmp.eq.s32.totalorder %s5931_s30, 0 }
   0x7   : > { %s10148_s8 = smov (%p27_p0, %s26_s8), 0  ;;  %s10150_s9 = smov (!%p27_p0, %s29_s9), %s5927_s29 }
   0x8   : > { %p31_p3 = scmp.ge.s32.totalorder %s10150_s9, 2  ;;  %p203_p4 = scmp.eq.s32.totalorder %s5338_s10, 7 }
   0x9   : > { %s34_s11 = ssub.s32 %s5923_s28, %s10148_s8  ;;  %p47_p5 = por %p46_p2, %p45_p1 }
   0xa   : > { %s10152_s9 = smov (%p31_p3, %s10150_s9), 0  ;;  %p6022_p6 = por %p203_p4, %p45_p1 }
   0xb   : > { %s33_s13 = ssub.s32 %s5927_s29, %s10152_s9  ;;  %s38_s15 = sadd.s32 1, %s5911_s25 }
   0xc   : > { %s35_s14 = sor.u32 %s34_s11, %s33_s13  ;;  %p5341_p8 = scmp.ge.s32.totalorder %s5931_s30, 8 }
   0xd   : > { %p36_p7 = scmp.eq.s32.totalorder %s35_s14, 0 }
   0xe   : > { %243 = sbr.rel (%p5341_p8) target bundleno = 58 (0x3a), region = 40 }
   0xf   : > { %s6030_s16 = scalar_select %p36_p7, %s5911_s25, %s38_s15  }
  0x13   : > { %246 = sbr.rel (!%p47_p5) target bundleno = 58 (0x3a), region = 44  ;;  %s248_s17 = sand.u32 (%p47_p5), 1, %s5911_s25  }
  0x14   : > { %s5343_s18 = sshll.u32 (%p47_p5), %s5923_s28, 3  ;;  %s5342_s19 = sshll.u32 (%p47_p5), %s248_s17, 8 }
  0x15   : > { %s5344_s20 = sshll.u32 (%p47_p5), %s5927_s29, 7  ;;  %s6044_s13 = scalar_lea.vmem (%p47_p5), [#allocation2], %s5342_s19 }
  0x16   : > { %s253_s21 = sadd.s32 (%p47_p5), %s5344_s20, %s5343_s18 }
  0x17   : > { %s5345_s22 = sshll.u32 (%p47_p5), %s253_s21, 3 }
  0x18   : > { %s6039_s11 = scalar_lea.vmem %s9914_s0, %s5345_s22 }
  0x19   : > { %v346_v0 = vld [vmem:[%s6039_s11] sm:$0xff]  ;;  %v348_v1 = vld [vmem:[%s6039_s11 + $0x8] sm:$0xff]  ;;  %v350_v2 = vld [vmem:[%s6039_s11 + $0x10] sm:$0xff] }
  0x1a   : > { %347 = vst [vmem:[%s6044_s13] sm:$0xff] %v346_v0  ;;  %v352_v3 = vld [vmem:[%s6039_s11 + $0x18] sm:$0xff]  ;;  %v354_v4 = vld [vmem:[%s6039_s11 + $0x20] sm:$0xff]  ;;  %v356_v5 = vld [vmem:[%s6039_s11 + $0x28] sm:$0xff] }
  0x1b   : > { %349 = vst [vmem:[%s6044_s13 + $0x8] sm:$0xff] %v348_v1  ;;  %v358_v6 = vld [vmem:[%s6039_s11 + $0x30] sm:$0xff]  ;;  %v360_v7 = vld [vmem:[%s6039_s11 + $0x38] sm:$0xff]  ;;  %v362_v8 = vld [vmem:[%s6039_s11 + $0x100] sm:$0xff] }
  0x1c   : > { %351 = vst [vmem:[%s6044_s13 + $0x10] sm:$0xff] %v350_v2  ;;  %v364_v9 = vld [vmem:[%s6039_s11 + $0x108] sm:$0xff]  ;;  %v366_v10 = vld [vmem:[%s6039_s11 + $0x110] sm:$0xff]  ;;  %v368_v11 = vld [vmem:[%s6039_s11 + $0x118] sm:$0xff] }
  0x1d   : > { %353 = vst [vmem:[%s6044_s13 + $0x18] sm:$0xff] %v352_v3  ;;  %v370_v12 = vld [vmem:[%s6039_s11 + $0x120] sm:$0xff]  ;;  %v372_v13 = vld [vmem:[%s6039_s11 + $0x128] sm:$0xff]  ;;  %v374_v14 = vld [vmem:[%s6039_s11 + $0x130] sm:$0xff] }
  0x1e   : > { %355 = vst [vmem:[%s6044_s13 + $0x20] sm:$0xff] %v354_v4  ;;  %v376_v15 = vld [vmem:[%s6039_s11 + $0x138] sm:$0xff]  ;;  %v378_v16 = vld [vmem:[%s6039_s11 + $0x200] sm:$0xff]  ;;  %v380_v17 = vld [vmem:[%s6039_s11 + $0x208] sm:$0xff] }
  0x1f   : > { %357 = vst [vmem:[%s6044_s13 + $0x28] sm:$0xff] %v356_v5  ;;  %v382_v18 = vld [vmem:[%s6039_s11 + $0x210] sm:$0xff]  ;;  %v384_v19 = vld [vmem:[%s6039_s11 + $0x218] sm:$0xff]  ;;  %v386_v20 = vld [vmem:[%s6039_s11 + $0x220] sm:$0xff] }
  0x20   : > { %359 = vst [vmem:[%s6044_s13 + $0x30] sm:$0xff] %v358_v6  ;;  %v388_v21 = vld [vmem:[%s6039_s11 + $0x228] sm:$0xff]  ;;  %v390_v22 = vld [vmem:[%s6039_s11 + $0x230] sm:$0xff]  ;;  %v392_v23 = vld [vmem:[%s6039_s11 + $0x238] sm:$0xff] }
  0x21   : > { %361 = vst [vmem:[%s6044_s13 + $0x38] sm:$0xff] %v360_v7  ;;  %v394_v24 = vld [vmem:[%s6039_s11 + $0x300] sm:$0xff]  ;;  %v396_v25 = vld [vmem:[%s6039_s11 + $0x308] sm:$0xff]  ;;  %v398_v26 = vld [vmem:[%s6039_s11 + $0x310] sm:$0xff] }
  0x22   : > { %363 = vst [vmem:[%s6044_s13 + $0x40] sm:$0xff] %v362_v8  ;;  %v400_v27 = vld [vmem:[%s6039_s11 + $0x318] sm:$0xff]  ;;  %v402_v28 = vld [vmem:[%s6039_s11 + $0x320] sm:$0xff]  ;;  %v404_v29 = vld [vmem:[%s6039_s11 + $0x328] sm:$0xff] }
  0x23   : > { %365 = vst [vmem:[%s6044_s13 + $0x48] sm:$0xff] %v364_v9  ;;  %v406_v30 = vld [vmem:[%s6039_s11 + $0x330] sm:$0xff]  ;;  %v408_v31 = vld [vmem:[%s6039_s11 + $0x338] sm:$0xff] }
  0x24   : > { %367 = vst [vmem:[%s6044_s13 + $0x50] sm:$0xff] %v366_v10 }
  0x25   : > { %369 = vst [vmem:[%s6044_s13 + $0x58] sm:$0xff] %v368_v11 }
  0x26   : > { %371 = vst [vmem:[%s6044_s13 + $0x60] sm:$0xff] %v370_v12 }
  0x27   : > { %373 = vst [vmem:[%s6044_s13 + $0x68] sm:$0xff] %v372_v13 }
  0x28   : > { %375 = vst [vmem:[%s6044_s13 + $0x70] sm:$0xff] %v374_v14 }
  0x29   : > { %377 = vst [vmem:[%s6044_s13 + $0x78] sm:$0xff] %v376_v15 }
  0x2a   : > { %379 = vst [vmem:[%s6044_s13 + $0x80] sm:$0xff] %v378_v16 }
  0x2b   : > { %381 = vst [vmem:[%s6044_s13 + $0x88] sm:$0xff] %v380_v17 }
  0x2c   : > { %383 = vst [vmem:[%s6044_s13 + $0x90] sm:$0xff] %v382_v18 }
  0x2d   : > { %385 = vst [vmem:[%s6044_s13 + $0x98] sm:$0xff] %v384_v19 }
  0x2e   : > { %387 = vst [vmem:[%s6044_s13 + $0xa0] sm:$0xff] %v386_v20 }
  0x2f   : > { %389 = vst [vmem:[%s6044_s13 + $0xa8] sm:$0xff] %v388_v21 }
  0x30   : > { %391 = vst [vmem:[%s6044_s13 + $0xb0] sm:$0xff] %v390_v22 }
  0x31   : > { %393 = vst [vmem:[%s6044_s13 + $0xb8] sm:$0xff] %v392_v23 }
  0x32   : > { %395 = vst [vmem:[%s6044_s13 + $0xc0] sm:$0xff] %v394_v24 }
  0x33   : > { %397 = vst [vmem:[%s6044_s13 + $0xc8] sm:$0xff] %v396_v25 }
  0x34   : > { %399 = vst [vmem:[%s6044_s13 + $0xd0] sm:$0xff] %v398_v26 }
  0x35   : > { %401 = vst [vmem:[%s6044_s13 + $0xd8] sm:$0xff] %v400_v27 }
  0x36   : > { %403 = vst [vmem:[%s6044_s13 + $0xe0] sm:$0xff] %v402_v28 }
  0x37   : > { %405 = vst [vmem:[%s6044_s13 + $0xe8] sm:$0xff] %v404_v29 }
  0x38   : > { %407 = vst [vmem:[%s6044_s13 + $0xf0] sm:$0xff] %v406_v30 }
  0x39   : > { %409 = vst [vmem:[%s6044_s13 + $0xf8] sm:$0xff] %v408_v31 }
  0x3a PF: > { %p5346_p9 = scmp.ge.s32.totalorder %s5931_s30, 1  ;;  %p414_p10 = scmp.lt.s32.totalorder %s5931_s30, 9 }
  0x3c   : > { %p415_p11 = pnand %p5346_p9, %p414_p10 }
  0x3e   : > { %418 = sbr.rel (%p415_p11) target bundleno = 1271 (0x4f7), region = 82 }
  0x43   : > { %v706_v32 = vld [vmem:[%s9916_s2 + $0x28] sm:$0xff]  ;;  %v705_v33 = vld [vmem:[%s9916_s2 + $0x20] sm:$0xff]  ;;  %s421_s19 = sand.u32 1, %s5907_s24   ;;  %v704_v34 = vld [vmem:[%s9916_s2 + $0x18] sm:$0xff]  ;;  %vm491_vm0 = vcmask 392192   ;;  %vm3562_vm5 = vcmask 523264  }
  0x44   : > { %717 = vmatpush.msra.mxu1 %v706_v32  ;;  %5609 = vmatpush.msra.mxu3 %v706_v32  ;;  %s6119_s22 = sshll.u32 %s421_s19, 8  ;;  %v703_v35 = vld [vmem:[%s9916_s2 + $0x10] sm:$0xff]  ;;  %v702_v36 = vld [vmem:[%s9916_s2 + $0x8] sm:$0xff]  ;;  %v701_v37 = vld [vmem:[%s9916_s2] sm:$0xff]  ;;  %s5599_s19 = sshll.u32 (%p6022_p6), %s5919_s27, 7 }
  0x45   : > { %s6131_s15 = scalar_lea.vmem [#allocation2], %s6119_s22  ;;  %v2376_v40 = vld [vmem:[%s9918_s4 + $0x28] sm:$0xff]  ;;  %v2375_v41 = vld [vmem:[%s9918_s4 + $0x20] sm:$0xff]  ;;  %v2374_v46 = vld [vmem:[%s9918_s4 + $0x18] sm:$0xff] }
  0x46   : > { %718 = vmatpush.msra.mxu1 %v705_v33  ;;  %5610 = vmatpush.msra.mxu3 %v705_v33  ;;  %v6134_v38 = vld [vmem:[%s6131_s15] sm:$0xff]  ;;  %v490_v42 = vld [vmem:[%s9915_s1 + $0x28] sm:$0xff]  ;;  %v488_v47 = vld [vmem:[%s9915_s1 + $0x18] sm:$0xff] }
  0x47   : > { %v469_v39 = vld [vmem:[%s6131_s15 + $0x80] sm:$0xff]  ;;  %598 = vmatpush.msra.mxu0 %v490_v42  ;;  %5603 = vmatpush.msra.mxu2 %v490_v42  ;;  %v6150_v43 = vld [vmem:[%s6131_s15 + $0x8] sm:$0xff]  ;;  %v487_v48 = vld [vmem:[%s9915_s1 + $0x10] sm:$0xff] }
  0x48   : > { %719 = vmatpush.msra.mxu1 %v704_v34  ;;  %5611 = vmatpush.msra.mxu3 %v704_v34  ;;  %v470_v44 = vld [vmem:[%s6131_s15 + $0x88] sm:$0xff]  ;;  %v489_v45 = vld [vmem:[%s9915_s1 + $0x20] sm:$0xff]  ;;  %v6172_v50 = vld [vmem:[%s6131_s15 + $0x10] sm:$0xff] }
  0x49   : > { %599 = vmatpush.msra.mxu0 %v489_v45  ;;  %5604 = vmatpush.msra.mxu2 %v489_v45  ;;  %v486_v49 = vld [vmem:[%s9915_s1 + $0x8] sm:$0xff]  ;;  %v471_v51 = vld [vmem:[%s6131_s15 + $0x90] sm:$0xff]  ;;  %v485_v52 = vld [vmem:[%s9915_s1] sm:$0xff] }
  0x4a   : > { %720 = vmatpush.msra.mxu1 %v703_v35  ;;  %5612 = vmatpush.msra.mxu3 %v703_v35  ;;  %v2265_v53 = vld [vmem:[%s9917_s3 + $0x28] sm:$0xff]  ;;  %v6188_v54 = vld [vmem:[%s6131_s15 + $0x18] sm:$0xff]  ;;  %v6198_v56 = vld [vmem:[%s6131_s15 + $0x20] sm:$0xff] }
  0x4b   : > { %600 = vmatpush.msra.mxu0 %v488_v47  ;;  %5605 = vmatpush.msra.mxu2 %v488_v47  ;;  %v472_v55 = vld [vmem:[%s6131_s15 + $0x98] sm:$0xff]  ;;  %v473_v57 = vld [vmem:[%s6131_s15 + $0xa0] sm:$0xff]  ;;  %v2373_v58 = vld [vmem:[%s9918_s4 + $0x10] sm:$0xff] }
  0x4c   : > { %721 = vmatpush.msra.mxu1 %v702_v36  ;;  %5613 = vmatpush.msra.mxu3 %v702_v36  ;;  %v6211_v59 = vld [vmem:[%s6131_s15 + $0x28] sm:$0xff]  ;;  %v2264_v61 = vld [vmem:[%s9917_s3 + $0x20] sm:$0xff]  ;;  %v6224_v62 = vld [vmem:[%s6131_s15 + $0x30] sm:$0xff] }
  0x4d   : > { %601 = vmatpush.msra.mxu0 %v487_v48  ;;  %5606 = vmatpush.msra.mxu2 %v487_v48  ;;  %v474_v60 = vld [vmem:[%s6131_s15 + $0xa8] sm:$0xff]  ;;  %v475_v63 = vld [vmem:[%s6131_s15 + $0xb0] sm:$0xff]  ;;  %v6237_v1 = vld [vmem:[%s6131_s15 + $0x38] sm:$0xff] }
  0x4e   : > { %722 = vmatpush.msra.mxu1 %v701_v37  ;;  %5614 = vmatpush.msra.mxu3 %v701_v37  ;;  %v2372_v0 = vld [vmem:[%s9918_s4 + $0x8] sm:$0xff]  ;;  %v476_v2 = vld [vmem:[%s6131_s15 + $0xb8] sm:$0xff]  ;;  %v6250_v4 = vld [vmem:[%s6131_s15 + $0x40] sm:$0xff]  ;;  %v5933_v37 = vmov 0.0  }
  0x4f   : > { %5381 = vmatmul.msk.f32.vlgmr.msra.gmra.mxu1 %vm491_vm0, %v6134_v38  ;;  %5397 = vmatmul.msk.f32.vlgmr.msra.gmra.mxu3 %vm491_vm0, %v469_v39  ;;  %v2263_v3 = vld [vmem:[%s9917_s3 + $0x18] sm:$0xff]  ;;  %v477_v5 = vld [vmem:[%s6131_s15 + $0xc0] sm:$0xff]  ;;  %v6260_v6 = vld [vmem:[%s6131_s15 + $0x48] sm:$0xff] }
  0x50   : > { %2387 = vmatpush.msrb.mxu3 %v2376_v40  ;;  %602 = vmatpush.msra.mxu0 %v486_v49  ;;  %v478_v7 = vld [vmem:[%s6131_s15 + $0xc8] sm:$0xff]  ;;  %v2371_v8 = vld [vmem:[%s9918_s4] sm:$0xff]  ;;  %v6273_v9 = vld [vmem:[%s6131_s15 + $0x50] sm:$0xff] }
  0x51   : > { %5607 = vmatpush.msra.mxu2 %v486_v49  ;;  %v479_v10 = vld [vmem:[%s6131_s15 + $0xd0] sm:$0xff]  ;;  %v6286_v12 = vld [vmem:[%s6131_s15 + $0x58] sm:$0xff]  ;;  %v6296_v14 = vld [vmem:[%s6131_s15 + $0x60] sm:$0xff]  ;;  %3659 = vadd.xlane.f32.xlu0 %v5933_v37 }
  0x52   : > { %2388 = vmatpush.msrb.mxu3 %v2375_v41  ;;  %603 = vmatpush.msra.mxu0 %v485_v52  ;;  %v2262_v11 = vld [vmem:[%s9917_s3 + $0x10] sm:$0xff]  ;;  %v480_v13 = vld [vmem:[%s6131_s15 + $0xd8] sm:$0xff]  ;;  %v481_v15 = vld [vmem:[%s6131_s15 + $0xe0] sm:$0xff] }
  0x53   : > { %5608 = vmatpush.msra.mxu2 %v485_v52  ;;  %5349 = vmatmul.msk.f32.vlgmr.msra.gmra.mxu0 %vm491_vm0, %v6134_v38  ;;  %v6306_v16 = vld [vmem:[%s6131_s15 + $0x68] sm:$0xff]  ;;  %v6316_v18 = vld [vmem:[%s6131_s15 + $0x70] sm:$0xff]  ;;  %v6326_v20 = vld [vmem:[%s6131_s15 + $0x78] sm:$0xff] }
  0x54   : > { %2389 = vmatpush.msrb.mxu3 %v2374_v46  ;;  %5365 = vmatmul.msk.f32.vlgmr.msra.gmra.mxu2 %vm491_vm0, %v469_v39  ;;  %v482_v17 = vld [vmem:[%s6131_s15 + $0xe8] sm:$0xff]  ;;  %v483_v19 = vld [vmem:[%s6131_s15 + $0xf0] sm:$0xff]  ;;  %v484_v21 = vld [vmem:[%s6131_s15 + $0xf8] sm:$0xff] }
  0x55   : > { %2276 = vmatpush.msrb.mxu2 %v2265_v53  ;;  %v2261_v25 = vld [vmem:[%s9917_s3 + $0x8] sm:$0xff]  ;;  %v2260_v45 = vld [vmem:[%s9917_s3] sm:$0xff] }
  0x56   : > { %2390 = vmatpush.msrb.mxu3 %v2373_v58 }
  0x57   : > { %5382 = vmatmul.msk.f32.gmra.mxu1 %vm491_vm0, %v6150_v43  ;;  %5398 = vmatmul.msk.f32.gmra.mxu3 %vm491_vm0, %v470_v44 }
  0x58   : > { %2277 = vmatpush.msrb.mxu2 %v2264_v61  ;;  %2391 = vmatpush.msrb.mxu3 %v2372_v0 }
  0x5a   : > { %2278 = vmatpush.msrb.mxu2 %v2263_v3  ;;  %2392 = vmatpush.msrb.mxu3 %v2371_v8 }
  0x5b   : > { %5350 = vmatmul.msk.f32.gmra.mxu0 %vm491_vm0, %v6150_v43 }
  0x5c   : > { %5366 = vmatmul.msk.f32.gmra.mxu2 %vm491_vm0, %v470_v44 }
  0x5d   : > { %2279 = vmatpush.msrb.mxu2 %v2262_v11 }
  0x5f   : > { %5383 = vmatmul.msk.f32.gmra.mxu1 %vm491_vm0, %v6172_v50  ;;  %5399 = vmatmul.msk.f32.gmra.mxu3 %vm491_vm0, %v471_v51 }
  0x60   : > { %2280 = vmatpush.msrb.mxu2 %v2261_v25 }
  0x62   : > { %2281 = vmatpush.msrb.mxu2 %v2260_v45 }
  0x63   : > { %5351 = vmatmul.msk.f32.gmra.mxu0 %vm491_vm0, %v6172_v50 }
  0x64   : > { %5367 = vmatmul.msk.f32.gmra.mxu2 %vm491_vm0, %v471_v51 }
  0x67   : > { %5384 = vmatmul.msk.f32.gmra.mxu1 %vm491_vm0, %v6188_v54  ;;  %5400 = vmatmul.msk.f32.gmra.mxu3 %vm491_vm0, %v472_v55 }
  0x6b   : > { %5352 = vmatmul.msk.f32.gmra.mxu0 %vm491_vm0, %v6188_v54 }
  0x6c   : > { %5368 = vmatmul.msk.f32.gmra.mxu2 %vm491_vm0, %v472_v55 }
  0x6f   : > { %5385 = vmatmul.msk.f32.gmra.mxu1 %vm491_vm0, %v6198_v56  ;;  %5401 = vmatmul.msk.f32.gmra.mxu3 %vm491_vm0, %v473_v57 }
  0x73   : > { %5353 = vmatmul.msk.f32.gmra.mxu0 %vm491_vm0, %v6198_v56 }
  0x74   : > { %5369 = vmatmul.msk.f32.gmra.mxu2 %vm491_vm0, %v473_v57 }
  0x77   : > { %5386 = vmatmul.msk.f32.gmra.mxu1 %vm491_vm0, %v6211_v59  ;;  %5402 = vmatmul.msk.f32.gmra.mxu3 %vm491_vm0, %v474_v60 }
  0x7b   : > { %5354 = vmatmul.msk.f32.gmra.mxu0 %vm491_vm0, %v6211_v59 }
  0x7c   : > { %5370 = vmatmul.msk.f32.gmra.mxu2 %vm491_vm0, %v474_v60 }
  0x7f   : > { %5387 = vmatmul.msk.f32.gmra.mxu1 %vm491_vm0, %v6224_v62  ;;  %5403 = vmatmul.msk.f32.gmra.mxu3 %vm491_vm0, %v475_v63 }
  0x83   : > { %5355 = vmatmul.msk.f32.gmra.mxu0 %vm491_vm0, %v6224_v62 }
  0x84   : > { %5371 = vmatmul.msk.f32.gmra.mxu2 %vm491_vm0, %v475_v63 }
  0x87   : > { %5388 = vmatmul.msk.f32.gmra.mxu1 %vm491_vm0, %v6237_v1  ;;  %5404 = vmatmul.msk.f32.gmra.mxu3 %vm491_vm0, %v476_v2 }
  0x8b   : > { %5356 = vmatmul.msk.f32.gmra.mxu0 %vm491_vm0, %v6237_v1 }
  0x8c   : > { %5372 = vmatmul.msk.f32.gmra.mxu2 %vm491_vm0, %v476_v2 }
  0x8f   : > { %5389 = vmatmul.msk.f32.gmra.mxu1 %vm491_vm0, %v6250_v4  ;;  %5405 = vmatmul.msk.f32.gmra.mxu3 %vm491_vm0, %v477_v5 }
  0x93   : > { %5357 = vmatmul.msk.f32.gmra.mxu0 %vm491_vm0, %v6250_v4 }
  0x94   : > { %5373 = vmatmul.msk.f32.gmra.mxu2 %vm491_vm0, %v477_v5 }
  0x97   : > { %5390 = vmatmul.msk.f32.gmra.mxu1 %vm491_vm0, %v6260_v6  ;;  %5406 = vmatmul.msk.f32.gmra.mxu3 %vm491_vm0, %v478_v7 }
  0x9b   : > { %5358 = vmatmul.msk.f32.gmra.mxu0 %vm491_vm0, %v6260_v6 }
  0x9c   : > { %5374 = vmatmul.msk.f32.gmra.mxu2 %vm491_vm0, %v478_v7 }
  0x9f   : > { %5391 = vmatmul.msk.f32.gmra.mxu1 %vm491_vm0, %v6273_v9  ;;  %5407 = vmatmul.msk.f32.gmra.mxu3 %vm491_vm0, %v479_v10 }
  0xa3   : > { %5359 = vmatmul.msk.f32.gmra.mxu0 %vm491_vm0, %v6273_v9 }
  0xa4   : > { %5375 = vmatmul.msk.f32.gmra.mxu2 %vm491_vm0, %v479_v10 }
  0xa7   : > { %5392 = vmatmul.msk.f32.gmra.mxu1 %vm491_vm0, %v6286_v12  ;;  %5408 = vmatmul.msk.f32.gmra.mxu3 %vm491_vm0, %v480_v13 }
  0xab   : > { %5360 = vmatmul.msk.f32.gmra.mxu0 %vm491_vm0, %v6286_v12 }
  0xac   : > { %5376 = vmatmul.msk.f32.gmra.mxu2 %vm491_vm0, %v480_v13 }
  0xaf   : > { %5393 = vmatmul.msk.f32.gmra.mxu1 %vm491_vm0, %v6296_v14  ;;  %5409 = vmatmul.msk.f32.gmra.mxu3 %vm491_vm0, %v481_v15 }
  0xb3   : > { %5361 = vmatmul.msk.f32.gmra.mxu0 %vm491_vm0, %v6296_v14 }
  0xb4   : > { %5377 = vmatmul.msk.f32.gmra.mxu2 %vm491_vm0, %v481_v15 }
  0xb7   : > { %5394 = vmatmul.msk.f32.gmra.mxu1 %vm491_vm0, %v6306_v16  ;;  %5410 = vmatmul.msk.f32.gmra.mxu3 %vm491_vm0, %v482_v17 }
  0xbb   : > { %5362 = vmatmul.msk.f32.gmra.mxu0 %vm491_vm0, %v6306_v16 }
  0xbc   : > { %5378 = vmatmul.msk.f32.gmra.mxu2 %vm491_vm0, %v482_v17 }
  0xbf   : > { %5395 = vmatmul.msk.f32.gmra.mxu1 %vm491_vm0, %v6316_v18  ;;  %5411 = vmatmul.msk.f32.gmra.mxu3 %vm491_vm0, %v483_v19 }
  0xc3   : > { %5363 = vmatmul.msk.f32.gmra.mxu0 %vm491_vm0, %v6316_v18 }
  0xc4   : > { %5379 = vmatmul.msk.f32.gmra.mxu2 %vm491_vm0, %v483_v19 }
  0xc7   : > { %5396 = vmatmul.msk.f32.gmra.mxu1 %vm491_vm0, %v6326_v20  ;;  %5412 = vmatmul.msk.f32.gmra.mxu3 %vm491_vm0, %v484_v21 }
  0xcb   : > { %5364 = vmatmul.msk.f32.gmra.mxu0 %vm491_vm0, %v6326_v20 }
  0xcc   : > { %v6335_v22 = vpop.f32.mrf.mxu1  ;;  %5380 = vmatmul.msk.f32.gmra.mxu2 %vm491_vm0, %v484_v21 }
  0xcd   : > { %v6338_v23 = vmul.f32 0.70710677, %v6335_v22 }
  0xcf   : > { %v884_v24 = vmul.f32 %v6338_v23, %v6338_v23  ;;  %5477 = vmatmul.msk.f32.vlgmr.msrb.gmra.mxu3 %vm491_vm0, %v6134_v38 }
  0xd1   : > { %v6347_v26 = vmin.f32 %v884_v24, 16.0 }
  0xd2   : > { %v6355_v29 = vpop.f32.mrf.mxu3 }
  0xd3   : > { %v897_v27 = vmul.f32 3.8918573e-05, %v6347_v26  ;;  %v6364_v33 = vmul.f32 0.70710677, %v6355_v29  ;;  %v886_v35 = vmul.f32 2.1237322e-06, %v6347_v26 }
  0xd4   : > { %v6358_v31 = vpop.f32.mrf.mxu1  ;;  %5445 = vmatmul.msk.f32.vlgmr.msrb.gmra.mxu2 %vm491_vm0, %v6134_v38 }
  0xd5   : > { %v898_v28 = vadd.f32 0.001143296, %v897_v27  ;;  %v1524_v39 = vmul.f32 %v6364_v33, %v6364_v33  ;;  %v6373_v40 = vmul.f32 0.70710677, %v6358_v31  ;;  %v887_v42 = vadd.f32 0.00028619796, %v886_v35 }
  0xd7   : > { %5478 = vmatmul.msk.f32.gmra.mxu3 %vm491_vm0, %v6150_v43  ;;  %v899_v30 = vmul.f32 %v898_v28, %v6347_v26  ;;  %v6383_v48 = vmin.f32 %v1524_v39, 16.0  ;;  %v924_v49 = vmul.f32 %v6373_v40, %v6373_v40  ;;  %v888_v52 = vmul.f32 %v887_v42, %v6347_v26 }
  0xd9   : > { %v900_v32 = vadd.f32 0.014752088, %v899_v30  ;;  %v1526_v58 = vmul.f32 2.1237322e-06, %v6383_v48  ;;  %v6402_v60 = vmin.f32 %v924_v49, 16.0 }
  0xda   : > { %v6376_v44 = vpop.f32.mrf.mxu3  ;;  %v889_v61 = vadd.f32 0.0036580483, %v888_v52  ;;  %v1537_v39 = vmul.f32 3.8918573e-05, %v6383_v48 }
  0xdb   : > { %v901_v34 = vmul.f32 %v900_v32, %v6347_v26  ;;  %v6392_v53 = vmul.f32 0.70710677, %v6376_v44  ;;  %v1527_v0 = vadd.f32 0.00028619796, %v1526_v58  ;;  %v926_v2 = vmul.f32 2.1237322e-06, %v6402_v60 }
  0xdc   : > { %v6381_v47 = vpop.f32.mrf.mxu1  ;;  %5446 = vmatmul.msk.f32.gmra.mxu2 %vm491_vm0, %v6150_v43  ;;  %v890_v3 = vmul.f32 %v889_v61, %v6347_v26 }
  0xdd   : > { %v902_v36 = vadd.f32 0.112945676, %v901_v34  ;;  %v6395_v55 = vmul.f32 0.70710677, %v6381_v47  ;;  %v1564_v38 = vmul.f32 %v6392_v53, %v6392_v53  ;;  %v1528_v13 = vmul.f32 %v1527_v0, %v6383_v48 }
  0xde   : > { %v927_v15 = vadd.f32 0.00028619796, %v926_v2  ;;  %v891_v17 = vadd.f32 0.05243302, %v890_v3 }
  0xdf   : > { %5479 = vmatmul.msk.f32.gmra.mxu3 %vm491_vm0, %v6172_v50  ;;  %v903_v41 = vmul.f32 %v902_v36, %v6347_v26  ;;  %v964_v63 = vmul.f32 %v6395_v55, %v6395_v55  ;;  %v6413_v5 = vmin.f32 %v1564_v38, 16.0  ;;  %v1529_v27 = vadd.f32 0.0036580483, %v1528_v13 }
  0xe0   : > { %v928_v28 = vmul.f32 %v927_v15, %v6402_v60  ;;  %v892_v30 = vmul.f32 %v891_v17, %v6347_v26  ;;  %v1538_v38 = vadd.f32 0.001143296, %v1537_v39 }
  0xe1   : > { %v904_v46 = vadd.f32 0.4994258, %v903_v41  ;;  %v6415_v7 = vmin.f32 %v964_v63, 16.0  ;;  %v1566_v43 = vmul.f32 2.1237322e-06, %v6413_v5  ;;  %v1530_v41 = vmul.f32 %v1529_v27, %v6383_v48 }
  0xe2   : > { %v6417_v8 = vpop.f32.mrf.mxu3  ;;  %v929_v42 = vadd.f32 0.0036580483, %v928_v28  ;;  %v893_v45 = vadd.f32 0.18741608, %v892_v30 }
  0xe3   : > { %v905_v51 = vmul.f32 %v904_v46, %v6347_v26  ;;  %v966_v19 = vmul.f32 2.1237322e-06, %v6415_v7  ;;  %v6429_v21 = vmul.f32 0.70710677, %v6417_v8  ;;  %v1567_v32 = vadd.f32 0.00028619796, %v1566_v43 }
  0xe4   : > { %v6419_v10 = vpop.f32.mrf.mxu1  ;;  %5447 = vmatmul.msk.f32.gmra.mxu2 %vm491_vm0, %v6172_v50  ;;  %v1531_v63 = vadd.f32 0.05243302, %v1530_v41  ;;  %v930_v0 = vmul.f32 %v929_v42, %v6402_v60  ;;  %v894_v2 = vmul.f32 %v893_v45, %v6347_v26 }
  0xe5   : > { %v6399_v57 = vadd.f32 1.0, %v905_v51  ;;  %v6432_v24 = vmul.f32 0.70710677, %v6419_v10  ;;  %v967_v34 = vadd.f32 0.00028619796, %v966_v19  ;;  %v1604_v35 = vmul.f32 %v6429_v21, %v6429_v21 }
  0xe6   : > { %v1568_v46 = vmul.f32 %v1567_v32, %v6413_v5  ;;  %v1532_v26 = vmul.f32 %v1531_v63, %v6383_v48  ;;  %v895_v27 = vadd.f32 1.1283791, %v894_v2 }
  0xe7   : > { %5480 = vmatmul.msk.f32.gmra.mxu3 %vm491_vm0, %v6188_v54  ;;  %5672 = vrcp.f32 %v6399_v57  ;;  %v1004_v36 = vmul.f32 %v6432_v24, %v6432_v24  ;;  %v968_v49 = vmul.f32 %v967_v34, %v6415_v7  ;;  %v6452_v51 = vmin.f32 %v1604_v35, 16.0 }
  0xe8   : > { %v1569_v3 = vadd.f32 0.0036580483, %v1568_v46  ;;  %vm912_vm2 = vweird.f32 %v6399_v57  ;;  %v916_v32 = vand.u32 2147483647, %v6399_v57  ;;  %v918_v39 = vand.u32 2147483648, %v6399_v57 }
  0xe9   : > { %v6454_v52 = vmin.f32 %v1004_v36, 16.0  ;;  %v969_v13 = vadd.f32 0.0036580483, %v968_v49  ;;  %v1606_v15 = vmul.f32 2.1237322e-06, %v6452_v51  ;;  %v896_v63 = vmul.f32 %v895_v27, %v6338_v23 }
  0xea   : > { %v6448_v50 = vpop.f32.mrf.mxu3  ;;  %v1570_v28 = vmul.f32 %v1569_v3, %v6413_v5  ;;  %v1533_v46 = vadd.f32 0.18741608, %v1532_v26  ;;  %vm917_vm4 = vcmp.eq.f32.partialorder %v916_v32, 8.507059e+37  ;;  %v6520_v32 = vmul.f32 0.5, %v6376_v44  ;;  %v605_v44 = vpop.f32.mrf.mxu0 }
  0xeb   : > { %v6457_v58 = vmul.f32 0.70710677, %v6448_v50  ;;  %v1006_v17 = vmul.f32 2.1237322e-06, %v6454_v52  ;;  %v970_v34 = vmul.f32 %v969_v13, %v6415_v7  ;;  %v1607_v35 = vadd.f32 0.00028619796, %v1606_v15 }
  0xec   : > { %5448 = vmatmul.msk.f32.gmra.mxu2 %vm491_vm0, %v6188_v54  ;;  %v1539_v54 = vmul.f32 %v1538_v38, %v6383_v48  ;;  %v6475_v30 = vpop.f32.mrf.mxu1  ;;  %v919_v38 = vor.u32 1.1754944e-38, %v918_v39  ;;  %v820_v15 = vmul.f32 0.5, %v6335_v22  ;;  %v1534_v23 = vmul.f32 %v1533_v46, %v6383_v48 }
  0xed   : > { %v6423_v11 = vpop.eup %5672  ;;  %v1644_v43 = vmul.f32 %v6457_v58, %v6457_v58  ;;  %v1007_v36 = vadd.f32 0.00028619796, %v1006_v17  ;;  %v1608_v2 = vmul.f32 %v1607_v35, %v6452_v51  ;;  %v6528_v46 = vmul.f32 0.5, %v6417_v8 }
  0xee   : > { %v908_v25 = vmul.f32 %v6423_v11, %v6399_v57  ;;  %vm913_vm1 = vweird.f32 %v6423_v11  ;;  %v1540_v45 = vadd.f32 0.014752088, %v1539_v54  ;;  %v1571_v57 = vadd.f32 0.05243302, %v1570_v28 }
  0xef   : > { %5481 = vmatmul.msk.f32.gmra.mxu3 %vm491_vm0, %v6198_v56  ;;  %vm6480_vm3 = vmor %vm912_vm2, %vm913_vm1  ;;  %v6485_v41 = vmin.f32 %v1644_v43, 16.0 }
  0xf0   : > { %v909_v37 = vsub.f32 1.0, %v908_v25  ;;  %v931_v25 = vadd.f32 0.05243302, %v930_v0  ;;  %v971_v0 = vadd.f32 0.05243302, %v970_v34  ;;  %v1572_v22 = vmul.f32 %v1571_v57, %v6413_v5 }
  0xf1   : > { %v1646_v17 = vmul.f32 2.1237322e-06, %v6485_v41  ;;  %v1609_v34 = vadd.f32 0.0036580483, %v1608_v2 }
  0xf2   : > { %v910_v61 = vmul.f32 %v6423_v11, %v909_v37  ;;  %v932_v49 = vmul.f32 %v931_v25, %v6402_v60  ;;  %v6499_v3 = vpop.f32.mrf.mxu3  ;;  %v6513_v25 = vmul.f32 0.5, %v6358_v31 }
  0xf3   : > { %v6517_v27 = vmul.f32 0.70710677, %v6499_v3  ;;  %v1647_v37 = vadd.f32 0.00028619796, %v1646_v17  ;;  %v1610_v2 = vmul.f32 %v1609_v34, %v6452_v51 }
  0xf4   : > { %v911_v19 = vadd.f32 %v6423_v11, %v910_v61  ;;  %v6492_v61 = vmul.f32 0.70710677, %v6475_v30  ;;  %5449 = vmatmul.msk.f32.gmra.mxu2 %vm491_vm0, %v6198_v56  ;;  %v6507_v56 = vmul.f32 0.5, %v6355_v29  ;;  %v933_v54 = vadd.f32 0.18741608, %v932_v49 }
  0xf5   : > { %v972_v29 = vmul.f32 %v971_v0, %v6415_v7  ;;  %v1648_v8 = vmul.f32 %v1647_v37, %v6485_v41 }
  0xf6   : > { %v915_v42 = vsel %vm6480_vm3, %v6423_v11, %v911_v19  ;;  %v1008_v11 = vmul.f32 %v1007_v36, %v6454_v52  ;;  %v1541_v19 = vmul.f32 %v1540_v45, %v6383_v48  ;;  %v1044_v26 = vmul.f32 %v6492_v61, %v6492_v61 }
  0xf7   : > { %5482 = vmatmul.msk.f32.gmra.mxu3 %vm491_vm0, %v6211_v59  ;;  %v920_v13 = vsel %vm917_vm4, %v919_v38, %v915_v42  ;;  %v6524_v36 = vmul.f32 0.5, %v6381_v47  ;;  %v1535_v42 = vadd.f32 1.1283791, %v1534_v23  ;;  %v934_v45 = vmul.f32 %v933_v54, %v6402_v60 }
  0xf8   : > { %v921_v43 = vmul.f32 %v920_v13, %v896_v63  ;;  %v1009_v35 = vadd.f32 0.0036580483, %v1008_v11  ;;  %v1542_v31 = vadd.f32 0.112945676, %v1541_v19  ;;  %v6530_v49 = vmin.f32 %v1044_v26, 16.0  ;;  %v739_v26 = vpop.f32.mrf.mxu1 }
  0xf9   : > { %v1573_v38 = vadd.f32 0.18741608, %v1572_v22  ;;  %v1684_v47 = vmul.f32 %v6517_v27, %v6517_v27  ;;  %v973_v0 = vadd.f32 0.18741608, %v972_v29  ;;  %v6549_v19 = vmul.f32 0.5, %v6448_v50 }
  0xfa   : > { %v5413_v28 = vclamps-f32 %v921_v43, 1.0  ;;  %v1543_v57 = vmul.f32 %v1542_v31, %v6383_v48  ;;  %v1010_v11 = vmul.f32 %v1009_v35, %v6454_v52  ;;  %v935_v43 = vadd.f32 1.1283791, %v934_v45 }
  0xfb   : > { %9993 = vst [vmem:[#allocation5_spill] sm:$0xff] %v6549_v19  ;;  %v1046_v23 = vmul.f32 2.1237322e-06, %v6530_v49  ;;  %v6552_v54 = vmin.f32 %v1684_v47, 16.0  ;;  %v1574_v34 = vmul.f32 %v1573_v38, %v6413_v5  ;;  %v1611_v35 = vadd.f32 0.05243302, %v1610_v2 }
  0xfc   : > { %v2164_v39 = vadd.f32 1.0, %v5413_v28  ;;  %5450 = vmatmul.msk.f32.gmra.mxu2 %vm491_vm0, %v6211_v59  ;;  %v1544_v17 = vadd.f32 0.4994258, %v1543_v57  ;;  %v937_v59 = vmul.f32 3.8918573e-05, %v6402_v60  ;;  %v6570_v38 = vmul.f32 %v1535_v42, %v6364_v33 }
  0xfd   : > { %v1011_v50 = vadd.f32 0.05243302, %v1010_v11  ;;  %v1649_v37 = vadd.f32 0.0036580483, %v1648_v8  ;;  %v6564_v47 = vmul.f32 0.70710677, %v739_v26  ;;  %v1612_v8 = vmul.f32 %v1611_v35, %v6452_v51 }
  0xfe   : > { %v2196_v63 = vmul.f32 %v2164_v39, %v820_v15  ;;  %v6546_v15 = vmul.f32 0.5, %v6419_v10  ;;  %v1545_v28 = vmul.f32 %v1544_v17, %v6383_v48  ;;  %v974_v10 = vmul.f32 %v973_v0, %v6415_v7 }
  0xff   : > { %5483 = vmatmul.msk.f32.gmra.mxu3 %vm491_vm0, %v6224_v62  ;;  %v938_v45 = vadd.f32 0.001143296, %v937_v59  ;;  %v1577_v48 = vmul.f32 3.8918573e-05, %v6413_v5  ;;  %v1686_v57 = vmul.f32 2.1237322e-06, %v6552_v54  ;;  %v6578_v0 = vmul.f32 %v935_v43, %v6373_v40 }
 0x100   : > { %v6540_v13 = vmul.f32 %v2196_v63, %v605_v44  ;;  %v6561_v39 = vadd.f32 1.0, %v1545_v28  ;;  %v1047_v44 = vadd.f32 0.00028619796, %v1046_v23  ;;  %v6573_v63 = vmul.f32 0.5, %v6475_v30 }
 0x101   : > { %v1575_v2 = vadd.f32 1.1283791, %v1574_v34  ;;  %v975_v11 = vadd.f32 1.1283791, %v974_v10  ;;  %v1012_v17 = vmul.f32 %v1011_v50, %v6454_v52  ;;  %v939_v33 = vmul.f32 %v938_v45, %v6402_v60 }
 0x102   : > { %9992 = vst [vmem:[#allocation4_spill] sm:$0xff] %v6540_v13  ;;  %v3563_v22 = vsel %vm3562_vm5, %v6540_v13, 0.0  ;;  %v3797_v29 = vmul.f32 %v6540_v13, %v6540_v13  ;;  %5674 = vrcp.f32 %v6561_v39  ;;  %v1578_v30 = vadd.f32 0.001143296, %v1577_v48 }
 0x103   : > { %3564 = vadd.xlane.f32.xlu0 %v3563_v22  ;;  %9994 = vst [vmem:[#allocation6_spill] sm:$0xff] %v6573_v63  ;;  %v1650_v42 = vmul.f32 %v1649_v37, %v6485_v41  ;;  %v1048_v40 = vmul.f32 %v1047_v44, %v6530_v49  ;;  %v6590_v59 = vmul.f32 0.5, %v739_v26  ;;  %v1084_v43 = vmul.f32 %v6564_v47, %v6564_v47  ;;  %v6603_v37 = vpop.f32.mrf.mxu3 }
 0x104   : > { %v3829_v31 = vsel %vm3562_vm5, %v3797_v29, 0.0  ;;  %5451 = vmatmul.msk.f32.gmra.mxu2 %vm491_vm0, %v6224_v62  ;;  %v6583_v62 = vmul.f32 0.5, %v6499_v3  ;;  %v1687_v23 = vadd.f32 0.00028619796, %v1686_v57  ;;  %v940_v22 = vadd.f32 0.014752088, %v939_v33 }
 0x105   : > { %3830 = vadd.xlane.f32.xlu1 %v3829_v31  ;;  %9996 = vst [vmem:[#allocation8_spill] sm:$0xff] %v6590_v59  ;;  %v1579_v3 = vmul.f32 %v1578_v30, %v6413_v5  ;;  %v977_v28 = vmul.f32 3.8918573e-05, %v6415_v7  ;;  %v6597_v29 = vmul.f32 %v1575_v2, %v6392_v53  ;;  %v6600_v34 = vmul.f32 %v975_v11, %v6395_v55 }
 0x106   : > { %9995 = vst [vmem:[#allocation7_spill] sm:$0xff] %v6583_v62  ;;  %v1613_v10 = vadd.f32 0.18741608, %v1612_v8  ;;  %v1617_v35 = vmul.f32 3.8918573e-05, %v6452_v51  ;;  %v941_v31 = vmul.f32 %v940_v22, %v6402_v60  ;;  %v6606_v33 = vmin.f32 %v1084_v43, 16.0 }
 0x107   : > { %5484 = vmatmul.msk.f32.gmra.mxu3 %vm491_vm0, %v6237_v1  ;;  %v1013_v50 = vadd.f32 0.18741608, %v1012_v17  ;;  %v1580_v45 = vadd.f32 0.014752088, %v1579_v3  ;;  %v978_v44 = vadd.f32 0.001143296, %v977_v28  ;;  %v1688_v55 = vmul.f32 %v1687_v23, %v6552_v54  ;;  %v6623_v28 = vpop.f32.mrf.mxu2 }
 0x108   : > { %v5675_v26 = vpop.eup %5674  ;;  %v1651_v48 = vadd.f32 0.05243302, %v1650_v42  ;;  %v1049_v57 = vadd.f32 0.0036580483, %v1048_v40  ;;  %v942_v2 = vadd.f32 0.112945676, %v941_v31  ;;  %v1614_v17 = vmul.f32 %v1613_v10, %v6452_v51 }
 0x109   : > { %v1548_v53 = vmul.f32 %v5675_v26, %v6561_v39  ;;  %v1581_v11 = vmul.f32 %v1580_v45, %v6413_v5  ;;  %v979_v8 = vmul.f32 %v978_v44, %v6415_v7  ;;  %v6616_v30 = vmul.f32 0.70710677, %v6603_v37 }
 0x10a   : > { %v1618_v40 = vadd.f32 0.001143296, %v1617_v35  ;;  %v1558_v43 = vand.u32 2147483648, %v6561_v39  ;;  %v943_v22 = vmul.f32 %v942_v2, %v6402_v60  ;;  %v1652_v23 = vmul.f32 %v1651_v48, %v6485_v41 }
 0x10b   : > { %v1549_v42 = vsub.f32 1.0, %v1548_v53  ;;  %v1582_v3 = vadd.f32 0.112945676, %v1581_v11  ;;  %vm1553_vm6 = vweird.f32 %v5675_v26  ;;  %v1556_v10 = vand.u32 2147483647, %v6561_v39  ;;  %v742_v53 = vpop.f32.mrf.mxu1 }
 0x10c   : > { %5452 = vmatmul.msk.f32.gmra.mxu2 %vm491_vm0, %v6237_v1  ;;  %v980_v1 = vadd.f32 0.014752088, %v979_v8  ;;  %v1050_v45 = vmul.f32 %v1049_v57, %v6530_v49  ;;  %v1689_v35 = vadd.f32 0.0036580483, %v1688_v55  ;;  %v1086_v44 = vmul.f32 2.1237322e-06, %v6606_v33 }
 0x10d   : > { %v1550_v31 = vmul.f32 %v5675_v26, %v1549_v42  ;;  %v944_v2 = vadd.f32 0.4994258, %v943_v22  ;;  %v1724_v11 = vmul.f32 %v6616_v30, %v6616_v30  ;;  %vm1552_vm7 = vweird.f32 %v6561_v39 }
 0x10e   : > { %v1619_v48 = vmul.f32 %v1618_v40, %v6452_v51  ;;  %vm1554_vm8 = vmor %vm1552_vm7, %vm1553_vm6  ;;  %v1559_v42 = vor.u32 1.1754944e-38, %v1558_v43  ;;  %v1583_v59 = vmul.f32 %v1582_v3, %v6413_v5  ;;  %v981_v57 = vmul.f32 %v980_v1, %v6415_v7 }
 0x10f   : > { %5485 = vmatmul.msk.f32.gmra.mxu3 %vm491_vm0, %v6250_v4  ;;  %v1551_v8 = vadd.f32 %v5675_v26, %v1550_v31  ;;  %v945_v13 = vmul.f32 %v944_v2, %v6402_v60  ;;  %v1014_v55 = vmul.f32 %v1013_v50, %v6454_v52  ;;  %v6636_v62 = vmul.f32 0.70710677, %v742_v53 }
 0x110   : > { %vm1557_vm9 = vcmp.eq.f32.partialorder %v1556_v10, 8.507059e+37  ;;  %v1653_v39 = vadd.f32 0.18741608, %v1652_v23  ;;  %v1584_v43 = vadd.f32 0.4994258, %v1583_v59  ;;  %v1690_v1 = vmul.f32 %v1689_v35, %v6552_v54 }
 0x111   : > { %v1555_v22 = vsel %vm1554_vm8, %v5675_v26, %v1551_v8  ;;  %v6640_v40 = vadd.f32 1.0, %v945_v13  ;;  %v1051_v63 = vadd.f32 0.05243302, %v1050_v45  ;;  %v982_v3 = vadd.f32 0.112945676, %v981_v57 }
 0x112   : > { %v1560_v31 = vsel %vm1557_vm9, %v1559_v42, %v1555_v22  ;;  %v1620_v2 = vadd.f32 0.014752088, %v1619_v48  ;;  %v1087_v50 = vadd.f32 0.00028619796, %v1086_v44  ;;  %v6644_v19 = vmin.f32 %v1724_v11, 16.0  ;;  %v6658_v11 = vpop.f32.mrf.mxu2 }
 0x113   : > { %v1561_v60 = vmul.f32 %v1560_v31, %v6570_v38  ;;  %5676 = vrcp.f32 %v6640_v40  ;;  %v1124_v13 = vmul.f32 %v6636_v62, %v6636_v62  ;;  %v1585_v26 = vmul.f32 %v1584_v43, %v6413_v5 }
 0x114   : > { %5453 = vmatmul.msk.f32.gmra.mxu2 %vm491_vm0, %v6250_v4  ;;  %v1615_v4 = vadd.f32 1.1283791, %v1614_v17  ;;  %v1015_v38 = vadd.f32 1.1283791, %v1014_v55  ;;  %v1654_v23 = vmul.f32 %v1653_v39, %v6485_v41  ;;  %v6654_v10 = vmul.f32 0.5, %v6603_v37 }
 0x115   : > { %v5429_v59 = vclamps-f32 %v1561_v60, 1.0  ;;  %v983_v45 = vmul.f32 %v982_v3, %v6415_v7  ;;  %v1052_v35 = vmul.f32 %v1051_v63, %v6530_v49  ;;  %v6660_v17 = vadd.f32 1.0, %v1585_v26  ;;  %v6682_v3 = vpop.f32.mrf.mxu3 }
 0x116   : > { %v1621_v8 = vmul.f32 %v1620_v2, %v6452_v51  ;;  %v1691_v48 = vadd.f32 0.05243302, %v1690_v1  ;;  %v1088_v5 = vmul.f32 %v1087_v50, %v6606_v33  ;;  %v1726_v42 = vmul.f32 2.1237322e-06, %v6644_v19 }
 0x117   : > { %5486 = vmatmul.msk.f32.gmra.mxu3 %vm491_vm0, %v6260_v6  ;;  %v2180_v44 = vadd.f32 1.0, %v5429_v59  ;;  %v984_v57 = vadd.f32 0.4994258, %v983_v45  ;;  %v6666_v37 = vmul.f32 %v1615_v4, %v6429_v21  ;;  %v6668_v55 = vmin.f32 %v1124_v13, 16.0 }
 0x118   : > { %5678 = vrcp.f32 %v6660_v17  ;;  %v6675_v39 = vmul.f32 %v1015_v38, %v6432_v24  ;;  %v6677_v31 = vadd.f32 1.1283791, %v1654_v23  ;;  %v6679_v43 = vmul.f32 0.5, %v742_v53 }
 0x119   : > { %v2212_v63 = vmul.f32 %v2180_v44, %v6507_v56  ;;  %v5677_v22 = vpop.eup %5676  ;;  %v985_v21 = vmul.f32 %v984_v57, %v6415_v7  ;;  %v1053_v60 = vadd.f32 0.18741608, %v1052_v35  ;;  %v1622_v1 = vadd.f32 0.112945676, %v1621_v8 }
 0x11a   : > { %v948_v2 = vmul.f32 %v5677_v22, %v6640_v40  ;;  %v1089_v50 = vadd.f32 0.0036580483, %v1088_v5  ;;  %v1727_v24 = vadd.f32 0.00028619796, %v1726_v42  ;;  %v1126_v7 = vmul.f32 2.1237322e-06, %v6668_v55 }
 0x11b   : > { %v6685_v56 = vmul.f32 %v2212_v63, %v6623_v28  ;;  %v6689_v4 = vadd.f32 1.0, %v985_v21  ;;  %v6699_v59 = vmul.f32 0.70710677, %v6682_v3  ;;  %v956_v26 = vand.u32 2147483647, %v6640_v40  ;;  %v6717_v21 = vpop.f32.mrf.mxu2 }
 0x11c   : > { %5454 = vmatmul.msk.f32.gmra.mxu2 %vm491_vm0, %v6260_v6  ;;  %v1692_v6 = vmul.f32 %v1691_v48, %v6552_v54  ;;  %v949_v53 = vsub.f32 1.0, %v948_v2  ;;  %v958_v38 = vand.u32 2147483648, %v6640_v40  ;;  %vm953_vm10 = vweird.f32 %v5677_v22 }
 0x11d   : > { %9997 = vst [vmem:[#allocation9_spill] sm:$0xff] %v6685_v56  ;;  %v3813_v13 = vmul.f32 %v6685_v56, %v6685_v56  ;;  %v3611_v28 = vsel %vm3562_vm5, %v6685_v56, 0.0  ;;  %5680 = vrcp.f32 %v6689_v4  ;;  %v1623_v35 = vmul.f32 %v1622_v1, %v6452_v51 }
 0x11e   : > { %3612 = vadd.xlane.f32.xlu1 %v3611_v28  ;;  %v950_v23 = vmul.f32 %v5677_v22, %v949_v53  ;;  %v6707_v44 = vmul.f32 %v1053_v60, %v6530_v49  ;;  %v6709_v8 = vadd.f32 0.18741608, %v1692_v6  ;;  %v6712_v48 = vmul.f32 %v1089_v50, %v6606_v33  ;;  %v6725_v50 = vpop.f32.mrf.mxu1 }
 0x11f   : > { %5487 = vmatmul.msk.f32.gmra.mxu3 %vm491_vm0, %v6273_v9  ;;  %v3877_v45 = vsel %vm3562_vm5, %v3813_v13, 0.0  ;;  %v1728_v42 = vmul.f32 %v1727_v24, %v6644_v19  ;;  %v1127_v57 = vadd.f32 0.00028619796, %v1126_v7  ;;  %vm952_vm11 = vweird.f32 %v6640_v40 }
 0x120   : > { %3878 = vadd.xlane.f32.xlu0 %v3877_v45  ;;  %v951_v63 = vadd.f32 %v5677_v22, %v950_v23  ;;  %v1764_v60 = vmul.f32 %v6699_v59, %v6699_v59  ;;  %vm954_vm12 = vmor %vm952_vm11, %vm953_vm10  ;;  %v959_v2 = vor.u32 1.1754944e-38, %v958_v38  ;;  %v1017_v6 = vmul.f32 3.8918573e-05, %v6454_v52 }
 0x121   : > { %vm957_vm13 = vcmp.eq.f32.partialorder %v956_v26, 8.507059e+37  ;;  %v1598_v40 = vand.u32 2147483648, %v6660_v17  ;;  %v1624_v7 = vadd.f32 0.4994258, %v1623_v35  ;;  %v1729_v38 = vadd.f32 0.0036580483, %v1728_v42 }
 0x122   : > { %v955_v24 = vsel %vm954_vm12, %v5677_v22, %v951_v63  ;;  %v1128_v23 = vmul.f32 %v1127_v57, %v6668_v55  ;;  %v6735_v26 = vmul.f32 0.70710677, %v6725_v50  ;;  %vm1592_vm15 = vweird.f32 %v6660_v17 }
 0x123   : > { %v960_v13 = vsel %vm957_vm13, %v959_v2, %v955_v24  ;;  %v1599_v2 = vor.u32 1.1754944e-38, %v1598_v40  ;;  %v996_v57 = vand.u32 2147483647, %v6689_v4  ;;  %vm992_vm4 = vweird.f32 %v6689_v4 }
 0x124   : > { %5455 = vmatmul.msk.f32.gmra.mxu2 %vm491_vm0, %v6273_v9  ;;  %v1596_v9 = vand.u32 2147483647, %v6660_v17  ;;  %v961_v45 = vmul.f32 %v960_v13, %v6578_v0  ;;  %v998_v0 = vand.u32 2147483648, %v6689_v4 }
 0x125   : > { %vm997_vm7 = vcmp.eq.f32.partialorder %v996_v57, 8.507059e+37 }
 0x126   : > { %v5414_v63 = vclamps-f32 %v961_v45, 1.0  ;;  %vm1597_vm2 = vcmp.eq.f32.partialorder %v1596_v9, 8.507059e+37  ;;  %v1730_v45 = vmul.f32 %v1729_v38, %v6644_v19 }
 0x127   : > { %5488 = vmatmul.msk.f32.gmra.mxu3 %vm491_vm0, %v6286_v12 }
 0x128   : > { %v2165_v24 = vadd.f32 1.0, %v5414_v63 }
 0x12f   : > { %5489 = vmatmul.msk.f32.gmra.mxu3 %vm491_vm0, %v6296_v14  ;;  %v5679_v14 = vpop.eup %5678 }
 0x130   : > { %v1588_v5 = vmul.f32 %v5679_v14, %v6660_v17  ;;  %v5681_v53 = vpop.eup %5680  ;;  %vm1593_vm14 = vweird.f32 %v5679_v14  ;;  %v1164_v17 = vmul.f32 %v6735_v26, %v6735_v26 }
 0x131   : > { %v988_v22 = vmul.f32 %v5681_v53, %v6689_v4  ;;  %vm1594_vm1 = vmor %vm1592_vm15, %vm1593_vm14  ;;  %vm993_vm3 = vweird.f32 %v5681_v53 }
 0x132   : > { %v1589_v1 = vsub.f32 1.0, %v1588_v5  ;;  %v1018_v5 = vadd.f32 0.001143296, %v1017_v6  ;;  %v608_v6 = vpop.f32.mrf.mxu0  ;;  %vm994_vm6 = vmor %vm992_vm4, %vm993_vm3 }
 0x134   : > { %v1590_v28 = vmul.f32 %v5679_v14, %v1589_v1  ;;  %v989_v1 = vsub.f32 1.0, %v988_v22  ;;  %v1129_v22 = vadd.f32 0.0036580483, %v1128_v23  ;;  %v1091_v23 = vadd.f32 0.05243302, %v6712_v48 }
 0x136   : > { %v1591_v35 = vadd.f32 %v5679_v14, %v1590_v28  ;;  %v990_v56 = vmul.f32 %v5681_v53, %v989_v1  ;;  %v6741_v28 = vmin.f32 %v1764_v60, 16.0  ;;  %v1657_v1 = vmul.f32 3.8918573e-05, %v6485_v41 }
 0x137   : > { %5490 = vmatmul.msk.f32.gmra.mxu3 %vm491_vm0, %v6306_v16  ;;  %v1625_v16 = vmul.f32 %v1624_v7, %v6452_v51  ;;  %v1019_v51 = vmul.f32 %v1018_v5, %v6454_v52  ;;  %v1130_v48 = vmul.f32 %v1129_v22, %v6668_v55 }
 0x138   : > { %v1595_v42 = vsel %vm1594_vm1, %v5679_v14, %v1591_v35  ;;  %v2197_v14 = vmul.f32 %v2165_v24, %v6513_v25  ;;  %v991_v7 = vadd.f32 %v5681_v53, %v990_v56  ;;  %v999_v35 = vor.u32 1.1754944e-38, %v998_v0  ;;  %v6759_v56 = vpop.f32.mrf.mxu3 }
 0x139   : > { %v1600_v13 = vsel %vm1597_vm2, %v1599_v2, %v1595_v42  ;;  %v6749_v9 = vadd.f32 1.0, %v1625_v16  ;;  %v6757_v25 = vmin.f32 %v1164_v17, 16.0  ;;  %v1020_v38 = vadd.f32 0.014752088, %v1019_v51 }
 0x13a   : > { %v1601_v40 = vmul.f32 %v1600_v13, %v6597_v29  ;;  %v6754_v63 = vmul.f32 %v2197_v14, %v608_v6  ;;  %v995_v29 = vsel %vm994_vm6, %v5681_v53, %v991_v7  ;;  %v1731_v53 = vadd.f32 0.05243302, %v1730_v45 }
 0x13b   : > { %5682 = vrcp.f32 %v6749_v9  ;;  %v1000_v5 = vsel %vm997_vm7, %v999_v35, %v995_v29  ;;  %v1766_v16 = vmul.f32 2.1237322e-06, %v6741_v28  ;;  %v6772_v0 = vmul.f32 %v6677_v31, %v6457_v58 }
 0x13c   : > { %v5430_v60 = vclamps-f32 %v1601_v40, 1.0  ;;  %9998 = vst [vmem:[#allocation10_spill] sm:$0xff] %v6754_v63  ;;  %v3798_v2 = vmul.f32 %v6754_v63, %v6754_v63  ;;  %v3566_v57 = vsel %vm3562_vm5, %v6754_v63, 0.0  ;;  %v1166_v17 = vmul.f32 2.1237322e-06, %v6757_v25 }
 0x13d   : > { %3567 = vadd.xlane.f32.xlu1 %v3566_v57  ;;  %v1021_v6 = vmul.f32 %v1020_v38, %v6454_v52  ;;  %v6785_v58 = vadd.f32 1.1283791, %v6707_v44  ;;  %v6789_v31 = vmul.f32 %v6709_v8, %v6552_v54  ;;  %v1658_v14 = vadd.f32 0.001143296, %v1657_v1  ;;  %v6806_v1 = vpop.f32.mrf.mxu1 }
 0x13e   : > { %v2181_v4 = vadd.f32 1.0, %v5430_v60  ;;  %v3832_v24 = vsel %vm3562_vm5, %v3798_v2, 0.0  ;;  %v1732_v7 = vmul.f32 %v1731_v53, %v6644_v19  ;;  %v1767_v45 = vadd.f32 0.00028619796, %v1766_v16 }
 0x13f   : > { %5491 = vmatmul.msk.f32.gmra.mxu3 %vm491_vm0, %v6316_v18  ;;  %v1001_v18 = vmul.f32 %v1000_v5, %v6600_v34  ;;  %v6777_v34 = vmul.f32 0.5, %v6682_v3  ;;  %3833 = vadd.xlane.f32.xlu2 %v3832_v24  ;;  %v1092_v3 = vmul.f32 %v1091_v23, %v6606_v33  ;;  %v1131_v60 = vadd.f32 0.05243302, %v1130_v48 }
 0x140   : > { %v2213_v42 = vmul.f32 %v2181_v4, %v6520_v32  ;;  %v1022_v35 = vadd.f32 0.112945676, %v1021_v6  ;;  %v1659_v8 = vmul.f32 %v1658_v14, %v6485_v41  ;;  %v1167_v29 = vadd.f32 0.00028619796, %v1166_v17  ;;  %v6816_v17 = vpop.f32.mrf.mxu2  ;;  %5456 = vmatmul.msk.f32.gmra.mxu2 %vm491_vm0, %v6286_v12 }
 0x141   : > { %v5415_v13 = vclamps-f32 %v1001_v18, 1.0  ;;  %v5683_v40 = vpop.eup %5682  ;;  %v1057_v38 = vmul.f32 3.8918573e-05, %v6530_v49  ;;  %v1636_v2 = vand.u32 2147483647, %v6749_v9  ;;  %v1638_v18 = vand.u32 2147483648, %v6749_v9 }
 0x142   : > { %v6781_v32 = vmul.f32 %v2213_v42, %v6658_v11  ;;  %v611_v11 = vpop.f32.mrf.mxu0  ;;  %v1628_v22 = vmul.f32 %v5683_v40, %v6749_v9  ;;  %vm1633_vm8 = vweird.f32 %v5683_v40  ;;  %v1660_v16 = vadd.f32 0.014752088, %v1659_v8 }
 0x143   : > { %v2166_v51 = vadd.f32 1.0, %v5415_v13  ;;  %v1768_v57 = vmul.f32 %v1767_v45, %v6741_v28  ;;  %v6821_v6 = vmul.f32 0.70710677, %v6759_v56  ;;  %vm1632_vm9 = vweird.f32 %v6749_v9  ;;  %v6833_v9 = vld [vmem:[%s6131_s15 + $0x80] sm:$0xff] }
 0x144   : > { %9999 = vst [vmem:[#allocation11_spill] sm:$0xff] %v6781_v32  ;;  %v1629_v4 = vsub.f32 1.0, %v1628_v22  ;;  %v3814_v5 = vmul.f32 %v6781_v32, %v6781_v32  ;;  %v3614_v48 = vsel %vm3562_vm5, %v6781_v32, 0.0  ;;  %v1058_v14 = vadd.f32 0.001143296, %v1057_v38  ;;  %vm1634_vm10 = vmor %vm1632_vm9, %vm1633_vm8 }
 0x145   : > { %v2198_v44 = vmul.f32 %v2166_v51, %v6524_v36  ;;  %v6808_v36 = vpop.f32.mrf.mxu3  ;;  %v6825_v45 = vmul.f32 0.70710677, %v6806_v1  ;;  %v1168_v12 = vmul.f32 %v1167_v29, %v6757_v25  ;;  %vm1637_vm11 = vcmp.eq.f32.partialorder %v1636_v2, 8.507059e+37 }
 0x146   : > { %v1630_v53 = vmul.f32 %v5683_v40, %v1629_v4  ;;  %v3880_v42 = vsel %vm3562_vm5, %v3814_v5, 0.0  ;;  %v1661_v8 = vmul.f32 %v1660_v16, %v6485_v41  ;;  %v1093_v4 = vadd.f32 0.18741608, %v1092_v3 }
 0x147   : > { %5492 = vmatmul.msk.f32.gmra.mxu3 %vm491_vm0, %v6326_v20  ;;  %v6801_v23 = vmul.f32 %v2198_v44, %v611_v11  ;;  %v1023_v20 = vmul.f32 %v1022_v35, %v6454_v52  ;;  %3881 = vadd.xlane.f32.xlu1 %v3880_v42  ;;  %v1639_v11 = vor.u32 1.1754944e-38, %v1638_v18  ;;  %v1733_v5 = vadd.f32 0.18741608, %v1732_v7 }
 0x148   : > { %v1631_v51 = vadd.f32 %v5683_v40, %v1630_v53  ;;  %3615 = vadd.xlane.f32.xlu2 %v3614_v48  ;;  %v1059_v29 = vmul.f32 %v1058_v14, %v6530_v49  ;;  %v1132_v2 = vmul.f32 %v1131_v60, %v6668_v55  ;;  %v1804_v53 = vmul.f32 %v6821_v6, %v6821_v6 }
 0x149   : > { %10000 = vst [vmem:[#allocation12_spill] sm:$0xff] %v6801_v23  ;;  %v3799_v24 = vmul.f32 %v6801_v23, %v6801_v23  ;;  %v1024_v13 = vadd.f32 0.4994258, %v1023_v20  ;;  %v1204_v16 = vmul.f32 %v6825_v45, %v6825_v45  ;;  %v1769_v3 = vadd.f32 0.0036580483, %v1768_v57 }
 0x14a   : > { %v1635_v35 = vsel %vm1634_vm10, %v5683_v40, %v1631_v51  ;;  %v1697_v40 = vmul.f32 3.8918573e-05, %v6552_v54  ;;  %v1169_v7 = vadd.f32 0.0036580483, %v1168_v12  ;;  %v6850_v48 = vmul.f32 0.5, %v6725_v50 }
 0x14b   : > { %v3835_v22 = vsel %vm3562_vm5, %v3799_v24, 0.0  ;;  %v1025_v44 = vmul.f32 %v1024_v13, %v6454_v52  ;;  %v1640_v38 = vsel %vm1637_vm11, %v1639_v11, %v1635_v35  ;;  %v1662_v52 = vadd.f32 0.112945676, %v1661_v8 }
 0x14c   : > { %3836 = vadd.xlane.f32.xlu0 %v3835_v22  ;;  %v1641_v20 = vmul.f32 %v1640_v38, %v6666_v37  ;;  %v3569_v24 = vsel %vm3562_vm5, %v6801_v23, 0.0  ;;  %v1060_v60 = vadd.f32 0.014752088, %v1059_v29  ;;  %v1698_v13 = vadd.f32 0.001143296, %v1697_v40 }
 0x14d   : > { %v6837_v18 = vadd.f32 1.0, %v1025_v44  ;;  %v1663_v37 = vmul.f32 %v1662_v52, %v6485_v41  ;;  %v6856_v51 = vmul.f32 %v6785_v58, %v6492_v61  ;;  %v1094_v14 = vmul.f32 %v1093_v4, %v6606_v33  ;;  %v6860_v22 = vpop.f32.mrf.mxu3  ;;  %v5849_v4 = vld [vmem:[%s6131_s15 + $0x88] sm:$0xff] }
 0x14e   : > { %v5431_v42 = vclamps-f32 %v1641_v20, 1.0  ;;  %v1734_v57 = vmul.f32 %v1733_v5, %v6644_v19  ;;  %v6862_v50 = vmin.f32 %v1804_v53, 16.0  ;;  %v6864_v44 = vmin.f32 %v1204_v16, 16.0 }
 0x14f   : > { %5493 = vmatmul.msk.f32.gmra.mxu3 %vm491_vm0, %v6833_v9  ;;  %5684 = vrcp.f32 %v6837_v18  ;;  %v1664_v12 = vadd.f32 0.4994258, %v1663_v37  ;;  %v1061_v35 = vmul.f32 %v1060_v60, %v6530_v49  ;;  %v1695_v8 = vadd.f32 1.1283791, %v6789_v31 }
 0x150   : > { %v2182_v11 = vadd.f32 1.0, %v5431_v42  ;;  %3570 = vadd.xlane.f32.xlu2 %v3569_v24  ;;  %v1133_v38 = vadd.f32 0.18741608, %v1132_v2  ;;  %v1770_v61 = vmul.f32 %v1769_v3, %v6741_v28  ;;  %v1170_v20 = vmul.f32 %v1169_v7, %v6757_v25 }
 0x151   : > { %v1665_v52 = vmul.f32 %v1664_v12, %v6485_v41  ;;  %v1062_v29 = vadd.f32 0.112945676, %v1061_v35  ;;  %v1699_v40 = vmul.f32 %v1698_v13, %v6552_v54  ;;  %v1095_v53 = vadd.f32 1.1283791, %v1094_v14 }
 0x152   : > { %v2214_v58 = vmul.f32 %v2182_v11, %v6528_v46  ;;  %v1735_v16 = vadd.f32 1.1283791, %v1734_v57  ;;  %v1806_v46 = vmul.f32 2.1237322e-06, %v6862_v50  ;;  %v1206_v3 = vmul.f32 2.1237322e-06, %v6864_v44 }
 0x153   : > { %v6881_v42 = vadd.f32 1.0, %v1665_v52  ;;  %v1063_v7 = vmul.f32 %v1062_v29, %v6530_v49  ;;  %v1134_v41 = vmul.f32 %v1133_v38, %v6668_v55  ;;  %v1771_v37 = vadd.f32 0.05243302, %v1770_v61 }
 0x154   : > { %v6876_v31 = vmul.f32 %v2214_v58, %v6717_v21  ;;  %v1171_v21 = vadd.f32 0.05243302, %v1170_v20  ;;  %v1038_v13 = vand.u32 2147483648, %v6837_v18  ;;  %v1700_v14 = vadd.f32 0.014752088, %v1699_v40  ;;  %v6893_v58 = vpop.f32.mrf.mxu2  ;;  %v5850_v20 = vld [vmem:[%s6131_s15 + $0x60] sm:$0xff] }
 0x155   : > { %v5685_v5 = vpop.eup %5684  ;;  %5686 = vrcp.f32 %v6881_v42  ;;  %v1036_v11 = vand.u32 2147483647, %v6837_v18  ;;  %v1064_v12 = vadd.f32 0.4994258, %v1063_v7  ;;  %v6891_v35 = vmul.f32 %v1695_v8, %v6517_v27  ;;  %5457 = vmatmul.msk.f32.gmra.mxu2 %vm491_vm0, %v5850_v20  ;;  %v5851_v7 = vld [vmem:[%s6131_s15 + $0x90] sm:$0xff] }
 0x156   : > { %10001 = vst [vmem:[#allocation13_spill] sm:$0xff] %v6876_v31  ;;  %v1028_v2 = vmul.f32 %v5685_v5, %v6837_v18  ;;  %v3617_v60 = vsel %vm3562_vm5, %v6876_v31, 0.0  ;;  %vm1033_vm12 = vweird.f32 %v5685_v5  ;;  %v1807_v38 = vadd.f32 0.00028619796, %v1806_v46 }
 0x157   : > { %5494 = vmatmul.msk.f32.gmra.mxu3 %vm491_vm0, %v5849_v4  ;;  %3618 = vadd.xlane.f32.xlu0 %v3617_v60  ;;  %v1207_v61 = vadd.f32 0.00028619796, %v1206_v3  ;;  %v1097_v4 = vmul.f32 3.8918573e-05, %v6606_v33  ;;  %v1135_v52 = vadd.f32 1.1283791, %v1134_v41  ;;  %vm1032_vm13 = vweird.f32 %v6837_v18 }
 0x158   : > { %v1029_v24 = vsub.f32 1.0, %v1028_v2  ;;  %v1065_v40 = vmul.f32 %v1064_v12, %v6530_v49  ;;  %v6900_v2 = vpop.f32.mrf.mxu3  ;;  %v1772_v27 = vmul.f32 %v1771_v37, %v6741_v28  ;;  %v6906_v8 = vmul.f32 0.70710677, %v6808_v36  ;;  %vm1034_vm14 = vmor %vm1032_vm13, %vm1033_vm12 }
 0x159   : > { %v1039_v46 = vor.u32 1.1754944e-38, %v1038_v13  ;;  %v1701_v3 = vmul.f32 %v1700_v14, %v6552_v54  ;;  %v1172_v41 = vmul.f32 %v1171_v21, %v6757_v25  ;;  %vm1037_vm15 = vcmp.eq.f32.partialorder %v1036_v11, 8.507059e+37 }
 0x15a   : > { %v1030_v57 = vmul.f32 %v5685_v5, %v1029_v24  ;;  %v6911_v49 = vadd.f32 1.0, %v1065_v40  ;;  %v1808_v60 = vmul.f32 %v1807_v38, %v6862_v50  ;;  %v1098_v12 = vadd.f32 0.001143296, %v1097_v4 }
 0x15b   : > { %v5687_v24 = vpop.eup %5686  ;;  %v6916_v20 = vmul.f32 %v1095_v53, %v6564_v47  ;;  %v6919_v13 = vmul.f32 %v1735_v16, %v6616_v30  ;;  %v6924_v21 = vmul.f32 %v1135_v52, %v6636_v62  ;;  %v1844_v11 = vmul.f32 %v6906_v8, %v6906_v8  ;;  %v6929_v47 = vpop.f32.mrf.mxu1 }
 0x15c   : > { %v1031_v29 = vadd.f32 %v5685_v5, %v1030_v57  ;;  %v1208_v57 = vmul.f32 %v1207_v61, %v6864_v44  ;;  %5688 = vrcp.f32 %v6911_v49  ;;  %v1702_v38 = vadd.f32 0.112945676, %v1701_v3  ;;  %v614_v3 = vpop.f32.mrf.mxu0 }
 0x15d   : > { %v1773_v61 = vadd.f32 0.18741608, %v1772_v27  ;;  %v1173_v4 = vadd.f32 0.18741608, %v1172_v41  ;;  %v1809_v16 = vadd.f32 0.0036580483, %v1808_v60  ;;  %v1099_v40 = vmul.f32 %v1098_v12, %v6606_v33 }
 0x15e   : > { %v1035_v18 = vsel %vm1034_vm14, %v5685_v5, %v1031_v29  ;;  %v1668_v5 = vmul.f32 %v5687_v24, %v6881_v42  ;;  %v1209_v29 = vadd.f32 0.0036580483, %v1208_v57  ;;  %vm1673_vm1 = vweird.f32 %v5687_v24 }
 0x15f   : > { %5495 = vmatmul.msk.f32.gmra.mxu3 %vm491_vm0, %v5851_v7  ;;  %v1040_v37 = vsel %vm1037_vm15, %v1039_v46, %v1035_v18  ;;  %v1676_v7 = vand.u32 2147483647, %v6881_v42  ;;  %v6934_v46 = vmin.f32 %v1844_v11, 16.0  ;;  %v6937_v27 = vmul.f32 0.70710677, %v6929_v47 }
 0x160   : > { %v1041_v14 = vmul.f32 %v1040_v37, %v6675_v39  ;;  %v1669_v30 = vsub.f32 1.0, %v1668_v5  ;;  %v1678_v39 = vand.u32 2147483648, %v6881_v42  ;;  %v1703_v41 = vmul.f32 %v1702_v38, %v6552_v54 }
 0x161   : > { %v1737_v18 = vmul.f32 3.8918573e-05, %v6644_v19  ;;  %vm1672_vm2 = vweird.f32 %v6881_v42  ;;  %v3815_v37 = vmul.f32 %v6876_v31, %v6876_v31  ;;  %vm1677_vm4 = vcmp.eq.f32.partialorder %v1676_v7, 8.507059e+37 }
 0x162   : > { %v5416_v53 = vclamps-f32 %v1041_v14, 1.0  ;;  %v1670_v52 = vmul.f32 %v5687_v24, %v1669_v30  ;;  %v5689_v12 = vpop.eup %5688  ;;  %v1774_v14 = vmul.f32 %v1773_v61, %v6741_v28  ;;  %vm1674_vm3 = vmor %vm1672_vm2, %vm1673_vm1  ;;  %v1679_v5 = vor.u32 1.1754944e-38, %v1678_v39 }
 0x163   : > { %v1704_v11 = vadd.f32 0.4994258, %v1703_v41  ;;  %v1068_v32 = vmul.f32 %v5689_v12, %v6911_v49  ;;  %v1244_v42 = vmul.f32 %v6937_v27, %v6937_v27  ;;  %v3883_v39 = vsel %vm3562_vm5, %v3815_v37, 0.0 }
 0x164   : > { %v2167_v62 = vadd.f32 1.0, %v5416_v53  ;;  %v1671_v57 = vadd.f32 %v5687_v24, %v1670_v52  ;;  %v1100_v53 = vadd.f32 0.014752088, %v1099_v40  ;;  %v1078_v7 = vand.u32 2147483648, %v6911_v49  ;;  %3884 = vadd.xlane.f32.xlu2 %v3883_v39 }
 0x165   : > { %v1705_v52 = vmul.f32 %v1704_v11, %v6552_v54  ;;  %v1069_v31 = vsub.f32 1.0, %v1068_v32  ;;  %vm1073_vm6 = vweird.f32 %v5689_v12  ;;  %v1775_v32 = vadd.f32 1.1283791, %v1774_v14 }
 0x166   : > { %v2199_v60 = vmul.f32 %v2167_v62, %v6546_v15  ;;  %v1675_v38 = vsel %vm1674_vm3, %v5687_v24, %v1671_v57  ;;  %v1846_v15 = vmul.f32 2.1237322e-06, %v6934_v46  ;;  %v1076_v24 = vand.u32 2147483647, %v6911_v49 }
 0x167   : > { %v1680_v62 = vsel %vm1677_vm4, %v1679_v5, %v1675_v38  ;;  %v1101_v41 = vmul.f32 %v1100_v53, %v6606_v33  ;;  %v1070_v54 = vmul.f32 %v5689_v12, %v1069_v31  ;;  %v1810_v57 = vmul.f32 %v1809_v16, %v6862_v50 }
 0x168   : > { %v6946_v30 = vmul.f32 %v2199_v60, %v614_v3  ;;  %v1681_v61 = vmul.f32 %v1680_v62, %v6772_v0  ;;  %v6959_v3 = vadd.f32 1.0, %v1705_v52  ;;  %v1738_v0 = vadd.f32 0.001143296, %v1737_v18 }
 0x169   : > { %v6963_v37 = vmin.f32 %v1244_v42, 16.0  ;;  %v1847_v5 = vadd.f32 0.00028619796, %v1846_v15  ;;  %v1071_v11 = vadd.f32 %v5689_v12, %v1070_v54  ;;  %vm1072_vm7 = vweird.f32 %v6911_v49 }
 0x16a   : > { %10002 = vst [vmem:[#allocation14_spill] sm:$0xff] %v6946_v30  ;;  %v3572_v40 = vsel %vm3562_vm5, %v6946_v30, 0.0  ;;  %v5432_v60 = vclamps-f32 %v1681_v61, 1.0  ;;  %5690 = vrcp.f32 %v6959_v3  ;;  %v3800_v38 = vmul.f32 %v6946_v30, %v6946_v30  ;;  %vm1074_vm8 = vmor %vm1072_vm7, %vm1073_vm6 }
 0x16b   : > { %3573 = vadd.xlane.f32.xlu1 %v3572_v40  ;;  %v1079_v53 = vor.u32 1.1754944e-38, %v1078_v7  ;;  %v1102_v31 = vadd.f32 0.112945676, %v1101_v41  ;;  %v1739_v18 = vmul.f32 %v1738_v0, %v6644_v19  ;;  %v1174_v16 = vmul.f32 %v1173_v4, %v6757_v25  ;;  %v6979_v41 = vpop.f32.mrf.mxu3 }
 0x16c   : > { %v2183_v62 = vadd.f32 1.0, %v5432_v60  ;;  %v1210_v14 = vmul.f32 %v1209_v29, %v6864_v44  ;;  %v1075_v42 = vsel %vm1074_vm8, %v5689_v12, %v1071_v11  ;;  %vm1077_vm9 = vcmp.eq.f32.partialorder %v1076_v24, 8.507059e+37  ;;  %v5852_v29 = vld [vmem:[%s6131_s15 + $0x98] sm:$0xff]  ;;  %v10003_v60 = vld [vmem:[#allocation5_spill] sm:$0xff] }
 0x16d   : > { %v1811_v15 = vadd.f32 0.05243302, %v1810_v57  ;;  %v1246_v52 = vmul.f32 2.1237322e-06, %v6963_v37  ;;  %v1080_v49 = vsel %vm1077_vm9, %v1079_v53, %v1075_v42  ;;  %v1103_v61 = vmul.f32 %v1102_v31, %v6606_v33  ;;  %5496 = vmatmul.msk.f32.gmra.mxu3 %vm491_vm0, %v5852_v29  ;;  %v5853_v57 = vld [vmem:[%s6131_s15 + $0x68] sm:$0xff] }
 0x16e   : > { %v6975_v39 = vmul.f32 %v1775_v32, %v6699_v59  ;;  %v1848_v40 = vmul.f32 %v1847_v5, %v6934_v46  ;;  %v1081_v7 = vmul.f32 %v1080_v49, %v6856_v51  ;;  %v3838_v4 = vsel %vm3562_vm5, %v3800_v38, 0.0  ;;  %v6988_v59 = vpop.f32.mrf.mxu2  ;;  %5458 = vmatmul.msk.f32.gmra.mxu2 %vm491_vm0, %v5853_v57 }
 0x16f   : > { %v6985_v24 = vmul.f32 0.5, %v6759_v56  ;;  %v2215_v54 = vmul.f32 %v2183_v62, %v10003_v60  ;;  %v1104_v0 = vadd.f32 0.4994258, %v1103_v61  ;;  %v1740_v32 = vadd.f32 0.014752088, %v1739_v18  ;;  %3839 = vadd.xlane.f32.xlu2 %v3838_v4 }
 0x170   : > { %v5691_v12 = vpop.eup %5690  ;;  %v1175_v51 = vadd.f32 1.1283791, %v1174_v16  ;;  %v6993_v5 = vmul.f32 0.5, %v6806_v1  ;;  %v5417_v11 = vclamps-f32 %v1081_v7, 1.0  ;;  %v1812_v56 = vmul.f32 %v1811_v15, %v6862_v50  ;;  %v617_v1 = vpop.f32.mrf.mxu0 }
 0x171   : > { %v1708_v38 = vmul.f32 %v5691_v12, %v6959_v3  ;;  %v1211_v53 = vadd.f32 0.05243302, %v1210_v14  ;;  %v1247_v31 = vadd.f32 0.00028619796, %v1246_v52  ;;  %v1105_v62 = vmul.f32 %v1104_v0, %v6606_v33  ;;  %v10005_v14 = vld [vmem:[#allocation6_spill] sm:$0xff]  ;;  %v7016_v0 = vpop.f32.mrf.mxu1 }
 0x172   : > { %v1849_v42 = vadd.f32 0.0036580483, %v1848_v40  ;;  %v6999_v18 = vmul.f32 0.70710677, %v6860_v22  ;;  %v2168_v49 = vadd.f32 1.0, %v5417_v11  ;;  %v7002_v16 = vmul.f32 %v2215_v54, %v6816_v17 }
 0x173   : > { %v1709_v61 = vsub.f32 1.0, %v1708_v38  ;;  %v1718_v7 = vand.u32 2147483648, %v6959_v3  ;;  %v7005_v4 = vadd.f32 1.0, %v1105_v62  ;;  %v1741_v15 = vmul.f32 %v1740_v32, %v6644_v19 }
 0x174   : > { %10004 = vst [vmem:[#allocation5_spill] sm:$0xff] %v7002_v16  ;;  %v2200_v52 = vmul.f32 %v2168_v49, %v10005_v14  ;;  %vm1713_vm10 = vweird.f32 %v5691_v12  ;;  %v1716_v33 = vand.u32 2147483647, %v6959_v3  ;;  %v7011_v40 = vmul.f32 %v1175_v51, %v6735_v26 }
 0x175   : > { %v1710_v29 = vmul.f32 %v5691_v12, %v1709_v61  ;;  %v1813_v60 = vadd.f32 0.18741608, %v1812_v56  ;;  %v1212_v17 = vmul.f32 %v1211_v53, %v6864_v44  ;;  %5692 = vrcp.f32 %v7005_v4 }
 0x176   : > { %v1248_v54 = vmul.f32 %v1247_v31, %v6963_v37  ;;  %v7018_v57 = vmul.f32 %v2200_v52, %v617_v1  ;;  %vm1712_vm11 = vweird.f32 %v6959_v3  ;;  %v1850_v11 = vmul.f32 %v1849_v42, %v6934_v46 }
 0x177   : > { %v1711_v32 = vadd.f32 %v5691_v12, %v1710_v29  ;;  %vm1714_vm12 = vmor %vm1712_vm11, %vm1713_vm10  ;;  %v1719_v38 = vor.u32 1.1754944e-38, %v1718_v7  ;;  %v1742_v26 = vadd.f32 0.112945676, %v1741_v15  ;;  %v3620_v51 = vsel %vm3562_vm5, %v7002_v16, 0.0 }
 0x178   : > { %10006 = vst [vmem:[#allocation6_spill] sm:$0xff] %v7018_v57  ;;  %v1884_v56 = vmul.f32 %v6999_v18, %v6999_v18  ;;  %vm1717_vm13 = vcmp.eq.f32.partialorder %v1716_v33, 8.507059e+37  ;;  %v3575_v31 = vsel %vm3562_vm5, %v7018_v57, 0.0  ;;  %3621 = vadd.xlane.f32.xlu1 %v3620_v51  ;;  %v7029_v62 = vmul.f32 0.70710677, %v7016_v0 }
 0x179   : > { %v1715_v53 = vsel %vm1714_vm12, %v5691_v12, %v1711_v32  ;;  %3576 = vadd.xlane.f32.xlu0 %v3575_v31  ;;  %v1743_v42 = vmul.f32 %v1742_v26, %v6644_v19  ;;  %v1137_v49 = vmul.f32 3.8918573e-05, %v6668_v55  ;;  %v1814_v61 = vmul.f32 %v1813_v60, %v6862_v50 }
 0x17a   : > { %v1720_v3 = vsel %vm1717_vm13, %v1719_v38, %v1715_v53  ;;  %v1213_v1 = vadd.f32 0.18741608, %v1212_v17  ;;  %v1777_v12 = vmul.f32 3.8918573e-05, %v6741_v28  ;;  %v1249_v14 = vadd.f32 0.0036580483, %v1248_v54 }
 0x17b   : > { %v1721_v7 = vmul.f32 %v1720_v3, %v6891_v35  ;;  %v5693_v15 = vpop.eup %5692  ;;  %v1744_v52 = vadd.f32 0.4994258, %v1743_v42  ;;  %v1138_v29 = vadd.f32 0.001143296, %v1137_v49  ;;  %v3801_v33 = vmul.f32 %v7018_v57, %v7018_v57  ;;  %v10007_v57 = vld [vmem:[#allocation7_spill] sm:$0xff] }
 0x17c   : > { %v1851_v32 = vadd.f32 0.05243302, %v1850_v11  ;;  %v7038_v38 = vmin.f32 %v1884_v56, 16.0  ;;  %v1108_v51 = vmul.f32 %v5693_v15, %v7005_v4  ;;  %v1284_v60 = vmul.f32 %v7029_v62, %v7029_v62 }
 0x17d   : > { %v5433_v26 = vclamps-f32 %v1721_v7, 1.0  ;;  %v1745_v35 = vmul.f32 %v1744_v52, %v6644_v19  ;;  %v1139_v17 = vmul.f32 %v1138_v29, %v6668_v55  ;;  %v1778_v53 = vadd.f32 0.001143296, %v1777_v12 }
 0x17e   : > { %v1109_v31 = vsub.f32 1.0, %v1108_v51  ;;  %v1116_v3 = vand.u32 2147483647, %v7005_v4  ;;  %v1118_v42 = vand.u32 2147483648, %v7005_v4  ;;  %v3841_v7 = vsel %vm3562_vm5, %v3801_v33, 0.0 }
 0x17f   : > { %v2184_v54 = vadd.f32 1.0, %v5433_v26  ;;  %v7047_v11 = vadd.f32 1.0, %v1745_v35  ;;  %v1140_v56 = vadd.f32 0.014752088, %v1139_v17  ;;  %v1779_v49 = vmul.f32 %v1778_v53, %v6741_v28 }
 0x180   : > { %v1110_v23 = vmul.f32 %v5693_v15, %v1109_v31  ;;  %vm1113_vm14 = vweird.f32 %v5693_v15  ;;  %3842 = vadd.xlane.f32.xlu1 %v3841_v7  ;;  %v1177_v19 = vmul.f32 3.8918573e-05, %v6757_v25  ;;  %v1815_v12 = vadd.f32 1.1283791, %v1814_v61 }
 0x181   : > { %v2216_v30 = vmul.f32 %v2184_v54, %v10007_v57  ;;  %v1214_v52 = vmul.f32 %v1213_v1, %v6864_v44  ;;  %v7054_v29 = vmin.f32 %v1284_v60, 16.0  ;;  %5694 = vrcp.f32 %v7047_v11 }
 0x182   : > { %v1886_v26 = vmul.f32 2.1237322e-06, %v7038_v38  ;;  %v1111_v33 = vadd.f32 %v5693_v15, %v1110_v23  ;;  %vm1112_vm15 = vweird.f32 %v7005_v4  ;;  %v1250_v57 = vmul.f32 %v1249_v14, %v6963_v37 }
 0x183   : > { %v7059_v51 = vmul.f32 %v2216_v30, %v6893_v58  ;;  %vm1114_vm1 = vmor %vm1112_vm15, %vm1113_vm14  ;;  %v1119_v35 = vor.u32 1.1754944e-38, %v1118_v42  ;;  %v1141_v61 = vmul.f32 %v1140_v56, %v6668_v55  ;;  %v1780_v17 = vadd.f32 0.014752088, %v1779_v49 }
 0x184   : > { %v1852_v1 = vmul.f32 %v1851_v32, %v6934_v46  ;;  %v1115_v60 = vsel %vm1114_vm1, %v5693_v15, %v1111_v33  ;;  %vm1117_vm2 = vcmp.eq.f32.partialorder %v1116_v3, 8.507059e+37  ;;  %v1178_v53 = vadd.f32 0.001143296, %v1177_v19 }
 0x185   : > { %10008 = vst [vmem:[#allocation7_spill] sm:$0xff] %v7059_v51  ;;  %v1286_v54 = vmul.f32 2.1237322e-06, %v7054_v29  ;;  %v1120_v31 = vsel %vm1117_vm2, %v1119_v35, %v1115_v60  ;;  %v1142_v58 = vadd.f32 0.112945676, %v1141_v61  ;;  %v1781_v23 = vmul.f32 %v1780_v17, %v6741_v28  ;;  %v5854_v35 = vld [vmem:[%s6131_s15 + $0xa0] sm:$0xff] }
 0x186   : > { %v7068_v30 = vmul.f32 0.5, %v6808_v36  ;;  %v1887_v4 = vadd.f32 0.00028619796, %v1886_v26  ;;  %v7071_v14 = vmul.f32 0.70710677, %v6900_v2  ;;  %v1121_v42 = vmul.f32 %v1120_v31, %v6916_v20  ;;  %v7079_v36 = vpop.f32.mrf.mxu3  ;;  %5497 = vmatmul.msk.f32.gmra.mxu3 %vm491_vm0, %v5854_v35  ;;  %v5855_v17 = vld [vmem:[%s6131_s15 + $0x70] sm:$0xff] }
 0x187   : > { %v5695_v32 = vpop.eup %5694  ;;  %v1215_v15 = vadd.f32 1.1283791, %v1214_v52  ;;  %v7075_v3 = vmul.f32 0.5, %v6929_v47  ;;  %v1251_v56 = vadd.f32 0.05243302, %v1250_v57  ;;  %v1143_v49 = vmul.f32 %v1142_v58, %v6668_v55  ;;  %v7087_v57 = vpop.f32.mrf.mxu2  ;;  %5459 = vmatmul.msk.f32.gmra.mxu2 %vm491_vm0, %v5855_v17 }
 0x188   : > { %10009 = vst [vmem:[#allocation15_spill] sm:$0xff] %v7071_v14  ;;  %v5418_v7 = vclamps-f32 %v1121_v42, 1.0  ;;  %v1748_v19 = vmul.f32 %v5695_v32, %v7047_v11  ;;  %v1782_v26 = vadd.f32 0.112945676, %v1781_v23  ;;  %v1179_v33 = vmul.f32 %v1178_v53, %v6757_v25  ;;  %v7094_v53 = vpop.f32.mrf.mxu1  ;;  %v620_v42 = vpop.f32.mrf.mxu0 }
 0x189   : > { %v7085_v20 = vmul.f32 %v1815_v12, %v6821_v6  ;;  %v1853_v52 = vadd.f32 0.18741608, %v1852_v1  ;;  %v1287_v47 = vadd.f32 0.00028619796, %v1286_v54  ;;  %v1144_v61 = vadd.f32 0.4994258, %v1143_v49 }
 0x18a   : > { %v1888_v60 = vmul.f32 %v1887_v4, %v7038_v38  ;;  %v1924_v31 = vmul.f32 %v7071_v14, %v7071_v14  ;;  %v2169_v58 = vadd.f32 1.0, %v5418_v7  ;;  %v1749_v23 = vsub.f32 1.0, %v1748_v19  ;;  %v10010_v54 = vld [vmem:[#allocation8_spill] sm:$0xff] }
 0x18b   : > { %vm1753_vm3 = vweird.f32 %v5695_v32  ;;  %v1756_v6 = vand.u32 2147483647, %v7047_v11  ;;  %v1758_v12 = vand.u32 2147483648, %v7047_v11  ;;  %v1145_v1 = vmul.f32 %v1144_v61, %v6668_v55 }
 0x18c   : > { %v2201_v49 = vmul.f32 %v2169_v58, %v10010_v54  ;;  %v1750_v35 = vmul.f32 %v5695_v32, %v1749_v23  ;;  %v1783_v4 = vmul.f32 %v1782_v26, %v6741_v28  ;;  %v1180_v17 = vadd.f32 0.014752088, %v1179_v33 }
 0x18d   : > { %v1252_v63 = vmul.f32 %v1251_v56, %v6963_v37  ;;  %v1288_v51 = vmul.f32 %v1287_v47, %v7054_v29  ;;  %v7104_v7 = vmul.f32 0.70710677, %v7094_v53  ;;  %v7106_v19 = vadd.f32 1.0, %v1145_v1 }
 0x18e   : > { %v7108_v16 = vmul.f32 %v2201_v49, %v620_v42  ;;  %v1751_v14 = vadd.f32 %v5695_v32, %v1750_v35  ;;  %vm1752_vm4 = vweird.f32 %v7047_v11  ;;  %v1784_v55 = vadd.f32 0.4994258, %v1783_v4 }
 0x18f   : > { %10011 = vst [vmem:[#allocation8_spill] sm:$0xff] %v7104_v7  ;;  %v7111_v61 = vmin.f32 %v1924_v31, 16.0  ;;  %vm1754_vm6 = vmor %vm1752_vm4, %vm1753_vm3  ;;  %v1759_v26 = vor.u32 1.1754944e-38, %v1758_v12  ;;  %5696 = vrcp.f32 %v7106_v19  ;;  %v1181_v56 = vmul.f32 %v1180_v17, %v6757_v25 }
 0x190   : > { %10012 = vst [vmem:[#allocation16_spill] sm:$0xff] %v7108_v16  ;;  %v1889_v33 = vadd.f32 0.0036580483, %v1888_v60  ;;  %v1755_v47 = vsel %vm1754_vm6, %v5695_v32, %v1751_v14  ;;  %vm1757_vm7 = vcmp.eq.f32.partialorder %v1756_v6, 8.507059e+37  ;;  %v3802_v58 = vmul.f32 %v7108_v16, %v7108_v16 }
 0x191   : > { %v1854_v23 = vmul.f32 %v1853_v52, %v6934_v46  ;;  %v1289_v42 = vadd.f32 0.0036580483, %v1288_v51  ;;  %v1760_v11 = vsel %vm1757_vm7, %v1759_v26, %v1755_v47  ;;  %v1785_v31 = vmul.f32 %v1784_v55, %v6741_v28 }
 0x192   : > { %v1253_v1 = vadd.f32 0.18741608, %v1252_v63  ;;  %v1324_v12 = vmul.f32 %v7104_v7, %v7104_v7  ;;  %v1761_v54 = vmul.f32 %v1760_v11, %v6919_v13  ;;  %v3844_v49 = vsel %vm3562_vm5, %v3802_v58, 0.0 }
 0x193   : > { %v1926_v14 = vmul.f32 2.1237322e-06, %v7111_v61  ;;  %3845 = vadd.xlane.f32.xlu0 %v3844_v49  ;;  %v7125_v32 = vadd.f32 1.0, %v1785_v31  ;;  %v3578_v52 = vsel %vm3562_vm5, %v7108_v16, 0.0  ;;  %v1182_v51 = vadd.f32 0.112945676, %v1181_v56  ;;  %v7151_v31 = vpop.f32.mrf.mxu3 }
 0x194   : > { %v7130_v60 = vmul.f32 %v1215_v15, %v6825_v45  ;;  %v1890_v28 = vmul.f32 %v1889_v33, %v7038_v38  ;;  %v5434_v63 = vclamps-f32 %v1761_v54, 1.0  ;;  %3579 = vadd.xlane.f32.xlu2 %v3578_v52  ;;  %v1817_v13 = vmul.f32 3.8918573e-05, %v6862_v50  ;;  %v5856_v54 = vld [vmem:[%s6131_s15 + $0xa8] sm:$0xff]  ;;  %v7158_v52 = vpop.f32.mrf.mxu1 }
 0x195   : > { %v5697_v6 = vpop.eup %5696  ;;  %v1855_v35 = vadd.f32 1.1283791, %v1854_v23  ;;  %v1290_v4 = vmul.f32 %v1289_v42, %v7054_v29  ;;  %v7136_v17 = vmul.f32 0.70710677, %v6979_v41  ;;  %5698 = vrcp.f32 %v7125_v32  ;;  %5498 = vmatmul.msk.f32.gmra.mxu3 %vm491_vm0, %v5856_v54 }
 0x196   : > { %v7140_v55 = vmul.f32 %v1253_v1, %v6963_v37  ;;  %v7143_v45 = vmul.f32 0.5, %v6860_v22  ;;  %v2185_v15 = vadd.f32 1.0, %v5434_v63  ;;  %v1148_v26 = vmul.f32 %v5697_v6, %v7106_v19 }
 0x197   : > { %10013 = vst [vmem:[#allocation17_spill] sm:$0xff] %v7136_v17  ;;  %v1927_v56 = vadd.f32 0.00028619796, %v1926_v14  ;;  %v7146_v33 = vmin.f32 %v1324_v12, 16.0  ;;  %v1183_v47 = vmul.f32 %v1182_v51, %v6757_v25  ;;  %v1217_v58 = vmul.f32 3.8918573e-05, %v6864_v44 }
 0x198   : > { %v1891_v23 = vadd.f32 0.05243302, %v1890_v28  ;;  %v2217_v42 = vmul.f32 %v2185_v15, %v6654_v10  ;;  %v1149_v11 = vsub.f32 1.0, %v1148_v26  ;;  %v1818_v1 = vadd.f32 0.001143296, %v1817_v13  ;;  %v7167_v26 = vpop.f32.mrf.mxu2 }
 0x199   : > { %v1291_v22 = vadd.f32 0.05243302, %v1290_v4  ;;  %v1964_v12 = vmul.f32 %v7136_v17, %v7136_v17  ;;  %v1158_v49 = vand.u32 2147483648, %v7106_v19  ;;  %v1184_v14 = vadd.f32 0.4994258, %v1183_v47  ;;  %v5857_v47 = vld [vmem:[%s6131_s15 + $0x78] sm:$0xff] }
 0x19a   : > { %v7161_v51 = vmul.f32 %v2217_v42, %v6988_v59  ;;  %v1150_v10 = vmul.f32 %v5697_v6, %v1149_v11  ;;  %vm1153_vm8 = vweird.f32 %v5697_v6  ;;  %v1156_v28 = vand.u32 2147483647, %v7106_v19  ;;  %5460 = vmatmul.msk.f32.gmra.mxu2 %vm491_vm0, %v5857_v47 }
 0x19b   : > { %v5699_v63 = vpop.eup %5698  ;;  %v1928_v13 = vmul.f32 %v1927_v56, %v7111_v61  ;;  %v1326_v4 = vmul.f32 2.1237322e-06, %v7146_v33  ;;  %v1185_v15 = vmul.f32 %v1184_v14, %v6757_v25  ;;  %v1218_v54 = vadd.f32 0.001143296, %v1217_v58 }
 0x19c   : > { %10014 = vst [vmem:[#allocation18_spill] sm:$0xff] %v7161_v51  ;;  %v1151_v16 = vadd.f32 %v5697_v6, %v1150_v10  ;;  %vm1152_vm9 = vweird.f32 %v7106_v19  ;;  %v1788_v59 = vmul.f32 %v5699_v63, %v7125_v32  ;;  %v1819_v42 = vmul.f32 %v1818_v1, %v6862_v50 }
 0x19d   : > { %v7174_v11 = vmin.f32 %v1964_v12, 16.0  ;;  %v7177_v56 = vmul.f32 0.70710677, %v7158_v52  ;;  %vm1154_vm10 = vmor %vm1152_vm9, %vm1153_vm8  ;;  %v1159_v25 = vor.u32 1.1754944e-38, %v1158_v49  ;;  %v7180_v14 = vadd.f32 1.0, %v1185_v15 }
 0x19e   : > { %v1155_v58 = vsel %vm1154_vm10, %v5697_v6, %v1151_v16  ;;  %vm1157_vm11 = vcmp.eq.f32.partialorder %v1156_v28, 8.507059e+37  ;;  %v1789_v47 = vsub.f32 1.0, %v1788_v59  ;;  %v1796_v10 = vand.u32 2147483647, %v7125_v32 }
 0x19f   : > { %10015 = vst [vmem:[#allocation19_spill] sm:$0xff] %v7177_v56  ;;  %v1160_v19 = vsel %vm1157_vm11, %v1159_v25, %v1155_v58  ;;  %v1798_v51 = vand.u32 2147483648, %v7125_v32  ;;  %5700 = vrcp.f32 %v7180_v14  ;;  %v1219_v1 = vmul.f32 %v1218_v54, %v6864_v44 }
 0x1a0   : > { %v1161_v12 = vmul.f32 %v1160_v19, %v6924_v21  ;;  %v1790_v17 = vmul.f32 %v5699_v63, %v1789_v47  ;;  %vm1793_vm12 = vweird.f32 %v5699_v63  ;;  %v1820_v7 = vadd.f32 0.014752088, %v1819_v42 }
 0x1a1   : > { %v7188_v49 = vmul.f32 %v1855_v35, %v6906_v8  ;;  %v1892_v16 = vmul.f32 %v1891_v23, %v7038_v38  ;;  %v1292_v6 = vmul.f32 %v1291_v22, %v7054_v29  ;;  %v1327_v28 = vadd.f32 0.00028619796, %v1326_v4 }
 0x1a2   : > { %v1364_v15 = vmul.f32 %v7177_v56, %v7177_v56  ;;  %v5419_v59 = vclamps-f32 %v1161_v12, 1.0  ;;  %v1791_v25 = vadd.f32 %v5699_v63, %v1790_v17  ;;  %vm1792_vm13 = vweird.f32 %v7125_v32  ;;  %v623_v12 = vpop.f32.mrf.mxu0 }
 0x1a3   : > { %v1929_v54 = vadd.f32 0.0036580483, %v1928_v13  ;;  %v1966_v21 = vmul.f32 2.1237322e-06, %v7174_v11  ;;  %vm1794_vm14 = vmor %vm1792_vm13, %vm1793_vm12  ;;  %vm1797_vm15 = vcmp.eq.f32.partialorder %v1796_v10, 8.507059e+37  ;;  %v1799_v42 = vor.u32 1.1754944e-38, %v1798_v51 }
 0x1a4   : > { %v2170_v8 = vadd.f32 1.0, %v5419_v59  ;;  %v1795_v35 = vsel %vm1794_vm14, %v5699_v63, %v1791_v25  ;;  %v1821_v23 = vmul.f32 %v1820_v7, %v6862_v50  ;;  %v1220_v58 = vadd.f32 0.014752088, %v1219_v1 }
 0x1a5   : > { %v5701_v22 = vpop.eup %5700  ;;  %v1893_v4 = vadd.f32 0.18741608, %v1892_v16  ;;  %v1293_v47 = vadd.f32 0.18741608, %v1292_v6  ;;  %v1328_v19 = vmul.f32 %v1327_v28, %v7146_v33  ;;  %v1800_v17 = vsel %vm1797_vm15, %v1799_v42, %v1795_v35 }
 0x1a6   : > { %v7198_v56 = vmin.f32 %v1364_v15, 16.0  ;;  %v2202_v32 = vmul.f32 %v2170_v8, %v6679_v43  ;;  %v1801_v13 = vmul.f32 %v1800_v17, %v6975_v39  ;;  %v1188_v51 = vmul.f32 %v5701_v22, %v7180_v14 }
 0x1a7   : > { %v1930_v63 = vmul.f32 %v1929_v54, %v7111_v61  ;;  %v1967_v10 = vadd.f32 0.00028619796, %v1966_v21  ;;  %v7205_v7 = vmul.f32 0.70710677, %v7079_v36  ;;  %v1822_v1 = vadd.f32 0.112945676, %v1821_v23 }
 0x1a8   : > { %v7207_v16 = vmul.f32 %v2202_v32, %v623_v12  ;;  %v5435_v6 = vclamps-f32 %v1801_v13, 1.0  ;;  %v1189_v28 = vsub.f32 1.0, %v1188_v51  ;;  %v1221_v15 = vmul.f32 %v1220_v58, %v6864_v44 }
 0x1a9   : > { %vm1193_vm1 = vweird.f32 %v5701_v22  ;;  %v1196_v43 = vand.u32 2147483647, %v7180_v14  ;;  %v1198_v39 = vand.u32 2147483648, %v7180_v14  ;;  %v1823_v59 = vmul.f32 %v1822_v1, %v6862_v50 }
 0x1aa   : > { %10016 = vst [vmem:[#allocation20_spill] sm:$0xff] %v7207_v16  ;;  %v2186_v25 = vadd.f32 1.0, %v5435_v6  ;;  %v1190_v54 = vmul.f32 %v5701_v22, %v1189_v28  ;;  %v3803_v21 = vmul.f32 %v7207_v16, %v7207_v16  ;;  %v3581_v42 = vsel %vm3562_vm5, %v7207_v16, 0.0  ;;  %v7227_v6 = vpop.f32.mrf.mxu1 }
 0x1ab   : > { %v1968_v8 = vmul.f32 %v1967_v10, %v7174_v11  ;;  %v1366_v35 = vmul.f32 2.1237322e-06, %v7198_v56  ;;  %v1824_v23 = vadd.f32 0.4994258, %v1823_v59  ;;  %3582 = vadd.xlane.f32.xlu1 %v3581_v42  ;;  %v1222_v58 = vadd.f32 0.112945676, %v1221_v15 }
 0x1ac   : > { %v2218_v12 = vmul.f32 %v2186_v25, %v6777_v34  ;;  %v1191_v17 = vadd.f32 %v5701_v22, %v1190_v54  ;;  %vm1192_vm2 = vweird.f32 %v7180_v14  ;;  %v3847_v32 = vsel %vm3562_vm5, %v3803_v21, 0.0  ;;  %10017 = vst [vmem:[#allocation21_spill] sm:$0xff] %v7227_v6 }
 0x1ad   : > { %v2004_v13 = vmul.f32 %v7205_v7, %v7205_v7  ;;  %vm1194_vm3 = vmor %vm1192_vm2, %vm1193_vm1  ;;  %v1199_v51 = vor.u32 1.1754944e-38, %v1198_v39  ;;  %v1825_v10 = vmul.f32 %v1824_v23, %v6862_v50  ;;  %3848 = vadd.xlane.f32.xlu2 %v3847_v32  ;;  %v1223_v1 = vmul.f32 %v1222_v58, %v6864_v44  ;;  %v7235_v39 = vpop.f32.mrf.mxu3  ;;  %v5858_v50 = vld [vmem:[%s6131_s15 + $0xb0] sm:$0xff] }
 0x1ae   : > { %v7230_v34 = vmul.f32 %v2218_v12, %v7087_v57  ;;  %v1195_v14 = vsel %vm1194_vm3, %v5701_v22, %v1191_v17  ;;  %vm1197_vm4 = vcmp.eq.f32.partialorder %v1196_v43, 8.507059e+37  ;;  %v1857_v28 = vmul.f32 3.8918573e-05, %v6934_v46  ;;  %5499 = vmatmul.msk.f32.gmra.mxu3 %vm491_vm0, %v5858_v50 }
 0x1af   : > { %v1931_v15 = vadd.f32 0.05243302, %v1930_v63  ;;  %v1329_v59 = vadd.f32 0.0036580483, %v1328_v19  ;;  %v1200_v25 = vsel %vm1197_vm4, %v1199_v51, %v1195_v14  ;;  %v7233_v54 = vadd.f32 1.0, %v1825_v10  ;;  %v7247_v19 = vpop.f32.mrf.mxu2  ;;  %5461 = vmatmul.msk.f32.gmra.mxu2 %vm491_vm0, %v6833_v9 }
 0x1b0   : > { %10018 = vst [vmem:[#allocation22_spill] sm:$0xff] %v7230_v34  ;;  %v1969_v21 = vadd.f32 0.0036580483, %v1968_v8  ;;  %v1367_v42 = vadd.f32 0.00028619796, %v1366_v35  ;;  %v1201_v23 = vmul.f32 %v1200_v25, %v7011_v40  ;;  %v1894_v22 = vmul.f32 %v1893_v4, %v7038_v38 }
 0x1b1   : > { %v1224_v57 = vadd.f32 0.4994258, %v1223_v1  ;;  %v7241_v43 = vmin.f32 %v2004_v13, 16.0  ;;  %v7244_v63 = vmul.f32 0.70710677, %v7227_v6  ;;  %5702 = vrcp.f32 %v7233_v54  ;;  %v626_v1 = vpop.f32.mrf.mxu0 }
 0x1b2   : > { %v1294_v8 = vmul.f32 %v1293_v47, %v7054_v29  ;;  %v5420_v35 = vclamps-f32 %v1201_v23, 1.0  ;;  %v1858_v58 = vadd.f32 0.001143296, %v1857_v28  ;;  %v1255_v4 = vadd.f32 1.1283791, %v7140_v55 }
 0x1b3   : > { %10019 = vst [vmem:[#allocation23_spill] sm:$0xff] %v7244_v63  ;;  %v1225_v40 = vmul.f32 %v1224_v57, %v6864_v44  ;;  %v7255_v12 = vmul.f32 0.5, %v7016_v0  ;;  %v1932_v17 = vmul.f32 %v1931_v15, %v7111_v61  ;;  %v1330_v32 = vmul.f32 %v1329_v59, %v7146_v33 }
 0x1b4   : > { %v1970_v13 = vmul.f32 %v1969_v21, %v7174_v11  ;;  %v1368_v51 = vmul.f32 %v1367_v42, %v7198_v56  ;;  %v2171_v9 = vadd.f32 1.0, %v5420_v35  ;;  %v7263_v47 = vadd.f32 1.1283791, %v1894_v22 }
 0x1b5   : > { %v7261_v10 = vadd.f32 1.0, %v1225_v40  ;;  %v7266_v44 = vmul.f32 0.5, %v6900_v2  ;;  %v2006_v55 = vmul.f32 2.1237322e-06, %v7241_v43  ;;  %v1404_v0 = vmul.f32 %v7244_v63, %v7244_v63 }
 0x1b6   : > { %v7271_v14 = vadd.f32 1.1283791, %v1294_v8  ;;  %v2203_v28 = vmul.f32 %v2171_v9, %v6850_v48  ;;  %v1859_v15 = vmul.f32 %v1858_v58, %v6934_v46  ;;  %v7277_v25 = vmul.f32 %v1255_v4, %v6937_v27 }
 0x1b7   : > { %5704 = vrcp.f32 %v7261_v10  ;;  %v5703_v59 = vpop.eup %5702  ;;  %v7279_v2 = vadd.f32 0.18741608, %v1932_v17  ;;  %v1331_v50 = vadd.f32 0.05243302, %v1330_v32  ;;  %v1257_v21 = vmul.f32 3.8918573e-05, %v6963_v37 }
 0x1b8   : > { %v7282_v42 = vadd.f32 0.05243302, %v1970_v13  ;;  %v7284_v23 = vadd.f32 0.0036580483, %v1368_v51  ;;  %v7286_v57 = vmul.f32 %v2203_v28, %v626_v1  ;;  %v1828_v48 = vmul.f32 %v5703_v59, %v7233_v54 }
 0x1b9   : > { %v7290_v22 = vmul.f32 0.5, %v7094_v53  ;;  %v2007_v8 = vadd.f32 0.00028619796, %v2006_v55  ;;  %v7292_v35 = vmin.f32 %v1404_v0, 16.0  ;;  %v1836_v27 = vand.u32 2147483647, %v7233_v54 }
 0x1ba   : > { %10020 = vst [vmem:[#allocation24_spill] sm:$0xff] %v7286_v57  ;;  %v3584_v40 = vsel %vm3562_vm5, %v7286_v57, 0.0  ;;  %v1829_v58 = vsub.f32 1.0, %v1828_v48  ;;  %v1860_v4 = vadd.f32 0.014752088, %v1859_v15  ;;  %v3804_v17 = vmul.f32 %v7286_v57, %v7286_v57 }
 0x1bb   : > { %3585 = vadd.xlane.f32.xlu0 %v3584_v40  ;;  %vm1833_vm6 = vweird.f32 %v5703_v59  ;;  %v1838_v32 = vand.u32 2147483648, %v7233_v54  ;;  %v1258_v13 = vadd.f32 0.001143296, %v1257_v21  ;;  %v1897_v53 = vmul.f32 3.8918573e-05, %v7038_v38 }
 0x1bc   : > { %v1830_v9 = vmul.f32 %v5703_v59, %v1829_v58  ;;  %v1861_v55 = vmul.f32 %v1860_v4, %v6934_v46  ;;  %v3850_v0 = vsel %vm3562_vm5, %v3804_v17, 0.0  ;;  %v1297_v1 = vmul.f32 3.8918573e-05, %v7054_v29 }
 0x1bd   : > { %v5705_v51 = vpop.eup %5704  ;;  %v1406_v28 = vmul.f32 2.1237322e-06, %v7292_v35  ;;  %vm1832_vm7 = vweird.f32 %v7233_v54  ;;  %vm7306_vm8 = vcmp.eq.f32.partialorder %v1836_v27, 8.507059e+37  ;;  %3851 = vadd.xlane.f32.xlu1 %v3850_v0  ;;  %v1259_v58 = vmul.f32 %v1258_v13, %v6963_v37 }
 0x1be   : > { %v1228_v21 = vmul.f32 %v5705_v51, %v7261_v10  ;;  %v1831_v48 = vadd.f32 %v5703_v59, %v1830_v9  ;;  %v1862_v40 = vadd.f32 0.112945676, %v1861_v55  ;;  %v1898_v4 = vadd.f32 0.001143296, %v1897_v53  ;;  %vm1834_vm9 = vmor %vm1832_vm7, %vm1833_vm6 }
 0x1bf   : > { %v1839_v17 = vor.u32 1.1754944e-38, %v1838_v32  ;;  %v1238_v57 = vand.u32 2147483648, %v7261_v10  ;;  %v1298_v34 = vadd.f32 0.001143296, %v1297_v1  ;;  %v1260_v6 = vadd.f32 0.014752088, %v1259_v58 }
 0x1c0   : > { %v1229_v16 = vsub.f32 1.0, %v1228_v21  ;;  %v1835_v54 = vsel %vm1834_vm9, %v5703_v59, %v1831_v48  ;;  %v1863_v27 = vmul.f32 %v1862_v40, %v6934_v46  ;;  %v1899_v63 = vmul.f32 %v1898_v4, %v7038_v38 }
 0x1c1   : > { %v1840_v9 = vsel %vm7306_vm8, %v1839_v17, %v1835_v54  ;;  %vm1233_vm10 = vweird.f32 %v5705_v51  ;;  %v1236_v13 = vand.u32 2147483647, %v7261_v10  ;;  %v1261_v0 = vmul.f32 %v1260_v6, %v6963_v37 }
 0x1c2   : > { %v1230_v55 = vmul.f32 %v5705_v51, %v1229_v16  ;;  %v1841_v53 = vmul.f32 %v1840_v9, %v7085_v20  ;;  %v1864_v32 = vadd.f32 0.4994258, %v1863_v27  ;;  %v1900_v21 = vadd.f32 0.014752088, %v1899_v63 }
 0x1c3   : > { %vm1232_vm11 = vweird.f32 %v7261_v10  ;;  %v1239_v59 = vor.u32 1.1754944e-38, %v1238_v57  ;;  %v1299_v48 = vmul.f32 %v1298_v34, %v7054_v29  ;;  %v1262_v16 = vadd.f32 0.112945676, %v1261_v0 }
 0x1c4   : > { %v1231_v1 = vadd.f32 %v5705_v51, %v1230_v55  ;;  %v5436_v40 = vclamps-f32 %v1841_v53, 1.0  ;;  %vm1234_vm12 = vmor %vm1232_vm11, %vm1233_vm10  ;;  %v1865_v15 = vmul.f32 %v1864_v32, %v6934_v46  ;;  %v1901_v58 = vmul.f32 %v1900_v21, %v7038_v38  ;;  %v7343_v53 = vpop.f32.mrf.mxu3 }
 0x1c5   : > { %v1332_v4 = vmul.f32 %v1331_v50, %v7146_v33  ;;  %v2008_v20 = vmul.f32 %v2007_v8, %v7241_v43  ;;  %vm1237_vm13 = vcmp.eq.f32.partialorder %v1236_v13, 8.507059e+37  ;;  %v1263_v34 = vmul.f32 %v1262_v16, %v6963_v37 }
 0x1c6   : > { %v1235_v17 = vsel %vm1234_vm12, %v5705_v51, %v1231_v1  ;;  %v2187_v6 = vadd.f32 1.0, %v5436_v40  ;;  %v7327_v10 = vadd.f32 1.0, %v1865_v15  ;;  %v1972_v57 = vmul.f32 %v7282_v42, %v7174_v11  ;;  %v629_v1 = vpop.f32.mrf.mxu0 }
 0x1c7   : > { %v1240_v63 = vsel %vm1237_vm13, %v1239_v59, %v1235_v17  ;;  %v1370_v46 = vmul.f32 %v7284_v23, %v7198_v56  ;;  %v1407_v54 = vadd.f32 0.00028619796, %v1406_v28  ;;  %v1902_v51 = vadd.f32 0.112945676, %v1901_v58  ;;  %v5859_v23 = vld [vmem:[%s6131_s15 + $0xb8] sm:$0xff] }
 0x1c8   : > { %v1241_v50 = vmul.f32 %v1240_v63, %v7130_v60  ;;  %v2219_v8 = vmul.f32 %v2187_v6, %v6985_v24  ;;  %5706 = vrcp.f32 %v7327_v10  ;;  %v1300_v27 = vadd.f32 0.014752088, %v1299_v48  ;;  %5500 = vmatmul.msk.f32.gmra.mxu3 %vm491_vm0, %v5859_v23  ;;  %v7359_v48 = vpop.f32.mrf.mxu2  ;;  %v7381_v63 = vpop.f32.mrf.mxu1 }
 0x1c9   : > { %v7339_v9 = vmul.f32 %v7263_v47, %v6999_v18  ;;  %v1934_v55 = vmul.f32 %v7279_v2, %v7111_v61  ;;  %v2009_v42 = vadd.f32 0.0036580483, %v2008_v20  ;;  %v7349_v24 = vmul.f32 %v7271_v14, %v7029_v62 }
 0x1ca   : > { %v5421_v13 = vclamps-f32 %v1241_v50, 1.0  ;;  %v1333_v60 = vadd.f32 0.18741608, %v1332_v4  ;;  %v7352_v28 = vmul.f32 %v2219_v8, %v7167_v26  ;;  %v1264_v18 = vadd.f32 0.4994258, %v1263_v34  ;;  %v5860_v26 = vld [vmem:[%s6131_s15 + $0x88] sm:$0xff] }
 0x1cb   : > { %v7355_v47 = vmul.f32 0.5, %v6979_v41  ;;  %v1973_v2 = vadd.f32 0.18741608, %v1972_v57  ;;  %v1371_v32 = vadd.f32 0.05243302, %v1370_v46  ;;  %v1408_v21 = vmul.f32 %v1407_v54, %v7292_v35  ;;  %5462 = vmatmul.msk.f32.gmra.mxu2 %vm491_vm0, %v5860_v26  ;;  %v5861_v26 = vld [vmem:[%s6131_s15 + $0xc0] sm:$0xff] }
 0x1cc   : > { %10023 = vst [vmem:[#allocation25_spill] sm:$0xff] %v7352_v28  ;;  %v2172_v0 = vadd.f32 1.0, %v5421_v13  ;;  %v1265_v59 = vmul.f32 %v1264_v18, %v6963_v37  ;;  %v1903_v62 = vmul.f32 %v1902_v51, %v7038_v38  ;;  %v1301_v14 = vmul.f32 %v1300_v27, %v7054_v29 }
 0x1cd   : > { %v7365_v40 = vadd.f32 1.1283791, %v1934_v55  ;;  %v2010_v41 = vmul.f32 %v2009_v42, %v7241_v43  ;;  %v7369_v15 = vmul.f32 0.70710677, %v7151_v31  ;;  %v7373_v37 = vmul.f32 %v1333_v60, %v7146_v33 }
 0x1ce   : > { %v2204_v16 = vmul.f32 %v2172_v0, %v6993_v5  ;;  %v5707_v58 = vpop.eup %5706  ;;  %v7376_v4 = vmul.f32 0.5, %v7158_v52  ;;  %v7378_v20 = vadd.f32 1.0, %v1265_v59  ;;  %v1904_v17 = vadd.f32 0.4994258, %v1903_v62 }
 0x1cf   : > { %v1372_v6 = vmul.f32 %v1371_v32, %v7198_v56  ;;  %v1868_v57 = vmul.f32 %v5707_v58, %v7327_v10  ;;  %v1302_v46 = vadd.f32 0.112945676, %v1301_v14  ;;  %v7387_v5 = vmul.f32 %v1973_v2, %v7174_v11  ;;  %v7410_v14 = vpop.f32.mrf.mxu3 }
 0x1d0   : > { %v7383_v34 = vmul.f32 %v2204_v16, %v629_v1  ;;  %v1409_v54 = vadd.f32 0.0036580483, %v1408_v21  ;;  %5708 = vrcp.f32 %v7378_v20  ;;  %v1937_v52 = vmul.f32 3.8918573e-05, %v7111_v61  ;;  %5501 = vmatmul.msk.f32.gmra.mxu3 %vm491_vm0, %v5861_v26 }
 0x1d1   : > { %v2011_v50 = vadd.f32 0.05243302, %v2010_v41  ;;  %v2044_v8 = vmul.f32 %v7369_v15, %v7369_v15  ;;  %v1869_v51 = vsub.f32 1.0, %v1868_v57  ;;  %v7396_v55 = vmul.f32 0.70710677, %v7381_v63 }
 0x1d2   : > { %10024 = vst [vmem:[#allocation26_spill] sm:$0xff] %v7383_v34  ;;  %v3587_v27 = vsel %vm3562_vm5, %v7383_v34, 0.0  ;;  %v1878_v42 = vand.u32 2147483648, %v7327_v10  ;;  %v1905_v13 = vmul.f32 %v1904_v17, %v7038_v38  ;;  %v3805_v23 = vmul.f32 %v7383_v34, %v7383_v34 }
 0x1d3   : > { %3588 = vadd.xlane.f32.xlu2 %v3587_v27  ;;  %v1870_v60 = vmul.f32 %v5707_v58, %v1869_v51  ;;  %vm1873_vm14 = vweird.f32 %v5707_v58  ;;  %v1876_v18 = vand.u32 2147483647, %v7327_v10  ;;  %v1303_v2 = vmul.f32 %v1302_v46, %v7054_v29  ;;  %v7419_v46 = vpop.f32.mrf.mxu2 }
 0x1d4   : > { %v7404_v32 = vadd.f32 1.0, %v1905_v13  ;;  %v3853_v0 = vsel %vm3562_vm5, %v3805_v23, 0.0  ;;  %v1938_v21 = vadd.f32 0.001143296, %v1937_v52  ;;  %v1337_v1 = vmul.f32 3.8918573e-05, %v7146_v33 }
 0x1d5   : > { %v1410_v38 = vmul.f32 %v1409_v54, %v7292_v35  ;;  %v1871_v59 = vadd.f32 %v5707_v58, %v1870_v60  ;;  %vm1872_vm15 = vweird.f32 %v7327_v10  ;;  %3854 = vadd.xlane.f32.xlu1 %v3853_v0  ;;  %v1304_v62 = vadd.f32 0.4994258, %v1303_v2  ;;  %v5862_v10 = vld [vmem:[%s6131_s15 + $0x90] sm:$0xff] }
 0x1d6   : > { %v5709_v41 = vpop.eup %5708  ;;  %v2012_v16 = vmul.f32 %v2011_v50, %v7241_v43  ;;  %v7415_v17 = vmin.f32 %v2044_v8, 16.0  ;;  %vm1874_vm1 = vmor %vm1872_vm15, %vm1873_vm14  ;;  %v1879_v57 = vor.u32 1.1754944e-38, %v1878_v42  ;;  %5710 = vrcp.f32 %v7404_v32  ;;  %5463 = vmatmul.msk.f32.gmra.mxu2 %vm491_vm0, %v5862_v10 }
 0x1d7   : > { %v1444_v54 = vmul.f32 %v7396_v55, %v7396_v55  ;;  %v1875_v52 = vsel %vm1874_vm1, %v5707_v58, %v1871_v59  ;;  %vm1877_vm2 = vcmp.eq.f32.partialorder %v1876_v18, 8.507059e+37  ;;  %v1268_v51 = vmul.f32 %v5709_v41, %v7378_v20 }
 0x1d8   : > { %v1880_v50 = vsel %vm1877_vm2, %v1879_v57, %v1875_v52  ;;  %v1305_v8 = vmul.f32 %v1304_v62, %v7054_v29  ;;  %v1939_v27 = vmul.f32 %v1938_v21, %v7111_v61  ;;  %v1338_v42 = vadd.f32 0.001143296, %v1337_v1 }
 0x1d9   : > { %v7428_v13 = vadd.f32 0.18741608, %v1372_v6  ;;  %v7430_v23 = vadd.f32 0.05243302, %v1410_v38  ;;  %v1881_v60 = vmul.f32 %v1880_v50, %v7188_v49  ;;  %v1269_v2 = vsub.f32 1.0, %v1268_v51 }
 0x1da   : > { %v2046_v0 = vmul.f32 2.1237322e-06, %v7415_v17  ;;  %v1276_v58 = vand.u32 2147483647, %v7378_v20  ;;  %v1278_v18 = vand.u32 2147483648, %v7378_v20  ;;  %v7436_v59 = vadd.f32 1.0, %v1305_v8 }
 0x1db   : > { %v7438_v26 = vadd.f32 0.18741608, %v2012_v16  ;;  %v5437_v29 = vclamps-f32 %v1881_v60, 1.0  ;;  %v1270_v21 = vmul.f32 %v5709_v41, %v1269_v2  ;;  %vm1273_vm3 = vweird.f32 %v5709_v41 }
 0x1dc   : > { %v5711_v6 = vpop.eup %5710  ;;  %v7440_v1 = vmin.f32 %v1444_v54, 16.0  ;;  %5712 = vrcp.f32 %v7436_v59  ;;  %v1940_v49 = vadd.f32 0.014752088, %v1939_v27  ;;  %v1339_v38 = vmul.f32 %v1338_v42, %v7146_v33 }
 0x1dd   : > { %v2188_v62 = vadd.f32 1.0, %v5437_v29  ;;  %v1271_v57 = vadd.f32 %v5709_v41, %v1270_v21  ;;  %vm1272_vm4 = vweird.f32 %v7378_v20  ;;  %v1908_v10 = vmul.f32 %v5711_v6, %v7404_v32 }
 0x1de   : > { %v7446_v52 = vadd.f32 0.00028619796, %v2046_v0  ;;  %vm1274_vm6 = vmor %vm1272_vm4, %vm1273_vm3  ;;  %vm1277_vm7 = vcmp.eq.f32.partialorder %v1276_v58, 8.507059e+37  ;;  %v1279_v16 = vor.u32 1.1754944e-38, %v1278_v18  ;;  %v1977_v51 = vmul.f32 3.8918573e-05, %v7174_v11 }
 0x1df   : > { %v2220_v54 = vmul.f32 %v2188_v62, %v7068_v30  ;;  %v1275_v50 = vsel %vm1274_vm6, %v5709_v41, %v1271_v57  ;;  %v1909_v8 = vsub.f32 1.0, %v1908_v10  ;;  %v1916_v27 = vand.u32 2147483647, %v7404_v32 }
 0x1e0   : > { %v1280_v42 = vsel %vm1277_vm7, %v1279_v16, %v1275_v50  ;;  %v1918_v60 = vand.u32 2147483648, %v7404_v32  ;;  %v1941_v20 = vmul.f32 %v1940_v49, %v7111_v61  ;;  %v1340_v2 = vadd.f32 0.014752088, %v1339_v38 }
 0x1e1   : > { %v7454_v0 = vmul.f32 %v2220_v54, %v7247_v19  ;;  %v1281_v58 = vmul.f32 %v1280_v42, %v7277_v25  ;;  %v1910_v18 = vmul.f32 %v5711_v6, %v1909_v8  ;;  %vm1913_vm8 = vweird.f32 %v5711_v6  ;;  %v632_v8 = vpop.f32.mrf.mxu0 }
 0x1e2   : > { %v5713_v29 = vpop.eup %5712  ;;  %vm1912_vm9 = vweird.f32 %v7404_v32  ;;  %v1942_v30 = vadd.f32 0.112945676, %v1941_v20  ;;  %v1341_v41 = vmul.f32 %v1340_v2, %v7146_v33  ;;  %v1978_v21 = vadd.f32 0.001143296, %v1977_v51 }
 0x1e3   : > { %10025 = vst [vmem:[#allocation27_spill] sm:$0xff] %v7454_v0  ;;  %v5422_v62 = vclamps-f32 %v1281_v58, 1.0  ;;  %v1911_v57 = vadd.f32 %v5711_v6, %v1910_v18  ;;  %vm1917_vm10 = vcmp.eq.f32.partialorder %v1916_v27, 8.507059e+37  ;;  %v1308_v49 = vmul.f32 %v5713_v29, %v7436_v59  ;;  %vm1914_vm11 = vmor %vm1912_vm9, %vm1913_vm8 }
 0x1e4   : > { %v1919_v38 = vor.u32 1.1754944e-38, %v1918_v60  ;;  %v1316_v19 = vand.u32 2147483647, %v7436_v59  ;;  %v1943_v25 = vmul.f32 %v1942_v30, %v7111_v61  ;;  %v1342_v10 = vadd.f32 0.112945676, %v1341_v41 }
 0x1e5   : > { %v2173_v16 = vadd.f32 1.0, %v5422_v62  ;;  %v1915_v54 = vsel %vm1914_vm11, %v5711_v6, %v1911_v57  ;;  %v1309_v50 = vsub.f32 1.0, %v1308_v49  ;;  %v1318_v32 = vand.u32 2147483648, %v7436_v59  ;;  %v10031_v49 = vld [vmem:[#allocation8_spill] sm:$0xff] }
 0x1e6   : > { %v1920_v42 = vsel %vm1917_vm10, %v1919_v38, %v1915_v54  ;;  %v1944_v51 = vadd.f32 0.4994258, %v1943_v25  ;;  %v1343_v27 = vmul.f32 %v1342_v10, %v7146_v33  ;;  %v1979_v20 = vmul.f32 %v1978_v21, %v7174_v11 }
 0x1e7   : > { %v2205_v60 = vmul.f32 %v2173_v16, %v7075_v3  ;;  %v1921_v2 = vmul.f32 %v1920_v42, %v7339_v9  ;;  %v1310_v58 = vmul.f32 %v5713_v29, %v1309_v50  ;;  %vm1313_vm12 = vweird.f32 %v5713_v29  ;;  %v7476_v3 = vpop.f32.mrf.mxu3  ;;  %v7479_v9 = vld [vmem:[%s6131_s15 + $0xc8] sm:$0xff] }
 0x1e8   : > { %v1446_v18 = vmul.f32 2.1237322e-06, %v7440_v1  ;;  %vm1312_vm13 = vweird.f32 %v7436_v59  ;;  %v1945_v6 = vmul.f32 %v1944_v51, %v7111_v61  ;;  %v1344_v30 = vadd.f32 0.4994258, %v1343_v27  ;;  %5502 = vmatmul.msk.f32.gmra.mxu3 %vm491_vm0, %v7479_v9 }
 0x1e9   : > { %v7470_v41 = vmul.f32 %v2205_v60, %v632_v8  ;;  %v5438_v62 = vclamps-f32 %v1921_v2, 1.0  ;;  %v1311_v57 = vadd.f32 %v5713_v29, %v1310_v58  ;;  %vm7472_vm14 = vcmp.eq.f32.partialorder %v1316_v19, 8.507059e+37  ;;  %vm1314_vm15 = vmor %vm1312_vm13, %vm1313_vm12  ;;  %v5864_v8 = vld [vmem:[%s6131_s15 + $0x98] sm:$0xff] }
 0x1ea   : > { %v1319_v59 = vor.u32 1.1754944e-38, %v1318_v32  ;;  %v7483_v61 = vadd.f32 1.0, %v1945_v6  ;;  %v1345_v21 = vmul.f32 %v1344_v30, %v7146_v33  ;;  %v1980_v38 = vadd.f32 0.014752088, %v1979_v20  ;;  %v7497_v33 = vpop.f32.mrf.mxu2  ;;  %5464 = vmatmul.msk.f32.gmra.mxu2 %vm491_vm0, %v5864_v8 }
 0x1eb   : > { %10026 = vst [vmem:[#allocation28_spill] sm:$0xff] %v7470_v41  ;;  %v3590_v19 = vsel %vm3562_vm5, %v7470_v41, 0.0  ;;  %v2189_v25 = vadd.f32 1.0, %v5438_v62  ;;  %v3806_v10 = vmul.f32 %v7470_v41, %v7470_v41  ;;  %v1315_v16 = vsel %vm1314_vm15, %v5713_v29, %v1311_v57 }
 0x1ec   : > { %v1374_v54 = vmul.f32 %v7428_v13, %v7198_v56  ;;  %v1412_v50 = vmul.f32 %v7430_v23, %v7292_v35  ;;  %3591 = vadd.xlane.f32.xlu0 %v3590_v19  ;;  %v1320_v32 = vsel %vm7472_vm14, %v1319_v59, %v1315_v16  ;;  %5714 = vrcp.f32 %v7483_v61 }
 0x1ed   : > { %v2014_v29 = vmul.f32 %v7438_v26, %v7241_v43  ;;  %v2221_v42 = vmul.f32 %v2189_v25, %v7143_v45  ;;  %v3856_v13 = vsel %vm3562_vm5, %v3806_v10, 0.0  ;;  %v1321_v23 = vmul.f32 %v1320_v32, %v7349_v24 }
 0x1ee   : > { %v1335_v51 = vadd.f32 1.1283791, %v7373_v37  ;;  %v2048_v27 = vmul.f32 %v7446_v52, %v7415_v17  ;;  %3857 = vadd.xlane.f32.xlu2 %v3856_v13  ;;  %v7509_v20 = vadd.f32 1.0, %v1345_v21  ;;  %v1377_v60 = vmul.f32 3.8918573e-05, %v7198_v56  ;;  %v10030_v52 = vld [vmem:[#allocation15_spill] sm:$0xff]  ;;  %v635_v21 = vpop.f32.mrf.mxu0 }
 0x1ef   : > { %v1447_v2 = vadd.f32 0.00028619796, %v1446_v18  ;;  %v7513_v58 = vmul.f32 %v2221_v42, %v7359_v48  ;;  %v5423_v26 = vclamps-f32 %v1321_v23, 1.0  ;;  %v1981_v45 = vmul.f32 %v1980_v38, %v7174_v11 }
 0x1f0   : > { %v7517_v6 = vadd.f32 1.1283791, %v7387_v5  ;;  %v7519_v24 = vadd.f32 1.1283791, %v1374_v54  ;;  %v1413_v37 = vadd.f32 0.18741608, %v1412_v50  ;;  %5716 = vrcp.f32 %v7509_v20 }
 0x1f1   : > { %10029 = vst [vmem:[#allocation29_spill] sm:$0xff] %v7513_v58  ;;  %v1936_v30 = vmul.f32 %v7365_v40, %v10030_v52  ;;  %v7524_v62 = vadd.f32 1.1283791, %v2014_v29  ;;  %v2174_v18 = vadd.f32 1.0, %v5423_v26  ;;  %v1956_v48 = vand.u32 2147483647, %v7483_v61 }
 0x1f2   : > { %v5715_v57 = vpop.eup %5714  ;;  %v7528_v59 = vmul.f32 %v1335_v51, %v10031_v49  ;;  %v1982_v5 = vadd.f32 0.112945676, %v1981_v45  ;;  %v1378_v38 = vadd.f32 0.001143296, %v1377_v60  ;;  %v2017_v19 = vmul.f32 3.8918573e-05, %v7241_v43 }
 0x1f3   : > { %v2049_v25 = vadd.f32 0.0036580483, %v2048_v27  ;;  %v1448_v10 = vmul.f32 %v1447_v2, %v7440_v1  ;;  %v2206_v16 = vmul.f32 %v2174_v18, %v7255_v12  ;;  %v1948_v40 = vmul.f32 %v5715_v57, %v7483_v61 }
 0x1f4   : > { %v7535_v54 = vmul.f32 0.70710677, %v7235_v39  ;;  %vm1952_vm1 = vweird.f32 %v7483_v61  ;;  %v1958_v50 = vand.u32 2147483648, %v7483_v61  ;;  %v1983_v32 = vmul.f32 %v1982_v5, %v7174_v11 }
 0x1f5   : > { %v7540_v8 = vmul.f32 %v2206_v16, %v635_v21  ;;  %v1949_v29 = vsub.f32 1.0, %v1948_v40  ;;  %v1379_v42 = vmul.f32 %v1378_v38, %v7198_v56  ;;  %v2018_v13 = vadd.f32 0.001143296, %v2017_v19 }
 0x1f6   : > { %v5717_v23 = vpop.eup %5716  ;;  %vm1953_vm2 = vweird.f32 %v5715_v57  ;;  %vm7543_vm3 = vcmp.eq.f32.partialorder %v1956_v48, 8.507059e+37  ;;  %v1984_v51 = vadd.f32 0.4994258, %v1983_v32  ;;  %v1417_v27 = vmul.f32 3.8918573e-05, %v7292_v35 }
 0x1f7   : > { %10032 = vst [vmem:[#allocation15_spill] sm:$0xff] %v7540_v8  ;;  %v1950_v60 = vmul.f32 %v5715_v57, %v1949_v29  ;;  %v3807_v2 = vmul.f32 %v7540_v8, %v7540_v8  ;;  %v3593_v26 = vsel %vm3562_vm5, %v7540_v8, 0.0  ;;  %v1348_v45 = vmul.f32 %v5717_v23, %v7509_v20  ;;  %vm1954_vm4 = vmor %vm1952_vm1, %vm1953_vm2 }
 0x1f8   : > { %v1959_v52 = vor.u32 1.1754944e-38, %v1958_v50  ;;  %3594 = vadd.xlane.f32.xlu1 %v3593_v26  ;;  %v1356_v18 = vand.u32 2147483647, %v7509_v20  ;;  %v1985_v48 = vmul.f32 %v1984_v51, %v7174_v11  ;;  %v1380_v49 = vadd.f32 0.014752088, %v1379_v42 }
 0x1f9   : > { %v1951_v21 = vadd.f32 %v5715_v57, %v1950_v60  ;;  %v3859_v5 = vsel %vm3562_vm5, %v3807_v2, 0.0  ;;  %v1349_v38 = vsub.f32 1.0, %v1348_v45  ;;  %v2019_v19 = vmul.f32 %v2018_v13, %v7241_v43  ;;  %v7569_v2 = vpop.f32.mrf.mxu1 }
 0x1fa   : > { %3860 = vadd.xlane.f32.xlu0 %v3859_v5  ;;  %v1358_v16 = vand.u32 2147483648, %v7509_v20  ;;  %v7561_v40 = vadd.f32 1.0, %v1985_v48  ;;  %v1381_v50 = vmul.f32 %v1380_v49, %v7198_v56  ;;  %v1418_v32 = vadd.f32 0.001143296, %v1417_v27 }
 0x1fb   : > { %v1955_v11 = vsel %vm1954_vm4, %v5715_v57, %v1951_v21  ;;  %v1350_v29 = vmul.f32 %v5717_v23, %v1349_v38  ;;  %vm1353_vm6 = vweird.f32 %v5717_v23  ;;  %v2020_v42 = vadd.f32 0.014752088, %v2019_v19  ;;  %v10035_v21 = vld [vmem:[#allocation17_spill] sm:$0xff] }
 0x1fc   : > { %v1414_v51 = vmul.f32 %v1413_v37, %v7292_v35  ;;  %v2050_v13 = vmul.f32 %v2049_v25, %v7415_v17  ;;  %v1960_v61 = vsel %vm7543_vm3, %v1959_v52, %v1955_v11  ;;  %5718 = vrcp.f32 %v7561_v40 }
 0x1fd   : > { %v1449_v60 = vadd.f32 0.0036580483, %v1448_v10  ;;  %v1961_v26 = vmul.f32 %v1960_v61, %v1936_v30  ;;  %v1351_v45 = vadd.f32 %v5717_v23, %v1350_v29  ;;  %vm1352_vm7 = vweird.f32 %v7509_v20 }
 0x1fe   : > { %vm1354_vm8 = vmor %vm1352_vm7, %vm1353_vm6  ;;  %v1359_v57 = vor.u32 1.1754944e-38, %v1358_v16  ;;  %v1382_v27 = vadd.f32 0.112945676, %v1381_v50  ;;  %v2021_v48 = vmul.f32 %v2020_v42, %v7241_v43  ;;  %v1419_v37 = vmul.f32 %v1418_v32, %v7292_v35  ;;  %v4644_v16 = vld [vmem:[%s9920_s6 + $0x38] sm:$0xff]  ;;  %v7594_v32 = vld [vmem:[%s6131_s15 + $0xd0] sm:$0xff] }
 0x1ff   : > { %v2084_v25 = vmul.f32 %v7535_v54, %v7535_v54  ;;  %v5439_v12 = vclamps-f32 %v1961_v26, 1.0  ;;  %v1355_v52 = vsel %vm1354_vm8, %v5717_v23, %v1351_v45  ;;  %vm1357_vm9 = vcmp.eq.f32.partialorder %v1356_v18, 8.507059e+37  ;;  %v4636_v23 = vld [vmem:[%s9919_s5 + $0x38] sm:$0xff]  ;;  %v7591_v18 = vpop.f32.mrf.mxu3  ;;  %5503 = vmatmul.msk.f32.gmra.mxu3 %vm491_vm0, %v7594_v32  ;;  %4749 = vmatpush.msrb.mxu0 %v4644_v16 }
 0x200   : > { %v7577_v10 = vmul.f32 0.70710677, %v7569_v2  ;;  %v1360_v30 = vsel %vm1357_vm9, %v1359_v57, %v1355_v52  ;;  %v1383_v20 = vmul.f32 %v1382_v27, %v7198_v56  ;;  %v2022_v49 = vadd.f32 0.112945676, %v2021_v48  ;;  %4958 = vmatpush.msrb.mxu1 %v4636_v23 }
 0x201   : > { %v7582_v5 = vmul.f32 %v7517_v6, %v10035_v21  ;;  %v2190_v38 = vadd.f32 1.0, %v5439_v12  ;;  %v1361_v19 = vmul.f32 %v1360_v30, %v7528_v59  ;;  %v1420_v50 = vadd.f32 0.014752088, %v1419_v37  ;;  %v5866_v37 = vld [vmem:[%s6131_s15 + $0xa0] sm:$0xff]  ;;  %v638_v30 = vpop.f32.mrf.mxu0 }
 0x202   : > { %v5719_v6 = vpop.eup %5718  ;;  %v7598_v11 = vadd.f32 1.1283791, %v1414_v51  ;;  %v2051_v59 = vadd.f32 0.05243302, %v2050_v13  ;;  %v1450_v29 = vmul.f32 %v1449_v60, %v7440_v1  ;;  %v1384_v42 = vadd.f32 0.4994258, %v1383_v20  ;;  %v7608_v51 = vpop.f32.mrf.mxu2  ;;  %5465 = vmatmul.msk.f32.gmra.mxu2 %vm491_vm0, %v5866_v37 }
 0x203   : > { %v7601_v61 = vmin.f32 %v2084_v25, 16.0  ;;  %v2222_v26 = vmul.f32 %v2190_v38, %v7266_v44  ;;  %v5424_v45 = vclamps-f32 %v1361_v19, 1.0  ;;  %v1988_v57 = vmul.f32 %v5719_v6, %v7561_v40 }
 0x204   : > { %v1484_v27 = vmul.f32 %v7577_v10, %v7577_v10  ;;  %v1385_v48 = vmul.f32 %v1384_v42, %v7198_v56  ;;  %v2023_v13 = vmul.f32 %v2022_v49, %v7241_v43  ;;  %v2057_v60 = vmul.f32 3.8918573e-05, %v7415_v17 }
 0x205   : > { %v7615_v25 = vmul.f32 %v2222_v26, %v7419_v46  ;;  %v2175_v44 = vadd.f32 1.0, %v5424_v45  ;;  %v1989_v12 = vsub.f32 1.0, %v1988_v57  ;;  %v1421_v52 = vmul.f32 %v1420_v50, %v7292_v35 }
 0x206   : > { %v1996_v20 = vand.u32 2147483647, %v7561_v40  ;;  %v1998_v56 = vand.u32 2147483648, %v7561_v40  ;;  %v7620_v21 = vadd.f32 1.0, %v1385_v48  ;;  %v2024_v49 = vadd.f32 0.4994258, %v2023_v13 }
 0x207   : > { %10036 = vst [vmem:[#allocation8_spill] sm:$0xff] %v7615_v25  ;;  %v2207_v38 = vmul.f32 %v2175_v44, %v7290_v22  ;;  %v1990_v19 = vmul.f32 %v5719_v6, %v1989_v12  ;;  %vm1993_vm10 = vweird.f32 %v5719_v6  ;;  %v1422_v16 = vadd.f32 0.112945676, %v1421_v52 }
 0x208   : > { %v2052_v46 = vmul.f32 %v2051_v59, %v7415_v17  ;;  %v1451_v23 = vadd.f32 0.05243302, %v1450_v29  ;;  %v7624_v42 = vmin.f32 %v1484_v27, 16.0  ;;  %5720 = vrcp.f32 %v7620_v21 }
 0x209   : > { %v2086_v50 = vmul.f32 2.1237322e-06, %v7601_v61  ;;  %v7628_v26 = vmul.f32 %v2207_v38, %v638_v30  ;;  %v1991_v45 = vadd.f32 %v5719_v6, %v1990_v19  ;;  %vm1992_vm11 = vweird.f32 %v7561_v40 }
 0x20a   : > { %vm1994_vm12 = vmor %vm1992_vm11, %vm1993_vm10  ;;  %vm1997_vm13 = vcmp.eq.f32.partialorder %v1996_v20, 8.507059e+37  ;;  %v1999_v22 = vor.u32 1.1754944e-38, %v1998_v56  ;;  %v2025_v57 = vmul.f32 %v2024_v49, %v7241_v43  ;;  %v1423_v59 = vmul.f32 %v1422_v16, %v7292_v35  ;;  %v7648_v56 = vld [vmem:[%s6131_s15 + $0xd8] sm:$0xff] }
 0x20b   : > { %10037 = vst [vmem:[#allocation17_spill] sm:$0xff] %v7628_v26  ;;  %v3596_v29 = vsel %vm3562_vm5, %v7628_v26, 0.0  ;;  %v1995_v27 = vsel %vm1994_vm12, %v5719_v6, %v1991_v45  ;;  %v3808_v48 = vmul.f32 %v7628_v26, %v7628_v26  ;;  %v2058_v13 = vadd.f32 0.001143296, %v2057_v60  ;;  %v7645_v6 = vpop.f32.mrf.mxu3  ;;  %5504 = vmatmul.msk.f32.gmra.mxu3 %vm491_vm0, %v7648_v56  ;;  %v10038_v49 = vld [vmem:[#allocation19_spill] sm:$0xff] }
 0x20c   : > { %v1486_v37 = vmul.f32 2.1237322e-06, %v7624_v42  ;;  %3597 = vadd.xlane.f32.xlu2 %v3596_v29  ;;  %v2000_v40 = vsel %vm1997_vm13, %v1999_v22, %v1995_v27  ;;  %v7638_v44 = vadd.f32 1.0, %v2025_v57  ;;  %v1424_v12 = vadd.f32 0.4994258, %v1423_v59  ;;  %v10039_v22 = vld [vmem:[#allocation23_spill] sm:$0xff] }
 0x20d   : > { %v7641_v43 = vmul.f32 0.5, %v7079_v36  ;;  %v2053_v52 = vadd.f32 0.18741608, %v2052_v46  ;;  %v2001_v30 = vmul.f32 %v2000_v40, %v7582_v5  ;;  %v3862_v20 = vsel %vm3562_vm5, %v3808_v48, 0.0 }
 0x20e   : > { %v5721_v60 = vpop.eup %5720  ;;  %v1376_v38 = vmul.f32 %v7519_v24, %v10038_v49  ;;  %v7656_v36 = vmul.f32 %v7524_v62, %v7205_v7  ;;  %v1452_v5 = vmul.f32 %v1451_v23, %v7440_v1  ;;  %3863 = vadd.xlane.f32.xlu1 %v3862_v20  ;;  %5722 = vrcp.f32 %v7638_v44  ;;  %v7668_v62 = vpop.f32.mrf.mxu2  ;;  %v5868_v23 = vld [vmem:[%s6131_s15 + $0xa8] sm:$0xff] }
 0x20f   : > { %v5440_v19 = vclamps-f32 %v2001_v30, 1.0  ;;  %v1388_v16 = vmul.f32 %v5721_v60, %v7620_v21  ;;  %v2059_v46 = vmul.f32 %v2058_v13, %v7415_v17  ;;  %v1457_v45 = vmul.f32 3.8918573e-05, %v7440_v1  ;;  %5466 = vmatmul.msk.f32.gmra.mxu2 %vm491_vm0, %v5868_v23 }
 0x210   : > { %v7665_v57 = vmul.f32 %v7598_v11, %v10039_v22  ;;  %v2087_v24 = vadd.f32 0.00028619796, %v2086_v50  ;;  %v1487_v59 = vadd.f32 0.00028619796, %v1486_v37  ;;  %v1425_v7 = vmul.f32 %v1424_v12, %v7292_v35 }
 0x211   : > { %v7673_v29 = vmul.f32 %v2053_v52, %v7415_v17  ;;  %v2191_v27 = vadd.f32 1.0, %v5440_v19  ;;  %v1389_v48 = vsub.f32 1.0, %v1388_v16  ;;  %v1396_v13 = vand.u32 2147483647, %v7620_v21 }
 0x212   : > { %v1453_v40 = vadd.f32 0.18741608, %v1452_v5  ;;  %vm1393_vm14 = vweird.f32 %v5721_v60  ;;  %v1398_v11 = vand.u32 2147483648, %v7620_v21  ;;  %v7677_v50 = vadd.f32 1.0, %v1425_v7 }
 0x213   : > { %v2223_v35 = vmul.f32 %v2191_v27, %v7355_v47  ;;  %v1390_v37 = vmul.f32 %v5721_v60, %v1389_v48  ;;  %v2060_v12 = vadd.f32 0.014752088, %v2059_v46  ;;  %v1458_v30 = vadd.f32 0.001143296, %v1457_v45 }
 0x214   : > { %v5723_v20 = vpop.eup %5722  ;;  %v2088_v49 = vmul.f32 %v2087_v24, %v7601_v61  ;;  %v1488_v52 = vmul.f32 %v1487_v59, %v7624_v42  ;;  %vm1392_vm15 = vweird.f32 %v7620_v21  ;;  %5724 = vrcp.f32 %v7677_v50 }
 0x215   : > { %v7685_v5 = vmul.f32 %v2223_v35, %v7497_v33  ;;  %v1391_v19 = vadd.f32 %v5721_v60, %v1390_v37  ;;  %vm1397_vm1 = vcmp.eq.f32.partialorder %v1396_v13, 8.507059e+37  ;;  %v2028_v16 = vmul.f32 %v5723_v20, %v7638_v44  ;;  %vm1394_vm2 = vmor %vm1392_vm15, %vm1393_vm14 }
 0x216   : > { %v1399_v47 = vor.u32 1.1754944e-38, %v1398_v11  ;;  %v2036_v46 = vand.u32 2147483647, %v7638_v44  ;;  %v2038_v45 = vand.u32 2147483648, %v7638_v44  ;;  %v2097_v22 = vmul.f32 3.8918573e-05, %v7601_v61 }
 0x217   : > { %10040 = vst [vmem:[#allocation19_spill] sm:$0xff] %v7685_v5  ;;  %v1395_v24 = vsel %vm1394_vm2, %v5721_v60, %v1391_v19  ;;  %v2029_v21 = vsub.f32 1.0, %v2028_v16  ;;  %v2061_v59 = vmul.f32 %v2060_v12, %v7415_v17  ;;  %v1459_v33 = vmul.f32 %v1458_v30, %v7440_v1 }
 0x218   : > { %v7695_v7 = vmul.f32 %v1453_v40, %v7440_v1  ;;  %v2089_v23 = vadd.f32 0.0036580483, %v2088_v49  ;;  %v1400_v27 = vsel %vm1397_vm1, %v1399_v47, %v1395_v24  ;;  %vm2033_vm3 = vweird.f32 %v5723_v20 }
 0x219   : > { %v1401_v48 = vmul.f32 %v1400_v27, %v1376_v38  ;;  %v2030_v13 = vmul.f32 %v5723_v20, %v2029_v21  ;;  %v2062_v11 = vadd.f32 0.112945676, %v2061_v59  ;;  %v1460_v35 = vadd.f32 0.014752088, %v1459_v33 }
 0x21a   : > { %v5725_v37 = vpop.eup %5724  ;;  %v7697_v26 = vadd.f32 0.0036580483, %v1488_v52  ;;  %vm2032_vm4 = vweird.f32 %v7638_v44  ;;  %vm7700_vm6 = vcmp.eq.f32.partialorder %v2036_v46, 8.507059e+37  ;;  %v2098_v12 = vadd.f32 0.001143296, %v2097_v22  ;;  %v641_v22 = vpop.f32.mrf.mxu0 }
 0x21b   : > { %v5425_v30 = vclamps-f32 %v1401_v48, 1.0  ;;  %v2031_v40 = vadd.f32 %v5723_v20, %v2030_v13  ;;  %v2039_v19 = vor.u32 1.1754944e-38, %v2038_v45  ;;  %v1428_v49 = vmul.f32 %v5725_v37, %v7677_v50  ;;  %vm2034_vm7 = vmor %vm2032_vm4, %vm2033_vm3 }
 0x21c   : > { %v1436_v38 = vand.u32 2147483647, %v7677_v50  ;;  %v1438_v16 = vand.u32 2147483648, %v7677_v50  ;;  %v2063_v52 = vmul.f32 %v2062_v11, %v7415_v17  ;;  %v1461_v47 = vmul.f32 %v1460_v35, %v7440_v1 }
 0x21d   : > { %v2176_v44 = vadd.f32 1.0, %v5425_v30  ;;  %v2035_v46 = vsel %vm2034_vm7, %v5723_v20, %v2031_v40  ;;  %v1429_v24 = vsub.f32 1.0, %v1428_v49  ;;  %v2099_v21 = vmul.f32 %v2098_v12, %v7601_v61 }
 0x21e   : > { %v2040_v45 = vsel %vm7700_vm6, %v2039_v19, %v2035_v46  ;;  %vm1433_vm8 = vweird.f32 %v5725_v37  ;;  %v2064_v59 = vadd.f32 0.4994258, %v2063_v52  ;;  %v1497_v33 = vmul.f32 3.8918573e-05, %v7624_v42 }
 0x21f   : > { %v2208_v27 = vmul.f32 %v2176_v44, %v7376_v4  ;;  %v2041_v48 = vmul.f32 %v2040_v45, %v7656_v36  ;;  %v1430_v13 = vmul.f32 %v5725_v37, %v1429_v24  ;;  %v1462_v11 = vadd.f32 0.112945676, %v1461_v47  ;;  %v4635_v45 = vld [vmem:[%s9919_s5 + $0x30] sm:$0xff] }
 0x220   : > { %v7716_v35 = vmul.f32 0.70710677, %v7343_v53  ;;  %vm1432_vm9 = vweird.f32 %v7677_v50  ;;  %v2065_v20 = vmul.f32 %v2064_v59, %v7415_v17  ;;  %v2100_v12 = vadd.f32 0.014752088, %v2099_v21  ;;  %v7744_v59 = vpop.f32.mrf.mxu3  ;;  %4959 = vmatpush.msrb.mxu1 %v4635_v45 }
 0x221   : > { %v7720_v60 = vmul.f32 %v2208_v27, %v641_v22  ;;  %v5441_v30 = vclamps-f32 %v2041_v48, 1.0  ;;  %v1431_v40 = vadd.f32 %v5725_v37, %v1430_v13  ;;  %vm1437_vm10 = vcmp.eq.f32.partialorder %v1436_v38, 8.507059e+37  ;;  %vm1434_vm11 = vmor %vm1432_vm9, %vm1433_vm8 }
 0x222   : > { %v1439_v4 = vor.u32 1.1754944e-38, %v1438_v16  ;;  %v7723_v19 = vadd.f32 1.0, %v2065_v20  ;;  %v1463_v36 = vmul.f32 %v1462_v11, %v7440_v1  ;;  %v1498_v49 = vadd.f32 0.001143296, %v1497_v33  ;;  %v7747_v33 = vld [vmem:[%s6131_s15 + $0xe0] sm:$0xff] }
 0x223   : > { %10043 = vst [vmem:[#allocation23_spill] sm:$0xff] %v7720_v60  ;;  %v3599_v52 = vsel %vm3562_vm5, %v7720_v60, 0.0  ;;  %v2192_v50 = vadd.f32 1.0, %v5441_v30  ;;  %v3809_v17 = vmul.f32 %v7720_v60, %v7720_v60  ;;  %v1435_v47 = vsel %vm1434_vm11, %v5725_v37, %v1431_v40  ;;  %v4643_v37 = vld [vmem:[%s9920_s6 + $0x30] sm:$0xff]  ;;  %5505 = vmatmul.msk.f32.gmra.mxu3 %vm491_vm0, %v7747_v33  ;;  %v7762_v30 = vpop.f32.mrf.mxu2 }
 0x224   : > { %v2124_v38 = vmul.f32 %v7716_v35, %v7716_v35  ;;  %3600 = vadd.xlane.f32.xlu0 %v3599_v52  ;;  %v1440_v44 = vsel %vm1437_vm10, %v1439_v4, %v1435_v47  ;;  %5726 = vrcp.f32 %v7723_v19  ;;  %v2101_v16 = vmul.f32 %v2100_v12, %v7601_v61  ;;  %4750 = vmatpush.msrb.mxu0 %v4643_v37  ;;  %v5870_v4 = vld [vmem:[%s6131_s15 + $0xb0] sm:$0xff] }
 0x225   : > { %v2090_v46 = vmul.f32 %v2089_v23, %v7601_v61  ;;  %v2224_v24 = vmul.f32 %v2192_v50, %v7641_v43  ;;  %v3865_v21 = vsel %vm3562_vm5, %v3809_v17, 0.0  ;;  %v1441_v22 = vmul.f32 %v1440_v44, %v7665_v57  ;;  %5467 = vmatmul.msk.f32.gmra.mxu2 %vm491_vm0, %v5870_v4  ;;  %v644_v50 = vpop.f32.mrf.mxu0 }
 0x226   : > { %3866 = vadd.xlane.f32.xlu2 %v3865_v21  ;;  %v1464_v43 = vadd.f32 0.4994258, %v1463_v36  ;;  %v1499_v57 = vmul.f32 %v1498_v49, %v7624_v42  ;;  %v2055_v23 = vadd.f32 1.1283791, %v7673_v29  ;;  %v1455_v27 = vadd.f32 1.1283791, %v7695_v7 }
 0x227   : > { %v7755_v48 = vmul.f32 %v2224_v24, %v7608_v51  ;;  %v5426_v13 = vclamps-f32 %v1441_v22, 1.0  ;;  %v1490_v11 = vmul.f32 %v7697_v26, %v7624_v42  ;;  %v7759_v20 = vmin.f32 %v2124_v38, 16.0  ;;  %v10045_v29 = vld [vmem:[#allocation21_spill] sm:$0xff] }
 0x228   : > { %v1465_v12 = vmul.f32 %v1464_v43, %v7440_v1  ;;  %v2102_v40 = vadd.f32 0.112945676, %v2101_v16  ;;  %v833_v7 = vmul.f32 0.5, %v10045_v29  ;;  %v2091_v36 = vadd.f32 0.05243302, %v2090_v46 }
 0x229   : > { %10044 = vst [vmem:[#allocation30_spill] sm:$0xff] %v7755_v48  ;;  %v7768_v51 = vmul.f32 0.70710677, %v7410_v14  ;;  %v2177_v49 = vadd.f32 1.0, %v5426_v13  ;;  %v7771_v26 = vmul.f32 0.5, %v7151_v31  ;;  %v2056_v38 = vmul.f32 %v2055_v23, %v7369_v15 }
 0x22a   : > { %v5727_v52 = vpop.eup %5726  ;;  %v7773_v17 = vadd.f32 1.0, %v1465_v12  ;;  %v2103_v1 = vmul.f32 %v2102_v40, %v7601_v61  ;;  %v1500_v47 = vadd.f32 0.014752088, %v1499_v57  ;;  %v7778_v44 = vmul.f32 0.5, %v7381_v63 }
 0x22b   : > { %v2209_v16 = vmul.f32 %v2177_v49, %v833_v7  ;;  %v2068_v46 = vmul.f32 %v5727_v52, %v7723_v19  ;;  %v7782_v24 = vmul.f32 %v1455_v27, %v7396_v55  ;;  %v1491_v21 = vadd.f32 0.05243302, %v1490_v11 }
 0x22c   : > { %v2126_v31 = vmul.f32 2.1237322e-06, %v7759_v20  ;;  %5728 = vrcp.f32 %v7773_v17  ;;  %v2092_v22 = vmul.f32 %v2091_v36, %v7601_v61  ;;  %v2530_v37 = vmul.f32 %v7768_v51, %v7768_v51 }
 0x22d   : > { %v7789_v15 = vmul.f32 %v2209_v16, %v644_v50  ;;  %v2069_v63 = vsub.f32 1.0, %v2068_v46  ;;  %v2076_v45 = vand.u32 2147483647, %v7723_v19  ;;  %v2078_v43 = vand.u32 2147483648, %v7723_v19 }
 0x22e   : > { %v2104_v57 = vadd.f32 0.4994258, %v2103_v1  ;;  %v1501_v55 = vmul.f32 %v1500_v47, %v7624_v42  ;;  %vm2073_vm12 = vweird.f32 %v5727_v52  ;;  %v1492_v11 = vmul.f32 %v1491_v21, %v7624_v42 }
 0x22f   : > { %10046 = vst [vmem:[#allocation21_spill] sm:$0xff] %v7789_v15  ;;  %v3602_v23 = vsel %vm3562_vm5, %v7789_v15, 0.0  ;;  %v2070_v27 = vmul.f32 %v5727_v52, %v2069_v63  ;;  %v3810_v13 = vmul.f32 %v7789_v15, %v7789_v15  ;;  %v2127_v12 = vadd.f32 0.00028619796, %v2126_v31 }
 0x230   : > { %3603 = vadd.xlane.f32.xlu1 %v3602_v23  ;;  %v2105_v40 = vmul.f32 %v2104_v57, %v7601_v61  ;;  %v1502_v4 = vadd.f32 0.112945676, %v1501_v55  ;;  %v7800_v29 = vmin.f32 %v2530_v37, 16.0  ;;  %vm2072_vm13 = vweird.f32 %v7723_v19  ;;  %v7812_v57 = vpop.f32.mrf.mxu3  ;;  %v7816_v55 = vld [vmem:[%s6131_s15 + $0xe8] sm:$0xff] }
 0x231   : > { %v2071_v7 = vadd.f32 %v5727_v52, %v2070_v27  ;;  %v3868_v36 = vsel %vm3562_vm5, %v3810_v13, 0.0  ;;  %v2093_v50 = vadd.f32 0.18741608, %v2092_v22  ;;  %vm2074_vm14 = vmor %vm2072_vm13, %vm2073_vm12  ;;  %vm2077_vm15 = vcmp.eq.f32.partialorder %v2076_v45, 8.507059e+37  ;;  %5506 = vmatmul.msk.f32.gmra.mxu3 %vm491_vm0, %v7816_v55 }
 0x232   : > { %v5729_v49 = vpop.eup %5728  ;;  %v2079_v1 = vor.u32 1.1754944e-38, %v2078_v43  ;;  %3869 = vadd.xlane.f32.xlu0 %v3868_v36  ;;  %v7804_v47 = vadd.f32 1.0, %v2105_v40  ;;  %v1503_v21 = vmul.f32 %v1502_v4, %v7624_v42  ;;  %v2137_v31 = vmul.f32 3.8918573e-05, %v7759_v20 }
 0x233   : > { %v2075_v16 = vsel %vm2074_vm14, %v5727_v52, %v2071_v7  ;;  %v1468_v46 = vmul.f32 %v5729_v49, %v7773_v17  ;;  %v1493_v37 = vadd.f32 0.18741608, %v1492_v11  ;;  %v2128_v19 = vmul.f32 %v2127_v12, %v7759_v20 }
 0x234   : > { %v2080_v63 = vsel %vm2077_vm15, %v2079_v1, %v2075_v16  ;;  %5730 = vrcp.f32 %v7804_v47  ;;  %v2532_v22 = vmul.f32 2.1237322e-06, %v7800_v29  ;;  %v2543_v52 = vmul.f32 3.8918573e-05, %v7800_v29  ;;  %v7828_v16 = vpop.f32.mrf.mxu2 }
 0x235   : > { %v2081_v45 = vmul.f32 %v2080_v63, %v2056_v38  ;;  %v1469_v43 = vsub.f32 1.0, %v1468_v46  ;;  %v2094_v23 = vmul.f32 %v2093_v50, %v7601_v61  ;;  %v1476_v27 = vand.u32 2147483647, %v7773_v17  ;;  %v5872_v61 = vld [vmem:[%s6131_s15 + $0xb8] sm:$0xff] }
 0x236   : > { %v1478_v13 = vand.u32 2147483648, %v7773_v17  ;;  %v1504_v11 = vadd.f32 0.4994258, %v1503_v21  ;;  %vm1473_vm1 = vweird.f32 %v5729_v49  ;;  %v2138_v40 = vadd.f32 0.001143296, %v2137_v31  ;;  %5468 = vmatmul.msk.f32.gmra.mxu2 %vm491_vm0, %v5872_v61 }
 0x237   : > { %v5442_v12 = vclamps-f32 %v2081_v45, 1.0  ;;  %v1470_v38 = vmul.f32 %v5729_v49, %v1469_v43  ;;  %v1494_v4 = vmul.f32 %v1493_v37, %v7624_v42  ;;  %v2129_v7 = vadd.f32 0.0036580483, %v2128_v19 }
 0x238   : > { %v7825_v36 = vmul.f32 0.70710677, %v7476_v3  ;;  %v1505_v1 = vmul.f32 %v1504_v11, %v7624_v42  ;;  %v2533_v50 = vadd.f32 0.00028619796, %v2532_v22  ;;  %vm1472_vm2 = vweird.f32 %v7773_v17 }
 0x239   : > { %v2193_v46 = vadd.f32 1.0, %v5442_v12  ;;  %v1471_v21 = vadd.f32 %v5729_v49, %v1470_v38  ;;  %vm1474_vm3 = vmor %vm1472_vm2, %vm1473_vm1  ;;  %vm1477_vm4 = vcmp.eq.f32.partialorder %v1476_v27, 8.507059e+37  ;;  %v1479_v31 = vor.u32 1.1754944e-38, %v1478_v13 }
 0x23a   : > { %v5731_v63 = vpop.eup %5730  ;;  %v7833_v37 = vadd.f32 1.0, %v1505_v1  ;;  %v2544_v19 = vadd.f32 0.001143296, %v2543_v52  ;;  %v2139_v11 = vmul.f32 %v2138_v40, %v7759_v20  ;;  %v2130_v22 = vmul.f32 %v2129_v7, %v7759_v20  ;;  %v7845_v52 = vpop.xlane.xlu0 %3659 }
 0x23b   : > { %v2225_v45 = vmul.f32 %v2193_v46, %v7771_v26  ;;  %v1475_v42 = vsel %vm1474_vm3, %v5729_v49, %v1471_v21  ;;  %v2108_v43 = vmul.f32 %v5731_v63, %v7804_v47  ;;  %v2570_v12 = vmul.f32 %v7825_v36, %v7825_v36 }
 0x23c   : > { %v1480_v17 = vsel %vm1477_vm4, %v1479_v31, %v1475_v42  ;;  %5732 = vrcp.f32 %v7833_v37  ;;  %v2095_v27 = vadd.f32 1.1283791, %v2094_v23  ;;  %v2534_v38 = vmul.f32 %v2533_v50, %v7800_v29 }
 0x23d   : > { %v7843_v13 = vmul.f32 %v2225_v45, %v7668_v62  ;;  %v1481_v26 = vmul.f32 %v1480_v17, %v7782_v24  ;;  %v2109_v49 = vsub.f32 1.0, %v2108_v43  ;;  %v2116_v40 = vand.u32 2147483647, %v7804_v47 }
 0x23e   : > { %v2118_v7 = vand.u32 2147483648, %v7804_v47  ;;  %v2545_v1 = vmul.f32 %v2544_v19, %v7800_v29  ;;  %vm2113_vm6 = vweird.f32 %v5731_v63  ;;  %v2140_v23 = vadd.f32 0.014752088, %v2139_v11 }
 0x23f   : > { %10047 = vst [vmem:[#allocation31_spill] sm:$0xff] %v7843_v13  ;;  %v5427_v61 = vclamps-f32 %v1481_v26, 1.0  ;;  %v2110_v46 = vmul.f32 %v5731_v63, %v2109_v49  ;;  %v850_v62 = vmul.f32 0.5, %v7235_v39  ;;  %v1495_v21 = vadd.f32 1.1283791, %v1494_v4  ;;  %v647_v26 = vpop.f32.mrf.mxu0 }
 0x240   : > { %v7853_v31 = vadd.f32 0.05243302, %v2130_v22  ;;  %v7855_v45 = vmin.f32 %v2570_v12, 16.0  ;;  %vm2112_vm7 = vweird.f32 %v7804_v47  ;;  %v2141_v50 = vmul.f32 %v2140_v23, %v7759_v20 }
 0x241   : > { %v2178_v24 = vadd.f32 1.0, %v5427_v61  ;;  %v2111_v42 = vadd.f32 %v5731_v63, %v2110_v46  ;;  %v2096_v19 = vmul.f32 %v2095_v27, %v7535_v54  ;;  %v2535_v17 = vadd.f32 0.0036580483, %v2534_v38  ;;  %vm2114_vm8 = vmor %vm2112_vm7, %vm2113_vm6 }
 0x242   : > { %v5733_v43 = vpop.eup %5732  ;;  %v2119_v11 = vor.u32 1.1754944e-38, %v2118_v7  ;;  %v2546_v49 = vadd.f32 0.014752088, %v2545_v1  ;;  %vm2117_vm9 = vcmp.eq.f32.partialorder %v2116_v40, 8.507059e+37  ;;  %v2572_v12 = vmul.f32 2.1237322e-06, %v7855_v45 }
 0x243   : > { %v2210_v39 = vmul.f32 %v2178_v24, %v7778_v44  ;;  %v2115_v4 = vsel %vm2114_vm8, %v5731_v63, %v2111_v42  ;;  %v1508_v22 = vmul.f32 %v5733_v43, %v7833_v37  ;;  %v7864_v47 = vmul.f32 0.70710677, %v7591_v18  ;;  %v3565_v42 = vpop.xlane.xlu0 %3564 }
 0x244   : > { %v2120_v61 = vsel %vm2117_vm9, %v2119_v11, %v2115_v4  ;;  %v2142_v46 = vadd.f32 0.112945676, %v2141_v50  ;;  %v2547_v38 = vmul.f32 %v2546_v49, %v7800_v29  ;;  %vm1513_vm10 = vweird.f32 %v5733_v43  ;;  %v7884_v4 = vpop.f32.mrf.mxu3 }
 0x245   : > { %v7866_v23 = vmul.f32 %v2210_v39, %v647_v26  ;;  %v2121_v54 = vmul.f32 %v2120_v61, %v2096_v19  ;;  %v1509_v27 = vsub.f32 1.0, %v1508_v22  ;;  %v1516_v44 = vand.u32 2147483647, %v7833_v37  ;;  %v4642_v19 = vld [vmem:[%s9920_s6 + $0x28] sm:$0xff] }
 0x246   : > { %v1518_v63 = vand.u32 2147483648, %v7833_v37  ;;  %v2143_v40 = vmul.f32 %v2142_v46, %v7759_v20  ;;  %v4634_v26 = vld [vmem:[%s9919_s5 + $0x28] sm:$0xff]  ;;  %v2536_v11 = vmul.f32 %v2535_v17, %v7800_v29  ;;  %v2573_v49 = vadd.f32 0.00028619796, %v2572_v12  ;;  %4751 = vmatpush.msrb.mxu0 %v4642_v19 }
 0x247   : > { %10048 = vst [vmem:[#allocation32_spill] sm:$0xff] %v7866_v23  ;;  %v3605_v7 = vsel %vm3562_vm5, %v7866_v23, 0.0  ;;  %v5443_v1 = vclamps-f32 %v2121_v54, 1.0  ;;  %v3811_v24 = vmul.f32 %v7866_v23, %v7866_v23  ;;  %v1510_v50 = vmul.f32 %v5733_v43, %v1509_v27  ;;  %4960 = vmatpush.msrb.mxu1 %v4634_v26  ;;  %v7887_v54 = vpop.f32.mrf.mxu2  ;;  %v5873_v23 = vld [vmem:[%s6131_s15 + $0xc0] sm:$0xff] }
 0x248   : > { %3606 = vadd.xlane.f32.xlu2 %v3605_v7  ;;  %vm1512_vm11 = vweird.f32 %v7833_v37  ;;  %v2144_v39 = vadd.f32 0.4994258, %v2143_v40  ;;  %v2548_v27 = vadd.f32 0.112945676, %v2547_v38  ;;  %5469 = vmatmul.msk.f32.gmra.mxu2 %vm491_vm0, %v5873_v23  ;;  %v1496_v17 = vmul.f32 %v1495_v21, %v7577_v10  ;;  %v3831_v21 = vpop.xlane.xlu1 %3830 }
 0x249   : > { %v2194_v22 = vadd.f32 1.0, %v5443_v1  ;;  %v3871_v61 = vsel %vm3562_vm5, %v3811_v24, 0.0  ;;  %v1511_v46 = vadd.f32 %v5733_v43, %v1510_v50  ;;  %v3733_v12 = vadd.f32 %v7845_v52, %v3565_v42  ;;  %vm1514_vm12 = vmor %vm1512_vm11, %vm1513_vm10  ;;  %v7898_v1 = vld [vmem:[%s6131_s15 + $0xf0] sm:$0xff] }
 0x24a   : > { %3872 = vadd.xlane.f32.xlu1 %v3871_v61  ;;  %v1519_v40 = vor.u32 1.1754944e-38, %v1518_v63  ;;  %v2145_v7 = vmul.f32 %v2144_v39, %v7759_v20  ;;  %5507 = vmatmul.msk.f32.gmra.mxu3 %vm491_vm0, %v7898_v1  ;;  %v2610_v23 = vmul.f32 %v7864_v47, %v7864_v47  ;;  %vm1517_vm13 = vcmp.eq.f32.partialorder %v1516_v44, 8.507059e+37 }
 0x24b   : > { %v2226_v38 = vmul.f32 %v2194_v22, %v850_v62  ;;  %v1515_v10 = vsel %vm1514_vm12, %v5733_v43, %v1511_v46  ;;  %v2132_v24 = vmul.f32 %v7853_v31, %v7759_v20  ;;  %v2537_v37 = vadd.f32 0.05243302, %v2536_v11 }
 0x24c   : > { %v1520_v42 = vsel %vm1517_vm13, %v1519_v40, %v1515_v10  ;;  %v7906_v63 = vadd.f32 1.0, %v2145_v7  ;;  %v2574_v50 = vmul.f32 %v2573_v49, %v7855_v45  ;;  %v2549_v39 = vmul.f32 %v2548_v27, %v7800_v29  ;;  %v5875_v10 = vld [vmem:[%s6131_s15 + $0xf8] sm:$0xff] }
 0x24d   : > { %v7910_v19 = vmul.f32 %v2226_v38, %v7762_v30  ;;  %v1521_v26 = vmul.f32 %v1520_v42, %v1496_v17  ;;  %v7913_v61 = vmul.f32 0.0078125, %v3733_v12  ;;  %v4021_v62 = vadd.f32 %v3831_v21, %v7845_v52  ;;  %v650_v17 = vpop.f32.mrf.mxu0 }
 0x24e   : > { %5734 = vrcp.f32 %v7906_v63  ;;  %v7917_v31 = vmin.f32 %v2610_v23, 16.0  ;;  %v2133_v44 = vadd.f32 0.18741608, %v2132_v24  ;;  %v7920_v11 = vmul.f32 0.70710677, %v7645_v6  ;;  %v7927_v23 = vpop.f32.mrf.mxu3 }
 0x24f   : > { %10049 = vst [vmem:[#allocation33_spill] sm:$0xff] %v7910_v19  ;;  %v5428_v43 = vclamps-f32 %v1521_v26, 1.0  ;;  %v2550_v49 = vadd.f32 0.4994258, %v2549_v39  ;;  %v835_v30 = vmul.f32 0.5, %v7569_v2  ;;  %v2538_v22 = vmul.f32 %v2537_v37, %v7800_v29  ;;  %v4641_v26 = vld [vmem:[%s9920_s6 + $0x20] sm:$0xff] }
 0x250   : > { %v2575_v46 = vadd.f32 0.0036580483, %v2574_v50  ;;  %v4053_v12 = vmul.f32 0.0078125, %v4021_v62  ;;  %v4085_v40 = vmul.f32 %v7913_v61, %v7913_v61  ;;  %v2583_v38 = vmul.f32 3.8918573e-05, %v7855_v45  ;;  %v4633_v39 = vld [vmem:[%s9919_s5 + $0x20] sm:$0xff]  ;;  %v7944_v62 = vpop.f32.mrf.mxu2  ;;  %5470 = vmatmul.msk.f32.gmra.mxu2 %vm491_vm0, %v7479_v9  ;;  %4752 = vmatpush.msrb.mxu0 %v4641_v26 }
 0x251   : > { %v2179_v27 = vadd.f32 1.0, %v5428_v43  ;;  %v2551_v7 = vmul.f32 %v2550_v49, %v7800_v29  ;;  %v2612_v2 = vmul.f32 2.1237322e-06, %v7917_v31  ;;  %v2134_v37 = vmul.f32 %v2133_v44, %v7759_v20  ;;  %4961 = vmatpush.msrb.mxu1 %v4633_v39 }
 0x252   : > { %5508 = vmatmul.msk.f32.gmra.mxu3 %vm491_vm0, %v5875_v10  ;;  %v2650_v42 = vmul.f32 %v7920_v11, %v7920_v11  ;;  %v2539_v43 = vadd.f32 0.18741608, %v2538_v22  ;;  %v2576_v49 = vmul.f32 %v2575_v46, %v7855_v45  ;;  %v2156_v46 = vand.u32 2147483647, %v7906_v63 }
 0x253   : > { %v2211_v21 = vmul.f32 %v2179_v27, %v835_v30  ;;  %v7936_v50 = vadd.f32 1.0, %v2551_v7  ;;  %v4117_v30 = vsub.f32 %v4053_v12, %v4085_v40  ;;  %v2584_v27 = vadd.f32 0.001143296, %v2583_v38 }
 0x254   : > { %v5735_v24 = vpop.eup %5734  ;;  %v2613_v7 = vadd.f32 0.00028619796, %v2612_v2  ;;  %v2135_v22 = vadd.f32 1.1283791, %v2134_v37  ;;  %v2540_v40 = vmul.f32 %v2539_v43, %v7800_v29  ;;  %v2577_v38 = vadd.f32 0.05243302, %v2576_v49 }
 0x255   : > { %v7948_v20 = vmul.f32 %v2211_v21, %v650_v17  ;;  %v2148_v44 = vmul.f32 %v5735_v24, %v7906_v63  ;;  %5736 = vrcp.f32 %v7936_v50  ;;  %v7957_v17 = vmin.f32 %v2650_v42, 16.0 }
 0x256   : > { %v2158_v21 = vand.u32 2147483648, %v7906_v63  ;;  %vm2153_vm14 = vweird.f32 %v5735_v24  ;;  %v7963_v2 = vmax.f32 %v4117_v30, 1e-05  ;;  %v2585_v39 = vmul.f32 %v2584_v27, %v7855_v45 }
 0x257   : > { %10050 = vst [vmem:[#allocation34_spill] sm:$0xff] %v7948_v20  ;;  %v3608_v10 = vsel %vm3562_vm5, %v7948_v20, 0.0  ;;  %v2149_v15 = vsub.f32 1.0, %v2148_v44  ;;  %v3812_v9 = vmul.f32 %v7948_v20, %v7948_v20  ;;  %v2614_v37 = vmul.f32 %v2613_v7, %v7917_v31 }
 0x258   : > { %3609 = vadd.xlane.f32.xlu0 %v3608_v10  ;;  %v7968_v42 = vmul.f32 0.70710677, %v7744_v59  ;;  %vm2152_vm15 = vweird.f32 %v7906_v63  ;;  %v2652_v10 = vmul.f32 2.1237322e-06, %v7957_v17  ;;  %v2586_v29 = vadd.f32 0.014752088, %v2585_v39 }
 0x259   : > { %v2150_v26 = vmul.f32 %v5735_v24, %v2149_v15  ;;  %v3874_v12 = vsel %vm3562_vm5, %v3812_v9, 0.0  ;;  %vm2154_vm1 = vmor %vm2152_vm15, %vm2153_vm14  ;;  %v2159_v9 = vor.u32 1.1754944e-38, %v2158_v21  ;;  %v2136_v43 = vmul.f32 %v2135_v22, %v7716_v35 }
 0x25a   : > { %3875 = vadd.xlane.f32.xlu2 %v3874_v12  ;;  %vm2157_vm2 = vcmp.eq.f32.partialorder %v2156_v46, 8.507059e+37  ;;  %v2541_v27 = vadd.f32 1.1283791, %v2540_v40  ;;  %5738 = vrsqrt.f32 %v7963_v2  ;;  %v2615_v12 = vadd.f32 0.0036580483, %v2614_v37 }
 0x25b   : > { %v2151_v44 = vadd.f32 %v5735_v24, %v2150_v26  ;;  %v5737_v15 = vpop.eup %5736  ;;  %v2587_v26 = vmul.f32 %v2586_v29, %v7855_v45  ;;  %v2690_v63 = vmul.f32 %v7968_v42, %v7968_v42  ;;  %v2578_v21 = vmul.f32 %v2577_v38, %v7855_v45 }
 0x25c   : > { %v2554_v30 = vmul.f32 %v5737_v15, %v7936_v50  ;;  %v2653_v39 = vadd.f32 0.00028619796, %v2652_v10  ;;  %v2564_v35 = vand.u32 2147483648, %v7936_v50  ;;  %vm2559_vm3 = vweird.f32 %v5737_v15 }
 0x25d   : > { %v2155_v49 = vsel %vm2154_vm1, %v5735_v24, %v2151_v44  ;;  %v2588_v24 = vadd.f32 0.112945676, %v2587_v26  ;;  %v2562_v40 = vand.u32 2147483647, %v7936_v50  ;;  %v851_v44 = vmul.f32 0.5, %v7343_v53  ;;  %v4632_v53 = vld [vmem:[%s9919_s5 + $0x18] sm:$0xff] }
 0x25e   : > { %v2160_v7 = vsel %vm2157_vm2, %v2159_v9, %v2155_v49  ;;  %v2555_v60 = vsub.f32 1.0, %v2554_v30  ;;  %v2542_v37 = vmul.f32 %v2541_v27, %v7768_v51  ;;  %v7984_v9 = vmul.f32 0.70710677, %v7812_v57  ;;  %v4639_v51 = vld [vmem:[%s9920_s6 + $0x10] sm:$0xff]  ;;  %4962 = vmatpush.msrb.mxu1 %v4632_v53 }
 0x25f   : > { %v2161_v20 = vmul.f32 %v2160_v7, %v2136_v43  ;;  %v2589_v29 = vmul.f32 %v2588_v24, %v7855_v45  ;;  %v7987_v43 = vmin.f32 %v2690_v63, 16.0  ;;  %vm2558_vm4 = vweird.f32 %v7936_v50  ;;  %v4631_v7 = vld [vmem:[%s9919_s5 + $0x10] sm:$0xff] }
 0x260   : > { %v2556_v46 = vmul.f32 %v5737_v15, %v2555_v60  ;;  %v4640_v60 = vld [vmem:[%s9920_s6 + $0x18] sm:$0xff]  ;;  %v2579_v49 = vadd.f32 0.18741608, %v2578_v21  ;;  %v2616_v30 = vmul.f32 %v2615_v12, %v7917_v31  ;;  %vm2560_vm6 = vmor %vm2558_vm4, %vm2559_vm3  ;;  %v2565_v50 = vor.u32 1.1754944e-38, %v2564_v35  ;;  %4963 = vmatpush.msrb.mxu1 %v4631_v7  ;;  %v4638_v35 = vld [vmem:[%s9920_s6 + $0x8] sm:$0xff] }
 0x261   : > { %v5444_v22 = vclamps-f32 %v2161_v20, 1.0  ;;  %v7999_v20 = vpop.eup %5738  ;;  %v2590_v27 = vadd.f32 0.4994258, %v2589_v29  ;;  %4753 = vmatpush.msrb.mxu0 %v4640_v60  ;;  %v2654_v26 = vmul.f32 %v2653_v39, %v7957_v17  ;;  %vm2563_vm7 = vcmp.eq.f32.partialorder %v2562_v40, 8.507059e+37  ;;  %v4637_v29 = vld [vmem:[%s9920_s6] sm:$0xff] }
 0x262   : > { %v2557_v10 = vadd.f32 %v5737_v15, %v2556_v46  ;;  %v2730_v21 = vmul.f32 %v7984_v9, %v7984_v9  ;;  %v4630_v46 = vld [vmem:[%s9919_s5 + $0x8] sm:$0xff]  ;;  %v2692_v39 = vmul.f32 2.1237322e-06, %v7987_v43  ;;  %v2482_v7 = vmul.f32 0.5, %v7410_v14 }
 0x263   : > { %v2195_v38 = vadd.f32 1.0, %v5444_v22  ;;  %v2591_v12 = vmul.f32 %v2590_v27, %v7855_v45  ;;  %4754 = vmatpush.msrb.mxu0 %v4639_v51  ;;  %4964 = vmatpush.msrb.mxu1 %v4630_v46  ;;  %v2617_v51 = vadd.f32 0.05243302, %v2616_v30  ;;  %vm4188_vm8 = vweird.f32 %v7999_v20 }
 0x264   : > { %v2561_v24 = vsel %vm2560_vm6, %v5737_v15, %v2557_v10  ;;  %v4182_v15 = vmul.f32 %v7999_v20, %v7963_v2  ;;  %v8028_v10 = vpop.f32.mrf.mxu2  ;;  %5471 = vmatmul.msk.f32.gmra.mxu2 %vm491_vm0, %v7594_v32  ;;  %v8036_v27 = vmin.f32 %v2730_v21, 16.0  ;;  %v2693_v32 = vadd.f32 0.00028619796, %v2692_v39 }
 0x265   : > { %v2227_v63 = vmul.f32 %v2195_v38, %v851_v44  ;;  %v2566_v22 = vsel %vm2563_vm7, %v2565_v50, %v2561_v24  ;;  %v4629_v38 = vld [vmem:[%s9919_s5] sm:$0xff]  ;;  %v8032_v60 = vadd.f32 1.0, %v2591_v12  ;;  %4755 = vmatpush.msrb.mxu0 %v4638_v35  ;;  %v2655_v50 = vadd.f32 0.0036580483, %v2654_v26 }
 0x266   : > { %v2567_v44 = vmul.f32 %v2566_v22, %v2542_v37  ;;  %v2580_v37 = vmul.f32 %v2579_v49, %v7855_v45  ;;  %4965 = vmatpush.msrb.mxu1 %v4629_v38  ;;  %v2618_v45 = vmul.f32 %v2617_v51, %v7917_v31  ;;  %v2732_v30 = vmul.f32 2.1237322e-06, %v8036_v27 }
 0x267   : > { %v8020_v40 = vmul.f32 %v2227_v63, %v7828_v16  ;;  %v2623_v16 = vmul.f32 3.8918573e-05, %v7917_v31  ;;  %5740 = vrcp.f32 %v8032_v60  ;;  %4756 = vmatpush.msrb.mxu0 %v4637_v29  ;;  %v4183_v63 = vmul.f32 %v7999_v20, %v4182_v15  ;;  %v10054_v29 = vld [vmem:[#allocation5_spill] sm:$0xff] }
 0x268   : > { %v5509_v53 = vclamps-f32 %v2567_v44, 1.0  ;;  %v2581_v12 = vadd.f32 1.1283791, %v2580_v37  ;;  %v2656_v49 = vmul.f32 %v2655_v50, %v7957_v17  ;;  %v2694_v21 = vmul.f32 %v2693_v32, %v7987_v43  ;;  %v8046_v44 = vpop.xlane.xlu1 %3612 }
 0x269   : > { %10051 = vst [vmem:[#allocation35_spill] sm:$0xff] %v8020_v40  ;;  %v2624_v22 = vadd.f32 0.001143296, %v2623_v16  ;;  %v4184_v46 = vmul.f32 0.5, %v4183_v63  ;;  %v8052_v15 = vmul.f32 0.70710677, %v7884_v4  ;;  %v3816_v38 = vmul.f32 %v10054_v29, %v10054_v29 }
 0x26a   : > { %v3490_v24 = vadd.f32 1.0, %v5509_v53  ;;  %10052 = vst [vmem:[#allocation36_spill] sm:$0xff] %v8046_v44  ;;  %v2582_v37 = vmul.f32 %v2581_v12, %v7825_v36  ;;  %v8057_v53 = vpop.xlane.xlu2 %3833  ;;  %v2657_v32 = vadd.f32 0.05243302, %v2656_v49  ;;  %v2733_v63 = vadd.f32 0.00028619796, %v2732_v30 }
 0x26b   : > { %v2625_v26 = vmul.f32 %v2624_v22, %v7917_v31  ;;  %v2695_v22 = vadd.f32 0.0036580483, %v2694_v21  ;;  %v2604_v29 = vand.u32 2147483648, %v8032_v60  ;;  %v2602_v21 = vand.u32 2147483647, %v8032_v60 }
 0x26c   : > { %v3514_v35 = vmul.f32 %v3490_v24, %v2482_v7  ;;  %v2619_v7 = vadd.f32 0.18741608, %v2618_v45  ;;  %v10055_v45 = vld [vmem:[#allocation4_spill] sm:$0xff]  ;;  %vm4187_vm10 = vweird.f32 %v7963_v2  ;;  %vm2598_vm12 = vweird.f32 %v8032_v60 }
 0x26d   : > { %v5741_v39 = vpop.eup %5740  ;;  %v2626_v16 = vadd.f32 0.014752088, %v2625_v26  ;;  %v2770_v26 = vmul.f32 %v8052_v15, %v8052_v15  ;;  %v4501_v49 = vsub.f32 %v10055_v45, %v7913_v61  ;;  %vm4189_vm11 = vmor %vm4187_vm10, %vm4188_vm8  ;;  %vm2603_vm14 = vcmp.eq.f32.partialorder %v2602_v21, 8.507059e+37 }
 0x26e   : > { %v8049_v14 = vmul.f32 %v3514_v35, %v7887_v54  ;;  %v2594_v54 = vmul.f32 %v5741_v39, %v8032_v60  ;;  %v4185_v35 = vsub.f32 1.5, %v4184_v46  ;;  %vm2599_vm9 = vweird.f32 %v5741_v39 }
 0x26f   : > { %v2627_v24 = vmul.f32 %v2626_v16, %v7917_v31  ;;  %v4565_v46 = vsub.f32 0.0, %v7913_v61  ;;  %v2734_v16 = vmul.f32 %v2733_v63, %v8036_v27  ;;  %vm2600_vm13 = vmor %vm2598_vm12, %vm2599_vm9  ;;  %v2605_v61 = vor.u32 1.1754944e-38, %v2604_v29 }
 0x270   : > { %10053 = vst [vmem:[#allocation37_spill] sm:$0xff] %v8049_v14  ;;  %v3661_v51 = vsel %vm3562_vm5, %v8049_v14, 0.0  ;;  %v3925_v50 = vmul.f32 %v8049_v14, %v8049_v14  ;;  %v2595_v12 = vsub.f32 1.0, %v2594_v54  ;;  %v3568_v45 = vpop.xlane.xlu1 %3567 }
 0x271   : > { %3662 = vadd.xlane.f32.xlu0 %v3661_v51  ;;  %v2628_v40 = vadd.f32 0.112945676, %v2627_v24  ;;  %v4186_v24 = vmul.f32 %v7999_v20, %v4185_v35  ;;  %v2735_v29 = vadd.f32 0.0036580483, %v2734_v16 }
 0x272   : > { %v3949_v36 = vsel %vm3562_vm5, %v3925_v50, 0.0  ;;  %v2596_v30 = vmul.f32 %v5741_v39, %v2595_v12  ;;  %v8078_v50 = vmul.f32 0.70710677, %v7927_v23  ;;  %v8083_v12 = vmin.f32 %v2770_v26, 16.0  ;;  %v8090_v26 = vpop.f32.mrf.mxu2  ;;  %5472 = vmatmul.msk.f32.gmra.mxu2 %vm491_vm0, %v7648_v56 }
 0x273   : > { %3950 = vadd.xlane.f32.xlu2 %v3949_v36  ;;  %v2629_v51 = vmul.f32 %v2628_v40, %v7917_v31  ;;  %v2696_v36 = vmul.f32 %v2695_v22, %v7987_v43  ;;  %v3886_v40 = vsel %vm3562_vm5, %v3816_v38, 0.0  ;;  %v4190_v44 = vsel %vm4189_vm11, %v7999_v20, %v4186_v24 }
 0x274   : > { %v2597_v54 = vadd.f32 %v5741_v39, %v2596_v30  ;;  %v10056_v30 = vld [vmem:[#allocation7_spill] sm:$0xff]  ;;  %v4597_v22 = vmul.f32 %v4565_v46, %v4190_v44  ;;  %v2810_v38 = vmul.f32 %v8078_v50, %v8078_v50  ;;  %v4533_v21 = vmul.f32 %v4501_v49, %v4190_v44 }
 0x275   : > { %v2630_v2 = vadd.f32 0.4994258, %v2629_v51  ;;  %v3623_v60 = vsel %vm3562_vm5, %v10056_v30, 0.0  ;;  %v2772_v51 = vmul.f32 2.1237322e-06, %v8083_v12  ;;  %v2620_v56 = vmul.f32 %v2619_v7, %v7917_v31 }
 0x276   : > { %v2601_v63 = vsel %vm2600_vm13, %v5741_v39, %v2597_v54  ;;  %v8094_v39 = vpop.xlane.xlu2 %3615  ;;  %v3734_v54 = vadd.f32 %v7845_v52, %v3568_v45  ;;  %5533 = vmatmul.msk.f32.vlgmr.msrb.gmra.mxu0 %vm3562_vm5, %v4597_v22  ;;  %v2663_v46 = vmul.f32 3.8918573e-05, %v7957_v17  ;;  %5565 = vmatmul.msk.f32.vlgmr.msrb.gmra.mxu1 %vm3562_vm5, %v4533_v21  ;;  %v2483_v44 = vmul.f32 0.5, %v7476_v3 }
 0x277   : > { %v2606_v19 = vsel %vm2603_vm14, %v2605_v61, %v2601_v63  ;;  %v2631_v35 = vmul.f32 %v2630_v2, %v7917_v31  ;;  %10057 = vst [vmem:[#allocation4_spill] sm:$0xff] %v8094_v39  ;;  %v2658_v61 = vmul.f32 %v2657_v32, %v7957_v17  ;;  %v8110_v49 = vmin.f32 %v2810_v38, 16.0 }
 0x278   : > { %v2607_v20 = vmul.f32 %v2606_v19, %v2582_v37  ;;  %v2697_v19 = vadd.f32 0.05243302, %v2696_v36  ;;  %v2736_v37 = vmul.f32 %v2735_v29, %v8036_v27  ;;  %v2773_v45 = vadd.f32 0.00028619796, %v2772_v51 }
 0x279   : > { %3887 = vadd.xlane.f32.xlu0 %v3886_v40  ;;  %v8100_v24 = vadd.f32 1.0, %v2631_v35  ;;  %v8112_v63 = vmul.f32 0.0078125, %v3734_v54  ;;  %v2664_v40 = vadd.f32 0.001143296, %v2663_v46  ;;  %v2621_v31 = vadd.f32 1.1283791, %v2620_v56 }
 0x27a   : > { %v5510_v16 = vclamps-f32 %v2607_v20, 1.0  ;;  %v2698_v35 = vmul.f32 %v2697_v19, %v7987_v43  ;;  %v4022_v32 = vadd.f32 %v8057_v53, %v7845_v52  ;;  %v2737_v3 = vadd.f32 0.05243302, %v2736_v37  ;;  %v8122_v20 = vpop.xlane.xlu0 %3878 }
 0x27b   : > { %3624 = vadd.xlane.f32.xlu2 %v3623_v60  ;;  %5742 = vrcp.f32 %v8100_v24  ;;  %v2659_v60 = vadd.f32 0.18741608, %v2658_v61  ;;  %v2665_v36 = vmul.f32 %v2664_v40, %v7957_v17  ;;  %v2812_v22 = vmul.f32 2.1237322e-06, %v8110_v49  ;;  %10059 = vst [vmem:[#allocation39_spill] sm:$0xff] %v8122_v20  ;;  %v8138_v20 = vpop.xlane.xlu1 %3881 }
 0x27c   : > { %v3491_v2 = vadd.f32 1.0, %v5510_v16  ;;  %v2774_v21 = vmul.f32 %v2773_v45, %v8083_v12  ;;  %v4086_v51 = vmul.f32 %v8112_v63, %v8112_v63  ;;  %v2622_v46 = vmul.f32 %v2621_v31, %v7864_v47  ;;  %10060 = vst [vmem:[#allocation40_spill] sm:$0xff] %v8138_v20 }
 0x27d   : > { %v2666_v54 = vadd.f32 0.014752088, %v2665_v36  ;;  %v2660_v61 = vmul.f32 %v2659_v60, %v7957_v17  ;;  %v2699_v19 = vadd.f32 0.18741608, %v2698_v35  ;;  %v2813_v45 = vadd.f32 0.00028619796, %v2812_v22 }
 0x27e   : > { %v3515_v7 = vmul.f32 %v3491_v2, %v2483_v44  ;;  %v3571_v53 = vpop.xlane.xlu2 %3570  ;;  %v4054_v44 = vmul.f32 0.0078125, %v4022_v32  ;;  %v2738_v2 = vmul.f32 %v2737_v3, %v8036_v27  ;;  %v2775_v31 = vadd.f32 0.0036580483, %v2774_v21 }
 0x27f   : > { %v2667_v37 = vmul.f32 %v2666_v54, %v7957_v17  ;;  %v2644_v36 = vand.u32 2147483648, %v8100_v24  ;;  %v2642_v35 = vand.u32 2147483647, %v8100_v24  ;;  %v3817_v32 = vmul.f32 %v10056_v30, %v10056_v30 }
 0x280   : > { %v8120_v29 = vmul.f32 %v3515_v7, %v7944_v62  ;;  %v4118_v7 = vsub.f32 %v4054_v44, %v4086_v51  ;;  %v2661_v3 = vadd.f32 1.1283791, %v2660_v61  ;;  %v2700_v22 = vmul.f32 %v2699_v19, %v7987_v43 }
 0x281   : > { %v5743_v38 = vpop.eup %5742  ;;  %v2668_v39 = vadd.f32 0.112945676, %v2667_v37  ;;  %v3735_v54 = vadd.f32 %v7845_v52, %v3571_v53  ;;  %v2739_v51 = vadd.f32 0.18741608, %v2738_v2  ;;  %vm2638_vm1 = vweird.f32 %v8100_v24 }
 0x282   : > { %10058 = vst [vmem:[#allocation38_spill] sm:$0xff] %v8120_v29  ;;  %v3664_v56 = vsel %vm3562_vm5, %v8120_v29, 0.0  ;;  %v2634_v16 = vmul.f32 %v5743_v38, %v8100_v24  ;;  %v3926_v62 = vmul.f32 %v8120_v29, %v8120_v29  ;;  %vm2639_vm15 = vweird.f32 %v5743_v38 }
 0x283   : > { %3665 = vadd.xlane.f32.xlu1 %v3664_v56  ;;  %v2669_v21 = vmul.f32 %v2668_v39, %v7957_v17  ;;  %v2814_v56 = vmul.f32 %v2813_v45, %v8110_v49  ;;  %v2776_v44 = vmul.f32 %v2775_v31, %v8083_v12  ;;  %v8151_v37 = vmax.f32 %v4118_v7, 1e-05  ;;  %vm2640_vm2 = vmor %vm2638_vm1, %vm2639_vm15 }
 0x284   : > { %v2635_v47 = vsub.f32 1.0, %v2634_v16  ;;  %v3952_v40 = vsel %vm3562_vm5, %v3926_v62, 0.0  ;;  %v8147_v16 = vpop.f32.mrf.mxu3  ;;  %v2645_v61 = vor.u32 1.1754944e-38, %v2644_v36  ;;  %vm2643_vm3 = vcmp.eq.f32.partialorder %v2642_v35, 8.507059e+37 }
 0x285   : > { %3953 = vadd.xlane.f32.xlu0 %v3952_v40  ;;  %v2670_v19 = vadd.f32 0.4994258, %v2669_v21  ;;  %v3889_v39 = vsel %vm3562_vm5, %v3817_v32, 0.0  ;;  %v2703_v2 = vmul.f32 3.8918573e-05, %v7987_v43  ;;  %v8156_v45 = vmul.f32 0.0078125, %v3735_v54  ;;  %v8169_v21 = vpop.f32.mrf.mxu2  ;;  %5473 = vmatmul.msk.f32.gmra.mxu2 %vm491_vm0, %v7747_v33 }
 0x286   : > { %v2636_v60 = vmul.f32 %v5743_v38, %v2635_v47  ;;  %v3837_v47 = vpop.xlane.xlu0 %3836  ;;  %v8159_v40 = vmul.f32 0.70710677, %v8147_v16  ;;  %v2740_v7 = vmul.f32 %v2739_v51, %v8036_v27  ;;  %v8164_v35 = vpop.xlane.xlu2 %3884  ;;  %v2777_v32 = vadd.f32 0.05243302, %v2776_v44 }
 0x287   : > { %v2671_v31 = vmul.f32 %v2670_v19, %v7957_v17  ;;  %v4023_v36 = vadd.f32 %v3837_v47, %v7845_v52  ;;  %10061 = vst [vmem:[#allocation41_spill] sm:$0xff] %v8164_v35  ;;  %5744 = vrsqrt.f32 %v8151_v37  ;;  %v2484_v17 = vmul.f32 0.5, %v7591_v18 }
 0x288   : > { %v2637_v62 = vadd.f32 %v5743_v38, %v2636_v60  ;;  %v2815_v60 = vadd.f32 0.0036580483, %v2814_v56  ;;  %v2701_v51 = vadd.f32 1.1283791, %v2700_v22  ;;  %v8175_v56 = vmul.f32 0.5, %v7645_v6  ;;  %v3574_v22 = vpop.xlane.xlu1 %3573 }
 0x289   : > { %v8167_v54 = vadd.f32 1.0, %v2671_v31  ;;  %v2850_v44 = vmul.f32 %v8159_v40, %v8159_v40  ;;  %v8183_v47 = vmul.f32 0.5, %v7744_v59  ;;  %v2741_v19 = vadd.f32 1.1283791, %v2740_v7 }
 0x28a   : > { %v2641_v53 = vsel %vm2640_vm2, %v5743_v38, %v2637_v62  ;;  %v2704_v62 = vadd.f32 0.001143296, %v2703_v2  ;;  %v2816_v33 = vmul.f32 %v2815_v60, %v8110_v49  ;;  %v2778_v6 = vmul.f32 %v2777_v32, %v8083_v12 }
 0x28b   : > { %v2646_v24 = vsel %vm2643_vm3, %v2645_v61, %v2641_v53  ;;  %3890 = vadd.xlane.f32.xlu1 %v3889_v39  ;;  %5746 = vrcp.f32 %v8167_v54  ;;  %v8187_v53 = vmul.f32 %v2661_v3, %v7920_v11  ;;  %v4055_v39 = vmul.f32 0.0078125, %v4023_v36 }
 0x28c   : > { %v2647_v38 = vmul.f32 %v2646_v24, %v2622_v46  ;;  %v4087_v46 = vmul.f32 %v8156_v45, %v8156_v45  ;;  %v2705_v2 = vmul.f32 %v2704_v62, %v7987_v43  ;;  %v8192_v24 = vmul.f32 %v2701_v51, %v7968_v42  ;;  %v10062_v42 = vld [vmem:[#allocation10_spill] sm:$0xff]  ;;  %v8237_v30 = vpop.f32.mrf.mxu3 }
 0x28d   : > { %v8195_v31 = vmul.f32 0.5, %v7812_v57  ;;  %v8198_v59 = vmul.f32 0.5, %v7884_v4  ;;  %v8200_v60 = vpop.eup %5744  ;;  %v8203_v11 = vmul.f32 0.5, %v7927_v23  ;;  %v8208_v32 = vmul.f32 %v2741_v19, %v7984_v9 }
 0x28e   : > { %v5511_v61 = vclamps-f32 %v2647_v38, 1.0  ;;  %v4119_v3 = vsub.f32 %v4055_v39, %v4087_v46  ;;  %v8205_v38 = vmin.f32 %v2850_v44, 16.0  ;;  %v2706_v36 = vadd.f32 0.014752088, %v2705_v2  ;;  %v10064_v46 = vld [vmem:[#allocation18_spill] sm:$0xff] }
 0x28f   : > { %v2817_v62 = vadd.f32 0.05243302, %v2816_v33  ;;  %v2779_v51 = vadd.f32 0.18741608, %v2778_v6  ;;  %v8219_v44 = vsel %vm3562_vm5, %v10064_v46, 0.0  ;;  %v4192_v9 = vmul.f32 %v8200_v60, %v8151_v37  ;;  %v8228_v6 = vpop.xlane.xlu0 %3618 }
 0x290   : > { %v3492_v18 = vadd.f32 1.0, %v5511_v61  ;;  %v2707_v23 = vmul.f32 %v2706_v36, %v7987_v43  ;;  %10065 = vst [vmem:[#allocation42_spill] sm:$0xff] %v8228_v6  ;;  %v8230_v39 = vmax.f32 %v4119_v3, 1e-05  ;;  %v2852_v2 = vmul.f32 2.1237322e-06, %v8205_v38 }
 0x291   : > { %v3818_v36 = vmul.f32 %v10064_v46, %v10064_v46  ;;  %v2818_v57 = vmul.f32 %v2817_v62, %v8110_v49  ;;  %v3736_v61 = vadd.f32 %v7845_v52, %v3574_v22  ;;  %v2682_v6 = vand.u32 2147483647, %v8167_v54  ;;  %v8244_v46 = vpop.xlane.xlu1 %3621 }
 0x292   : > { %v3516_v7 = vmul.f32 %v3492_v18, %v2484_v17  ;;  %v5747_v17 = vpop.eup %5746  ;;  %v2684_v3 = vand.u32 2147483648, %v8167_v54  ;;  %10066 = vst [vmem:[#allocation43_spill] sm:$0xff] %v8244_v46  ;;  %v4193_v22 = vmul.f32 %v8200_v60, %v4192_v9  ;;  %v2743_v62 = vmul.f32 3.8918573e-05, %v8036_v27 }
 0x293   : > { %v2674_v33 = vmul.f32 %v5747_v17, %v8167_v54  ;;  %vm2679_vm4 = vweird.f32 %v5747_v17  ;;  %5748 = vrsqrt.f32 %v8230_v39  ;;  %v8252_v13 = vmul.f32 0.0078125, %v3736_v61 }
 0x294   : > { %v8213_v4 = vmul.f32 %v3516_v7, %v8028_v10  ;;  %v3840_v10 = vpop.xlane.xlu2 %3839  ;;  %v2708_v7 = vadd.f32 0.112945676, %v2707_v23  ;;  %vm2678_vm6 = vweird.f32 %v8167_v54  ;;  %vm2683_vm8 = vcmp.eq.f32.partialorder %v2682_v6, 8.507059e+37 }
 0x295   : > { %v2675_v35 = vsub.f32 1.0, %v2674_v33  ;;  %v2853_v33 = vadd.f32 0.00028619796, %v2852_v2  ;;  %vm2680_vm7 = vmor %vm2678_vm6, %vm2679_vm4  ;;  %vm4198_vm9 = vweird.f32 %v8200_v60  ;;  %v2744_v2 = vadd.f32 0.001143296, %v2743_v62 }
 0x296   : > { %10063 = vst [vmem:[#allocation10_spill] sm:$0xff] %v8213_v4  ;;  %v3667_v19 = vsel %vm3562_vm5, %v8213_v4, 0.0  ;;  %v3927_v18 = vmul.f32 %v8213_v4, %v8213_v4  ;;  %v4024_v4 = vadd.f32 %v3840_v10, %v7845_v52  ;;  %v2709_v23 = vmul.f32 %v2708_v7, %v7987_v43 }
 0x297   : > { %3668 = vadd.xlane.f32.xlu2 %v3667_v19  ;;  %v2676_v19 = vmul.f32 %v5747_v17, %v2675_v35  ;;  %v4194_v35 = vmul.f32 0.5, %v4193_v22  ;;  %v2685_v10 = vor.u32 1.1754944e-38, %v2684_v3  ;;  %v2854_v41 = vmul.f32 %v2853_v33, %v8205_v38  ;;  %v3577_v6 = vpop.xlane.xlu0 %3576 }
 0x298   : > { %v3955_v20 = vsel %vm3562_vm5, %v3927_v18, 0.0  ;;  %v8250_v18 = vmul.f32 0.70710677, %v8237_v30  ;;  %v2710_v8 = vadd.f32 0.4994258, %v2709_v23  ;;  %v4056_v7 = vmul.f32 0.0078125, %v4024_v4 }
 0x299   : > { %3956 = vadd.xlane.f32.xlu1 %v3955_v20  ;;  %v2677_v20 = vadd.f32 %v5747_v17, %v2676_v19  ;;  %v4195_v29 = vsub.f32 1.5, %v4194_v35  ;;  %v4088_v4 = vmul.f32 %v8252_v13, %v8252_v13  ;;  %vm4197_vm10 = vweird.f32 %v8151_v37 }
 0x29a   : > { %v2711_v9 = vmul.f32 %v2710_v8, %v7987_v43  ;;  %v2890_v61 = vmul.f32 %v8250_v18, %v8250_v18  ;;  %v8267_v43 = vpop.f32.mrf.mxu2  ;;  %5474 = vmatmul.msk.f32.gmra.mxu2 %vm491_vm0, %v7816_v55  ;;  %vm4199_vm11 = vmor %vm4197_vm10, %vm4198_vm9  ;;  %v2745_v62 = vmul.f32 %v2744_v2, %v8036_v27  ;;  %v2855_v33 = vadd.f32 0.0036580483, %v2854_v41  ;;  %v10070_v41 = vld [vmem:[#allocation12_spill] sm:$0xff] }
 0x29b   : > { %v2681_v46 = vsel %vm2680_vm7, %v5747_v17, %v2677_v20  ;;  %v4196_v8 = vmul.f32 %v8200_v60, %v4195_v29  ;;  %v8271_v17 = vpop.eup %5748  ;;  %v10067_v29 = vld [vmem:[#allocation22_spill] sm:$0xff]  ;;  %v4120_v22 = vsub.f32 %v4056_v7, %v4088_v4  ;;  %v10068_v20 = vsub.f32 0.0, %v8112_v63 }
 0x29c   : > { %v2686_v23 = vsel %vm2683_vm8, %v2685_v10, %v2681_v46  ;;  %v8260_v19 = vadd.f32 1.0, %v2711_v9  ;;  %v2780_v46 = vmul.f32 %v2779_v51, %v8083_v12  ;;  %v8282_v37 = vsel %vm3562_vm5, %v10067_v29, 0.0 }
 0x29d   : > { %v2687_v54 = vmul.f32 %v2686_v23, %v8187_v53  ;;  %v8278_v53 = vsel %vm3562_vm5, %v3818_v36, 0.0  ;;  %v4200_v55 = vsel %vm4199_vm11, %v8200_v60, %v4196_v8  ;;  %v2819_v51 = vadd.f32 0.18741608, %v2818_v57  ;;  %v8316_v8 = vpop.f32.mrf.mxu3 }
 0x29e   : > { %5750 = vrcp.f32 %v8260_v19  ;;  %v4598_v35 = vmul.f32 %v10068_v20, %v4200_v55  ;;  %v10069_v10 = vsub.f32 %v10062_v42, %v8112_v63  ;;  %v3737_v9 = vadd.f32 %v7845_v52, %v3577_v6  ;;  %10071 = vst [vmem:[#allocation12_spill] sm:$0xff] %v8316_v8 }
 0x29f   : > { %v5512_v3 = vclamps-f32 %v2687_v54, 1.0  ;;  %v8292_v23 = vmin.f32 %v2890_v61, 16.0  ;;  %v3843_v54 = vpop.xlane.xlu1 %3842  ;;  %v8296_v60 = vmul.f32 %v10067_v29, %v10067_v29  ;;  %v8298_v7 = vadd.f32 1.1283791, %v2780_v46 }
 0x2a0   : > { %v4534_v36 = vmul.f32 %v10069_v10, %v4200_v55  ;;  %5534 = vmatmul.msk.f32.gmra.mxu0 %vm3562_vm5, %v4598_v35  ;;  %v8306_v63 = vsel %vm3562_vm5, %v7352_v28, 0.0  ;;  %v8310_v42 = vmul.f32 %v7352_v28, %v7352_v28  ;;  %v8314_v4 = vmax.f32 %v4120_v22, 1e-05 }
 0x2a1   : > { %v3493_v14 = vadd.f32 1.0, %v5512_v3  ;;  %v2746_v46 = vadd.f32 0.014752088, %v2745_v62  ;;  %v8319_v3 = vmul.f32 %v2819_v51, %v8110_v49  ;;  %v4202_v55 = vmul.f32 %v8271_v17, %v8230_v39  ;;  %v3580_v62 = vpop.xlane.xlu2 %3579 }
 0x2a2   : > { %5566 = vmatmul.msk.f32.gmra.mxu1 %vm3562_vm5, %v4534_v36  ;;  %v8324_v20 = vmul.f32 %v2855_v33, %v8205_v38  ;;  %v4025_v35 = vadd.f32 %v3843_v54, %v7845_v52  ;;  %v8327_v10 = vmul.f32 0.0078125, %v3737_v9  ;;  %v8335_v51 = vmul.f32 0.70710677, %v8316_v8 }
 0x2a3   : > { %v3517_v61 = vmul.f32 %v3493_v14, %v8175_v56  ;;  %v2892_v14 = vmul.f32 2.1237322e-06, %v8292_v23  ;;  %v2747_v36 = vmul.f32 %v2746_v46, %v8036_v27  ;;  %v2783_v33 = vmul.f32 3.8918573e-05, %v8083_v12 }
 0x2a4   : > { %v5751_v6 = vpop.eup %5750  ;;  %10073 = vst [vmem:[#allocation45_spill] sm:$0xff] %v8335_v51  ;;  %v2823_v57 = vmul.f32 3.8918573e-05, %v8110_v49  ;;  %5752 = vrsqrt.f32 %v8314_v4  ;;  %v4057_v2 = vmul.f32 0.0078125, %v4025_v35  ;;  %v3738_v28 = vadd.f32 %v7845_v52, %v3580_v62 }
 0x2a5   : > { %v8331_v56 = vmul.f32 %v3517_v61, %v8090_v26  ;;  %v2714_v22 = vmul.f32 %v5751_v6, %v8260_v19  ;;  %v2724_v61 = vand.u32 2147483648, %v8260_v19  ;;  %v2748_v46 = vadd.f32 0.112945676, %v2747_v36 }
 0x2a6   : > { %vm2719_vm12 = vweird.f32 %v5751_v6  ;;  %v2722_v48 = vand.u32 2147483647, %v8260_v19  ;;  %v2893_v5 = vadd.f32 0.00028619796, %v2892_v14  ;;  %v2784_v58 = vadd.f32 0.001143296, %v2783_v33  ;;  %v3846_v33 = vpop.xlane.xlu0 %3845 }
 0x2a7   : > { %10072 = vst [vmem:[#allocation44_spill] sm:$0xff] %v8331_v56  ;;  %v3670_v9 = vsel %vm3562_vm5, %v8331_v56, 0.0  ;;  %v3928_v26 = vmul.f32 %v8331_v56, %v8331_v56  ;;  %v2715_v54 = vsub.f32 1.0, %v2714_v22  ;;  %v2749_v25 = vmul.f32 %v2748_v46, %v8036_v27 }
 0x2a8   : > { %3671 = vadd.xlane.f32.xlu0 %v3670_v9  ;;  %v2824_v56 = vadd.f32 0.001143296, %v2823_v57  ;;  %vm2718_vm13 = vweird.f32 %v8260_v19  ;;  %v4089_v35 = vmul.f32 %v8327_v10, %v8327_v10  ;;  %v4203_v62 = vmul.f32 %v8271_v17, %v4202_v55 }
 0x2a9   : > { %v3958_v29 = vsel %vm3562_vm5, %v3928_v26, 0.0  ;;  %v2716_v34 = vmul.f32 %v5751_v6, %v2715_v54  ;;  %v2930_v36 = vmul.f32 %v8335_v51, %v8335_v51  ;;  %vm2720_vm14 = vmor %vm2718_vm13, %vm2719_vm12  ;;  %v2725_v9 = vor.u32 1.1754944e-38, %v2724_v61 }
 0x2aa   : > { %3959 = vadd.xlane.f32.xlu2 %v3958_v29  ;;  %v8356_v26 = vmul.f32 0.0078125, %v3738_v28  ;;  %v2750_v29 = vadd.f32 0.4994258, %v2749_v25  ;;  %v8358_v14 = vpop.eup %5752  ;;  %vm2723_vm15 = vcmp.eq.f32.partialorder %v2722_v48, 8.507059e+37  ;;  %v4204_v19 = vmul.f32 0.5, %v4203_v62 }
 0x2ab   : > { %v2717_v22 = vadd.f32 %v5751_v6, %v2716_v34  ;;  %v4121_v34 = vsub.f32 %v4057_v2, %v4089_v35  ;;  %v2785_v55 = vmul.f32 %v2784_v58, %v8083_v12  ;;  %v2825_v8 = vmul.f32 %v2824_v56, %v8110_v49  ;;  %v8374_v58 = vpop.f32.mrf.mxu2  ;;  %5475 = vmatmul.msk.f32.gmra.mxu2 %vm491_vm0, %v7898_v1 }
 0x2ac   : > { %v2751_v46 = vmul.f32 %v2750_v29, %v8036_v27  ;;  %v2894_v51 = vmul.f32 %v2893_v5, %v8292_v23  ;;  %v4205_v61 = vsub.f32 1.5, %v4204_v19  ;;  %vm4208_vm1 = vweird.f32 %v8271_v17  ;;  %v8392_v29 = vpop.f32.mrf.mxu3 }
 0x2ad   : > { %v2721_v57 = vsel %vm2720_vm14, %v5751_v6, %v2717_v22  ;;  %v4212_v25 = vmul.f32 %v8358_v14, %v8314_v4  ;;  %v4026_v48 = vadd.f32 %v3846_v33, %v7845_v52  ;;  %v8369_v2 = vmin.f32 %v2930_v36, 16.0 }
 0x2ae   : > { %v2726_v54 = vsel %vm2723_vm15, %v2725_v9, %v2721_v57  ;;  %v8372_v27 = vadd.f32 1.0, %v2751_v46  ;;  %v4206_v6 = vmul.f32 %v8271_v17, %v4205_v61  ;;  %vm4207_vm2 = vweird.f32 %v8230_v39  ;;  %v10076_v46 = vld [vmem:[#allocation14_spill] sm:$0xff] }
 0x2af   : > { %v2727_v28 = vmul.f32 %v2726_v54, %v8192_v24  ;;  %v4090_v24 = vmul.f32 %v8356_v26, %v8356_v26  ;;  %v8382_v56 = vmax.f32 %v4121_v34, 1e-05  ;;  %vm4209_vm3 = vmor %vm4207_vm2, %vm4208_vm1  ;;  %v2826_v22 = vadd.f32 0.014752088, %v2825_v8 }
 0x2b0   : > { %3627 = vadd.xlane.f32.xlu0 %v8219_v44  ;;  %5754 = vrcp.f32 %v8372_v27  ;;  %v2786_v44 = vadd.f32 0.014752088, %v2785_v55  ;;  %v2821_v1 = vadd.f32 1.1283791, %v8319_v3  ;;  %v2857_v35 = vadd.f32 0.05243302, %v8324_v20 }
 0x2b1   : > { %v5513_v5 = vclamps-f32 %v2727_v28, 1.0  ;;  %v4210_v36 = vsel %vm4209_vm3, %v8271_v17, %v4206_v6  ;;  %v4213_v39 = vmul.f32 %v8358_v14, %v4212_v25  ;;  %v4058_v9 = vmul.f32 0.0078125, %v4026_v48 }
 0x2b2   : > { %3893 = vadd.xlane.f32.xlu2 %v8278_v53  ;;  %v10074_v53 = vsub.f32 0.0, %v8156_v45  ;;  %v10075_v57 = vsub.f32 %v10070_v41, %v8156_v45  ;;  %v8401_v8 = vmul.f32 %v8298_v7, %v8052_v15  ;;  %v2895_v3 = vadd.f32 0.0036580483, %v2894_v51 }
 0x2b3   : > { %v3494_v62 = vadd.f32 1.0, %v5513_v5  ;;  %v2932_v20 = vmul.f32 2.1237322e-06, %v8369_v2  ;;  %5756 = vrsqrt.f32 %v8382_v56  ;;  %v4122_v19 = vsub.f32 %v4058_v9, %v4090_v24  ;;  %v3583_v24 = vpop.xlane.xlu1 %3582 }
 0x2b4   : > { %v4599_v33 = vmul.f32 %v10074_v53, %v4210_v36  ;;  %v4535_v34 = vmul.f32 %v10075_v57, %v4210_v36  ;;  %v2787_v54 = vmul.f32 %v2786_v44, %v8083_v12  ;;  %v2827_v45 = vmul.f32 %v2826_v22, %v8110_v49 }
 0x2b5   : > { %v3518_v17 = vmul.f32 %v3494_v62, %v8183_v47  ;;  %v8411_v41 = vmul.f32 %v2821_v1, %v8078_v50  ;;  %v2858_v15 = vmul.f32 %v2857_v35, %v8205_v38  ;;  %v8418_v47 = vmul.f32 0.70710677, %v8392_v29 }
 0x2b6   : > { %5535 = vmatmul.msk.f32.gmra.mxu0 %vm3562_vm5, %v4599_v33  ;;  %5567 = vmatmul.msk.f32.gmra.mxu1 %vm3562_vm5, %v4535_v34  ;;  %v5755_v51 = vpop.eup %5754  ;;  %v4504_v55 = vsub.f32 %v10076_v46, %v8252_v13  ;;  %v4214_v28 = vmul.f32 0.5, %v4213_v39  ;;  %v2788_v61 = vadd.f32 0.112945676, %v2787_v54  ;;  %v2828_v25 = vadd.f32 0.112945676, %v2827_v45 }
 0x2b7   : > { %v8415_v7 = vmul.f32 %v3518_v17, %v8169_v21  ;;  %v4568_v48 = vsub.f32 0.0, %v8252_v13  ;;  %v2896_v50 = vmul.f32 %v2895_v3, %v8292_v23  ;;  %v2754_v21 = vmul.f32 %v5755_v51, %v8372_v27 }
 0x2b8   : > { %v2933_v6 = vadd.f32 0.00028619796, %v2932_v20  ;;  %v8427_v44 = vmax.f32 %v4122_v19, 1e-05  ;;  %v2789_v1 = vmul.f32 %v2788_v61, %v8083_v12  ;;  %v2859_v35 = vadd.f32 0.18741608, %v2858_v15 }
 0x2b9   : > { %v3673_v5 = vsel %vm3562_vm5, %v8415_v7, 0.0  ;;  %v3929_v22 = vmul.f32 %v8415_v7, %v8415_v7  ;;  %v2970_v62 = vmul.f32 %v8418_v47, %v8418_v47  ;;  %v2755_v36 = vsub.f32 1.0, %v2754_v21  ;;  %v8435_v9 = vpop.eup %5756  ;;  %v8450_v21 = vpop.f32.mrf.mxu2 }
 0x2ba   : > { %3674 = vadd.xlane.f32.xlu1 %v3673_v5  ;;  %v2829_v39 = vmul.f32 %v2828_v25, %v8110_v49  ;;  %v4215_v53 = vsub.f32 1.5, %v4214_v28  ;;  %v2764_v33 = vand.u32 2147483648, %v8372_v27  ;;  %v2790_v34 = vadd.f32 0.4994258, %v2789_v1  ;;  %v3586_v1 = vpop.xlane.xlu0 %3585 }
 0x2bb   : > { %v3961_v57 = vsel %vm3562_vm5, %v3929_v22, 0.0  ;;  %v2756_v3 = vmul.f32 %v5755_v51, %v2755_v36  ;;  %vm2759_vm4 = vweird.f32 %v5755_v51  ;;  %v2762_v20 = vand.u32 2147483647, %v8372_v27  ;;  %v5876_v22 = vld [vmem:[%s6131_s15 + $0xf8] sm:$0xff]  ;;  %s8992_s15 = scalar_lea.vmem [#allocation3], %s6119_s22  ;;  %s5598_s22 = sshll.u32 (%p6022_p6), %s5915_s26, 3 }
 0x2bc   : > { %3962 = vadd.xlane.f32.xlu0 %v3961_v57  ;;  %v2830_v17 = vadd.f32 0.4994258, %v2829_v39  ;;  %v2897_v19 = vadd.f32 0.05243302, %v2896_v50  ;;  %v2934_v54 = vmul.f32 %v2933_v6, %v8369_v2  ;;  %5758 = vrsqrt.f32 %v8427_v44  ;;  %5476 = vmatmul.msk.f32.gmra.mxu2 %vm491_vm0, %v5876_v22  ;;  %v3852_v57 = vpop.xlane.xlu1 %3851  ;;  %s5104_s20 = sadd.s32 (%p6022_p6), %s5599_s19, %s5598_s22 }
 0x2bd   : > { %v2791_v45 = vmul.f32 %v2790_v34, %v8083_v12  ;;  %v4222_v15 = vmul.f32 %v8435_v9, %v8382_v56  ;;  %v8445_v28 = vmin.f32 %v2970_v62, 16.0  ;;  %v2757_v61 = vadd.f32 %v5755_v51, %v2756_v3  ;;  %s5600_s21 = sshll.u32 (%p6022_p6), %s5104_s20, 3 }
 0x2be   : > { %vm2758_vm6 = vweird.f32 %v8372_v27  ;;  %v2765_v25 = vor.u32 1.1754944e-38, %v2764_v33  ;;  %v2831_v50 = vmul.f32 %v2830_v17, %v8110_v49  ;;  %v2863_v6 = vmul.f32 3.8918573e-05, %v8205_v38  ;;  %v10077_v49 = vld [vmem:[#allocation6_spill] sm:$0xff]  ;;  %s9829_s10 = scalar_lea.vmem (%p6022_p6), %s9921_s7, %s5600_s21 }
 0x2bf   : > { %vm2760_vm7 = vmor %vm2758_vm6, %vm2759_vm4  ;;  %v8448_v5 = vadd.f32 1.0, %v2791_v45  ;;  %vm2763_vm8 = vcmp.eq.f32.partialorder %v2762_v20, 8.507059e+37  ;;  %v4216_v62 = vmul.f32 %v8358_v14, %v4215_v53  ;;  %vm4218_vm9 = vweird.f32 %v8358_v14 }
 0x2c0   : > { %v2761_v12 = vsel %vm2760_vm7, %v5755_v51, %v2757_v61  ;;  %v2898_v27 = vmul.f32 %v2897_v19, %v8292_v23  ;;  %v3739_v39 = vadd.f32 %v7845_v52, %v3583_v24  ;;  %v4505_v33 = vsub.f32 %v10077_v49, %v8327_v10  ;;  %v3849_v24 = vpop.xlane.xlu2 %3848 }
 0x2c1   : > { %v2766_v36 = vsel %vm2763_vm8, %v2765_v25, %v2761_v12  ;;  %5760 = vrcp.f32 %v8448_v5  ;;  %vm4217_vm10 = vweird.f32 %v8314_v4  ;;  %v4223_v51 = vmul.f32 %v8435_v9, %v4222_v15 }
 0x2c2   : > { %3630 = vadd.xlane.f32.xlu1 %v8282_v37  ;;  %v2767_v53 = vmul.f32 %v2766_v36, %v8208_v32  ;;  %v8467_v34 = vpop.eup %5758  ;;  %v2935_v3 = vadd.f32 0.0036580483, %v2934_v54  ;;  %v3740_v20 = vadd.f32 %v7845_v52, %v3586_v1  ;;  %v8470_v17 = vadd.f32 1.0, %v2831_v50  ;;  %vm4219_vm11 = vmor %vm4217_vm10, %vm4218_vm9 }
 0x2c3   : > { %v2864_v37 = vadd.f32 0.001143296, %v2863_v6  ;;  %v4569_v19 = vsub.f32 0.0, %v8327_v10  ;;  %v2972_v4 = vmul.f32 2.1237322e-06, %v8445_v28  ;;  %v4220_v32 = vsel %vm4219_vm11, %v8358_v14, %v4216_v62 }
 0x2c4   : > { %v5514_v45 = vclamps-f32 %v2767_v53, 1.0  ;;  %v8478_v15 = vmul.f32 %v2859_v35, %v8205_v38  ;;  %v8480_v54 = vadd.f32 0.18741608, %v2898_v27  ;;  %v8482_v61 = vmul.f32 0.0078125, %v3739_v39 }
 0x2c5   : > { %v4028_v25 = vadd.f32 %v3852_v57, %v7845_v52  ;;  %v4224_v50 = vmul.f32 0.5, %v4223_v51  ;;  %v4027_v6 = vadd.f32 %v3849_v24, %v7845_v52  ;;  %5762 = vrcp.f32 %v8470_v17 }
 0x2c6   : > { %v3495_v22 = vadd.f32 1.0, %v5514_v45  ;;  %v8488_v1 = vmul.f32 %v2935_v3, %v8369_v2  ;;  %v8490_v14 = vmul.f32 0.0078125, %v3740_v20  ;;  %v4600_v35 = vmul.f32 %v4568_v48, %v4220_v32 }
 0x2c7   : > { %v5761_v12 = vpop.eup %5760  ;;  %v2865_v62 = vmul.f32 %v2864_v37, %v8205_v38  ;;  %vm4227_vm12 = vweird.f32 %v8382_v56  ;;  %v8496_v27 = vadd.f32 0.00028619796, %v2972_v4  ;;  %v4232_v39 = vmul.f32 %v8467_v34, %v8427_v44 }
 0x2c8   : > { %v3519_v36 = vmul.f32 %v3495_v22, %v8195_v31  ;;  %v2794_v52 = vmul.f32 %v5761_v12, %v8448_v5  ;;  %v4091_v51 = vmul.f32 %v8482_v61, %v8482_v61  ;;  %v4060_v53 = vmul.f32 0.0078125, %v4028_v25  ;;  %5536 = vmatmul.msk.f32.gmra.mxu0 %vm3562_vm5, %v4600_v35 }
 0x2c9   : > { %v4536_v48 = vmul.f32 %v4504_v55, %v4220_v32  ;;  %v4225_v57 = vsub.f32 1.5, %v4224_v50  ;;  %v4059_v31 = vmul.f32 0.0078125, %v4027_v6  ;;  %v2802_v24 = vand.u32 2147483647, %v8448_v5 }
 0x2ca   : > { %v8509_v3 = vmul.f32 %v3519_v36, %v8267_v43  ;;  %v2795_v20 = vsub.f32 1.0, %v2794_v52  ;;  %v2804_v37 = vand.u32 2147483648, %v8448_v5  ;;  %v4092_v4 = vmul.f32 %v8490_v14, %v8490_v14 }
 0x2cb   : > { %5568 = vmatmul.msk.f32.gmra.mxu1 %vm3562_vm5, %v4536_v48  ;;  %v2866_v45 = vadd.f32 0.014752088, %v2865_v62  ;;  %v5763_v25 = vpop.eup %5762  ;;  %vm2799_vm13 = vweird.f32 %v5761_v12  ;;  %v4123_v55 = vsub.f32 %v4059_v31, %v4091_v51  ;;  %v2903_v22 = vmul.f32 3.8918573e-05, %v8292_v23 }
 0x2cc   : > { %v3676_v13 = vsel %vm3562_vm5, %v8509_v3, 0.0  ;;  %v2796_v46 = vmul.f32 %v5761_v12, %v2795_v20  ;;  %v3930_v43 = vmul.f32 %v8509_v3, %v8509_v3  ;;  %v4124_v32 = vsub.f32 %v4060_v53, %v4092_v4 }
 0x2cd   : > { %3677 = vadd.xlane.f32.xlu2 %v3676_v13  ;;  %v2834_v50 = vmul.f32 %v5763_v25, %v8470_v17  ;;  %vm2798_vm14 = vweird.f32 %v8448_v5  ;;  %vm4228_vm15 = vweird.f32 %v8435_v9  ;;  %vm2803_vm2 = vcmp.eq.f32.partialorder %v2802_v24, 8.507059e+37 }
 0x2ce   : > { %v2797_v6 = vadd.f32 %v5761_v12, %v2796_v46  ;;  %v3964_v35 = vsel %vm3562_vm5, %v3930_v43, 0.0  ;;  %vm2800_vm1 = vmor %vm2798_vm14, %vm2799_vm13  ;;  %v2805_v62 = vor.u32 1.1754944e-38, %v2804_v37  ;;  %v2867_v52 = vmul.f32 %v2866_v45, %v8205_v38  ;;  %v8543_v43 = vpop.f32.mrf.mxu3 }
 0x2cf   : > { %3965 = vadd.xlane.f32.xlu1 %v3964_v35  ;;  %v2835_v36 = vsub.f32 1.0, %v2834_v50  ;;  %v2842_v53 = vand.u32 2147483647, %v8470_v17  ;;  %v2844_v48 = vand.u32 2147483648, %v8470_v17  ;;  %v4226_v31 = vmul.f32 %v8435_v9, %v4225_v57  ;;  %vm4229_vm4 = vmor %vm4227_vm12, %vm4228_vm15 }
 0x2d0   : > { %v2801_v51 = vsel %vm2800_vm1, %v5761_v12, %v2797_v6  ;;  %vm2839_vm3 = vweird.f32 %v5763_v25  ;;  %v2868_v4 = vadd.f32 0.112945676, %v2867_v52  ;;  %v8533_v24 = vmax.f32 %v4123_v55, 1e-05 }
 0x2d1   : > { %v2806_v20 = vsel %vm2803_vm2, %v2805_v62, %v2801_v51  ;;  %v2836_v5 = vmul.f32 %v5763_v25, %v2835_v36  ;;  %v8536_v12 = vmax.f32 %v4124_v32, 1e-05  ;;  %v4230_v45 = vsel %vm4229_vm4, %v8435_v9, %v4226_v31 }
 0x2d2   : > { %v2807_v37 = vmul.f32 %v2806_v20, %v8401_v8  ;;  %vm2838_vm6 = vweird.f32 %v8470_v17  ;;  %v2869_v57 = vmul.f32 %v2868_v4, %v8205_v38  ;;  %v4601_v46 = vmul.f32 %v4569_v19, %v4230_v45 }
 0x2d3   : > { %v2837_v13 = vadd.f32 %v5763_v25, %v2836_v5  ;;  %vm2840_vm7 = vmor %vm2838_vm6, %vm2839_vm3  ;;  %v2845_v55 = vor.u32 1.1754944e-38, %v2844_v48  ;;  %v4537_v8 = vmul.f32 %v4505_v33, %v4230_v45  ;;  %v2904_v32 = vadd.f32 0.001143296, %v2903_v22 }
 0x2d4   : > { %v5515_v56 = vclamps-f32 %v2807_v37, 1.0  ;;  %vm2843_vm8 = vcmp.eq.f32.partialorder %v2842_v53, 8.507059e+37  ;;  %v2870_v9 = vadd.f32 0.4994258, %v2869_v57  ;;  %5537 = vmatmul.msk.f32.gmra.mxu0 %vm3562_vm5, %v4601_v46  ;;  %v4233_v17 = vmul.f32 %v8467_v34, %v4232_v39 }
 0x2d5   : > { %v2841_v50 = vsel %vm2840_vm7, %v5763_v25, %v2837_v13  ;;  %v2861_v6 = vadd.f32 1.1283791, %v8478_v15  ;;  %v2900_v19 = vmul.f32 %v8480_v54, %v8292_v23  ;;  %5569 = vmatmul.msk.f32.gmra.mxu1 %vm3562_vm5, %v4537_v8  ;;  %v2937_v10 = vadd.f32 0.05243302, %v8488_v1 }
 0x2d6   : > { %v3496_v35 = vadd.f32 1.0, %v5515_v56  ;;  %v2846_v62 = vsel %vm2843_vm8, %v2845_v55, %v2841_v50  ;;  %v8556_v49 = vmul.f32 0.70710677, %v8543_v43  ;;  %v2871_v25 = vmul.f32 %v2870_v9, %v8205_v38 }
 0x2d7   : > { %v2847_v33 = vmul.f32 %v2846_v62, %v8411_v41  ;;  %5764 = vrsqrt.f32 %v8533_v24  ;;  %v2905_v39 = vmul.f32 %v2904_v32, %v8292_v23  ;;  %v4234_v54 = vmul.f32 0.5, %v4233_v17  ;;  %v8616_v17 = vpop.f32.mrf.mxu3 }
 0x2d8   : > { %v3520_v15 = vmul.f32 %v3496_v35, %v8198_v59  ;;  %v2974_v22 = vmul.f32 %v8496_v27, %v8445_v28  ;;  %5766 = vrsqrt.f32 %v8536_v12  ;;  %v8566_v36 = vadd.f32 1.0, %v2871_v25 }
 0x2d9   : > { %v5516_v1 = vclamps-f32 %v2847_v33, 1.0  ;;  %v2901_v52 = vadd.f32 1.1283791, %v2900_v19  ;;  %v2906_v38 = vadd.f32 0.014752088, %v2905_v39  ;;  %v4235_v51 = vsub.f32 1.5, %v4234_v54 }
 0x2da   : > { %v8569_v41 = vmul.f32 %v3520_v15, %v8374_v58  ;;  %v2938_v53 = vmul.f32 %v2937_v10, %v8369_v2  ;;  %v3010_v59 = vmul.f32 %v8556_v49, %v8556_v49  ;;  %5768 = vrcp.f32 %v8566_v36  ;;  %v10079_v33 = vld [vmem:[#allocation24_spill] sm:$0xff] }
 0x2db   : > { %v3497_v48 = vadd.f32 1.0, %v5516_v1  ;;  %v3895_v58 = vsel %vm3562_vm5, %v8296_v60, 0.0  ;;  %v8583_v20 = vsel %vm3562_vm5, %v8310_v42, 0.0  ;;  %v8586_v5 = vmul.f32 0.5, %v8147_v16 }
 0x2dc   : > { %v3679_v27 = vsel %vm3562_vm5, %v8569_v41, 0.0  ;;  %v3931_v31 = vmul.f32 %v8569_v41, %v8569_v41  ;;  %v2975_v4 = vadd.f32 0.0036580483, %v2974_v22  ;;  %v2907_v45 = vmul.f32 %v2906_v38, %v8292_v23 }
 0x2dd   : > { %3680 = vadd.xlane.f32.xlu0 %v3679_v27  ;;  %v3521_v37 = vmul.f32 %v3497_v48, %v8203_v11  ;;  %v8590_v13 = vpop.eup %5764  ;;  %v8593_v57 = vmul.f32 %v2861_v6, %v8159_v40  ;;  %v8596_v60 = vmul.f32 %v2901_v52, %v8250_v18  ;;  %v4236_v46 = vmul.f32 %v8467_v34, %v4235_v51 }
 0x2de   : > { %v3967_v42 = vsel %vm3562_vm5, %v3931_v31, 0.0  ;;  %v8600_v16 = vpop.eup %5766  ;;  %v8602_v56 = vadd.f32 0.18741608, %v2938_v53  ;;  %v8604_v55 = vmin.f32 %v3010_v59, 16.0  ;;  %v2908_v8 = vadd.f32 0.112945676, %v2907_v45 }
 0x2df   : > { %3968 = vadd.xlane.f32.xlu2 %v3967_v42  ;;  %v8607_v11 = vmul.f32 %v3521_v37, %v8450_v21  ;;  %v4570_v40 = vsub.f32 0.0, %v8356_v26  ;;  %vm4237_vm9 = vweird.f32 %v8427_v44  ;;  %vm4238_vm10 = vweird.f32 %v8467_v34  ;;  %v10078_v44 = vld [vmem:[#allocation16_spill] sm:$0xff] }
 0x2e0   : > { %v2943_v18 = vmul.f32 3.8918573e-05, %v8369_v2  ;;  %v5769_v32 = vpop.eup %5768  ;;  %v2976_v50 = vmul.f32 %v2975_v4, %v8445_v28  ;;  %v4242_v9 = vmul.f32 %v8590_v13, %v8533_v24  ;;  %v2909_v6 = vmul.f32 %v2908_v8, %v8292_v23  ;;  %vm4239_vm11 = vmor %vm4237_vm9, %vm4238_vm10 }
 0x2e1   : > { %v3682_v21 = vsel %vm3562_vm5, %v8607_v11, 0.0  ;;  %v4506_v19 = vsub.f32 %v10078_v44, %v8356_v26  ;;  %v4252_v35 = vmul.f32 %v8600_v16, %v8536_v12  ;;  %v2874_v62 = vmul.f32 %v5769_v32, %v8566_v36 }
 0x2e2   : > { %3683 = vadd.xlane.f32.xlu1 %v3682_v21  ;;  %v4240_v10 = vsel %vm4239_vm11, %v8467_v34, %v4236_v46  ;;  %v4508_v25 = vsub.f32 %v10079_v33, %v8490_v14  ;;  %v3012_v15 = vmul.f32 2.1237322e-06, %v8604_v55  ;;  %v2910_v39 = vadd.f32 0.4994258, %v2909_v6 }
 0x2e3   : > { %v4602_v54 = vmul.f32 %v4570_v40, %v4240_v10  ;;  %v4572_v22 = vsub.f32 0.0, %v8490_v14  ;;  %v2875_v1 = vsub.f32 1.0, %v2874_v62  ;;  %v4538_v52 = vmul.f32 %v4506_v19, %v4240_v10 }
 0x2e4   : > { %v2944_v26 = vadd.f32 0.001143296, %v2943_v18  ;;  %v2977_v38 = vadd.f32 0.05243302, %v2976_v50  ;;  %v2884_v51 = vand.u32 2147483648, %v8566_v36  ;;  %v2911_v53 = vmul.f32 %v2910_v39, %v8292_v23 }
 0x2e5   : > { %3896 = vadd.xlane.f32.xlu0 %v3895_v58  ;;  %5538 = vmatmul.msk.f32.gmra.mxu0 %vm3562_vm5, %v4602_v54  ;;  %v4243_v34 = vmul.f32 %v8590_v13, %v4242_v9  ;;  %v4253_v59 = vmul.f32 %v8600_v16, %v4252_v35  ;;  %v2876_v48 = vmul.f32 %v5769_v32, %v2875_v1  ;;  %vm2879_vm12 = vweird.f32 %v5769_v32  ;;  %v8655_v9 = vpop.f32.mrf.mxu3 }
 0x2e6   : > { %v2882_v27 = vand.u32 2147483647, %v8566_v36  ;;  %5570 = vmatmul.msk.f32.gmra.mxu1 %vm3562_vm5, %v4538_v52  ;;  %v3013_v31 = vadd.f32 0.00028619796, %v3012_v15  ;;  %v8639_v58 = vadd.f32 1.0, %v2911_v53  ;;  %v2945_v4 = vmul.f32 %v2944_v26, %v8369_v2 }
 0x2e7   : > { %3633 = vadd.xlane.f32.xlu2 %v8306_v63  ;;  %v4244_v23 = vmul.f32 0.5, %v4243_v34  ;;  %v8643_v37 = vmul.f32 0.70710677, %v8616_v17  ;;  %v2877_v45 = vadd.f32 %v5769_v32, %v2876_v48  ;;  %vm2878_vm13 = vweird.f32 %v8566_v36 }
 0x2e8   : > { %v3932_v42 = vmul.f32 %v8607_v11, %v8607_v11  ;;  %v8649_v46 = vmul.f32 %v2977_v38, %v8445_v28  ;;  %vm2880_vm14 = vmor %vm2878_vm13, %vm2879_vm12  ;;  %v2885_v8 = vor.u32 1.1754944e-38, %v2884_v51  ;;  %5770 = vrcp.f32 %v8639_v58 }
 0x2e9   : > { %v2983_v63 = vmul.f32 3.8918573e-05, %v8445_v28  ;;  %v4254_v40 = vmul.f32 0.5, %v4253_v59  ;;  %v2881_v18 = vsel %vm2880_vm14, %v5769_v32, %v2877_v45  ;;  %vm2883_vm15 = vcmp.eq.f32.partialorder %v2882_v27, 8.507059e+37 }
 0x2ea   : > { %3899 = vadd.xlane.f32.xlu1 %v8583_v20  ;;  %v2946_v50 = vadd.f32 0.014752088, %v2945_v4  ;;  %v3014_v36 = vmul.f32 %v3013_v31, %v8604_v55  ;;  %v2886_v21 = vsel %vm2883_vm15, %v2885_v8, %v2881_v18  ;;  %v4245_v6 = vsub.f32 1.5, %v4244_v23  ;;  %v10080_v20 = vld [vmem:[#allocation20_spill] sm:$0xff] }
 0x2eb   : > { %vm4248_vm1 = vweird.f32 %v8590_v13  ;;  %v3050_v44 = vmul.f32 %v8643_v37, %v8643_v37  ;;  %v2887_v19 = vmul.f32 %v2886_v21, %v8593_v57  ;;  %v3970_v35 = vsel %vm3562_vm5, %v3932_v42, 0.0 }
 0x2ec   : > { %v2947_v32 = vmul.f32 %v2946_v50, %v8369_v2  ;;  %v4507_v62 = vsub.f32 %v10080_v20, %v8482_v61  ;;  %v4246_v10 = vmul.f32 %v8590_v13, %v4245_v6  ;;  %vm4247_vm2 = vweird.f32 %v8533_v24 }
 0x2ed   : > { %3971 = vadd.xlane.f32.xlu0 %v3970_v35  ;;  %v2984_v15 = vadd.f32 0.001143296, %v2983_v63  ;;  %v4571_v39 = vsub.f32 0.0, %v8482_v61  ;;  %v4255_v54 = vsub.f32 1.5, %v4254_v40  ;;  %v5517_v1 = vclamps-f32 %v2887_v19, 1.0  ;;  %vm4249_vm3 = vmor %vm4247_vm2, %vm4248_vm1  ;;  %v2307_v61 = vpop.f32.mrf.mxu2  ;;  %v8687_v21 = vpop.f32.mrf.mxu3 }
 0x2ee   : > { %v2948_v52 = vadd.f32 0.112945676, %v2947_v32  ;;  %v5771_v57 = vpop.eup %5770  ;;  %v3015_v26 = vadd.f32 0.0036580483, %v3014_v36  ;;  %v4250_v38 = vsel %vm4249_vm3, %v8590_v13, %v4246_v10  ;;  %v3023_v53 = vmul.f32 3.8918573e-05, %v8604_v55 }
 0x2ef   : > { %v2985_v51 = vmul.f32 %v2984_v15, %v8445_v28  ;;  %v8671_v34 = vmin.f32 %v3050_v44, 16.0  ;;  %v3498_v59 = vadd.f32 1.0, %v5517_v1  ;;  %v2914_v24 = vmul.f32 %v5771_v57, %v8639_v58 }
 0x2f0   : > { %vm4258_vm4 = vweird.f32 %v8600_v16  ;;  %v2922_v48 = vand.u32 2147483647, %v8639_v58  ;;  %v2949_v27 = vmul.f32 %v2948_v52, %v8369_v2  ;;  %v4603_v31 = vmul.f32 %v4571_v39, %v4250_v38 }
 0x2f1   : > { %v4539_v4 = vmul.f32 %v4507_v62, %v4250_v38  ;;  %v3522_v13 = vmul.f32 %v3498_v59, %v8586_v5  ;;  %v2915_v23 = vsub.f32 1.0, %v2914_v24  ;;  %v2986_v45 = vadd.f32 0.014752088, %v2985_v51 }
 0x2f2   : > { %v4256_v42 = vmul.f32 %v8600_v16, %v4255_v54  ;;  %vm4257_vm6 = vweird.f32 %v8536_v12  ;;  %v2924_v8 = vand.u32 2147483648, %v8639_v58  ;;  %v2950_v63 = vadd.f32 0.4994258, %v2949_v27  ;;  %5539 = vmatmul.msk.f32.gmra.mxu0 %vm3562_vm5, %v4603_v31 }
 0x2f3   : > { %5571 = vmatmul.msk.f32.gmra.mxu1 %vm3562_vm5, %v4539_v4  ;;  %v3024_v40 = vadd.f32 0.001143296, %v3023_v53  ;;  %v8683_v18 = vmul.f32 %v3522_v13, %v2307_v61  ;;  %v2916_v50 = vmul.f32 %v5771_v57, %v2915_v23  ;;  %vm2919_vm7 = vweird.f32 %v5771_v57  ;;  %vm4259_vm9 = vmor %vm4257_vm6, %vm4258_vm4 }
 0x2f4   : > { %v2987_v5 = vmul.f32 %v2986_v45, %v8445_v28  ;;  %v3052_v36 = vmul.f32 2.1237322e-06, %v8671_v34  ;;  %vm2918_vm8 = vweird.f32 %v8639_v58  ;;  %v2951_v12 = vmul.f32 %v2950_v63, %v8369_v2 }
 0x2f5   : > { %v3025_v6 = vmul.f32 %v3024_v40, %v8604_v55  ;;  %v3685_v44 = vsel %vm3562_vm5, %v8683_v18, 0.0  ;;  %v2917_v19 = vadd.f32 %v5771_v57, %v2916_v50  ;;  %v3933_v35 = vmul.f32 %v8683_v18, %v8683_v18  ;;  %vm2920_vm10 = vmor %vm2918_vm8, %vm2919_vm7  ;;  %v2310_v13 = vpop.f32.mrf.mxu2  ;;  %v8725_v23 = vpop.f32.mrf.mxu3 }
 0x2f6   : > { %v4260_v32 = vsel %vm4259_vm9, %v8600_v16, %v4256_v42  ;;  %v3016_v20 = vmul.f32 %v3015_v26, %v8604_v55  ;;  %3686 = vadd.xlane.f32.xlu2 %v3685_v44  ;;  %v2925_v58 = vor.u32 1.1754944e-38, %v2924_v8  ;;  %v8700_v62 = vadd.f32 1.0, %v2951_v12 }
 0x2f7   : > { %v2988_v10 = vadd.f32 0.112945676, %v2987_v5  ;;  %v2921_v15 = vsel %vm2920_vm10, %v5771_v57, %v2917_v19  ;;  %vm2923_vm11 = vcmp.eq.f32.partialorder %v2922_v48, 8.507059e+37  ;;  %v3973_v39 = vsel %vm3562_vm5, %v3933_v35, 0.0 }
 0x2f8   : > { %v3026_v54 = vadd.f32 0.014752088, %v3025_v6  ;;  %v2926_v1 = vsel %vm2923_vm11, %v2925_v58, %v2921_v15  ;;  %3974 = vadd.xlane.f32.xlu1 %v3973_v39  ;;  %5772 = vrcp.f32 %v8700_v62  ;;  %v4604_v16 = vmul.f32 %v4572_v22, %v4260_v32  ;;  %v10081_v39 = vld [vmem:[#allocation45_spill] sm:$0xff] }
 0x2f9   : > { %v4540_v52 = vmul.f32 %v4508_v25, %v4260_v32  ;;  %v3053_v26 = vadd.f32 0.00028619796, %v3052_v36  ;;  %v8710_v38 = vmul.f32 0.70710677, %v8655_v9  ;;  %v2927_v57 = vmul.f32 %v2926_v1, %v8596_v60 }
 0x2fa   : > { %v2940_v51 = vmul.f32 %v8602_v56, %v8369_v2  ;;  %v2989_v53 = vmul.f32 %v2988_v10, %v8445_v28  ;;  %5540 = vmatmul.msk.f32.gmra.mxu0 %vm3562_vm5, %v4604_v16  ;;  %v3027_v22 = vmul.f32 %v3026_v54, %v8604_v55  ;;  %v3063_v14 = vmul.f32 3.8918573e-05, %v8671_v34 }
 0x2fb   : > { %5572 = vmatmul.msk.f32.gmra.mxu1 %vm3562_vm5, %v4540_v52  ;;  %v2979_v33 = vadd.f32 0.18741608, %v8649_v46  ;;  %v3017_v25 = vadd.f32 0.05243302, %v3016_v20  ;;  %v5518_v59 = vclamps-f32 %v2927_v57, 1.0  ;;  %v2491_v48 = vmul.f32 0.5, %v8237_v30 }
 0x2fc   : > { %v2990_v24 = vadd.f32 0.4994258, %v2989_v53  ;;  %v3028_v61 = vadd.f32 0.112945676, %v3027_v22  ;;  %v3064_v60 = vadd.f32 0.001143296, %v3063_v14  ;;  %v3054_v2 = vmul.f32 %v3053_v26, %v8671_v34 }
 0x2fd   : > { %v3090_v56 = vmul.f32 %v8710_v38, %v8710_v38  ;;  %v3499_v27 = vadd.f32 1.0, %v5518_v59  ;;  %v2941_v4 = vadd.f32 1.1283791, %v2940_v51  ;;  %v3635_v46 = vsel %vm3562_vm5, %v7454_v0, 0.0 }
 0x2fe   : > { %v5773_v31 = vpop.eup %5772  ;;  %v2991_v45 = vmul.f32 %v2990_v24, %v8445_v28  ;;  %v3029_v42 = vmul.f32 %v3028_v61, %v8604_v55  ;;  %v2980_v30 = vmul.f32 %v2979_v33, %v8445_v28  ;;  %v3065_v40 = vmul.f32 %v3064_v60, %v8671_v34 }
 0x2ff   : > { %v3523_v8 = vmul.f32 %v3499_v27, %v2491_v48  ;;  %v2954_v63 = vmul.f32 %v5773_v31, %v8700_v62  ;;  %v3018_v50 = vmul.f32 %v3017_v25, %v8604_v55  ;;  %v8736_v5 = vmul.f32 0.70710677, %v8687_v21 }
 0x300   : > { %v8738_v36 = vadd.f32 1.0, %v2991_v45  ;;  %v3030_v12 = vadd.f32 0.4994258, %v3029_v42  ;;  %v3055_v6 = vadd.f32 0.0036580483, %v3054_v2  ;;  %v8740_v44 = vmin.f32 %v3090_v56, 16.0 }
 0x301   : > { %v8742_v19 = vmul.f32 %v3523_v8, %v2310_v13  ;;  %v2955_v35 = vsub.f32 1.0, %v2954_v63  ;;  %vm2959_vm12 = vweird.f32 %v5773_v31  ;;  %v2962_v28 = vand.u32 2147483647, %v8700_v62  ;;  %v10082_v56 = vld [vmem:[#allocation12_spill] sm:$0xff]  ;;  %v2313_v63 = vpop.f32.mrf.mxu2 }
 0x302   : > { %v2964_v32 = vand.u32 2147483648, %v8700_v62  ;;  %5774 = vrcp.f32 %v8738_v36  ;;  %v3066_v15 = vadd.f32 0.014752088, %v3065_v40  ;;  %v2942_v54 = vmul.f32 %v2941_v4, %v10081_v39  ;;  %v8783_v39 = vpop.xlane.xlu2 %3588 }
 0x303   : > { %v3688_v20 = vsel %vm3562_vm5, %v8742_v19, 0.0  ;;  %v3934_v58 = vmul.f32 %v8742_v19, %v8742_v19  ;;  %v2956_v10 = vmul.f32 %v5773_v31, %v2955_v35  ;;  %v3130_v1 = vmul.f32 %v8736_v5, %v8736_v5 }
 0x304   : > { %3689 = vadd.xlane.f32.xlu0 %v3688_v20  ;;  %v3821_v16 = vmul.f32 %v7454_v0, %v7454_v0  ;;  %v3031_v52 = vmul.f32 %v3030_v12, %v8604_v55  ;;  %v3019_v26 = vadd.f32 0.18741608, %v3018_v50  ;;  %vm2958_vm13 = vweird.f32 %v8700_v62  ;;  %v8767_v62 = vpop.f32.mrf.mxu3 }
 0x305   : > { %v3976_v57 = vsel %vm3562_vm5, %v3934_v58, 0.0  ;;  %v2957_v51 = vadd.f32 %v5773_v31, %v2956_v10  ;;  %v3056_v53 = vmul.f32 %v3055_v6, %v8671_v34  ;;  %v3092_v22 = vmul.f32 2.1237322e-06, %v8740_v44  ;;  %vm2960_vm14 = vmor %vm2958_vm13, %vm2959_vm12 }
 0x306   : > { %3977 = vadd.xlane.f32.xlu2 %v3976_v57  ;;  %v2965_v14 = vor.u32 1.1754944e-38, %v2964_v32  ;;  %v8762_v33 = vadd.f32 1.0, %v3031_v52  ;;  %v2981_v25 = vadd.f32 1.1283791, %v2980_v30  ;;  %vm2963_vm15 = vcmp.eq.f32.partialorder %v2962_v28, 8.507059e+37 }
 0x307   : > { %v2961_v59 = vsel %vm2960_vm14, %v5773_v31, %v2957_v51  ;;  %v3067_v24 = vmul.f32 %v3066_v15, %v8671_v34  ;;  %v8765_v60 = vmin.f32 %v3130_v1, 16.0  ;;  %v3103_v2 = vmul.f32 3.8918573e-05, %v8740_v44 }
 0x308   : > { %v5775_v61 = vpop.eup %5774  ;;  %v2966_v48 = vsel %vm2963_vm15, %v2965_v14, %v2961_v59  ;;  %5776 = vrcp.f32 %v8762_v33  ;;  %v2492_v27 = vmul.f32 0.5, %v10082_v56  ;;  %v3901_v13 = vsel %vm3562_vm5, %v3821_v16, 0.0 }
 0x309   : > { %v2967_v4 = vmul.f32 %v2966_v48, %v2942_v54  ;;  %v2994_v31 = vmul.f32 %v5775_v61, %v8738_v36  ;;  %v8775_v45 = vmul.f32 0.5, %v8392_v29  ;;  %v3020_v42 = vmul.f32 %v3019_v26, %v8604_v55 }
 0x30a   : > { %v3057_v30 = vadd.f32 0.05243302, %v3056_v53  ;;  %v3093_v8 = vadd.f32 0.00028619796, %v3092_v22  ;;  %v3002_v12 = vand.u32 2147483647, %v8738_v36  ;;  %v2982_v35 = vmul.f32 %v2981_v25, %v8418_v47 }
 0x30b   : > { %v5519_v40 = vclamps-f32 %v2967_v4, 1.0  ;;  %v2995_v50 = vsub.f32 1.0, %v2994_v31  ;;  %v3068_v6 = vadd.f32 0.112945676, %v3067_v24  ;;  %v3004_v28 = vand.u32 2147483648, %v8738_v36  ;;  %v2316_v31 = vpop.f32.mrf.mxu2 }
 0x30c   : > { %3636 = vadd.xlane.f32.xlu0 %v3635_v46  ;;  %v3104_v32 = vadd.f32 0.001143296, %v3103_v2  ;;  %v3143_v20 = vmul.f32 3.8918573e-05, %v8765_v60  ;;  %vm2999_vm1 = vweird.f32 %v5775_v61  ;;  %v3021_v15 = vadd.f32 1.1283791, %v3020_v42  ;;  %v8793_v24 = vpop.f32.mrf.mxu3 }
 0x30d   : > { %v3500_v29 = vadd.f32 1.0, %v5519_v40  ;;  %v2996_v58 = vmul.f32 %v5775_v61, %v2995_v50  ;;  %v3069_v55 = vmul.f32 %v3068_v6, %v8671_v34  ;;  %v3058_v54 = vmul.f32 %v3057_v30, %v8671_v34 }
 0x30e   : > { %v5777_v10 = vpop.eup %5776  ;;  %v3094_v1 = vmul.f32 %v3093_v8, %v8740_v44  ;;  %v3132_v47 = vmul.f32 2.1237322e-06, %v8765_v60  ;;  %3902 = vadd.xlane.f32.xlu2 %v3901_v13  ;;  %vm2998_vm2 = vweird.f32 %v8738_v36  ;;  %vm3003_vm4 = vcmp.eq.f32.partialorder %v3002_v12, 8.507059e+37  ;;  %v8801_v13 = vpop.xlane.xlu0 %3591 }
 0x30f   : > { %v3524_v46 = vmul.f32 %v3500_v29, %v2492_v27  ;;  %v2997_v16 = vadd.f32 %v5775_v61, %v2996_v58  ;;  %v3034_v52 = vmul.f32 %v5777_v10, %v8762_v33  ;;  %vm3000_vm3 = vmor %vm2998_vm2, %vm2999_vm1  ;;  %v3005_v26 = vor.u32 1.1754944e-38, %v3004_v28  ;;  %v8812_v58 = vpop.xlane.xlu2 %3857 }
 0x310   : > { %v3105_v57 = vmul.f32 %v3104_v32, %v8740_v44  ;;  %v3144_v51 = vadd.f32 0.001143296, %v3143_v20  ;;  %v3070_v25 = vadd.f32 0.4994258, %v3069_v55  ;;  %vm3039_vm6 = vweird.f32 %v5777_v10 }
 0x311   : > { %v8791_v53 = vmul.f32 %v3524_v46, %v2313_v63  ;;  %v3001_v22 = vsel %vm3000_vm3, %v5775_v61, %v2997_v16  ;;  %v3035_v14 = vsub.f32 1.0, %v3034_v52  ;;  %v3042_v48 = vand.u32 2147483647, %v8762_v33  ;;  %v10084_v46 = vld [vmem:[#allocation29_spill] sm:$0xff] }
 0x312   : > { %v3006_v59 = vsel %vm3003_vm4, %v3005_v26, %v3001_v22  ;;  %v3044_v36 = vand.u32 2147483648, %v8762_v33  ;;  %v3133_v61 = vadd.f32 0.00028619796, %v3132_v47  ;;  %v3071_v42 = vmul.f32 %v3070_v25, %v8671_v34 }
 0x313   : > { %10083 = vst [vmem:[#allocation14_spill] sm:$0xff] %v8791_v53  ;;  %v3691_v2 = vsel %vm3562_vm5, %v8791_v53, 0.0  ;;  %v3007_v56 = vmul.f32 %v3006_v59, %v2982_v35  ;;  %v3935_v27 = vmul.f32 %v8791_v53, %v8791_v53  ;;  %v3036_v4 = vmul.f32 %v5777_v10, %v3035_v14 }
 0x314   : > { %3692 = vadd.xlane.f32.xlu1 %v3691_v2  ;;  %v3106_v30 = vadd.f32 0.014752088, %v3105_v57  ;;  %v3145_v8 = vmul.f32 %v3144_v51, %v8765_v60  ;;  %vm3038_vm7 = vweird.f32 %v8762_v33  ;;  %v3022_v12 = vmul.f32 %v3021_v15, %v8556_v49  ;;  %v8826_v14 = vpop.f32.mrf.mxu3  ;;  %v2319_v2 = vpop.f32.mrf.mxu2 }
 0x315   : > { %v5520_v63 = vclamps-f32 %v3007_v56, 1.0  ;;  %v3979_v40 = vsel %vm3562_vm5, %v3935_v27, 0.0  ;;  %v3037_v50 = vadd.f32 %v5777_v10, %v3036_v4  ;;  %v3059_v6 = vadd.f32 0.18741608, %v3058_v54  ;;  %vm3040_vm8 = vmor %vm3038_vm7, %vm3039_vm6 }
 0x316   : > { %3980 = vadd.xlane.f32.xlu0 %v3979_v40  ;;  %v3045_v35 = vor.u32 1.1754944e-38, %v3044_v36  ;;  %v8809_v28 = vadd.f32 1.0, %v3071_v42  ;;  %vm3043_vm9 = vcmp.eq.f32.partialorder %v3042_v48, 8.507059e+37  ;;  %v3107_v29 = vmul.f32 %v3106_v30, %v8740_v44  ;;  %v8824_v22 = vpop.xlane.xlu0 %3860 }
 0x317   : > { %v3501_v32 = vadd.f32 1.0, %v5520_v63  ;;  %v3041_v20 = vsel %vm3040_vm8, %v5777_v10, %v3037_v50  ;;  %v3095_v55 = vadd.f32 0.0036580483, %v3094_v1  ;;  %v3146_v33 = vadd.f32 0.014752088, %v3145_v8  ;;  %v8835_v42 = vpop.xlane.xlu2 %3597 }
 0x318   : > { %v3046_v47 = vsel %vm3043_vm9, %v3045_v35, %v3041_v20  ;;  %5778 = vrcp.f32 %v8809_v28  ;;  %v3134_v49 = vmul.f32 %v3133_v61, %v8765_v60  ;;  %v3638_v16 = vsel %vm3562_vm5, %v10084_v46, 0.0 }
 0x319   : > { %v3525_v15 = vmul.f32 %v3501_v32, %v8775_v45  ;;  %v3047_v54 = vmul.f32 %v3046_v47, %v3022_v12  ;;  %v3060_v10 = vmul.f32 %v3059_v6, %v8671_v34  ;;  %v3108_v57 = vadd.f32 0.112945676, %v3107_v29 }
 0x31a   : > { %v2494_v1 = vmul.f32 0.5, %v8543_v43  ;;  %v3096_v51 = vmul.f32 %v3095_v55, %v8740_v44  ;;  %v3147_v45 = vmul.f32 %v3146_v33, %v8765_v60  ;;  %v3135_v25 = vadd.f32 0.0036580483, %v3134_v49 }
 0x31b   : > { %v8820_v52 = vmul.f32 %v3525_v15, %v2316_v31  ;;  %v5521_v26 = vclamps-f32 %v3047_v54, 1.0  ;;  %v3109_v48 = vmul.f32 %v3108_v57, %v8740_v44  ;;  %v3061_v27 = vadd.f32 1.1283791, %v3060_v10 }
 0x31c   : > { %3639 = vadd.xlane.f32.xlu1 %v3638_v16  ;;  %v3148_v56 = vadd.f32 0.112945676, %v3147_v45  ;;  %v3097_v31 = vadd.f32 0.05243302, %v3096_v51  ;;  %v8838_v30 = vmul.f32 0.70710677, %v8725_v23  ;;  %v3136_v63 = vmul.f32 %v3135_v25, %v8765_v60  ;;  %v8861_v51 = vpop.f32.mrf.mxu3 }
 0x31d   : > { %10085 = vst [vmem:[#allocation6_spill] sm:$0xff] %v8820_v52  ;;  %v3694_v59 = vsel %vm3562_vm5, %v8820_v52, 0.0  ;;  %v3502_v34 = vadd.f32 1.0, %v5521_v26  ;;  %v3936_v43 = vmul.f32 %v8820_v52, %v8820_v52  ;;  %v3110_v8 = vadd.f32 0.4994258, %v3109_v48 }
 0x31e   : > { %v5779_v36 = vpop.eup %5778  ;;  %3695 = vadd.xlane.f32.xlu2 %v3694_v59  ;;  %v3149_v12 = vmul.f32 %v3148_v56, %v8765_v60  ;;  %v3082_v35 = vand.u32 2147483647, %v8809_v28  ;;  %v3084_v32 = vand.u32 2147483648, %v8809_v28  ;;  %v3098_v33 = vmul.f32 %v3097_v31, %v8740_v44  ;;  %v8855_v15 = vpop.xlane.xlu0 %3600 }
 0x31f   : > { %v3526_v4 = vmul.f32 %v3502_v34, %v2494_v1  ;;  %v3074_v61 = vmul.f32 %v5779_v36, %v8809_v28  ;;  %v3982_v6 = vsel %vm3562_vm5, %v3936_v43, 0.0  ;;  %v3111_v20 = vmul.f32 %v3110_v8, %v8740_v44 }
 0x320   : > { %vm3079_vm10 = vweird.f32 %v5779_v36  ;;  %v3170_v49 = vmul.f32 %v8838_v30, %v8838_v30  ;;  %vm3078_vm11 = vweird.f32 %v8809_v28  ;;  %v3150_v26 = vadd.f32 0.4994258, %v3149_v12  ;;  %v8869_v28 = vpop.xlane.xlu2 %3866 }
 0x321   : > { %v8841_v40 = vmul.f32 %v3526_v4, %v2319_v2  ;;  %v3075_v50 = vsub.f32 1.0, %v3074_v61  ;;  %v8857_v54 = vadd.f32 1.0, %v3111_v20  ;;  %v3137_v57 = vadd.f32 0.05243302, %v3136_v63  ;;  %vm3080_vm12 = vmor %vm3078_vm11, %vm3079_vm10 }
 0x322   : > { %v3085_v1 = vor.u32 1.1754944e-38, %v3084_v32  ;;  %v3062_v45 = vmul.f32 %v3061_v27, %v8643_v37  ;;  %vm3083_vm13 = vcmp.eq.f32.partialorder %v3082_v35, 8.507059e+37  ;;  %v3822_v59 = vmul.f32 %v10084_v46, %v10084_v46 }
 0x323   : > { %10086 = vst [vmem:[#allocation16_spill] sm:$0xff] %v8841_v40  ;;  %v3697_v29 = vsel %vm3562_vm5, %v8841_v40, 0.0  ;;  %v3937_v55 = vmul.f32 %v8841_v40, %v8841_v40  ;;  %v3076_v47 = vmul.f32 %v5779_v36, %v3075_v50  ;;  %5780 = vrcp.f32 %v8857_v54 }
 0x324   : > { %3983 = vadd.xlane.f32.xlu1 %v3982_v6  ;;  %3698 = vadd.xlane.f32.xlu0 %v3697_v29  ;;  %v3099_v34 = vadd.f32 0.18741608, %v3098_v33  ;;  %v8867_v48 = vmin.f32 %v3170_v49, 16.0  ;;  %v3151_v43 = vmul.f32 %v3150_v26, %v8765_v60  ;;  %v3138_v4 = vmul.f32 %v3137_v57, %v8765_v60  ;;  %v10087_v6 = vld [vmem:[#allocation8_spill] sm:$0xff]  ;;  %v2322_v29 = vpop.f32.mrf.mxu2 }
 0x325   : > { %v3985_v16 = vsel %vm3562_vm5, %v3937_v55, 0.0  ;;  %v3077_v10 = vadd.f32 %v5779_v36, %v3076_v47  ;;  %v3904_v37 = vsel %vm3562_vm5, %v3822_v59, 0.0  ;;  %v2495_v50 = vmul.f32 0.5, %v8616_v17  ;;  %v8889_v17 = vpop.f32.mrf.mxu3 }
 0x326   : > { %3986 = vadd.xlane.f32.xlu2 %v3985_v16  ;;  %v8873_v61 = vadd.f32 1.0, %v3151_v43  ;;  %v3100_v27 = vmul.f32 %v3099_v34, %v8740_v44  ;;  %v3172_v8 = vmul.f32 2.1237322e-06, %v8867_v48  ;;  %v8878_v63 = vpop.xlane.xlu0 %3869  ;;  %v3641_v35 = vsel %vm3562_vm5, %v10087_v6, 0.0 }
 0x327   : > { %v3081_v25 = vsel %vm3080_vm12, %v5779_v36, %v3077_v10  ;;  %v3139_v20 = vadd.f32 0.18741608, %v3138_v4  ;;  %v3183_v47 = vmul.f32 3.8918573e-05, %v8867_v48  ;;  %v3124_v10 = vand.u32 2147483648, %v8857_v54 }
 0x328   : > { %v3086_v2 = vsel %vm3083_vm13, %v3085_v1, %v3081_v25  ;;  %5782 = vrcp.f32 %v8873_v61  ;;  %v3101_v33 = vadd.f32 1.1283791, %v3100_v27  ;;  %v3173_v49 = vadd.f32 0.00028619796, %v3172_v8  ;;  %v8886_v16 = vpop.xlane.xlu2 %3606  ;;  %v3855_v27 = vpop.xlane.xlu1 %3854 }
 0x329   : > { %v3087_v56 = vmul.f32 %v3086_v2, %v3062_v45  ;;  %v5781_v36 = vpop.eup %5780  ;;  %v3122_v1 = vand.u32 2147483647, %v8857_v54  ;;  %v3140_v25 = vmul.f32 %v3139_v20, %v8765_v60  ;;  %v8896_v59 = vmul.f32 0.70710677, %v8767_v62 }
 0x32a   : > { %v3114_v32 = vmul.f32 %v5781_v36, %v8857_v54  ;;  %vm3119_vm14 = vweird.f32 %v5781_v36  ;;  %vm3118_vm15 = vweird.f32 %v8857_v54  ;;  %v3174_v4 = vmul.f32 %v3173_v49, %v8867_v48 }
 0x32b   : > { %v5522_v31 = vclamps-f32 %v3087_v56, 1.0  ;;  %v3184_v56 = vadd.f32 0.001143296, %v3183_v47  ;;  %vm3120_vm1 = vmor %vm3118_vm15, %vm3119_vm14  ;;  %v3125_v60 = vor.u32 1.1754944e-38, %v3124_v10  ;;  %v3102_v8 = vmul.f32 %v3101_v33, %v8710_v38 }
 0x32c   : > { %3905 = vadd.xlane.f32.xlu0 %v3904_v37  ;;  %v3115_v44 = vsub.f32 1.0, %v3114_v32  ;;  %v3823_v37 = vmul.f32 %v10087_v6, %v10087_v6  ;;  %vm3123_vm2 = vcmp.eq.f32.partialorder %v3122_v1, 8.507059e+37  ;;  %v3175_v49 = vadd.f32 0.0036580483, %v3174_v4  ;;  %v2325_v33 = vpop.f32.mrf.mxu2 }
 0x32d   : > { %v3503_v12 = vadd.f32 1.0, %v5522_v31  ;;  %v3185_v47 = vmul.f32 %v3184_v56, %v8867_v48  ;;  %vm3158_vm4 = vweird.f32 %v8873_v61  ;;  %v2496_v56 = vmul.f32 0.5, %v8655_v9 }
 0x32e   : > { %3642 = vadd.xlane.f32.xlu2 %v3641_v35  ;;  %v3116_v57 = vmul.f32 %v5781_v36, %v3115_v44  ;;  %v5783_v45 = vpop.eup %5782  ;;  %v8904_v31 = vpop.xlane.xlu0 %3609  ;;  %v3210_v35 = vmul.f32 %v8896_v59, %v8896_v59  ;;  %v3164_v44 = vand.u32 2147483648, %v8873_v61  ;;  %v3907_v1 = vsel %vm3562_vm5, %v3823_v37, 0.0 }
 0x32f   : > { %v3527_v55 = vmul.f32 %v3503_v12, %v2495_v50  ;;  %v3154_v54 = vmul.f32 %v5783_v45, %v8873_v61  ;;  %vm3159_vm3 = vweird.f32 %v5783_v45 }
 0x330   : > { %v3117_v2 = vadd.f32 %v5781_v36, %v3116_v57  ;;  %v8915_v10 = vpop.xlane.xlu2 %3875  ;;  %vm3160_vm6 = vmor %vm3158_vm4, %vm3159_vm3  ;;  %v8929_v9 = vpop.xlane.xlu1 %3594 }
 0x331   : > { %v8891_v26 = vmul.f32 %v3527_v55, %v2322_v29  ;;  %v3155_v20 = vsub.f32 1.0, %v3154_v54  ;;  %v3141_v29 = vadd.f32 1.1283791, %v3140_v25  ;;  %v8922_v25 = vpop.f32.mrf.mxu3  ;;  %v3165_v54 = vor.u32 1.1754944e-38, %v3164_v44 }
 0x332   : > { %v3121_v50 = vsel %vm3120_vm1, %v5781_v36, %v3117_v2  ;;  %v3162_v36 = vand.u32 2147483647, %v8873_v61 }
 0x333   : > { %10088 = vst [vmem:[#allocation24_spill] sm:$0xff] %v8891_v26  ;;  %v3700_v34 = vsel %vm3562_vm5, %v8891_v26, 0.0  ;;  %v3938_v43 = vmul.f32 %v8891_v26, %v8891_v26  ;;  %v3126_v32 = vsel %vm3123_vm2, %v3125_v60, %v3121_v50  ;;  %v3156_v38 = vmul.f32 %v5783_v45, %v3155_v20 }
 0x334   : > { %3701 = vadd.xlane.f32.xlu1 %v3700_v34  ;;  %v3127_v55 = vmul.f32 %v3126_v32, %v3102_v8  ;;  %v8919_v34 = vmin.f32 %v3210_v35, 16.0  ;;  %v3142_v4 = vmul.f32 %v3141_v29, %v8736_v5  ;;  %v3176_v8 = vmul.f32 %v3175_v49, %v8867_v48 }
 0x335   : > { %v3988_v12 = vsel %vm3562_vm5, %v3938_v43, 0.0  ;;  %v3157_v2 = vadd.f32 %v5783_v45, %v3156_v38  ;;  %v3186_v43 = vadd.f32 0.014752088, %v3185_v47  ;;  %vm3163_vm7 = vcmp.eq.f32.partialorder %v3162_v36, 8.507059e+37 }
 0x336   : > { %3989 = vadd.xlane.f32.xlu0 %v3988_v12  ;;  %v5523_v57 = vclamps-f32 %v3127_v55, 1.0  ;;  %v3663_v50 = vpop.xlane.xlu0 %3662  ;;  %v3212_v32 = vmul.f32 2.1237322e-06, %v8919_v34  ;;  %v3177_v44 = vadd.f32 0.05243302, %v3176_v8 }
 0x337   : > { %v3161_v37 = vsel %vm3160_vm6, %v5783_v45, %v3157_v2  ;;  %v3187_v12 = vmul.f32 %v3186_v43, %v8867_v48  ;;  %v3741_v29 = vadd.f32 %v3663_v50, %v8783_v39  ;;  %v2328_v39 = vpop.f32.mrf.mxu2 }
 0x338   : > { %v3504_v60 = vadd.f32 1.0, %v5523_v57  ;;  %v3166_v61 = vsel %vm3163_vm7, %v3165_v54, %v3161_v37  ;;  %v3951_v49 = vpop.xlane.xlu2 %3950  ;;  %v2497_v57 = vmul.f32 0.5, %v8687_v21  ;;  %v8948_v21 = vmul.f32 0.70710677, %v8793_v24 }
 0x339   : > { %v3167_v20 = vmul.f32 %v3166_v61, %v3142_v4  ;;  %v3188_v55 = vadd.f32 0.112945676, %v3187_v12  ;;  %v8940_v43 = vmul.f32 0.0078125, %v3741_v29  ;;  %v8945_v50 = vpop.f32.mrf.mxu3  ;;  %v3223_v37 = vmul.f32 3.8918573e-05, %v8919_v34 }
 0x33a   : > { %v3528_v35 = vmul.f32 %v3504_v60, %v2496_v56  ;;  %v4029_v56 = vadd.f32 %v3951_v49, %v3855_v27  ;;  %v3178_v60 = vmul.f32 %v3177_v44, %v8867_v48  ;;  %v3250_v49 = vmul.f32 %v8948_v21, %v8948_v21 }
 0x33b   : > { %v5524_v47 = vclamps-f32 %v3167_v20, 1.0  ;;  %v3189_v45 = vmul.f32 %v3188_v55, %v8867_v48  ;;  %v3224_v20 = vadd.f32 0.001143296, %v3223_v37 }
 0x33c   : > { %3908 = vadd.xlane.f32.xlu1 %v3907_v1  ;;  %v8931_v5 = vmul.f32 %v3528_v35, %v2325_v33  ;;  %v3213_v1 = vadd.f32 0.00028619796, %v3212_v32  ;;  %v4061_v61 = vmul.f32 0.0078125, %v4029_v56  ;;  %v4093_v32 = vmul.f32 %v8940_v43, %v8940_v43 }
 0x33d   : > { %v3505_v2 = vadd.f32 1.0, %v5524_v47  ;;  %v3190_v33 = vadd.f32 0.4994258, %v3189_v45  ;;  %v3179_v55 = vadd.f32 0.18741608, %v3178_v60  ;;  %v8960_v47 = vpop.xlane.xlu1 %3863  ;;  %v10091_v60 = vld [vmem:[#allocation19_spill] sm:$0xff] }
 0x33e   : > { %10089 = vst [vmem:[#allocation20_spill] sm:$0xff] %v8931_v5  ;;  %v3703_v38 = vsel %vm3562_vm5, %v8931_v5, 0.0  ;;  %v3939_v36 = vmul.f32 %v8931_v5, %v8931_v5  ;;  %v3214_v12 = vmul.f32 %v3213_v1, %v8919_v34 }
 0x33f   : > { %3704 = vadd.xlane.f32.xlu2 %v3703_v38  ;;  %v3529_v54 = vmul.f32 %v3505_v2, %v2497_v57  ;;  %v3191_v8 = vmul.f32 %v3190_v33, %v8867_v48  ;;  %v4125_v57 = vsub.f32 %v4061_v61, %v4093_v32  ;;  %v3180_v1 = vmul.f32 %v3179_v55, %v8867_v48 }
 0x340   : > { %v3991_v4 = vsel %vm3562_vm5, %v3939_v36, 0.0  ;;  %v3215_v45 = vadd.f32 0.0036580483, %v3214_v12  ;;  %v3225_v36 = vmul.f32 %v3224_v20, %v8919_v34  ;;  %v3644_v61 = vsel %vm3562_vm5, %v10091_v60, 0.0 }
 0x341   : > { %v8952_v35 = vmul.f32 %v3529_v54, %v2328_v39  ;;  %v3192_v27 = vadd.f32 1.0, %v3191_v8  ;;  %v2466_v33 = vpop.f32.mrf.mxu3  ;;  %v8967_v39 = vmin.f32 %v3250_v49, 16.0  ;;  %v3824_v54 = vmul.f32 %v10091_v60, %v10091_v60 }
 0x342   : > { %v3226_v2 = vadd.f32 0.014752088, %v3225_v36  ;;  %v8973_v37 = vmax.f32 %v4125_v57, 1e-05  ;;  %v3181_v20 = vadd.f32 1.1283791, %v3180_v1 }
 0x343   : > { %10090 = vst [vmem:[#allocation45_spill] sm:$0xff] %v8952_v35  ;;  %v3706_v29 = vsel %vm3562_vm5, %v8952_v35, 0.0  ;;  %v3940_v44 = vmul.f32 %v8952_v35, %v8952_v35  ;;  %5784 = vrcp.f32 %v3192_v27  ;;  %v3252_v55 = vmul.f32 2.1237322e-06, %v8967_v39 }
 0x344   : > { %3992 = vadd.xlane.f32.xlu1 %v3991_v4  ;;  %3707 = vadd.xlane.f32.xlu0 %v3706_v29  ;;  %v3216_v4 = vmul.f32 %v3215_v45, %v8919_v34  ;;  %v3227_v8 = vmul.f32 %v3226_v2, %v8919_v34  ;;  %v8981_v29 = vmul.f32 0.70710677, %v8826_v14  ;;  %v3204_v45 = vand.u32 2147483648, %v3192_v27  ;;  %v4758_v2 = vpop.f32.mrf.mxu0 }
 0x345   : > { %v3994_v38 = vsel %vm3562_vm5, %v3940_v44, 0.0  ;;  %v8977_v32 = vpop.xlane.xlu1 %3603  ;;  %5786 = vrsqrt.f32 %v8973_v37  ;;  %v3202_v1 = vand.u32 2147483647, %v3192_v27  ;;  %v3253_v6 = vadd.f32 0.00028619796, %v3252_v55 }
 0x346   : > { %v3228_v48 = vadd.f32 0.112945676, %v3227_v8  ;;  %v3217_v49 = vadd.f32 0.05243302, %v3216_v4  ;;  %v4967_v8 = vpop.f32.mrf.mxu1  ;;  %vm3198_vm9 = vweird.f32 %v3192_v27  ;;  %vm4267_vm2 = vweird.f32 %v8973_v37 }
 0x347   : > { %3995 = vadd.xlane.f32.xlu2 %v3994_v38  ;;  %v3910_v38 = vsel %vm3562_vm5, %v3824_v54, 0.0  ;;  %v4968_v4 = vadd.f32 %v4967_v8, %v4758_v2  ;;  %v3290_v54 = vmul.f32 %v8981_v29, %v8981_v29  ;;  %vm3203_vm11 = vcmp.eq.f32.partialorder %v3202_v1, 8.507059e+37 }
 0x348   : > { %v3229_v36 = vmul.f32 %v3228_v48, %v8919_v34  ;;  %v3205_v48 = vor.u32 1.1754944e-38, %v3204_v45  ;;  %v3263_v45 = vmul.f32 3.8918573e-05, %v8967_v39  ;;  %v3254_v2 = vmul.f32 %v3253_v6, %v8967_v39  ;;  %v2331_v6 = vpop.f32.mrf.mxu2 }
 0x349   : > { %v5785_v56 = vpop.eup %5784  ;;  %v2468_v60 = vpop.f32.mrf.mxu3  ;;  %5063 = vst.msk [vmem:[%s8992_s15] sm:$0xff] %vm491_vm0, %v4968_v4 }
 0x34a   : > { %v3194_v12 = vmul.f32 %v5785_v56, %v3192_v27  ;;  %vm3199_vm8 = vweird.f32 %v5785_v56  ;;  %v3230_v33 = vadd.f32 0.4994258, %v3229_v36 }
 0x34b   : > { %vm3200_vm10 = vmor %vm3198_vm9, %vm3199_vm8  ;;  %v8996_v55 = vpop.eup %5786 }
 0x34c   : > { %v3195_v44 = vsub.f32 1.0, %v3194_v12  ;;  %3645 = vadd.xlane.f32.xlu0 %v3644_v61  ;;  %v3218_v61 = vmul.f32 %v3217_v49, %v8919_v34  ;;  %vm4268_vm1 = vweird.f32 %v8996_v55 }
 0x34d   : > { %v8998_v49 = vpop.xlane.xlu1 %3872  ;;  %vm4269_vm3 = vmor %vm4267_vm2, %vm4268_vm1 }
 0x34e   : > { %v3196_v57 = vmul.f32 %v5785_v56, %v3195_v44  ;;  %v3231_v44 = vmul.f32 %v3230_v33, %v8919_v34  ;;  %v2498_v33 = vmul.f32 0.5, %v8725_v23 }
 0x34f   : > { %3911 = vadd.xlane.f32.xlu2 %v3910_v38  ;;  %v3182_v38 = vmul.f32 %v3181_v20, %v8838_v30  ;;  %v9002_v30 = vmin.f32 %v3290_v54, 16.0 }
 0x350   : > { %v3197_v12 = vadd.f32 %v5785_v56, %v3196_v57  ;;  %v3232_v60 = vadd.f32 1.0, %v3231_v44  ;;  %v3219_v57 = vadd.f32 0.18741608, %v3218_v61 }
 0x351   : > { %v2470_v1 = vpop.f32.mrf.mxu3  ;;  %v3292_v61 = vmul.f32 2.1237322e-06, %v9002_v30 }
 0x352   : > { %v3201_v46 = vsel %vm3200_vm10, %v5785_v56, %v3197_v12  ;;  %v9004_v56 = vpop.xlane.xlu0 %3887  ;;  %5788 = vrcp.f32 %v3232_v60  ;;  %v3264_v12 = vadd.f32 0.001143296, %v3263_v45  ;;  %v3220_v4 = vmul.f32 %v3219_v57, %v8919_v34 }
 0x353   : > { %v3206_v27 = vsel %vm3203_vm11, %v3205_v48, %v3201_v46  ;;  %v4262_v46 = vmul.f32 %v8996_v55, %v8973_v37  ;;  %v3255_v48 = vadd.f32 0.0036580483, %v3254_v2  ;;  %vm3238_vm13 = vweird.f32 %v3232_v60 }
 0x354   : > { %v3207_v36 = vmul.f32 %v3206_v27, %v3182_v38  ;;  %v3265_v44 = vmul.f32 %v3264_v12, %v8967_v39  ;;  %v3221_v23 = vadd.f32 1.1283791, %v3220_v4 }
 0x355   : > { %v4263_v27 = vmul.f32 %v8996_v55, %v4262_v46  ;;  %v3256_v45 = vmul.f32 %v3255_v48, %v8967_v39 }
 0x356   : > { %v5525_v20 = vclamps-f32 %v3207_v36, 1.0  ;;  %v3666_v36 = vpop.xlane.xlu1 %3665  ;;  %v3266_v35 = vadd.f32 0.014752088, %v3265_v44 }
 0x357   : > { %v3742_v46 = vadd.f32 %v3666_v36, %v8801_v13  ;;  %v3257_v5 = vadd.f32 0.05243302, %v3256_v45  ;;  %v3222_v36 = vmul.f32 %v3221_v23, %v8896_v59  ;;  %v2499_v23 = vmul.f32 0.5, %v8767_v62 }
 0x358   : > { %v3506_v8 = vadd.f32 1.0, %v5525_v20  ;;  %v5789_v38 = vpop.eup %5788  ;;  %v3293_v20 = vadd.f32 0.00028619796, %v3292_v61 }
 0x359   : > { %v3234_v1 = vmul.f32 %v5789_v38, %v3232_v60  ;;  %v2472_v4 = vpop.f32.mrf.mxu3  ;;  %vm3239_vm12 = vweird.f32 %v5789_v38 }
 0x35a   : > { %v3530_v54 = vmul.f32 %v3506_v8, %v2498_v33  ;;  %v3267_v33 = vmul.f32 %v3266_v35, %v8967_v39  ;;  %v4264_v8 = vmul.f32 0.5, %v4263_v27  ;;  %v3954_v12 = vpop.xlane.xlu0 %3953  ;;  %vm3240_vm14 = vmor %vm3238_vm13, %vm3239_vm12 }
 0x35b   : > { %v3235_v57 = vsub.f32 1.0, %v3234_v1  ;;  %v9024_v1 = vmul.f32 0.70710677, %v8861_v51  ;;  %v4030_v35 = vadd.f32 %v3954_v12, %v8812_v58 }
 0x35c   : > { %v9013_v0 = vmul.f32 %v3530_v54, %v2331_v6  ;;  %v3242_v6 = vand.u32 2147483647, %v3232_v60  ;;  %v3244_v54 = vand.u32 2147483648, %v3232_v60  ;;  %v3268_v61 = vadd.f32 0.112945676, %v3267_v33 }
 0x35d   : > { %v3236_v44 = vmul.f32 %v5789_v38, %v3235_v57  ;;  %v9030_v57 = vmul.f32 0.0078125, %v3742_v46  ;;  %v4265_v33 = vsub.f32 1.5, %v4264_v8  ;;  %v4062_v12 = vmul.f32 0.0078125, %v4030_v35 }
 0x35e   : > { %10092 = vst [vmem:[#allocation12_spill] sm:$0xff] %v9013_v0  ;;  %v3709_v34 = vsel %vm3562_vm5, %v9013_v0, 0.0  ;;  %v3941_v2 = vmul.f32 %v9013_v0, %v9013_v0  ;;  %v3269_v13 = vmul.f32 %v3268_v61, %v8967_v39  ;;  %vm3243_vm15 = vcmp.eq.f32.partialorder %v3242_v6, 8.507059e+37 }
 0x35f   : > { %3710 = vadd.xlane.f32.xlu1 %v3709_v34  ;;  %v3237_v27 = vadd.f32 %v5789_v38, %v3236_v44  ;;  %v3294_v34 = vmul.f32 %v3293_v20, %v9002_v30  ;;  %v10093_v44 = vld [vmem:[#allocation30_spill] sm:$0xff]  ;;  %v3258_v20 = vmul.f32 %v3257_v5, %v8967_v39  ;;  %v4094_v8 = vmul.f32 %v9030_v57, %v9030_v57  ;;  %v10095_v5 = vld [vmem:[#allocation37_spill] sm:$0xff] }
 0x360   : > { %v3997_v48 = vsel %vm3562_vm5, %v3941_v2, 0.0  ;;  %v3245_v2 = vor.u32 1.1754944e-38, %v3244_v54  ;;  %v3270_v4 = vadd.f32 0.4994258, %v3269_v13  ;;  %v3647_v61 = vsel %vm3562_vm5, %v10093_v44, 0.0  ;;  %v10094_v13 = vld [vmem:[#allocation26_spill] sm:$0xff] }
 0x361   : > { %3998 = vadd.xlane.f32.xlu0 %v3997_v48  ;;  %v3241_v45 = vsel %vm3240_vm14, %v5789_v38, %v3237_v27  ;;  %v3330_v48 = vmul.f32 %v9024_v1, %v9024_v1  ;;  %v3295_v46 = vadd.f32 0.0036580483, %v3294_v34  ;;  %v2474_v38 = vpop.f32.mrf.mxu3  ;;  %v4266_v35 = vmul.f32 %v8996_v55, %v4265_v33  ;;  %v2334_v33 = vpop.f32.mrf.mxu2 }
 0x362   : > { %v3246_v58 = vsel %vm3243_vm15, %v3245_v2, %v3241_v45  ;;  %v3271_v59 = vmul.f32 %v3270_v4, %v8967_v39  ;;  %v4509_v62 = vsub.f32 %v10094_v13, %v8940_v43  ;;  %v4126_v34 = vsub.f32 %v4062_v12, %v4094_v8  ;;  %v9059_v38 = vpop.xlane.xlu1 %3890 }
 0x363   : > { %v3247_v60 = vmul.f32 %v3246_v58, %v3222_v36  ;;  %v9045_v27 = vmin.f32 %v3330_v48, 16.0  ;;  %v4573_v36 = vsub.f32 %v10095_v5, %v8940_v43  ;;  %v3303_v45 = vmul.f32 3.8918573e-05, %v9002_v30  ;;  %v9054_v58 = vpop.xlane.xlu2 %3624 }
 0x364   : > { %v9042_v54 = vadd.f32 1.0, %v3271_v59  ;;  %v3259_v4 = vadd.f32 0.18741608, %v3258_v20  ;;  %v4270_v48 = vsel %vm4269_vm3, %v8996_v55, %v4266_v35  ;;  %v9061_v12 = vmax.f32 %v4126_v34, 1e-05 }
 0x365   : > { %v5526_v6 = vclamps-f32 %v3247_v60, 1.0  ;;  %v3296_v60 = vmul.f32 %v3295_v46, %v9002_v30  ;;  %v4605_v59 = vmul.f32 %v4573_v36, %v4270_v48  ;;  %v4541_v43 = vmul.f32 %v4509_v62, %v4270_v48 }
 0x366   : > { %5790 = vrcp.f32 %v9042_v54  ;;  %v3332_v37 = vmul.f32 2.1237322e-06, %v9045_v27  ;;  %v3304_v20 = vadd.f32 0.001143296, %v3303_v45  ;;  %v3260_v55 = vmul.f32 %v3259_v4, %v8967_v39 }
 0x367   : > { %3648 = vadd.xlane.f32.xlu1 %v3647_v61  ;;  %v3507_v2 = vadd.f32 1.0, %v5526_v6  ;;  %5541 = vmatmul.msk.f32.gmra.mxu0 %vm3562_vm5, %v4605_v59  ;;  %v9069_v46 = vmul.f32 0.70710677, %v8889_v17  ;;  %v3297_v35 = vadd.f32 0.05243302, %v3296_v60  ;;  %5792 = vrsqrt.f32 %v9061_v12 }
 0x368   : > { %5573 = vmatmul.msk.f32.gmra.mxu1 %vm3562_vm5, %v4541_v43  ;;  %v3305_v5 = vmul.f32 %v3304_v20, %v9002_v30  ;;  %v3333_v36 = vadd.f32 0.00028619796, %v3332_v37  ;;  %v3284_v60 = vand.u32 2147483648, %v9042_v54  ;;  %v3282_v20 = vand.u32 2147483647, %v9042_v54 }
 0x369   : > { %v3531_v61 = vmul.f32 %v3507_v2, %v2499_v23  ;;  %v2476_v23 = vpop.f32.mrf.mxu3  ;;  %v3370_v45 = vmul.f32 %v9069_v46, %v9069_v46  ;;  %v3298_v48 = vmul.f32 %v3297_v35, %v9002_v30  ;;  %vm3278_vm6 = vweird.f32 %v9042_v54 }
 0x36a   : > { %v3306_v2 = vadd.f32 0.014752088, %v3305_v5  ;;  %v3334_v59 = vmul.f32 %v3333_v36, %v9045_v27  ;;  %v3285_v36 = vor.u32 1.1754944e-38, %v3284_v60  ;;  %vm3283_vm8 = vcmp.eq.f32.partialorder %v3282_v20, 8.507059e+37  ;;  %v4970_v60 = vpop.f32.mrf.mxu1 }
 0x36b   : > { %v9063_v8 = vmul.f32 %v3531_v61, %v2334_v33  ;;  %v3261_v33 = vadd.f32 1.1283791, %v3260_v55  ;;  %v3669_v43 = vpop.xlane.xlu2 %3668  ;;  %vm4277_vm9 = vweird.f32 %v9061_v12 }
 0x36c   : > { %v5791_v6 = vpop.eup %5790  ;;  %v3307_v61 = vmul.f32 %v3306_v2, %v9002_v30 }
 0x36d   : > { %10096 = vst [vmem:[#allocation26_spill] sm:$0xff] %v9063_v8  ;;  %v3712_v13 = vsel %vm3562_vm5, %v9063_v8, 0.0  ;;  %v3942_v62 = vmul.f32 %v9063_v8, %v9063_v8  ;;  %v3274_v34 = vmul.f32 %v5791_v6, %v9042_v54  ;;  %vm3279_vm4 = vweird.f32 %v5791_v6  ;;  %v9089_v35 = vpop.eup %5792 }
 0x36e   : > { %3713 = vadd.xlane.f32.xlu2 %v3712_v13  ;;  %v3308_v23 = vadd.f32 0.112945676, %v3307_v61  ;;  %v9086_v13 = vmin.f32 %v3370_v45, 16.0  ;;  %vm3280_vm7 = vmor %vm3278_vm6, %vm3279_vm4  ;;  %v3335_v8 = vadd.f32 0.0036580483, %v3334_v59  ;;  %vm4278_vm10 = vweird.f32 %v9089_v35 }
 0x36f   : > { %v4000_v39 = vsel %vm3562_vm5, %v3942_v62, 0.0  ;;  %v3275_v4 = vsub.f32 1.0, %v3274_v34  ;;  %v3957_v62 = vpop.xlane.xlu1 %3956  ;;  %v3262_v34 = vmul.f32 %v3261_v33, %v8948_v21  ;;  %vm4279_vm12 = vmor %vm4277_vm9, %vm4278_vm10 }
 0x370   : > { %4001 = vadd.xlane.f32.xlu1 %v4000_v39  ;;  %v3743_v39 = vadd.f32 %v3669_v43, %v8929_v9  ;;  %v3309_v2 = vmul.f32 %v3308_v23, %v9002_v30  ;;  %v4031_v45 = vadd.f32 %v3957_v62, %v8824_v22  ;;  %v3372_v54 = vmul.f32 2.1237322e-06, %v9086_v13  ;;  %v4761_v43 = vpop.f32.mrf.mxu0 }
 0x371   : > { %v3276_v37 = vmul.f32 %v5791_v6, %v3275_v4  ;;  %v2478_v55 = vpop.f32.mrf.mxu3  ;;  %v3299_v4 = vadd.f32 0.18741608, %v3298_v48  ;;  %v3343_v48 = vmul.f32 3.8918573e-05, %v9045_v27  ;;  %v3336_v59 = vmul.f32 %v3335_v8, %v9045_v27  ;;  %v2337_v8 = vpop.f32.mrf.mxu2 }
 0x372   : > { %v3310_v0 = vadd.f32 0.4994258, %v3309_v2  ;;  %v4272_v55 = vmul.f32 %v9089_v35, %v9061_v12  ;;  %v9098_v33 = vmul.f32 0.0078125, %v3743_v39  ;;  %v4063_v20 = vmul.f32 0.0078125, %v4031_v45 }
 0x373   : > { %v3277_v5 = vadd.f32 %v5791_v6, %v3276_v37  ;;  %v4971_v62 = vadd.f32 %v4970_v60, %v4761_v43  ;;  %v3373_v39 = vadd.f32 0.00028619796, %v3372_v54  ;;  %v3337_v54 = vadd.f32 0.05243302, %v3336_v59 }
 0x374   : > { %v3311_v9 = vmul.f32 %v3310_v0, %v9002_v30  ;;  %v4273_v0 = vmul.f32 %v9089_v35, %v4272_v55 }
 0x375   : > { %v3281_v61 = vsel %vm3280_vm7, %v5791_v6, %v3277_v5  ;;  %v3300_v6 = vmul.f32 %v3299_v4, %v9002_v30  ;;  %v3344_v5 = vadd.f32 0.001143296, %v3343_v48  ;;  %v4095_v30 = vmul.f32 %v9098_v33, %v9098_v33  ;;  %5064 = vst.msk [vmem:[%s8992_s15 + $0x8] sm:$0xff] %vm491_vm0, %v4971_v62  ;;  %v3672_v4 = vpop.xlane.xlu0 %3671 }
 0x376   : > { %v3286_v37 = vsel %vm3283_vm8, %v3285_v36, %v3281_v61  ;;  %v9104_v23 = vadd.f32 1.0, %v3311_v9  ;;  %v9109_v61 = vmul.f32 0.70710677, %v8922_v25  ;;  %v4274_v9 = vmul.f32 0.5, %v4273_v0 }
 0x377   : > { %v3287_v21 = vmul.f32 %v3286_v37, %v3262_v34  ;;  %v2500_v34 = vmul.f32 0.5, %v8793_v24  ;;  %v3345_v24 = vmul.f32 %v3344_v5, %v9045_v27  ;;  %v3301_v37 = vadd.f32 1.1283791, %v3300_v6 }
 0x378   : > { %5794 = vrcp.f32 %v9104_v23  ;;  %v4127_v55 = vsub.f32 %v4063_v20, %v4095_v30  ;;  %v3338_v20 = vmul.f32 %v3337_v54, %v9045_v27  ;;  %vm3318_vm13 = vweird.f32 %v9104_v23 }
 0x379   : > { %v5527_v22 = vclamps-f32 %v3287_v21, 1.0  ;;  %v2480_v2 = vpop.f32.mrf.mxu3  ;;  %v3374_v21 = vmul.f32 %v3373_v39, %v9086_v13  ;;  %v3346_v48 = vadd.f32 0.014752088, %v3345_v24  ;;  %v3302_v59 = vmul.f32 %v3301_v37, %v8981_v29  ;;  %v10099_v29 = vld [vmem:[#allocation38_spill] sm:$0xff] }
 0x37a   : > { %v3825_v39 = vmul.f32 %v10093_v44, %v10093_v44  ;;  %v4574_v37 = vsub.f32 %v10099_v29, %v9030_v57 }
 0x37b   : > { %v3508_v36 = vadd.f32 1.0, %v5527_v22  ;;  %v3410_v22 = vmul.f32 %v9109_v61, %v9109_v61  ;;  %v3347_v5 = vmul.f32 %v3346_v48, %v9045_v27  ;;  %v3375_v0 = vadd.f32 0.0036580483, %v3374_v21  ;;  %v3960_v21 = vpop.xlane.xlu2 %3959 }
 0x37c   : > { %v3744_v48 = vadd.f32 %v3672_v4, %v8835_v42 }
 0x37d   : > { %v3532_v45 = vmul.f32 %v3508_v36, %v2500_v34  ;;  %v9129_v34 = vmax.f32 %v4127_v55, 1e-05  ;;  %v4275_v36 = vsub.f32 1.5, %v4274_v9  ;;  %v3348_v54 = vadd.f32 0.112945676, %v3347_v5 }
 0x37e   : > { %v5795_v6 = vpop.eup %5794  ;;  %v9142_v55 = vmul.f32 0.70710677, %v8945_v50  ;;  %v3322_v5 = vand.u32 2147483647, %v9104_v23  ;;  %v9162_v44 = vmul.f32 0.0078125, %v3744_v48  ;;  %v4973_v48 = vpop.f32.mrf.mxu1 }
 0x37f   : > { %v9118_v60 = vmul.f32 %v3532_v45, %v2337_v8  ;;  %v3314_v30 = vmul.f32 %v5795_v6, %v9104_v23  ;;  %v9135_v8 = vmin.f32 %v3410_v22, 16.0  ;;  %v10098_v45 = vld [vmem:[#allocation28_spill] sm:$0xff]  ;;  %5796 = vrsqrt.f32 %v9129_v34 }
 0x380   : > { %v4510_v24 = vsub.f32 %v10098_v45, %v9030_v57  ;;  %v3324_v22 = vand.u32 2147483648, %v9104_v23  ;;  %v9150_v57 = vpop.xlane.xlu0 %3627  ;;  %vm3319_vm11 = vweird.f32 %v5795_v6  ;;  %v4276_v12 = vmul.f32 %v9089_v35, %v4275_v36  ;;  %v10100_v45 = vld [vmem:[#allocation31_spill] sm:$0xff] }
 0x381   : > { %10097 = vst [vmem:[#allocation37_spill] sm:$0xff] %v9118_v60  ;;  %v3715_v43 = vsel %vm3562_vm5, %v9118_v60, 0.0  ;;  %v3943_v62 = vmul.f32 %v9118_v60, %v9118_v60  ;;  %v3315_v9 = vsub.f32 1.0, %v3314_v30  ;;  %v3913_v30 = vsel %vm3562_vm5, %v3825_v39, 0.0  ;;  %v3675_v60 = vpop.xlane.xlu1 %3674  ;;  %vm3320_vm14 = vmor %vm3318_vm13, %vm3319_vm11 }
 0x382   : > { %3716 = vadd.xlane.f32.xlu0 %v3715_v43  ;;  %v3349_v43 = vmul.f32 %v3348_v54, %v9045_v27  ;;  %v3650_v42 = vsel %vm3562_vm5, %v10100_v45, 0.0  ;;  %v3450_v29 = vmul.f32 %v9142_v55, %v9142_v55  ;;  %v4032_v36 = vadd.f32 %v3960_v21, %v8960_v47 }
 0x383   : > { %v4003_v2 = vsel %vm3562_vm5, %v3943_v62, 0.0  ;;  %v3316_v62 = vmul.f32 %v5795_v6, %v3315_v9  ;;  %v4280_v9 = vsel %vm4279_vm12, %v9089_v35, %v4276_v12  ;;  %v3325_v39 = vor.u32 1.1754944e-38, %v3324_v22  ;;  %v4764_v12 = vpop.f32.mrf.mxu0 }
 0x384   : > { %4004 = vadd.xlane.f32.xlu2 %v4003_v2  ;;  %v3412_v2 = vmul.f32 2.1237322e-06, %v9135_v8  ;;  %v3350_v4 = vadd.f32 0.4994258, %v3349_v43  ;;  %vm3323_vm15 = vcmp.eq.f32.partialorder %v3322_v5, 8.507059e+37  ;;  %v4606_v40 = vmul.f32 %v4574_v37, %v4280_v9 }
 0x385   : > { %v3317_v54 = vadd.f32 %v5795_v6, %v3316_v62  ;;  %v4542_v52 = vmul.f32 %v4510_v24, %v4280_v9  ;;  %v9167_v62 = vpop.eup %5796  ;;  %v3339_v47 = vadd.f32 0.18741608, %v3338_v20  ;;  %v3376_v21 = vmul.f32 %v3375_v0, %v9086_v13  ;;  %v9179_v20 = vpop.xlane.xlu2 %3893 }
 0x386   : > { %v3351_v26 = vmul.f32 %v3350_v4, %v9045_v27  ;;  %v3413_v53 = vadd.f32 0.00028619796, %v3412_v2  ;;  %5542 = vmatmul.msk.f32.gmra.mxu0 %vm3562_vm5, %v4606_v40  ;;  %v4064_v24 = vmul.f32 0.0078125, %v4032_v36  ;;  %v4096_v37 = vmul.f32 %v9162_v44, %v9162_v44 }
 0x387   : > { %v3321_v43 = vsel %vm3320_vm14, %v5795_v6, %v3317_v54  ;;  %5574 = vmatmul.msk.f32.gmra.mxu1 %vm3562_vm5, %v4542_v52  ;;  %v9174_v6 = vmin.f32 %v3450_v29, 16.0  ;;  %v4974_v0 = vadd.f32 %v4973_v48, %v4764_v12  ;;  %v3383_v40 = vmul.f32 3.8918573e-05, %v9086_v13 }
 0x388   : > { %v3326_v23 = vsel %vm3323_vm15, %v3325_v39, %v3321_v43  ;;  %v9169_v35 = vadd.f32 1.0, %v3351_v26  ;;  %v2340_v26 = vpop.f32.mrf.mxu2  ;;  %v2501_v52 = vmul.f32 0.5, %v8826_v14  ;;  %v3340_v2 = vmul.f32 %v3339_v47, %v9045_v27  ;;  %v3963_v4 = vpop.xlane.xlu0 %3962 }
 0x389   : > { %v3327_v22 = vmul.f32 %v3326_v23, %v3302_v59  ;;  %v4282_v59 = vmul.f32 %v9167_v62, %v9129_v34  ;;  %5065 = vst.msk [vmem:[%s8992_s15 + $0x10] sm:$0xff] %vm491_vm0, %v4974_v0  ;;  %v3377_v29 = vadd.f32 0.05243302, %v3376_v21  ;;  %v3452_v54 = vmul.f32 2.1237322e-06, %v9174_v6  ;;  %v9195_v27 = vpop.xlane.xlu1 %3630 }
 0x38a   : > { %3914 = vadd.xlane.f32.xlu0 %v3913_v30  ;;  %5798 = vrcp.f32 %v9169_v35  ;;  %v3414_v30 = vmul.f32 %v3413_v53, %v9135_v8  ;;  %v4128_v9 = vsub.f32 %v4064_v24, %v4096_v37  ;;  %v3384_v36 = vadd.f32 0.001143296, %v3383_v40 }
 0x38b   : > { %v5528_v5 = vclamps-f32 %v3327_v22, 1.0  ;;  %v3745_v39 = vadd.f32 %v3675_v60, %v8855_v15  ;;  %v9192_v48 = vmul.f32 0.5, %v8861_v51  ;;  %v4283_v14 = vmul.f32 %v9167_v62, %v4282_v59 }
 0x38c   : > { %3651 = vadd.xlane.f32.xlu2 %v3650_v42  ;;  %v4033_v53 = vadd.f32 %v3963_v4, %v8869_v28  ;;  %v3385_v12 = vmul.f32 %v3384_v36, %v9086_v13  ;;  %v3341_v47 = vadd.f32 1.1283791, %v3340_v2  ;;  %v3415_v21 = vadd.f32 0.0036580483, %v3414_v30 }
 0x38d   : > { %v3509_v42 = vadd.f32 1.0, %v5528_v5  ;;  %v3378_v15 = vmul.f32 %v3377_v29, %v9086_v13  ;;  %v3453_v60 = vadd.f32 0.00028619796, %v3452_v54  ;;  %v9203_v37 = vmax.f32 %v4128_v9, 1e-05  ;;  %v3678_v29 = vpop.xlane.xlu2 %3677 }
 0x38e   : > { %v3386_v51 = vadd.f32 0.014752088, %v3385_v12  ;;  %v9205_v5 = vmul.f32 0.0078125, %v3745_v39  ;;  %v4284_v40 = vmul.f32 0.5, %v4283_v14  ;;  %v3364_v2 = vand.u32 2147483648, %v9169_v35 }
 0x38f   : > { %v3533_v43 = vmul.f32 %v3509_v42, %v2501_v52  ;;  %v3362_v4 = vand.u32 2147483647, %v9169_v35  ;;  %v3416_v9 = vmul.f32 %v3415_v21, %v9135_v8  ;;  %v3454_v36 = vmul.f32 %v3453_v60, %v9174_v6 }
 0x390   : > { %v5799_v23 = vpop.eup %5798  ;;  %v9211_v52 = vpop.f32.mrf.mxu2  ;;  %v3387_v30 = vmul.f32 %v3386_v51, %v9086_v13  ;;  %v3826_v39 = vmul.f32 %v10100_v45, %v10100_v45  ;;  %5800 = vrsqrt.f32 %v9203_v37  ;;  %v4097_v14 = vmul.f32 %v9205_v5, %v9205_v5 }
 0x391   : > { %v9199_v22 = vmul.f32 %v3533_v43, %v2340_v26  ;;  %v3354_v24 = vmul.f32 %v5799_v23, %v9169_v35  ;;  %v4065_v26 = vmul.f32 0.0078125, %v4033_v53  ;;  %vm3359_vm1 = vweird.f32 %v5799_v23 }
 0x392   : > { %v3388_v43 = vadd.f32 0.112945676, %v3387_v30  ;;  %vm3358_vm2 = vweird.f32 %v9169_v35  ;;  %v3342_v12 = vmul.f32 %v3341_v47, %v9024_v1  ;;  %v3365_v21 = vor.u32 1.1754944e-38, %v3364_v2  ;;  %v10101_v2 = vld [vmem:[#allocation15_spill] sm:$0xff] }
 0x393   : > { %v3718_v0 = vsel %vm3562_vm5, %v9199_v22, 0.0  ;;  %v3355_v28 = vsub.f32 1.0, %v3354_v24  ;;  %v3944_v59 = vmul.f32 %v9199_v22, %v9199_v22  ;;  %v4285_v24 = vsub.f32 1.5, %v4284_v40  ;;  %vm3360_vm3 = vmor %vm3358_vm2, %vm3359_vm1  ;;  %v3681_v40 = vpop.xlane.xlu0 %3680 }
 0x394   : > { %3719 = vadd.xlane.f32.xlu1 %v3718_v0  ;;  %v3389_v60 = vmul.f32 %v3388_v43, %v9086_v13  ;;  %v3379_v51 = vadd.f32 0.18741608, %v3378_v15  ;;  %v4129_v0 = vsub.f32 %v4065_v26, %v4097_v14  ;;  %vm3363_vm4 = vcmp.eq.f32.partialorder %v3362_v4, 8.507059e+37  ;;  %v10102_v4 = vld [vmem:[#allocation10_spill] sm:$0xff] }
 0x395   : > { %v3356_v42 = vmul.f32 %v5799_v23, %v3355_v28  ;;  %v4006_v54 = vsel %vm3562_vm5, %v3944_v59, 0.0  ;;  %vm4288_vm6 = vweird.f32 %v9167_v62  ;;  %v3916_v30 = vsel %vm3562_vm5, %v3826_v39, 0.0 }
 0x396   : > { %4007 = vadd.xlane.f32.xlu0 %v4006_v54  ;;  %v3390_v54 = vadd.f32 0.4994258, %v3389_v60  ;;  %v3417_v35 = vadd.f32 0.05243302, %v3416_v9  ;;  %v3455_v45 = vadd.f32 0.0036580483, %v3454_v36  ;;  %v3746_v47 = vadd.f32 %v3678_v29, %v8977_v32  ;;  %v9236_v26 = vpop.eup %5800 }
 0x397   : > { %v3357_v53 = vadd.f32 %v5799_v23, %v3356_v42  ;;  %v3966_v42 = vpop.xlane.xlu1 %3965  ;;  %v4511_v43 = vsub.f32 %v10101_v2, %v9098_v33  ;;  %vm4287_vm7 = vweird.f32 %v9129_v34  ;;  %v4286_v15 = vmul.f32 %v9167_v62, %v4285_v24 }
 0x398   : > { %v4575_v9 = vsub.f32 %v10102_v4, %v9098_v33  ;;  %vm4289_vm8 = vmor %vm4287_vm7, %vm4288_vm6  ;;  %v9242_v32 = vmax.f32 %v4129_v0, 1e-05  ;;  %v4034_v36 = vadd.f32 %v3966_v42, %v8878_v63  ;;  %v3747_v34 = vadd.f32 %v3681_v40, %v8886_v16  ;;  %v9246_v39 = vpop.f32.mrf.mxu2 }
 0x399   : > { %v3361_v28 = vsel %vm3360_vm3, %v5799_v23, %v3357_v53  ;;  %v3391_v23 = vmul.f32 %v3390_v54, %v9086_v13  ;;  %v4290_v53 = vsel %vm4289_vm8, %v9167_v62, %v4286_v15  ;;  %v9252_v33 = vmul.f32 0.0078125, %v3746_v47 }
 0x39a   : > { %v3366_v59 = vsel %vm3363_vm4, %v3365_v21, %v3361_v28  ;;  %v3969_v21 = vpop.xlane.xlu2 %3968  ;;  %v4607_v60 = vmul.f32 %v4575_v9, %v4290_v53  ;;  %v4543_v0 = vmul.f32 %v4511_v43, %v4290_v53  ;;  %v4292_v28 = vmul.f32 %v9236_v26, %v9203_v37 }
 0x39b   : > { %v3367_v1 = vmul.f32 %v3366_v59, %v3342_v12  ;;  %v9248_v14 = vadd.f32 1.0, %v3391_v23  ;;  %v3423_v12 = vmul.f32 3.8918573e-05, %v9135_v8  ;;  %v3380_v63 = vmul.f32 %v3379_v51, %v9086_v13 }
 0x39c   : > { %3917 = vadd.xlane.f32.xlu1 %v3916_v30  ;;  %v4066_v59 = vmul.f32 0.0078125, %v4034_v36  ;;  %5543 = vmatmul.msk.f32.gmra.mxu0 %vm3562_vm5, %v4607_v60  ;;  %v3418_v30 = vmul.f32 %v3417_v35, %v9135_v8  ;;  %v9262_v42 = vmul.f32 0.0078125, %v3747_v34  ;;  %v4035_v54 = vadd.f32 %v3969_v21, %v8998_v49  ;;  %v9282_v36 = vpop.xlane.xlu0 %3896 }
 0x39d   : > { %v5529_v29 = vclamps-f32 %v3367_v1, 1.0  ;;  %5802 = vrcp.f32 %v9248_v14  ;;  %5575 = vmatmul.msk.f32.gmra.mxu1 %vm3562_vm5, %v4543_v0  ;;  %v3424_v62 = vadd.f32 0.001143296, %v3423_v12  ;;  %v3456_v1 = vmul.f32 %v3455_v45, %v9174_v6 }
 0x39e   : > { %5804 = vrsqrt.f32 %v9242_v32  ;;  %v4293_v51 = vmul.f32 %v9236_v26, %v4292_v28  ;;  %v3381_v40 = vadd.f32 1.1283791, %v3380_v63  ;;  %v3419_v43 = vadd.f32 0.18741608, %v3418_v30 }
 0x39f   : > { %v3510_v24 = vadd.f32 1.0, %v5529_v29  ;;  %v3425_v47 = vmul.f32 %v3424_v62, %v9135_v8  ;;  %v4099_v23 = vmul.f32 %v9262_v42, %v9262_v42  ;;  %v3457_v4 = vadd.f32 0.05243302, %v3456_v1 }
 0x3a0   : > { %v4294_v34 = vmul.f32 0.5, %v4293_v51  ;;  %v9284_v53 = vpop.f32.mrf.mxu2  ;;  %v3382_v21 = vmul.f32 %v3381_v40, %v9069_v46  ;;  %v3420_v28 = vmul.f32 %v3419_v43, %v9135_v8  ;;  %v3404_v63 = vand.u32 2147483648, %v9248_v14 }
 0x3a1   : > { %v3534_v16 = vmul.f32 %v3510_v24, %v9192_v48  ;;  %v4098_v48 = vmul.f32 %v9252_v33, %v9252_v33  ;;  %v3426_v15 = vadd.f32 0.014752088, %v3425_v47  ;;  %v3458_v30 = vmul.f32 %v3457_v4, %v9174_v6 }
 0x3a2   : > { %v3402_v1 = vand.u32 2147483647, %v9248_v14  ;;  %v4295_v46 = vsub.f32 1.5, %v4294_v34  ;;  %vm3398_vm10 = vweird.f32 %v9248_v14  ;;  %vm4298_vm11 = vweird.f32 %v9236_v26  ;;  %v4767_v34 = vpop.f32.mrf.mxu0 }
 0x3a3   : > { %v9268_v13 = vmul.f32 %v3534_v16, %v9211_v52  ;;  %v4130_v2 = vsub.f32 %v4066_v59, %v4098_v48  ;;  %v5803_v45 = vpop.eup %5802  ;;  %v4067_v52 = vmul.f32 0.0078125, %v4035_v54  ;;  %v3427_v12 = vmul.f32 %v3426_v15, %v9135_v8  ;;  %v3684_v59 = vpop.xlane.xlu1 %3683  ;;  %v10103_v48 = vld [vmem:[#allocation17_spill] sm:$0xff] }
 0x3a4   : > { %v3394_v9 = vmul.f32 %v5803_v45, %v9248_v14  ;;  %v9287_v24 = vpop.eup %5804  ;;  %vm3399_vm9 = vweird.f32 %v5803_v45  ;;  %v4512_v51 = vsub.f32 %v10103_v48, %v9162_v44  ;;  %vm4297_vm13 = vweird.f32 %v9203_v37  ;;  %v3972_v37 = vpop.xlane.xlu0 %3971 }
 0x3a5   : > { %v3721_v35 = vsel %vm3562_vm5, %v9268_v13, 0.0  ;;  %v3945_v49 = vmul.f32 %v9268_v13, %v9268_v13  ;;  %v9290_v60 = vmax.f32 %v4130_v2, 1e-05  ;;  %v4131_v16 = vsub.f32 %v4067_v52, %v4099_v23  ;;  %vm3400_vm12 = vmor %vm3398_vm10, %vm3399_vm9  ;;  %v10104_v23 = vld [vmem:[#allocation44_spill] sm:$0xff] }
 0x3a6   : > { %3722 = vadd.xlane.f32.xlu2 %v3721_v35  ;;  %v3395_v0 = vsub.f32 1.0, %v3394_v9  ;;  %v3428_v62 = vadd.f32 0.112945676, %v3427_v12  ;;  %v4302_v47 = vmul.f32 %v9287_v24, %v9242_v32  ;;  %v3748_v2 = vadd.f32 %v3684_v59, %v8904_v31  ;;  %v4976_v12 = vpop.f32.mrf.mxu1  ;;  %vm4299_vm15 = vmor %vm4297_vm13, %vm4298_vm11 }
 0x3a7   : > { %v4009_v29 = vsel %vm3562_vm5, %v3945_v49, 0.0  ;;  %5806 = vrsqrt.f32 %v9290_v60  ;;  %v3405_v49 = vor.u32 1.1754944e-38, %v3404_v63  ;;  %v9305_v43 = vmax.f32 %v4131_v16, 1e-05 }
 0x3a8   : > { %4010 = vadd.xlane.f32.xlu1 %v4009_v29  ;;  %v3396_v54 = vmul.f32 %v5803_v45, %v3395_v0  ;;  %v3429_v40 = vmul.f32 %v3428_v62, %v9135_v8  ;;  %v4576_v15 = vsub.f32 %v10104_v23, %v9162_v44  ;;  %vm3403_vm14 = vcmp.eq.f32.partialorder %v3402_v1, 8.507059e+37  ;;  %v9323_v62 = vpop.f32.mrf.mxu2 }
 0x3a9   : > { %v4303_v9 = vmul.f32 %v9287_v24, %v4302_v47  ;;  %v4296_v31 = vmul.f32 %v9236_v26, %v4295_v46  ;;  %v9315_v63 = vmul.f32 0.0078125, %v3748_v2  ;;  %v4977_v44 = vadd.f32 %v4976_v12, %v4767_v34 }
 0x3aa   : > { %v3397_v35 = vadd.f32 %v5803_v45, %v3396_v54  ;;  %v3430_v52 = vadd.f32 0.4994258, %v3429_v40  ;;  %5808 = vrsqrt.f32 %v9305_v43  ;;  %v4036_v59 = vadd.f32 %v3972_v37, %v8915_v10 }
 0x3ab   : > { %5066 = vst.msk [vmem:[%s8992_s15 + $0x18] sm:$0xff] %vm491_vm0, %v4977_v44  ;;  %v2503_v47 = vmul.f32 0.5, %v8889_v17  ;;  %v4100_v10 = vmul.f32 %v9315_v63, %v9315_v63  ;;  %v3421_v2 = vadd.f32 1.1283791, %v3420_v28  ;;  %v9345_v34 = vmul.f32 0.5, %v8922_v25  ;;  %v9347_v12 = vpop.xlane.xlu1 %3899 }
 0x3ac   : > { %v3401_v4 = vsel %vm3400_vm12, %v5803_v45, %v3397_v35  ;;  %v3431_v14 = vmul.f32 %v3430_v52, %v9135_v8  ;;  %v3463_v45 = vmul.f32 3.8918573e-05, %v9174_v6  ;;  %v4300_v8 = vsel %vm4299_vm15, %v9236_v26, %v4296_v31  ;;  %v9331_v35 = vpop.xlane.xlu2 %3633  ;;  %v10105_v52 = vld [vmem:[#allocation33_spill] sm:$0xff] }
 0x3ad   : > { %v3406_v29 = vsel %vm3403_vm14, %v3405_v49, %v3401_v4  ;;  %v9325_v54 = vpop.eup %5806  ;;  %v4544_v48 = vmul.f32 %v4512_v51, %v4300_v8  ;;  %v4068_v26 = vmul.f32 0.0078125, %v4036_v59  ;;  %v3459_v49 = vadd.f32 0.18741608, %v3458_v30 }
 0x3ae   : > { %v3407_v0 = vmul.f32 %v3406_v29, %v3382_v21  ;;  %v9319_v16 = vadd.f32 1.0, %v3431_v14  ;;  %v4608_v21 = vmul.f32 %v4576_v15, %v4300_v8  ;;  %v3464_v46 = vadd.f32 0.001143296, %v3463_v45 }
 0x3af   : > { %5576 = vmatmul.msk.f32.gmra.mxu1 %vm3562_vm5, %v4544_v48  ;;  %v4312_v17 = vmul.f32 %v9325_v54, %v9290_v60  ;;  %v3827_v23 = vmul.f32 %v10105_v52, %v10105_v52  ;;  %v4304_v15 = vmul.f32 0.5, %v4303_v9  ;;  %v4132_v29 = vsub.f32 %v4068_v26, %v4100_v10 }
 0x3b0   : > { %v5530_v1 = vclamps-f32 %v3407_v0, 1.0  ;;  %5810 = vrcp.f32 %v9319_v16  ;;  %5544 = vmatmul.msk.f32.gmra.mxu0 %vm3562_vm5, %v4608_v21  ;;  %v3465_v51 = vmul.f32 %v3464_v46, %v9174_v6  ;;  %v9342_v31 = vpop.eup %5808  ;;  %v3653_v30 = vsel %vm3562_vm5, %v10105_v52, 0.0  ;;  %v2355_v59 = vpop.f32.mrf.mxu2  ;;  %v10106_v46 = vld [vmem:[#allocation23_spill] sm:$0xff] }
 0x3b1   : > { %v9354_v0 = vmax.f32 %v4132_v29, 1e-05  ;;  %v3422_v37 = vmul.f32 %v3421_v2, %v9109_v61  ;;  %v9359_v45 = vmul.f32 %v3459_v49, %v9174_v6  ;;  %v4313_v25 = vmul.f32 %v9325_v54, %v4312_v17 }
 0x3b2   : > { %v3511_v40 = vadd.f32 1.0, %v5530_v1  ;;  %v3466_v14 = vadd.f32 0.014752088, %v3465_v51  ;;  %v3919_v8 = vsel %vm3562_vm5, %v3827_v23, 0.0  ;;  %v4513_v61 = vsub.f32 %v10106_v46, %v9205_v5 }
 0x3b3   : > { %5812 = vrsqrt.f32 %v9354_v0  ;;  %vm4308_vm1 = vweird.f32 %v9287_v24  ;;  %v3444_v51 = vand.u32 2147483648, %v9319_v16  ;;  %v4577_v2 = vsub.f32 %v8415_v7, %v9205_v5  ;;  %v10107_v5 = vld [vmem:[#allocation36_spill] sm:$0xff] }
 0x3b4   : > { %v3535_v4 = vmul.f32 %v3511_v40, %v2503_v47  ;;  %v3467_v9 = vmul.f32 %v3466_v14, %v9174_v6  ;;  %v4322_v47 = vmul.f32 %v9342_v31, %v9305_v43  ;;  %vm4307_vm2 = vweird.f32 %v9242_v32  ;;  %v4770_v14 = vpop.f32.mrf.mxu0 }
 0x3b5   : > { %v4314_v49 = vmul.f32 0.5, %v4313_v25  ;;  %vm4309_vm4 = vmor %vm4307_vm2, %vm4308_vm1  ;;  %vm3438_vm6 = vweird.f32 %v9319_v16  ;;  %v4979_v25 = vpop.f32.mrf.mxu1  ;;  %vm4318_vm9 = vweird.f32 %v9325_v54  ;;  %vm4317_vm10 = vweird.f32 %v9290_v60 }
 0x3b6   : > { %v9350_v28 = vmul.f32 %v3535_v4, %v9246_v39  ;;  %v5811_v44 = vpop.eup %5810  ;;  %v4305_v39 = vsub.f32 1.5, %v4304_v15  ;;  %v3468_v40 = vadd.f32 0.112945676, %v3467_v9  ;;  %v3442_v15 = vand.u32 2147483647, %v9319_v16  ;;  %v3687_v4 = vpop.xlane.xlu2 %3686  ;;  %vm4319_vm11 = vmor %vm4317_vm10, %vm4318_vm9 }
 0x3b7   : > { %v3434_v48 = vmul.f32 %v5811_v44, %v9319_v16  ;;  %vm3439_vm3 = vweird.f32 %v5811_v44  ;;  %v4323_v9 = vmul.f32 %v9342_v31, %v4322_v47  ;;  %v3749_v32 = vadd.f32 %v3687_v4, %v10107_v5 }
 0x3b8   : > { %v3724_v1 = vsel %vm3562_vm5, %v9350_v28, 0.0  ;;  %v3946_v21 = vmul.f32 %v9350_v28, %v9350_v28  ;;  %v3469_v17 = vmul.f32 %v3468_v40, %v9174_v6  ;;  %v4306_v29 = vmul.f32 %v9287_v24, %v4305_v39  ;;  %vm3440_vm7 = vmor %vm3438_vm6, %vm3439_vm3  ;;  %v2357_v4 = vpop.f32.mrf.mxu2 }
 0x3b9   : > { %3725 = vadd.xlane.f32.xlu0 %v3724_v1  ;;  %v3435_v26 = vsub.f32 1.0, %v3434_v48  ;;  %v3445_v1 = vor.u32 1.1754944e-38, %v3444_v51  ;;  %v4980_v48 = vadd.f32 %v4979_v25, %v4770_v14  ;;  %v9388_v46 = vpop.eup %5812  ;;  %v9392_v40 = vmul.f32 0.0078125, %v3749_v32  ;;  %v10110_v32 = vld [vmem:[#allocation21_spill] sm:$0xff] }
 0x3ba   : > { %v4012_v10 = vsel %vm3562_vm5, %v3946_v21, 0.0  ;;  %v3470_v7 = vadd.f32 0.4994258, %v3469_v17  ;;  %v4310_v21 = vsel %vm4309_vm4, %v9287_v24, %v4306_v29  ;;  %vm3443_vm8 = vcmp.eq.f32.partialorder %v3442_v15, 8.507059e+37  ;;  %v10108_v24 = vld [vmem:[#allocation39_spill] sm:$0xff] }
 0x3bb   : > { %4013 = vadd.xlane.f32.xlu2 %v4012_v10  ;;  %v3436_v23 = vmul.f32 %v5811_v44, %v3435_v26  ;;  %v4609_v47 = vmul.f32 %v4577_v2, %v4310_v21  ;;  %v4545_v16 = vmul.f32 %v4513_v61, %v4310_v21  ;;  %v3975_v10 = vpop.xlane.xlu1 %3974  ;;  %v3690_v26 = vpop.xlane.xlu0 %3689  ;;  %v4332_v51 = vmul.f32 %v9388_v46, %v9354_v0  ;;  %v10109_v61 = vld [vmem:[#allocation35_spill] sm:$0xff] }
 0x3bc   : > { %v3471_v39 = vmul.f32 %v3470_v7, %v9174_v6  ;;  %5067 = vst.msk [vmem:[%s8992_s15 + $0x20] sm:$0xff] %vm491_vm0, %v4980_v48  ;;  %v4315_v29 = vsub.f32 1.5, %v4314_v49  ;;  %v9404_v2 = vmul.f32 %v10109_v61, %v10109_v61  ;;  %v4101_v5 = vmul.f32 %v9392_v40, %v9392_v40  ;;  %v4773_v48 = vpop.f32.mrf.mxu0 }
 0x3bd   : > { %v3437_v59 = vadd.f32 %v5811_v44, %v3436_v23  ;;  %v4037_v23 = vadd.f32 %v3975_v10, %v10108_v24  ;;  %5545 = vmatmul.msk.f32.gmra.mxu0 %vm3562_vm5, %v4609_v47  ;;  %5577 = vmatmul.msk.f32.gmra.mxu1 %vm3562_vm5, %v4545_v16  ;;  %v3461_v49 = vadd.f32 1.1283791, %v9359_v45  ;;  %v4514_v25 = vsub.f32 %v10110_v32, %v9252_v33  ;;  %v10112_v45 = vld [vmem:[#allocation40_spill] sm:$0xff]  ;;  %v4982_v16 = vpop.f32.mrf.mxu1 }
 0x3be   : > { %v9399_v6 = vadd.f32 1.0, %v3471_v39  ;;  %v3978_v21 = vpop.xlane.xlu2 %3977  ;;  %v4578_v39 = vsub.f32 %v8509_v3, %v9252_v33  ;;  %v4316_v47 = vmul.f32 %v9325_v54, %v4315_v29  ;;  %v4983_v33 = vadd.f32 %v4982_v16, %v4773_v48 }
 0x3bf   : > { %v3441_v17 = vsel %vm3440_vm7, %v5811_v44, %v3437_v59  ;;  %v4324_v44 = vmul.f32 0.5, %v4323_v9  ;;  %v4069_v7 = vmul.f32 0.0078125, %v4037_v23  ;;  %v10111_v59 = vld [vmem:[#allocation4_spill] sm:$0xff]  ;;  %v9431_v29 = vmul.f32 %v3461_v49, %v9142_v55 }
 0x3c0   : > { %v3446_v14 = vsel %vm3443_vm8, %v3445_v1, %v3441_v17  ;;  %5814 = vrcp.f32 %v9399_v6  ;;  %v3750_v1 = vadd.f32 %v3690_v26, %v10111_v59  ;;  %v4320_v3 = vsel %vm4319_vm11, %v9325_v54, %v4316_v47  ;;  %5068 = vst.msk [vmem:[%s8992_s15 + $0x28] sm:$0xff] %vm491_vm0, %v4983_v33 }
 0x3c1   : > { %3654 = vadd.xlane.f32.xlu0 %v3653_v30  ;;  %v3447_v15 = vmul.f32 %v3446_v14, %v3422_v37  ;;  %v4333_v30 = vmul.f32 %v9388_v46, %v4332_v51  ;;  %v4133_v37 = vsub.f32 %v4069_v7, %v4101_v5  ;;  %v4325_v10 = vsub.f32 1.5, %v4324_v44  ;;  %v10113_v14 = vld [vmem:[#allocation32_spill] sm:$0xff]  ;;  %v2359_v7 = vpop.f32.mrf.mxu2 }
 0x3c2   : > { %v9425_v26 = vmul.f32 0.0078125, %v3750_v1  ;;  %v4515_v44 = vsub.f32 %v10113_v14, %v9262_v42  ;;  %vm4328_vm12 = vweird.f32 %v9342_v31  ;;  %v4546_v32 = vmul.f32 %v4514_v25, %v4320_v3  ;;  %v10115_v7 = vld [vmem:[#allocation41_spill] sm:$0xff] }
 0x3c3   : > { %3920 = vadd.xlane.f32.xlu2 %v3919_v8  ;;  %v5531_v9 = vclamps-f32 %v3447_v15, 1.0  ;;  %v4038_v8 = vadd.f32 %v3978_v21, %v10112_v45  ;;  %v9423_v51 = vmax.f32 %v4133_v37, 1e-05  ;;  %v4334_v24 = vmul.f32 0.5, %v4333_v30  ;;  %v3693_v60 = vpop.xlane.xlu1 %3692  ;;  %v9428_v4 = vpop.xlane.xlu0 %3636 }
 0x3c4   : > { %v4102_v54 = vmul.f32 %v9425_v26, %v9425_v26  ;;  %v4610_v30 = vmul.f32 %v4578_v39, %v4320_v3  ;;  %v4326_v37 = vmul.f32 %v9342_v31, %v4325_v10  ;;  %v4579_v59 = vsub.f32 %v8569_v41, %v9262_v42  ;;  %v4776_v41 = vpop.f32.mrf.mxu0 }
 0x3c5   : > { %v3512_v17 = vadd.f32 1.0, %v5531_v9  ;;  %v4070_v23 = vmul.f32 0.0078125, %v4038_v8  ;;  %5816 = vrsqrt.f32 %v9423_v51  ;;  %v10114_v9 = vld [vmem:[#allocation42_spill] sm:$0xff]  ;;  %vm4327_vm13 = vweird.f32 %v9305_v43  ;;  %5578 = vmatmul.msk.f32.gmra.mxu1 %vm3562_vm5, %v4546_v32  ;;  %v4985_v8 = vpop.f32.mrf.mxu1 }
 0x3c6   : > { %v5815_v5 = vpop.eup %5814  ;;  %v4335_v1 = vsub.f32 1.5, %v4334_v24  ;;  %5546 = vmatmul.msk.f32.gmra.mxu0 %vm3562_vm5, %v4610_v30  ;;  %vm4337_vm14 = vweird.f32 %v9354_v0  ;;  %v9458_v39 = vpop.xlane.xlu2 %3902  ;;  %vm4329_vm15 = vmor %vm4327_vm13, %vm4328_vm12  ;;  %v3482_v42 = vand.u32 2147483647, %v9399_v6  ;;  %v3484_v43 = vand.u32 2147483648, %v9399_v6 }
 0x3c7   : > { %v3536_v15 = vmul.f32 %v3512_v17, %v9345_v34  ;;  %v3474_v49 = vmul.f32 %v5815_v5, %v9399_v6  ;;  %v3751_v34 = vadd.f32 %v3693_v60, %v10114_v9  ;;  %v4134_v21 = vsub.f32 %v4070_v23, %v4102_v54 }
 0x3c8   : > { %vm3479_vm1 = vweird.f32 %v5815_v5  ;;  %v4330_v24 = vsel %vm4329_vm15, %v9342_v31, %v4326_v37  ;;  %vm4338_vm2 = vweird.f32 %v9388_v46  ;;  %v4336_v60 = vmul.f32 %v9388_v46, %v4335_v1 }
 0x3c9   : > { %v9443_v55 = vmul.f32 %v3536_v15, %v9284_v53  ;;  %v3475_v25 = vsub.f32 1.0, %v3474_v49  ;;  %v9464_v45 = vmax.f32 %v4134_v21, 1e-05  ;;  %v9469_v17 = vmul.f32 0.0078125, %v3751_v34  ;;  %v2361_v54 = vpop.f32.mrf.mxu2  ;;  %vm4339_vm6 = vmor %vm4337_vm14, %vm4338_vm2 }
 0x3ca   : > { %vm3478_vm3 = vweird.f32 %v9399_v6  ;;  %v4986_v15 = vadd.f32 %v4985_v8, %v4776_v41  ;;  %v3485_v30 = vor.u32 1.1754944e-38, %v3484_v43  ;;  %v4611_v49 = vmul.f32 %v4579_v59, %v4330_v24  ;;  %v10116_v43 = vld [vmem:[#allocation34_spill] sm:$0xff] }
 0x3cb   : > { %v3727_v53 = vsel %vm3562_vm5, %v9443_v55, 0.0  ;;  %v3947_v48 = vmul.f32 %v9443_v55, %v9443_v55  ;;  %v9466_v47 = vpop.eup %5816  ;;  %v3476_v16 = vmul.f32 %v5815_v5, %v3475_v25  ;;  %5818 = vrsqrt.f32 %v9464_v45  ;;  %v9476_v3 = vpop.xlane.xlu1 %3639  ;;  %vm3480_vm4 = vmor %vm3478_vm3, %vm3479_vm1 }
 0x3cc   : > { %3728 = vadd.xlane.f32.xlu1 %v3727_v53  ;;  %v4342_v23 = vmul.f32 %v9466_v47, %v9423_v51  ;;  %v3981_v33 = vpop.xlane.xlu0 %3980  ;;  %v4547_v9 = vmul.f32 %v4515_v44, %v4330_v24  ;;  %vm3483_vm7 = vcmp.eq.f32.partialorder %v3482_v42, 8.507059e+37  ;;  %5069 = vst.msk [vmem:[%s8992_s15 + $0x30] sm:$0xff] %vm491_vm0, %v4986_v15  ;;  %v4103_v6 = vmul.f32 %v9469_v17, %v9469_v17  ;;  %v4779_v41 = vpop.f32.mrf.mxu0 }
 0x3cd   : > { %v4015_v10 = vsel %vm3562_vm5, %v3947_v48, 0.0  ;;  %v3477_v14 = vadd.f32 %v5815_v5, %v3476_v16  ;;  %v4039_v31 = vadd.f32 %v3981_v33, %v10115_v7  ;;  %v3656_v21 = vsel %vm3562_vm5, %v10109_v61, 0.0 }
 0x3ce   : > { %4016 = vadd.xlane.f32.xlu0 %v4015_v10  ;;  %v4343_v32 = vmul.f32 %v9466_v47, %v4342_v23  ;;  %5547 = vmatmul.msk.f32.gmra.mxu0 %vm3562_vm5, %v4611_v49  ;;  %v4340_v0 = vsel %vm4339_vm6, %v9388_v46, %v4336_v60  ;;  %v4580_v44 = vsub.f32 %v8607_v11, %v9315_v63  ;;  %v3922_v59 = vsel %vm3562_vm5, %v9404_v2, 0.0  ;;  %v3696_v48 = vpop.xlane.xlu2 %3695  ;;  %v10117_v46 = vld [vmem:[#allocation43_spill] sm:$0xff]  ;;  %v4988_v11 = vpop.f32.mrf.mxu1 }
 0x3cf   : > { %v3481_v34 = vsel %vm3480_vm4, %v5815_v5, %v3477_v14  ;;  %v4071_v37 = vmul.f32 0.0078125, %v4039_v31  ;;  %5579 = vmatmul.msk.f32.gmra.mxu1 %vm3562_vm5, %v4547_v9  ;;  %v4516_v8 = vsub.f32 %v10116_v43, %v9315_v63  ;;  %vm4348_vm8 = vweird.f32 %v9466_v47 }
 0x3d0   : > { %v3486_v1 = vsel %vm3483_vm7, %v3485_v30, %v3481_v34  ;;  %v4344_v53 = vmul.f32 0.5, %v4343_v32  ;;  %v3752_v10 = vadd.f32 %v3696_v48, %v10117_v46  ;;  %v4612_v23 = vmul.f32 %v4580_v44, %v4340_v0 }
 0x3d1   : > { %v3487_v5 = vmul.f32 %v3486_v1, %v9431_v29  ;;  %v4135_v25 = vsub.f32 %v4071_v37, %v4103_v6  ;;  %v9501_v42 = vpop.eup %5818  ;;  %v4548_v60 = vmul.f32 %v4516_v8, %v4340_v0  ;;  %v4989_v63 = vadd.f32 %v4988_v11, %v4779_v41  ;;  %v2363_v32 = vpop.f32.mrf.mxu2 }
 0x3d2   : > { %v4345_v16 = vsub.f32 1.5, %v4344_v53  ;;  %v4352_v29 = vmul.f32 %v9501_v42, %v9464_v45  ;;  %v9511_v33 = vmul.f32 0.0078125, %v3752_v10  ;;  %v2505_v31 = vmul.f32 0.5, %v8945_v50 }
 0x3d3   : > { %v5532_v24 = vclamps-f32 %v3487_v5, 1.0  ;;  %v9509_v2 = vmax.f32 %v4135_v25, 1e-05  ;;  %v3984_v14 = vpop.xlane.xlu1 %3983  ;;  %vm4347_vm9 = vweird.f32 %v9423_v51  ;;  %5070 = vst.msk [vmem:[%s8992_s15 + $0x38] sm:$0xff] %vm491_vm0, %v4989_v63  ;;  %vm4358_vm11 = vweird.f32 %v9501_v42 }
 0x3d4   : > { %3657 = vadd.xlane.f32.xlu1 %v3656_v21  ;;  %v3699_v15 = vpop.xlane.xlu0 %3698  ;;  %v4346_v7 = vmul.f32 %v9466_v47, %v4345_v16  ;;  %v4353_v30 = vmul.f32 %v9501_v42, %v4352_v29  ;;  %v4040_v49 = vadd.f32 %v3984_v14, %v9004_v56  ;;  %vm4349_vm10 = vmor %vm4347_vm9, %vm4348_vm8  ;;  %v4104_v37 = vmul.f32 %v9511_v33, %v9511_v33 }
 0x3d5   : > { %v3513_v54 = vadd.f32 1.0, %v5532_v24  ;;  %5820 = vrsqrt.f32 %v9509_v2  ;;  %v3753_v6 = vadd.f32 %v3699_v15, %v9054_v58  ;;  %v4581_v56 = vsub.f32 %v8683_v18, %v9392_v40  ;;  %v10118_v58 = vld [vmem:[#allocation9_spill] sm:$0xff] }
 0x3d6   : > { %3923 = vadd.xlane.f32.xlu0 %v3922_v59  ;;  %v4354_v34 = vmul.f32 0.5, %v4353_v30  ;;  %5548 = vmatmul.msk.f32.gmra.mxu0 %vm3562_vm5, %v4612_v23  ;;  %v4072_v50 = vmul.f32 0.0078125, %v4040_v49  ;;  %v4350_v51 = vsel %vm4349_vm10, %v9466_v47, %v4346_v7  ;;  %v3987_v53 = vpop.xlane.xlu2 %3986  ;;  %v4517_v0 = vsub.f32 %v10118_v58, %v9392_v40 }
 0x3d7   : > { %v3537_v9 = vmul.f32 %v3513_v54, %v2505_v31  ;;  %5580 = vmatmul.msk.f32.gmra.mxu1 %vm3562_vm5, %v4548_v60  ;;  %v9534_v21 = vmul.f32 0.0078125, %v3753_v6  ;;  %v4041_v5 = vadd.f32 %v3987_v53, %v9059_v38  ;;  %v4613_v48 = vmul.f32 %v4581_v56, %v4350_v51  ;;  %v10119_v54 = vld [vmem:[#allocation11_spill] sm:$0xff] }
 0x3d8   : > { %v4136_v44 = vsub.f32 %v4072_v50, %v4104_v37  ;;  %v4355_v47 = vsub.f32 1.5, %v4354_v34  ;;  %v4549_v8 = vmul.f32 %v4517_v0, %v4350_v51  ;;  %vm4357_vm12 = vweird.f32 %v9464_v45 }
 0x3d9   : > { %v9530_v1 = vmul.f32 %v3537_v9, %v9323_v62  ;;  %v4073_v43 = vmul.f32 0.0078125, %v4041_v5  ;;  %v4105_v46 = vmul.f32 %v9534_v21, %v9534_v21  ;;  %v2365_v10 = vpop.f32.mrf.mxu2  ;;  %vm4359_vm13 = vmor %vm4357_vm12, %vm4358_vm11  ;;  %v4518_v30 = vsub.f32 %v10119_v54, %v9425_v26  ;;  %v10123_v54 = vld [vmem:[#allocation6_spill] sm:$0xff] }
 0x3da   : > { %v9544_v41 = vmax.f32 %v4136_v44, 1e-05  ;;  %v4356_v23 = vmul.f32 %v9501_v42, %v4355_v47  ;;  %v4582_v32 = vsub.f32 %v8742_v19, %v9425_v26  ;;  %vm4367_vm15 = vweird.f32 %v9509_v2  ;;  %v10120_v44 = vld [vmem:[#allocation13_spill] sm:$0xff] }
 0x3db   : > { %v5821_v59 = vpop.eup %5820  ;;  %v3730_v25 = vsel %vm3562_vm5, %v9530_v1, 0.0  ;;  %v3948_v62 = vmul.f32 %v9530_v1, %v9530_v1  ;;  %v3702_v40 = vpop.xlane.xlu1 %3701  ;;  %v4137_v24 = vsub.f32 %v4073_v43, %v4105_v46  ;;  %v4519_v5 = vsub.f32 %v10120_v44, %v9469_v17 }
 0x3dc   : > { %3731 = vadd.xlane.f32.xlu2 %v3730_v25  ;;  %v4362_v18 = vmul.f32 %v5821_v59, %v9509_v2  ;;  %v9546_v16 = vpop.xlane.xlu0 %3905  ;;  %5822 = vrsqrt.f32 %v9544_v41  ;;  %v3754_v29 = vadd.f32 %v3702_v40, %v9150_v57  ;;  %v4360_v57 = vsel %vm4359_vm13, %v9501_v42, %v4356_v23  ;;  %v10121_v2 = vld [vmem:[#allocation14_spill] sm:$0xff] }
 0x3dd   : > { %v4018_v38 = vsel %vm3562_vm5, %v3948_v62, 0.0  ;;  %v9558_v63 = vmax.f32 %v4137_v24, 1e-05  ;;  %vm4368_vm14 = vweird.f32 %v5821_v59  ;;  %v4614_v37 = vmul.f32 %v4582_v32, %v4360_v57 }
 0x3de   : > { %4019 = vadd.xlane.f32.xlu1 %v4018_v38  ;;  %v4363_v11 = vmul.f32 %v5821_v59, %v4362_v18  ;;  %5549 = vmatmul.msk.f32.gmra.mxu0 %vm3562_vm5, %v4613_v48  ;;  %v9560_v14 = vpop.xlane.xlu2 %3642  ;;  %v9563_v7 = vmul.f32 0.0078125, %v3754_v29  ;;  %v4550_v51 = vmul.f32 %v4518_v30, %v4360_v57  ;;  %vm4369_vm1 = vmor %vm4367_vm15, %vm4368_vm14  ;;  %v4583_v25 = vsub.f32 %v10121_v2, %v9469_v17 }
 0x3df   : > { %5581 = vmatmul.msk.f32.gmra.mxu1 %vm3562_vm5, %v4549_v8  ;;  %5824 = vrsqrt.f32 %v9558_v63  ;;  %vm4377_vm3 = vweird.f32 %v9544_v41  ;;  %v4584_v30 = vsub.f32 %v10123_v54, %v9511_v33  ;;  %vm4387_vm7 = vweird.f32 %v9558_v63  ;;  %v10127_v54 = vld [vmem:[#allocation24_spill] sm:$0xff] }
 0x3e0   : > { %v4364_v60 = vmul.f32 0.5, %v4363_v11  ;;  %v4106_v56 = vmul.f32 %v9563_v7, %v9563_v7 }
 0x3e1   : > { %v2367_v50 = vpop.f32.mrf.mxu2 }
 0x3e2   : > { %v4365_v15 = vsub.f32 1.5, %v4364_v60  ;;  %v5823_v31 = vpop.eup %5822 }
 0x3e3   : > { %v9570_v45 = vpop.xlane.xlu1 %3908  ;;  %v4372_v9 = vmul.f32 %v5823_v31, %v9544_v41  ;;  %vm4378_vm2 = vweird.f32 %v5823_v31 }
 0x3e4   : > { %v3990_v49 = vpop.xlane.xlu0 %3989  ;;  %v4366_v6 = vmul.f32 %v5821_v59, %v4365_v15  ;;  %vm4379_vm4 = vmor %vm4377_vm3, %vm4378_vm2 }
 0x3e5   : > { %v4042_v34 = vadd.f32 %v3990_v49, %v9179_v20  ;;  %v4373_v42 = vmul.f32 %v5823_v31, %v4372_v9  ;;  %v9579_v19 = vpop.eup %5824 }
 0x3e6   : > { %5550 = vmatmul.msk.f32.gmra.mxu0 %vm3562_vm5, %v4614_v37  ;;  %v3705_v58 = vpop.xlane.xlu2 %3704  ;;  %v4370_v0 = vsel %vm4369_vm1, %v5821_v59, %v4366_v6  ;;  %v4382_v47 = vmul.f32 %v9579_v19, %v9558_v63  ;;  %vm4388_vm6 = vweird.f32 %v9579_v19 }
 0x3e7   : > { %v4074_v53 = vmul.f32 0.0078125, %v4042_v34  ;;  %5582 = vmatmul.msk.f32.gmra.mxu1 %vm3562_vm5, %v4550_v51  ;;  %v4374_v26 = vmul.f32 0.5, %v4373_v42  ;;  %v3755_v62 = vadd.f32 %v3705_v58, %v9195_v27  ;;  %v4615_v40 = vmul.f32 %v4583_v25, %v4370_v0  ;;  %vm4389_vm8 = vmor %vm4387_vm7, %vm4388_vm6  ;;  %v10124_v25 = vld [vmem:[#allocation7_spill] sm:$0xff] }
 0x3e8   : > { %v4383_v43 = vmul.f32 %v9579_v19, %v4382_v47  ;;  %v4551_v59 = vmul.f32 %v4519_v5, %v4370_v0  ;;  %v4521_v47 = vsub.f32 %v10124_v25, %v9534_v21 }
 0x3e9   : > { %v4138_v20 = vsub.f32 %v4074_v53, %v4106_v56  ;;  %v4375_v48 = vsub.f32 1.5, %v4374_v26  ;;  %v9591_v8 = vmul.f32 0.0078125, %v3755_v62  ;;  %v2369_v11 = vpop.f32.mrf.mxu2  ;;  %v10125_v62 = vld [vmem:[#allocation16_spill] sm:$0xff] }
 0x3ea   : > { %v4384_v27 = vmul.f32 0.5, %v4383_v43 }
 0x3eb   : > { %v9588_v18 = vmax.f32 %v4138_v20, 1e-05  ;;  %v3993_v38 = vpop.xlane.xlu1 %3992  ;;  %v4107_v29 = vmul.f32 %v9591_v8, %v9591_v8  ;;  %v4376_v60 = vmul.f32 %v5823_v31, %v4375_v48  ;;  %v4585_v48 = vsub.f32 %v10125_v62, %v9534_v21  ;;  %v4991_v21 = vpop.f32.mrf.mxu1 }
 0x3ec   : > { %v3708_v46 = vpop.xlane.xlu0 %3707  ;;  %v4043_v17 = vadd.f32 %v3993_v38, %v9282_v36  ;;  %v10122_v36 = vld [vmem:[#allocation5_spill] sm:$0xff]  ;;  %v4385_v34 = vsub.f32 1.5, %v4384_v27  ;;  %v4782_v27 = vpop.f32.mrf.mxu0 }
 0x3ed   : > { %5826 = vrsqrt.f32 %v9588_v18  ;;  %v3756_v10 = vadd.f32 %v3708_v46, %v9331_v35  ;;  %v4520_v15 = vsub.f32 %v10122_v36, %v9511_v33  ;;  %v4380_v9 = vsel %vm4379_vm4, %v5823_v31, %v4376_v60 }
 0x3ee   : > { %v4075_v24 = vmul.f32 0.0078125, %v4043_v17  ;;  %5551 = vmatmul.msk.f32.gmra.mxu0 %vm3562_vm5, %v4615_v40  ;;  %v3996_v57 = vpop.xlane.xlu2 %3995  ;;  %v4616_v51 = vmul.f32 %v4584_v30, %v4380_v9  ;;  %v4386_v26 = vmul.f32 %v9579_v19, %v4385_v34  ;;  %vm4397_vm10 = vweird.f32 %v9588_v18 }
 0x3ef   : > { %v9598_v23 = vmul.f32 0.0078125, %v3756_v10  ;;  %5583 = vmatmul.msk.f32.gmra.mxu1 %vm3562_vm5, %v4551_v59  ;;  %v4044_v32 = vadd.f32 %v3996_v57, %v9347_v12  ;;  %v4552_v42 = vmul.f32 %v4520_v15, %v4380_v9  ;;  %v4586_v30 = vsub.f32 %v10127_v54, %v9563_v7 }
 0x3f0   : > { %v4139_v35 = vsub.f32 %v4075_v24, %v4107_v29 }
 0x3f1   : > { %v4108_v49 = vmul.f32 %v9598_v23, %v9598_v23  ;;  %v4076_v37 = vmul.f32 0.0078125, %v4044_v32 }
 0x3f2   : > { %v9610_v6 = vmax.f32 %v4139_v35, 1e-05  ;;  %v10126_v35 = vld [vmem:[#allocation18_spill] sm:$0xff] }
 0x3f3   : > { %v5827_v41 = vpop.eup %5826  ;;  %v3711_v56 = vpop.xlane.xlu1 %3710  ;;  %v4140_v12 = vsub.f32 %v4076_v37, %v4108_v49  ;;  %v4522_v57 = vsub.f32 %v10126_v35, %v9563_v7 }
 0x3f4   : > { %v4392_v50 = vmul.f32 %v5827_v41, %v9588_v18  ;;  %v9613_v53 = vpop.xlane.xlu0 %3645  ;;  %5828 = vrsqrt.f32 %v9610_v6  ;;  %v3757_v31 = vadd.f32 %v3711_v56, %v9428_v4  ;;  %v4390_v4 = vsel %vm4389_vm8, %v9579_v19, %v4386_v26 }
 0x3f5   : > { %v9619_v58 = vmax.f32 %v4140_v12, 1e-05  ;;  %vm4398_vm9 = vweird.f32 %v5827_v41  ;;  %v4617_v17 = vmul.f32 %v4585_v48, %v4390_v4  ;;  %v4553_v10 = vmul.f32 %v4521_v47, %v4390_v4  ;;  %v10129_v47 = vld [vmem:[#allocation22_spill] sm:$0xff]  ;;  %v10130_v48 = vld [vmem:[#allocation45_spill] sm:$0xff] }
 0x3f6   : > { %v4393_v33 = vmul.f32 %v5827_v41, %v4392_v50  ;;  %5552 = vmatmul.msk.f32.gmra.mxu0 %vm3562_vm5, %v4616_v51  ;;  %v9624_v0 = vpop.xlane.xlu2 %3911  ;;  %v9627_v2 = vmul.f32 0.0078125, %v3757_v31  ;;  %vm4399_vm11 = vmor %vm4397_vm10, %vm4398_vm9  ;;  %vm4407_vm13 = vweird.f32 %v9610_v6  ;;  %v4523_v62 = vsub.f32 %v10129_v47, %v9591_v8 }
 0x3f7   : > { %5584 = vmatmul.msk.f32.gmra.mxu1 %vm3562_vm5, %v4552_v42  ;;  %5830 = vrsqrt.f32 %v9619_v58  ;;  %vm4417_vm1 = vweird.f32 %v9619_v58 }
 0x3f8   : > { %v4394_v20 = vmul.f32 0.5, %v4393_v33  ;;  %v4109_v19 = vmul.f32 %v9627_v2, %v9627_v2 }
 0x3fa   : > { %v4395_v44 = vsub.f32 1.5, %v4394_v20  ;;  %v5829_v5 = vpop.eup %5828 }
 0x3fb   : > { %v4402_v43 = vmul.f32 %v5829_v5, %v9610_v6  ;;  %v9635_v63 = vpop.xlane.xlu1 %3648  ;;  %vm4408_vm12 = vweird.f32 %v5829_v5 }
 0x3fc   : > { %v3999_v40 = vpop.xlane.xlu0 %3998  ;;  %v4396_v38 = vmul.f32 %v5827_v41, %v4395_v44  ;;  %vm4409_vm14 = vmor %vm4407_vm13, %vm4408_vm12 }
 0x3fd   : > { %v4045_v59 = vadd.f32 %v3999_v40, %v9458_v39  ;;  %v4403_v46 = vmul.f32 %v5829_v5, %v4402_v43  ;;  %v5831_v24 = vpop.eup %5830  ;;  %v4992_v39 = vadd.f32 %v4991_v21, %v4782_v27  ;;  %v4588_v43 = vsub.f32 %v10130_v48, %v9598_v23  ;;  %v10134_v48 = vld [vmem:[#allocation29_spill] sm:$0xff] }
 0x3fe   : > { %5553 = vmatmul.msk.f32.gmra.mxu0 %vm3562_vm5, %v4617_v17  ;;  %v4412_v60 = vmul.f32 %v5831_v24, %v9619_v58  ;;  %v3714_v15 = vpop.xlane.xlu2 %3713  ;;  %v4400_v18 = vsel %vm4399_vm11, %v5827_v41, %v4396_v38  ;;  %vm4418_vm15 = vweird.f32 %v5831_v24  ;;  %v10131_v38 = vld [vmem:[#allocation25_spill] sm:$0xff] }
 0x3ff   : > { %v4077_v11 = vmul.f32 0.0078125, %v4045_v59  ;;  %v4404_v29 = vmul.f32 0.5, %v4403_v46  ;;  %5585 = vmatmul.msk.f32.gmra.mxu1 %vm3562_vm5, %v4553_v10  ;;  %v3758_v49 = vadd.f32 %v3714_v15, %v9476_v3  ;;  %5071 = vst.msk [vmem:[%s8992_s15 + $0x40] sm:$0xff] %vm491_vm0, %v4992_v39  ;;  %v4618_v37 = vmul.f32 %v4586_v30, %v4400_v18  ;;  %vm4419_vm2 = vmor %vm4417_vm1, %vm4418_vm15 }
 0x400   : > { %v4413_v9 = vmul.f32 %v5831_v24, %v4412_v60  ;;  %v4554_v51 = vmul.f32 %v4522_v57, %v4400_v18  ;;  %v4524_v46 = vsub.f32 %v10131_v38, %v9598_v23  ;;  %v10135_v38 = vld [vmem:[#allocation26_spill] sm:$0xff] }
 0x401   : > { %v4141_v36 = vsub.f32 %v4077_v11, %v4109_v19  ;;  %v4405_v32 = vsub.f32 1.5, %v4404_v29  ;;  %v9653_v50 = vmul.f32 0.0078125, %v3758_v49 }
 0x402   : > { %v4414_v33 = vmul.f32 0.5, %v4413_v9 }
 0x403   : > { %v9651_v34 = vmax.f32 %v4141_v36, 1e-05  ;;  %v4002_v41 = vpop.xlane.xlu1 %4001  ;;  %v4406_v56 = vmul.f32 %v5829_v5, %v4405_v32  ;;  %v4110_v26 = vmul.f32 %v9653_v50, %v9653_v50 }
 0x404   : > { %v3717_v42 = vpop.xlane.xlu0 %3716  ;;  %v4046_v7 = vadd.f32 %v4002_v41, %v9546_v16  ;;  %v4415_v12 = vsub.f32 1.5, %v4414_v33  ;;  %v10128_v16 = vld [vmem:[#allocation20_spill] sm:$0xff] }
 0x405   : > { %5832 = vrsqrt.f32 %v9651_v34  ;;  %v3759_v3 = vadd.f32 %v3717_v42, %v9560_v14  ;;  %v4410_v44 = vsel %vm4409_vm14, %v5829_v5, %v4406_v56  ;;  %v4587_v4 = vsub.f32 %v10128_v16, %v9591_v8 }
 0x406   : > { %v4078_v31 = vmul.f32 0.0078125, %v4046_v7  ;;  %5554 = vmatmul.msk.f32.gmra.mxu0 %vm3562_vm5, %v4618_v37  ;;  %v4005_v6 = vpop.xlane.xlu2 %4004  ;;  %v4416_v25 = vmul.f32 %v5831_v24, %v4415_v12  ;;  %v4555_v11 = vmul.f32 %v4523_v62, %v4410_v44  ;;  %vm4427_vm4 = vweird.f32 %v9651_v34 }
 0x407   : > { %5586 = vmatmul.msk.f32.gmra.mxu1 %vm3562_vm5, %v4554_v51  ;;  %v9663_v20 = vmul.f32 0.0078125, %v3759_v3  ;;  %v4047_v40 = vadd.f32 %v4005_v6, %v9570_v45  ;;  %v4619_v17 = vmul.f32 %v4587_v4, %v4410_v44  ;;  %v10133_v3 = vld [vmem:[#allocation12_spill] sm:$0xff] }
 0x408   : > { %v4142_v14 = vsub.f32 %v4078_v31, %v4110_v26  ;;  %v4420_v10 = vsel %vm4419_vm2, %v5831_v24, %v4416_v25 }
 0x409   : > { %v4111_v5 = vmul.f32 %v9663_v20, %v9663_v20  ;;  %v4079_v8 = vmul.f32 0.0078125, %v4047_v40  ;;  %v4620_v29 = vmul.f32 %v4588_v43, %v4420_v10  ;;  %v4556_v45 = vmul.f32 %v4524_v46, %v4420_v10  ;;  %v4785_v40 = vpop.f32.mrf.mxu0 }
 0x40a   : > { %v9677_v58 = vmax.f32 %v4142_v14, 1e-05  ;;  %v4526_v43 = vsub.f32 %v10134_v48, %v9653_v50  ;;  %v4590_v46 = vsub.f32 %v10135_v38, %v9653_v50 }
 0x40b   : > { %v5833_v59 = vpop.eup %5832  ;;  %v3720_v27 = vpop.xlane.xlu1 %3719  ;;  %v4143_v60 = vsub.f32 %v4079_v8, %v4111_v5 }
 0x40c   : > { %v4422_v19 = vmul.f32 %v5833_v59, %v9651_v34  ;;  %v3915_v21 = vpop.xlane.xlu0 %3914  ;;  %5834 = vrsqrt.f32 %v9677_v58  ;;  %v3760_v36 = vadd.f32 %v3720_v27, %v9613_v53  ;;  %vm4428_vm3 = vweird.f32 %v5833_v59  ;;  %v4994_v5 = vpop.f32.mrf.mxu1 }
 0x40d   : > { %v9682_v23 = vmax.f32 %v4143_v60, 1e-05  ;;  %vm4429_vm6 = vmor %vm4427_vm4, %vm4428_vm3  ;;  %v4589_v34 = vsub.f32 %v10133_v3, %v9627_v2  ;;  %vm4437_vm8 = vweird.f32 %v9677_v58 }
 0x40e   : > { %v4423_v39 = vmul.f32 %v5833_v59, %v4422_v19  ;;  %5555 = vmatmul.msk.f32.gmra.mxu0 %vm3562_vm5, %v4619_v17  ;;  %v9686_v24 = vpop.xlane.xlu2 %3651  ;;  %v9689_v57 = vmul.f32 0.0078125, %v3760_v36  ;;  %v4995_v19 = vadd.f32 %v4994_v5, %v4785_v40 }
 0x40f   : > { %5587 = vmatmul.msk.f32.gmra.mxu1 %vm3562_vm5, %v4555_v11  ;;  %5836 = vrsqrt.f32 %v9682_v23  ;;  %vm4447_vm11 = vweird.f32 %v9682_v23 }
 0x410   : > { %v4424_v15 = vmul.f32 0.5, %v4423_v39  ;;  %v4112_v37 = vmul.f32 %v9689_v57, %v9689_v57  ;;  %5072 = vst.msk [vmem:[%s8992_s15 + $0x48] sm:$0xff] %vm491_vm0, %v4995_v19 }
 0x412   : > { %v4425_v18 = vsub.f32 1.5, %v4424_v15  ;;  %v5835_v35 = vpop.eup %5834 }
 0x413   : > { %v4432_v54 = vmul.f32 %v5835_v35, %v9677_v58  ;;  %v9692_v30 = vpop.xlane.xlu1 %3917  ;;  %vm4438_vm7 = vweird.f32 %v5835_v35 }
 0x414   : > { %v4008_v53 = vpop.xlane.xlu0 %4007  ;;  %v4426_v49 = vmul.f32 %v5833_v59, %v4425_v18  ;;  %vm4439_vm9 = vmor %vm4437_vm8, %vm4438_vm7 }
 0x415   : > { %v4048_v32 = vadd.f32 %v4008_v53, %v9624_v0  ;;  %v4433_v9 = vmul.f32 %v5835_v35, %v4432_v54  ;;  %v5837_v41 = vpop.eup %5836  ;;  %v10132_v0 = vld [vmem:[#allocation27_spill] sm:$0xff] }
 0x416   : > { %5556 = vmatmul.msk.f32.gmra.mxu0 %vm3562_vm5, %v4620_v29  ;;  %v4442_v42 = vmul.f32 %v5837_v41, %v9682_v23  ;;  %v4430_v33 = vsel %vm4429_vm6, %v5833_v59, %v4426_v49  ;;  %v4525_v7 = vsub.f32 %v10132_v0, %v9627_v2  ;;  %vm4448_vm10 = vweird.f32 %v5837_v41 }
 0x417   : > { %v4080_v51 = vmul.f32 0.0078125, %v4048_v32  ;;  %5588 = vmatmul.msk.f32.gmra.mxu1 %vm3562_vm5, %v4556_v45  ;;  %v4434_v12 = vmul.f32 0.5, %v4433_v9  ;;  %v4621_v16 = vmul.f32 %v4589_v34, %v4430_v33  ;;  %vm4449_vm12 = vmor %vm4447_vm11, %vm4448_vm10  ;;  %v10136_v32 = vld [vmem:[#allocation8_spill] sm:$0xff]  ;;  %v10137_v9 = vld [vmem:[#allocation37_spill] sm:$0xff] }
 0x418   : > { %v4443_v26 = vmul.f32 %v5837_v41, %v4442_v42  ;;  %v4557_v4 = vmul.f32 %v4525_v7, %v4430_v33  ;;  %v4527_v49 = vsub.f32 %v10136_v32, %v9663_v20 }
 0x419   : > { %v4144_v56 = vsub.f32 %v4080_v51, %v4112_v37  ;;  %v3723_v31 = vpop.xlane.xlu2 %3722  ;;  %v4435_v25 = vsub.f32 1.5, %v4434_v12  ;;  %v4788_v36 = vpop.f32.mrf.mxu0  ;;  %v4591_v37 = vsub.f32 %v10137_v9, %v9663_v20 }
 0x41a   : > { %v3761_v6 = vadd.f32 %v3723_v31, %v9635_v63  ;;  %v4444_v47 = vmul.f32 0.5, %v4443_v26  ;;  %v4997_v15 = vpop.f32.mrf.mxu1  ;;  %v10138_v26 = vld [vmem:[#allocation19_spill] sm:$0xff] }
 0x41b   : > { %v9705_v44 = vmax.f32 %v4144_v56, 1e-05  ;;  %v4011_v14 = vpop.xlane.xlu1 %4010  ;;  %v4436_v59 = vmul.f32 %v5835_v35, %v4435_v25  ;;  %v4998_v54 = vadd.f32 %v4997_v15, %v4788_v36 }
 0x41c   : > { %v4049_v62 = vadd.f32 %v4011_v14, %v3915_v21  ;;  %v9711_v2 = vmul.f32 0.0078125, %v3761_v6  ;;  %v4445_v17 = vsub.f32 1.5, %v4444_v47 }
 0x41d   : > { %5838 = vrsqrt.f32 %v9705_v44  ;;  %v4440_v8 = vsel %vm4439_vm9, %v5835_v35, %v4436_v59  ;;  %5073 = vst.msk [vmem:[%s8992_s15 + $0x50] sm:$0xff] %vm491_vm0, %v4998_v54  ;;  %vm4457_vm14 = vweird.f32 %v9705_v44 }
 0x41e   : > { %5557 = vmatmul.msk.f32.gmra.mxu0 %vm3562_vm5, %v4621_v16  ;;  %v4081_v10 = vmul.f32 0.0078125, %v4049_v62  ;;  %v4113_v11 = vmul.f32 %v9711_v2, %v9711_v2  ;;  %v4622_v27 = vmul.f32 %v4590_v46, %v4440_v8  ;;  %v4558_v21 = vmul.f32 %v4526_v43, %v4440_v8 }
 0x41f   : > { %5589 = vmatmul.msk.f32.gmra.mxu1 %vm3562_vm5, %v4557_v4  ;;  %v4446_v45 = vmul.f32 %v5837_v41, %v4445_v17  ;;  %v4528_v16 = vsub.f32 %v10138_v26, %v9689_v57  ;;  %v4592_v4 = vsub.f32 %v9199_v22, %v9689_v57  ;;  %v4593_v36 = vsub.f32 %v9268_v13, %v9711_v2 }
 0x420   : > { %v4145_v29 = vsub.f32 %v4081_v10, %v4113_v11 }
 0x421   : > { %v4450_v53 = vsel %vm4449_vm12, %v5837_v41, %v4446_v45 }
 0x422   : > { %v9727_v18 = vmax.f32 %v4145_v29, 1e-05  ;;  %v4623_v56 = vmul.f32 %v4591_v37, %v4450_v53  ;;  %v4559_v33 = vmul.f32 %v4527_v49, %v4450_v53 }
 0x423   : > { %v5839_v63 = vpop.eup %5838 }
 0x424   : > { %v4452_v58 = vmul.f32 %v5839_v63, %v9705_v44  ;;  %5840 = vrsqrt.f32 %v9727_v18  ;;  %vm4458_vm13 = vweird.f32 %v5839_v63  ;;  %vm4467_vm2 = vweird.f32 %v9727_v18 }
 0x425   : > { %vm4459_vm15 = vmor %vm4457_vm14, %vm4458_vm13 }
 0x426   : > { %5558 = vmatmul.msk.f32.gmra.mxu0 %vm3562_vm5, %v4622_v27  ;;  %v4453_v39 = vmul.f32 %v5839_v63, %v4452_v58 }
 0x427   : > { %5590 = vmatmul.msk.f32.gmra.mxu1 %vm3562_vm5, %v4558_v21 }
 0x42c   : > { %v3726_v50 = vpop.xlane.xlu0 %3725  ;;  %v5000_v12 = vpop.f32.mrf.mxu1 }
 0x42d   : > { %v3762_v60 = vadd.f32 %v3726_v50, %v9686_v24  ;;  %v4454_v24 = vmul.f32 0.5, %v4453_v39  ;;  %v4791_v34 = vpop.f32.mrf.mxu0  ;;  %v10139_v39 = vld [vmem:[#allocation30_spill] sm:$0xff] }
 0x42e   : > { %v4014_v35 = vpop.xlane.xlu2 %4013  ;;  %5559 = vmatmul.msk.f32.gmra.mxu0 %vm3562_vm5, %v4623_v56  ;;  %v5001_v14 = vadd.f32 %v5000_v12, %v4791_v34 }
 0x42f   : > { %v9733_v51 = vmul.f32 0.0078125, %v3762_v60  ;;  %v4050_v23 = vadd.f32 %v4014_v35, %v9692_v30  ;;  %5591 = vmatmul.msk.f32.gmra.mxu1 %vm3562_vm5, %v4559_v33  ;;  %v4455_v0 = vsub.f32 1.5, %v4454_v24  ;;  %v5841_v30 = vpop.eup %5840  ;;  %v4529_v60 = vsub.f32 %v10139_v39, %v9711_v2 }
 0x430   : > { %v4462_v6 = vmul.f32 %v5841_v30, %v9727_v18  ;;  %5074 = vst.msk [vmem:[%s8992_s15 + $0x58] sm:$0xff] %vm491_vm0, %v5001_v14  ;;  %vm4468_vm1 = vweird.f32 %v5841_v30 }
 0x431   : > { %v4082_v42 = vmul.f32 0.0078125, %v4050_v23  ;;  %v4114_v41 = vmul.f32 %v9733_v51, %v9733_v51  ;;  %v4456_v31 = vmul.f32 %v5839_v63, %v4455_v0  ;;  %vm4469_vm3 = vmor %vm4467_vm2, %vm4468_vm1  ;;  %v4594_v33 = vsub.f32 %v9350_v28, %v9733_v51 }
 0x432   : > { %v4463_v44 = vmul.f32 %v5841_v30, %v4462_v6 }
 0x433   : > { %v4146_v20 = vsub.f32 %v4082_v42, %v4114_v41  ;;  %v4460_v25 = vsel %vm4459_vm15, %v5839_v63, %v4456_v31  ;;  %v10140_v42 = vld [vmem:[#allocation31_spill] sm:$0xff] }
 0x434   : > { %v3655_v3 = vpop.xlane.xlu0 %3654  ;;  %v4624_v47 = vmul.f32 %v4592_v4, %v4460_v25  ;;  %v4560_v62 = vmul.f32 %v4528_v16, %v4460_v25  ;;  %v4464_v57 = vmul.f32 0.5, %v4463_v44  ;;  %v4530_v56 = vsub.f32 %v10140_v42, %v9733_v51 }
 0x435   : > { %v4178_v7 = vmax.f32 %v4146_v20, 1e-05 }
 0x436   : > { %5560 = vmatmul.msk.f32.gmra.mxu0 %vm3562_vm5, %v4624_v47  ;;  %v3921_v59 = vpop.xlane.xlu2 %3920  ;;  %v4465_v19 = vsub.f32 1.5, %v4464_v57 }
 0x437   : > { %5842 = vrsqrt.f32 %v4178_v7  ;;  %5592 = vmatmul.msk.f32.gmra.mxu1 %vm3562_vm5, %v4560_v62  ;;  %vm4477_vm6 = vweird.f32 %v4178_v7 }
 0x438   : > { %v4466_v50 = vmul.f32 %v5841_v30, %v4465_v19 }
 0x43a   : > { %v4794_v29 = vpop.f32.mrf.mxu0  ;;  %v5003_v45 = vpop.f32.mrf.mxu1  ;;  %v4470_v35 = vsel %vm4469_vm3, %v5841_v30, %v4466_v50 }
 0x43b   : > { %v5004_v15 = vadd.f32 %v5003_v45, %v4794_v29  ;;  %v4625_v54 = vmul.f32 %v4593_v36, %v4470_v35  ;;  %v4561_v53 = vmul.f32 %v4529_v60, %v4470_v35 }
 0x43d   : > { %v5843_v48 = vpop.eup %5842  ;;  %5075 = vst.msk [vmem:[%s8992_s15 + $0x60] sm:$0xff] %vm491_vm0, %v5004_v15 }
 0x43e   : > { %v4472_v43 = vmul.f32 %v5843_v48, %v4178_v7  ;;  %vm4478_vm4 = vweird.f32 %v5843_v48  ;;  %5561 = vmatmul.msk.f32.gmra.mxu0 %vm3562_vm5, %v4625_v54 }
 0x43f   : > { %v3729_v40 = vpop.xlane.xlu1 %3728  ;;  %5593 = vmatmul.msk.f32.gmra.mxu1 %vm3562_vm5, %v4561_v53  ;;  %vm4479_vm7 = vmor %vm4477_vm6, %vm4478_vm4 }
 0x440   : > { %v3763_v5 = vadd.f32 %v3729_v40, %v3655_v3  ;;  %v4473_v38 = vmul.f32 %v5843_v48, %v4472_v43 }
 0x441   : > { %v4017_v22 = vpop.xlane.xlu0 %4016 }
 0x442   : > { %v9753_v46 = vmul.f32 0.0078125, %v3763_v5  ;;  %v4051_v63 = vadd.f32 %v4017_v22, %v3921_v59  ;;  %v4474_v8 = vmul.f32 0.5, %v4473_v38  ;;  %v5006_v23 = vpop.f32.mrf.mxu1 }
 0x443   : > { %v4797_v37 = vpop.f32.mrf.mxu0 }
 0x444   : > { %v4115_v17 = vmul.f32 %v9753_v46, %v9753_v46  ;;  %v4083_v10 = vmul.f32 0.0078125, %v4051_v63  ;;  %v4475_v58 = vsub.f32 1.5, %v4474_v8  ;;  %v5007_v20 = vadd.f32 %v5006_v23, %v4797_v37 }
 0x445   : > { %v4531_v6 = vsub.f32 %v10105_v52, %v9753_v46  ;;  %v4595_v25 = vsub.f32 %v9443_v55, %v9753_v46 }
 0x446   : > { %v4147_v11 = vsub.f32 %v4083_v10, %v4115_v17  ;;  %v4476_v18 = vmul.f32 %v5843_v48, %v4475_v58  ;;  %5076 = vst.msk [vmem:[%s8992_s15 + $0x68] sm:$0xff] %vm491_vm0, %v5007_v20 }
 0x447   : > { %v3658_v27 = vpop.xlane.xlu1 %3657 }
 0x448   : > { %v4179_v21 = vmax.f32 %v4147_v11, 1e-05  ;;  %v4480_v24 = vsel %vm4479_vm7, %v5843_v48, %v4476_v18 }
 0x449   : > { %v3924_v13 = vpop.xlane.xlu0 %3923  ;;  %v4626_v3 = vmul.f32 %v4594_v33, %v4480_v24  ;;  %v4562_v34 = vmul.f32 %v4530_v56, %v4480_v24 }
 0x44a   : > { %5844 = vrsqrt.f32 %v4179_v21  ;;  %vm4487_vm9 = vweird.f32 %v4179_v21 }
 0x44b   : > { %5562 = vmatmul.msk.f32.gmra.mxu0 %vm3562_vm5, %v4626_v3  ;;  %5594 = vmatmul.msk.f32.gmra.mxu1 %vm3562_vm5, %v4562_v34  ;;  %v4800_v51 = vpop.f32.mrf.mxu0 }
 0x44c   : > { %v5009_v4 = vpop.f32.mrf.mxu1 }
 0x44d   : > { %v5010_v62 = vadd.f32 %v5009_v4, %v4800_v51 }
 0x44f   : > { %v3732_v49 = vpop.xlane.xlu2 %3731  ;;  %5077 = vst.msk [vmem:[%s8992_s15 + $0x70] sm:$0xff] %vm491_vm0, %v5010_v62 }
 0x450   : > { %v5845_v32 = vpop.eup %5844  ;;  %v3764_v9 = vadd.f32 %v3732_v49, %v3658_v27 }
 0x451   : > { %v4482_v2 = vmul.f32 %v5845_v32, %v4179_v21  ;;  %v4020_v41 = vpop.xlane.xlu1 %4019  ;;  %vm4488_vm8 = vweird.f32 %v5845_v32 }
 0x452   : > { %v3796_v7 = vmul.f32 0.0078125, %v3764_v9  ;;  %v4052_v30 = vadd.f32 %v4020_v41, %v3924_v13  ;;  %vm4489_vm10 = vmor %vm4487_vm9, %vm4488_vm8 }
 0x453   : > { %v4483_v0 = vmul.f32 %v5845_v32, %v4482_v2  ;;  %v4803_v40 = vpop.f32.mrf.mxu0 }
 0x454   : > { %v4116_v31 = vmul.f32 %v3796_v7, %v3796_v7  ;;  %v4084_v26 = vmul.f32 0.0078125, %v4052_v30  ;;  %v5012_v5 = vpop.f32.mrf.mxu1  ;;  %v4532_v19 = vsub.f32 %v10109_v61, %v3796_v7  ;;  %v4596_v8 = vsub.f32 %v9530_v1, %v3796_v7 }
 0x455   : > { %v4484_v12 = vmul.f32 0.5, %v4483_v0  ;;  %v5013_v59 = vadd.f32 %v5012_v5, %v4803_v40  ;;  %v5201_v40 = vld [vmem:[%s8992_s15 + $0x10] sm:$0xff] (%p6022_p6)  ;;  %v5203_v5 = vld [vmem:[%s8992_s15 + $0x18] sm:$0xff] (%p6022_p6) }
 0x456   : > { %v4148_v28 = vsub.f32 %v4084_v26, %v4116_v31  ;;  %5202 = vst [vmem:[%s9829_s10 + $0x10] sm:$0xff] (%p6022_p6), %v5201_v40 }
 0x457   : > { %v4485_v16 = vsub.f32 1.5, %v4484_v12  ;;  %5078 = vst.msk [vmem:[%s8992_s15 + $0x78] sm:$0xff] %vm491_vm0, %v5013_v59  ;;  %v5207_v59 = vld [vmem:[%s8992_s15 + $0x28] sm:$0xff] (%p6022_p6) }
 0x458   : > { %v4180_v47 = vmax.f32 %v4148_v28, 1e-05  ;;  %5204 = vst [vmem:[%s9829_s10 + $0x18] sm:$0xff] (%p6022_p6), %v5203_v5 }
 0x459   : > { %v4486_v14 = vmul.f32 %v5845_v32, %v4485_v16  ;;  %5208 = vst [vmem:[%s9829_s10 + $0x28] sm:$0xff] (%p6022_p6), %v5207_v59 }
 0x45a   : > { %5846 = vrsqrt.f32 %v4180_v47  ;;  %vm4497_vm12 = vweird.f32 %v4180_v47 }
 0x45b   : > { %v4490_v48 = vsel %vm4489_vm10, %v5845_v32, %v4486_v14  ;;  %v4806_v46 = vpop.f32.mrf.mxu0 }
 0x45c   : > { %v4627_v44 = vmul.f32 %v4595_v25, %v4490_v48  ;;  %v4563_v43 = vmul.f32 %v4531_v6, %v4490_v48  ;;  %v5015_v63 = vpop.f32.mrf.mxu1 }
 0x45d   : > { %v5016_v17 = vadd.f32 %v5015_v63, %v4806_v46  ;;  %v5217_v46 = vld [vmem:[%s8992_s15 + $0x50] sm:$0xff] (%p6022_p6)  ;;  %v5219_v63 = vld [vmem:[%s8992_s15 + $0x58] sm:$0xff] (%p6022_p6) }
 0x45e   : > { %5563 = vmatmul.msk.f32.gmra.mxu0 %vm3562_vm5, %v4627_v44  ;;  %5595 = vmatmul.msk.f32.gmra.mxu1 %vm3562_vm5, %v4563_v43  ;;  %v5197_v44 = vld [vmem:[%s8992_s15] sm:$0xff] (%p6022_p6)  ;;  %v5199_v43 = vld [vmem:[%s8992_s15 + $0x8] sm:$0xff] (%p6022_p6)  ;;  %5218 = vst [vmem:[%s9829_s10 + $0x110] sm:$0xff] (%p6022_p6), %v5217_v46 }
 0x45f   : > { %5079 = vst.msk [vmem:[%s8992_s15 + $0x80] sm:$0xff] %vm491_vm0, %v5016_v17  ;;  %v5221_v17 = vld [vmem:[%s8992_s15 + $0x60] sm:$0xff] (%p6022_p6) }
 0x460   : > { %v5847_v52 = vpop.eup %5846  ;;  %5198 = vst [vmem:[%s9829_s10] sm:$0xff] (%p6022_p6), %v5197_v44 }
 0x461   : > { %v4492_v55 = vmul.f32 %v5847_v52, %v4180_v47  ;;  %vm4498_vm11 = vweird.f32 %v5847_v52  ;;  %5200 = vst [vmem:[%s9829_s10 + $0x8] sm:$0xff] (%p6022_p6), %v5199_v43 }
 0x462   : > { %vm4499_vm13 = vmor %vm4497_vm12, %vm4498_vm11  ;;  %5220 = vst [vmem:[%s9829_s10 + $0x118] sm:$0xff] (%p6022_p6), %v5219_v63 }
 0x463   : > { %v4493_v22 = vmul.f32 %v5847_v52, %v4492_v55  ;;  %v4809_v58 = vpop.f32.mrf.mxu0  ;;  %v5209_v55 = vld [vmem:[%s8992_s15 + $0x30] sm:$0xff] (%p6022_p6)  ;;  %5222 = vst [vmem:[%s9829_s10 + $0x120] sm:$0xff] (%p6022_p6), %v5221_v17 }
 0x464   : > { %v5018_v29 = vpop.f32.mrf.mxu1  ;;  %5210 = vst [vmem:[%s9829_s10 + $0x30] sm:$0xff] (%p6022_p6), %v5209_v55 }
 0x465   : > { %v4494_v57 = vmul.f32 0.5, %v4493_v22  ;;  %v5019_v45 = vadd.f32 %v5018_v29, %v4809_v58  ;;  %v5211_v22 = vld [vmem:[%s8992_s15 + $0x38] sm:$0xff] (%p6022_p6) }
 0x466   : > { %5212 = vst [vmem:[%s9829_s10 + $0x38] sm:$0xff] (%p6022_p6), %v5211_v22 }
 0x467   : > { %v4495_v38 = vsub.f32 1.5, %v4494_v57  ;;  %5080 = vst.msk [vmem:[%s8992_s15 + $0x88] sm:$0xff] %vm491_vm0, %v5019_v45  ;;  %v5213_v57 = vld [vmem:[%s8992_s15 + $0x40] sm:$0xff] (%p6022_p6) }
 0x468   : > { %5214 = vst [vmem:[%s9829_s10 + $0x100] sm:$0xff] (%p6022_p6), %v5213_v57 }
 0x469   : > { %v4496_v10 = vmul.f32 %v5847_v52, %v4495_v38  ;;  %v5215_v38 = vld [vmem:[%s8992_s15 + $0x48] sm:$0xff] (%p6022_p6) }
 0x46a   : > { %5216 = vst [vmem:[%s9829_s10 + $0x108] sm:$0xff] (%p6022_p6), %v5215_v38 }
 0x46b   : > { %v4500_v11 = vsel %vm4499_vm13, %v5847_v52, %v4496_v10  ;;  %v4812_v61 = vpop.f32.mrf.mxu0  ;;  %v5205_v52 = vld [vmem:[%s8992_s15 + $0x20] sm:$0xff] (%p6022_p6)  ;;  %v5223_v10 = vld [vmem:[%s8992_s15 + $0x68] sm:$0xff] (%p6022_p6) }
 0x46c   : > { %v4628_v27 = vmul.f32 %v4596_v8, %v4500_v11  ;;  %v4564_v21 = vmul.f32 %v4532_v19, %v4500_v11  ;;  %v5021_v1 = vpop.f32.mrf.mxu1  ;;  %5206 = vst [vmem:[%s9829_s10 + $0x20] sm:$0xff] (%p6022_p6), %v5205_v52  ;;  %v5225_v19 = vld [vmem:[%s8992_s15 + $0x70] sm:$0xff] (%p6022_p6)  ;;  %v5227_v8 = vld [vmem:[%s8992_s15 + $0x78] sm:$0xff] (%p6022_p6)  ;;  %v5229_v11 = vld [vmem:[%s8992_s15 + $0x80] sm:$0xff] (%p6022_p6) }
 0x46d   : > { %v5022_v50 = vadd.f32 %v5021_v1, %v4812_v61  ;;  %5224 = vst [vmem:[%s9829_s10 + $0x128] sm:$0xff] (%p6022_p6), %v5223_v10 }
 0x46e   : > { %5564 = vmatmul.msk.f32.gmra.mxu0 %vm3562_vm5, %v4628_v27  ;;  %5596 = vmatmul.msk.f32.gmra.mxu1 %vm3562_vm5, %v4564_v21  ;;  %5226 = vst [vmem:[%s9829_s10 + $0x130] sm:$0xff] (%p6022_p6), %v5225_v19  ;;  %v5231_v27 = vld [vmem:[%s8992_s15 + $0x88] sm:$0xff] (%p6022_p6) }
 0x46f   : > { %5081 = vst.msk [vmem:[%s8992_s15 + $0x90] sm:$0xff] %vm491_vm0, %v5022_v50 }
 0x470   : > { %5228 = vst [vmem:[%s9829_s10 + $0x138] sm:$0xff] (%p6022_p6), %v5227_v8 }
 0x471   : > { %5230 = vst [vmem:[%s9829_s10 + $0x200] sm:$0xff] (%p6022_p6), %v5229_v11 }
 0x472   : > { %5232 = vst [vmem:[%s9829_s10 + $0x208] sm:$0xff] (%p6022_p6), %v5231_v27 }
 0x473   : > { %v4815_v39 = vpop.f32.mrf.mxu0 }
 0x474   : > { %v5024_v60 = vpop.f32.mrf.mxu1 }
 0x475   : > { %v5025_v36 = vadd.f32 %v5024_v60, %v4815_v39 }
 0x476   : > { %v5233_v21 = vld [vmem:[%s8992_s15 + $0x90] sm:$0xff] (%p6022_p6) }
 0x477   : > { %5082 = vst.msk [vmem:[%s8992_s15 + $0x98] sm:$0xff] %vm491_vm0, %v5025_v36 }
 0x478   : > { %5234 = vst [vmem:[%s9829_s10 + $0x210] sm:$0xff] (%p6022_p6), %v5233_v21 }
 0x47b   : > { %v4818_v15 = vpop.f32.mrf.mxu0 }
 0x47c   : > { %v5027_v35 = vpop.f32.mrf.mxu1 }
 0x47d   : > { %v5028_v54 = vadd.f32 %v5027_v35, %v4818_v15 }
 0x47e   : > { %v5235_v58 = vld [vmem:[%s8992_s15 + $0x98] sm:$0xff] (%p6022_p6) }
 0x47f   : > { %5083 = vst.msk [vmem:[%s8992_s15 + $0xa0] sm:$0xff] %vm491_vm0, %v5028_v54 }
 0x480   : > { %5236 = vst [vmem:[%s9829_s10 + $0x218] sm:$0xff] (%p6022_p6), %v5235_v58 }
 0x483   : > { %v4821_v53 = vpop.f32.mrf.mxu0 }
 0x484   : > { %v5030_v18 = vpop.f32.mrf.mxu1 }
 0x485   : > { %v5031_v32 = vadd.f32 %v5030_v18, %v4821_v53 }
 0x486   : > { %v5237_v29 = vld [vmem:[%s8992_s15 + $0xa0] sm:$0xff] (%p6022_p6) }
 0x487   : > { %5084 = vst.msk [vmem:[%s8992_s15 + $0xa8] sm:$0xff] %vm491_vm0, %v5031_v32 }
 0x488   : > { %5238 = vst [vmem:[%s9829_s10 + $0x220] sm:$0xff] (%p6022_p6), %v5237_v29 }
 0x48b   : > { %v4824_v49 = vpop.f32.mrf.mxu0 }
 0x48c   : > { %v5033_v13 = vpop.f32.mrf.mxu1 }
 0x48d   : > { %v5034_v2 = vadd.f32 %v5033_v13, %v4824_v49 }
 0x48e   : > { %v5239_v45 = vld [vmem:[%s8992_s15 + $0xa8] sm:$0xff] (%p6022_p6) }
 0x48f   : > { %5085 = vst.msk [vmem:[%s8992_s15 + $0xb0] sm:$0xff] %vm491_vm0, %v5034_v2 }
 0x490   : > { %5240 = vst [vmem:[%s9829_s10 + $0x228] sm:$0xff] (%p6022_p6), %v5239_v45 }
 0x493   : > { %v4827_v9 = vpop.f32.mrf.mxu0 }
 0x494   : > { %v5036_v37 = vpop.f32.mrf.mxu1 }
 0x495   : > { %v5037_v23 = vadd.f32 %v5036_v37, %v4827_v9 }
 0x496   : > { %v5241_v61 = vld [vmem:[%s8992_s15 + $0xb0] sm:$0xff] (%p6022_p6) }
 0x497   : > { %5086 = vst.msk [vmem:[%s8992_s15 + $0xb8] sm:$0xff] %vm491_vm0, %v5037_v23 }
 0x498   : > { %5242 = vst [vmem:[%s9829_s10 + $0x230] sm:$0xff] (%p6022_p6), %v5241_v61 }
 0x49b   : > { %v4830_v24 = vpop.f32.mrf.mxu0 }
 0x49c   : > { %v5039_v42 = vpop.f32.mrf.mxu1 }
 0x49d   : > { %v5040_v56 = vadd.f32 %v5039_v42, %v4830_v24 }
 0x49e   : > { %v5243_v1 = vld [vmem:[%s8992_s15 + $0xb8] sm:$0xff] (%p6022_p6) }
 0x49f   : > { %5087 = vst.msk [vmem:[%s8992_s15 + $0xc0] sm:$0xff] %vm491_vm0, %v5040_v56 }
 0x4a0   : > { %5244 = vst [vmem:[%s9829_s10 + $0x238] sm:$0xff] (%p6022_p6), %v5243_v1 }
 0x4a3   : > { %v4833_v33 = vpop.f32.mrf.mxu0 }
 0x4a4   : > { %v5042_v41 = vpop.f32.mrf.mxu1 }
 0x4a5   : > { %v5043_v20 = vadd.f32 %v5042_v41, %v4833_v33 }
 0x4a6   : > { %v5245_v50 = vld [vmem:[%s8992_s15 + $0xc0] sm:$0xff] (%p6022_p6) }
 0x4a7   : > { %5088 = vst.msk [vmem:[%s8992_s15 + $0xc8] sm:$0xff] %vm491_vm0, %v5043_v20 }
 0x4a8   : > { %5246 = vst [vmem:[%s9829_s10 + $0x300] sm:$0xff] (%p6022_p6), %v5245_v50 }
 0x4ab   : > { %v4836_v0 = vpop.f32.mrf.mxu0 }
 0x4ac   : > { %v5045_v7 = vpop.f32.mrf.mxu1 }
 0x4ad   : > { %v5046_v30 = vadd.f32 %v5045_v7, %v4836_v0 }
 0x4ae   : > { %v5247_v39 = vld [vmem:[%s8992_s15 + $0xc8] sm:$0xff] (%p6022_p6) }
 0x4af   : > { %5089 = vst.msk [vmem:[%s8992_s15 + $0xd0] sm:$0xff] %vm491_vm0, %v5046_v30 }
 0x4b0   : > { %5248 = vst [vmem:[%s9829_s10 + $0x308] sm:$0xff] (%p6022_p6), %v5247_v39 }
 0x4b3   : > { %v4839_v3 = vpop.f32.mrf.mxu0 }
 0x4b4   : > { %v5048_v34 = vpop.f32.mrf.mxu1 }
 0x4b5   : > { %v5049_v12 = vadd.f32 %v5048_v34, %v4839_v3 }
 0x4b6   : > { %v5249_v60 = vld [vmem:[%s8992_s15 + $0xd0] sm:$0xff] (%p6022_p6) }
 0x4b7   : > { %5090 = vst.msk [vmem:[%s8992_s15 + $0xd8] sm:$0xff] %vm491_vm0, %v5049_v12 }
 0x4b8   : > { %5250 = vst [vmem:[%s9829_s10 + $0x310] sm:$0xff] (%p6022_p6), %v5249_v60 }
 0x4bb   : > { %v4842_v31 = vpop.f32.mrf.mxu0 }
 0x4bc   : > { %v5051_v26 = vpop.f32.mrf.mxu1 }
 0x4bd   : > { %v5052_v16 = vadd.f32 %v5051_v26, %v4842_v31 }
 0x4be   : > { %v5251_v36 = vld [vmem:[%s8992_s15 + $0xd8] sm:$0xff] (%p6022_p6) }
 0x4bf   : > { %5091 = vst.msk [vmem:[%s8992_s15 + $0xe0] sm:$0xff] %vm491_vm0, %v5052_v16 }
 0x4c0   : > { %5252 = vst [vmem:[%s9829_s10 + $0x318] sm:$0xff] (%p6022_p6), %v5251_v36 }
 0x4c6   : > { %v5253_v15 = vld [vmem:[%s8992_s15 + $0xe0] sm:$0xff] (%p6022_p6) }
 0x4c7   : > { %5254 = vst [vmem:[%s9829_s10 + $0x320] sm:$0xff] (%p6022_p6), %v5253_v15 }
 0x4c8   : > { %v4845_v28 = vpop.f32.mrf.mxu0  ;;  %v5054_v51 = vpop.f32.mrf.mxu1 }
 0x4c9   : > { %v5055_v4 = vadd.f32 %v5054_v51, %v4845_v28 }
 0x4cb   : > { %5092 = vst.msk [vmem:[%s8992_s15 + $0xe8] sm:$0xff] %vm491_vm0, %v5055_v4 }
 0x4d2   : > { %v5255_v35 = vld [vmem:[%s8992_s15 + $0xe8] sm:$0xff] (%p6022_p6) }
 0x4d3   : > { %5256 = vst [vmem:[%s9829_s10 + $0x328] sm:$0xff] (%p6022_p6), %v5255_v35 }
 0x4db   : > { %v4848_v14 = vpop.f32.mrf.mxu0  ;;  %v5057_v6 = vpop.f32.mrf.mxu1 }
 0x4dc   : > { %v5058_v25 = vadd.f32 %v5057_v6, %v4848_v14 }
 0x4de   : > { %5093 = vst.msk [vmem:[%s8992_s15 + $0xf0] sm:$0xff] %vm491_vm0, %v5058_v25 }
 0x4e5   : > { %v5257_v54 = vld [vmem:[%s8992_s15 + $0xf0] sm:$0xff] (%p6022_p6) }
 0x4e6   : > { %5258 = vst [vmem:[%s9829_s10 + $0x330] sm:$0xff] (%p6022_p6), %v5257_v54 }
 0x4ea   : > { %5101 = sbr.rel (!%p6022_p6) target bundleno = 1271 (0x4f7), region = 90 }
 0x4eb   : > { %v4851_v47 = vpop.f32.mrf.mxu0  ;;  %v5060_v62 = vpop.f32.mrf.mxu1 }
 0x4ec   : > { %v5061_v48 = vadd.f32 %v5060_v62, %v4851_v47 }
 0x4ee   : > { %5094 = vst.msk [vmem:[%s8992_s15 + $0xf8] sm:$0xff] %vm491_vm0, %v5061_v48 }
 0x4f5   : > { %v5259_v53 = vld [vmem:[%s8992_s15 + $0xf8] sm:$0xff] }
 0x4f6   : > { %5260 = vst [vmem:[%s9829_s10 + $0x338] sm:$0xff] %v5259_v53 }
 0x4f7 PF: > { %s17_s30 = sadd.s32 1, %s5931_s30   ;;  %s10141_s24 = smov %s5911_s25 }
 0x4f8   : > { %p14_p12 = scmp.ge.s32.totalorder %s17_s30, 10   ;;  %s10142_s25 = smov %s6030_s16 }
 0x4f9   : > { %s10143_s26 = smov %s5923_s28  ;;  %s10144_s27 = smov %s5927_s29 }
 0x4fa   : > { %s10145_s28 = smov %s10148_s8  ;;  %s10146_s29 = smov %s10152_s9 }
 0x4fb   :  { %16 = sbr.rel (!%p14_p12) target bundleno = 4 (0x4), region = 159 }

</bundles_post_ra>
